<compile_context>
chip_gen: v6e
topology: v6e:2x2x1
jax: 0.10.0
libtpu: 0.0.40
codegen_flags: <defaults>
</compile_context>

<pallas_src>
import jax
import jax.numpy as jnp
from jax.experimental import pallas as pl
from jax.experimental.pallas import tpu as pltpu

EPS = 1e-5


def _reflect_pad1(img):
    """ReflectionPad2d(1) on an (H, W, C) tile (built once, in bf16, in VMEM)."""
    H, W = img.shape[0], img.shape[1]
    rows = jnp.concatenate([img[1:2], img, img[H - 2:H - 1]], axis=0)            # (H+2, W, C)
    return jnp.concatenate([rows[:, 1:2], rows, rows[:, W - 2:W - 1]], axis=1)   # (H+2, W+2, C)


def _conv3x3_accumulate(xpad_bf16, w_ref, acc_ref, H, W, C):
    """3x3 VALID conv as 9 accumulated per-tap (H*W, C) x (C, C) MXU matmuls.

    xpad_bf16 : (H+2, W+2, C) bf16 padded tile (cast once).
    w_ref     : (9*C, C) bf16 ref, row index = (dy*3 + dx)*C + cin.
    acc_ref   : (H*W, C) f32 VMEM scratch accumulator (overwritten on tap 0).
    """
    for t in range(9):
        dy, dx = divmod(t, 3)
        tap = xpad_bf16[dy:dy + H, dx:dx + W, :].reshape(H * W, C)
        part = jnp.dot(tap, w_ref[t * C:(t + 1) * C, :],
                       preferred_element_type=jnp.float32)
        if t == 0:
            acc_ref[...] = part
        else:
            acc_ref[...] += part


def _pick_chunk(n_rows, max_chunk=2048):
    """Largest power-of-two row-chunk (<= max_chunk) dividing n_rows; fall back to n_rows."""
    c = 1
    while c * 2 <= max_chunk and n_rows % (c * 2) == 0:
        c *= 2
    return c if c >= 8 else n_rows


def _instance_norm_stats(acc_ref, n_rows, C):
    """Per-channel (mean, inv_std) of the (n_rows, C) f32 accumulator.

    One fused chunked sweep computes shifted sum and sum-of-squares together
    (no full acc*acc temporary, no second pass over acc).  Shifting by the first
    row keeps the variance numerically stable for non-zero-mean conv outputs.
    """
    shift = acc_ref[0:1, :]                                   # (1, C)
    chunk = _pick_chunk(n_rows)
    n_chunks = n_rows // chunk
    zero = jnp.zeros((1, C), jnp.float32)

    def accum(off, s, s2):
        d = acc_ref[pl.ds(off, chunk), :] - shift
        return (s + jnp.sum(d, axis=0, keepdims=True),
                s2 + jnp.sum(d * d, axis=0, keepdims=True))

    if n_chunks == 1:
        s, s2 = accum(0, zero, zero)
    else:
        def body(i, carry):
            off = pl.multiple_of(i * chunk, chunk)
            return accum(off, *carry)
        s, s2 = jax.lax.fori_loop(0, n_chunks, body, (zero, zero))

    inv_n = 1.0 / n_rows
    mean_d = s * inv_n
    var = jnp.maximum(s2 * inv_n - mean_d * mean_d, 0.0)       # biased variance (PyTorch IN)
    mean = shift + mean_d
    inv_std = jax.lax.rsqrt(var + EPS)
    return mean, inv_std


def resnet_block_kernel(x_ref, w1_ref, w2_ref, out_ref, acc_ref):
    """Fused per-image forward:
       out = x + IN(conv2(refpad(relu(IN(conv1(refpad(x)))))))."""
    H, W, C = x_ref.shape[1], x_ref.shape[2], x_ref.shape[3]
    HW = H * W

    x_bf16 = x_ref[0].astype(jnp.bfloat16)                     # single bf16 cast of the tile

    # conv1 + InstanceNorm + ReLU (conv bias omitted: cancelled exactly by the IN mean).
    _conv3x3_accumulate(_reflect_pad1(x_bf16), w1_ref, acc_ref, H, W, C)
    mean1, inv1 = _instance_norm_stats(acc_ref, HW, C)
    h = jnp.maximum((acc_ref[...] - mean1) * inv1, 0.0).astype(jnp.bfloat16)

    # conv2 + InstanceNorm + skip connection; the intermediate h never leaves VMEM.
    _conv3x3_accumulate(_reflect_pad1(h.reshape(H, W, C)), w2_ref, acc_ref, H, W, C)
    mean2, inv2 = _instance_norm_stats(acc_ref, HW, C)
    y = (acc_ref[...] - mean2) * inv2 + x_ref[0].astype(jnp.float32).reshape(HW, C)

    out_ref[...] = y.reshape(1, H, W, C).astype(out_ref.dtype)


def resnet_block_forward(x_nchw, w1, b1, w2, b2):
    """out = x + conv_block(x) with
       conv_block = [RefPad, Conv3x3, InstanceNorm, ReLU, RefPad, Conv3x3, InstanceNorm].

    x_nchw : (B, C, H, W)          -- PyTorch layout
    w1, w2 : (C_out, C_in, 3, 3)   -- PyTorch Conv2d weight layout
    b1, b2 : (C,)                  -- accepted for API parity; a per-channel conv bias
                                      is a mathematical no-op under InstanceNorm
                                      (affine=False), so it is not sent to the kernel.
    """
    del b1, b2
    x = jnp.transpose(x_nchw, (0, 2, 3, 1))                    # NCHW -> NHWC
    B, H, W, C = x.shape
    assert H >= 2 and W >= 2, "ReflectionPad2d(1) needs spatial dims >= 2"
    # (Cout, Cin, kh, kw) -> (kh, kw, Cin, Cout) -> (9*Cin, Cout); bf16 MXU operands.
    w1_k = jnp.transpose(w1, (2, 3, 1, 0)).reshape(9 * C, C).astype(jnp.bfloat16)
    w2_k = jnp.transpose(w2, (2, 3, 1, 0)).reshape(9 * C, C).astype(jnp.bfloat16)

    io_spec = pl.BlockSpec((1, H, W, C), lambda b: (b, 0, 0, 0))
    w_spec = pl.BlockSpec((9 * C, C), lambda b: (0, 0))

    # Honest per-grid-step VMEM estimate for the per-tap-accumulation design.
    img_f32 = H * W * C * 4
    img_bf16 = H * W * C * 2
    pad_bf16 = (H + 2) * (W + 2) * C * 2
    w_bytes = 9 * C * C * 2
    est = (4 * img_f32          # x / out tiles, double-buffered by the pipeline
           + img_f32            # f32 accumulator scratch
           + pad_bf16           # padded bf16 tile
           + 3 * img_bf16       # x_bf16 / current tap / normalized h (bf16 transients)
           + 3 * img_f32        # matmul result + normalize/residual f32 transients
           + 4 * w_bytes)       # both weight matrices, double-buffered
    try:
        vmem_cap = int(pltpu.get_tpu_info().vmem_capacity_bytes)
    except Exception:           # pragma: no cover - conservative fallback (v7x: 64 MiB)
        vmem_cap = 64 * 2**20
    vmem_limit = int(min(int(0.8 * vmem_cap), max(32 * 2**20, int(1.25 * est))))

    out = pl.pallas_call(
        resnet_block_kernel,
        out_shape=jax.ShapeDtypeStruct((B, H, W, C), x.dtype),
        grid_spec=pltpu.PrefetchScalarGridSpec(
            num_scalar_prefetch=0,
            grid=(B,),
            in_specs=[io_spec, w_spec, w_spec],
            out_specs=io_spec,
            scratch_shapes=[pltpu.VMEM((H * W, C), jnp.float32)],
        ),
        compiler_params=pltpu.CompilerParams(
            dimension_semantics=("parallel",),
            vmem_limit_bytes=vmem_limit,
        ),
    )(x, w1_k, w2_k)
    return jnp.transpose(out, (0, 3, 1, 2))                    # NHWC -> NCHW


# ---- pure-JAX references (for correctness check only) -----------------------
def _ref_conv_in(x_nhwc, w, b, relu, matmul_dtype):
    xp = jnp.pad(x_nhwc, ((0, 0), (1, 1), (1, 1), (0, 0)), mode="reflect")
    y = jax.lax.conv_general_dilated(
        xp.astype(matmul_dtype),
        jnp.transpose(w, (2, 3, 1, 0)).astype(matmul_dtype),
        window_strides=(1, 1), padding="VALID",
        dimension_numbers=("NHWC", "HWIO", "NHWC"),
        preferred_element_type=jnp.float32)
    y = y + b.reshape(1, 1, 1, -1).astype(jnp.float32)
    mean = jnp.mean(y, axis=(1, 2), keepdims=True)
    var = jnp.mean((y - mean) ** 2, axis=(1, 2), keepdims=True)
    y = (y - mean) / jnp.sqrt(var + EPS)
    return jnp.maximum(y, 0.0) if relu else y


def _ref_forward(x_nchw, w1, b1, w2, b2, matmul_dtype=jnp.float32):
    x = jnp.transpose(x_nchw, (0, 2, 3, 1))
    h = _ref_conv_in(x, w1, b1, relu=True, matmul_dtype=matmul_dtype)
    y = _ref_conv_in(h, w2, b2, relu=False, matmul_dtype=matmul_dtype) + x
    return jnp.transpose(y, (0, 3, 1, 2))


if __name__ == "__main__":
    B, C, H, W = 2, 4, 16, 16  # dim = 4

    key = jax.random.PRNGKey(0)
    kx, kw1, kb1, kw2, kb2 = jax.random.split(key, 5)
    x = jax.random.normal(kx, (B, C, H, W), jnp.float32)
    w1 = jax.random.normal(kw1, (C, C, 3, 3), jnp.float32) * 0.1
    b1 = jax.random.normal(kb1, (C,), jnp.float32) * 0.1
    w2 = jax.random.normal(kw2, (C, C, 3, 3), jnp.float32) * 0.1
    b2 = jax.random.normal(kb2, (C,), jnp.float32) * 0.1

    out = jax.block_until_ready(jax.jit(resnet_block_forward)(x, w1, b1, w2, b2))
    assert out.shape == (B, C, H, W)

    # Strict check vs. a reference that also feeds bf16 operands to the MXU.
    ref_bf16 = jax.block_until_ready(_ref_forward(x, w1, b1, w2, b2, jnp.bfloat16))
    assert jnp.max(jnp.abs(out - ref_bf16)) < 3e-2, "mismatch vs. bf16-matmul reference"

    # Loose sanity check vs. the exact f32 PyTorch-semantics reference
    # (kernel intentionally uses bf16 MXU operands with f32 accumulation).
    ref_f32 = jax.block_until_ready(_ref_forward(x, w1, b1, w2, b2, jnp.float32))
    assert jnp.max(jnp.abs(out - ref_f32)) < 2e-1, "mismatch vs. f32 reference"

    print("KERNEL_OK")
</pallas_src>

<mosaic_0001>
module attributes {stable_mosaic.version = 11 : i64} {
  func.func @resnet_block_kernel(%arg0: i32, %arg1: memref<1x16x16x4xf32, #tpu.memory_space<vmem>>, %arg2: memref<36x4xbf16, #tpu.memory_space<vmem>>, %arg3: memref<36x4xbf16, #tpu.memory_space<vmem>>, %arg4: memref<1x16x16x4xf32, #tpu.memory_space<vmem>>, %arg5: memref<256x4xf32, #tpu.memory_space<vmem>>) attributes {dimension_semantics = [#tpu.dimension_semantics<parallel>], iteration_bounds = array<i64: 2>, scalar_prefetch = 0 : i64, scratch_operands = 1 : i64, tpu.core_type = #tpu.core_type<tc>, window_params = [{transform_indices = @transform_0, window_bounds = array<i64: 1, 16, 16, 4>}, {pipeline_mode = #tpu.pipeline_mode<synchronous>, transform_indices = @transform_1, window_bounds = array<i64: 36, 4>}, {pipeline_mode = #tpu.pipeline_mode<synchronous>, transform_indices = @transform_2, window_bounds = array<i64: 36, 4>}, {transform_indices = @transform_3, window_bounds = array<i64: 1, 16, 16, 4>}]} {
    %c0 = arith.constant 0 : index
    %c0_0 = arith.constant 0 : index
    %c0_1 = arith.constant 0 : index
    %c0_2 = arith.constant 0 : index
    %0 = vector.load %arg1[%c0, %c0_0, %c0_1, %c0_2] : memref<1x16x16x4xf32, #tpu.memory_space<vmem>>, vector<1x16x16x4xf32>
    %1 = vector.shape_cast %0 : vector<1x16x16x4xf32> to vector<16x16x4xf32>
    %2 = arith.truncf %1 : vector<16x16x4xf32> to vector<16x16x4xbf16>
    %3 = vector.extract_strided_slice %2 {offsets = [1, 0, 0], sizes = [1, 16, 4], strides = [1, 1, 1]} : vector<16x16x4xbf16> to vector<1x16x4xbf16>
    %4 = vector.extract_strided_slice %2 {offsets = [14, 0, 0], sizes = [1, 16, 4], strides = [1, 1, 1]} : vector<16x16x4xbf16> to vector<1x16x4xbf16>
    %5 = tpu.concatenate %3, %2, %4 in 0 : vector<1x16x4xbf16>, vector<16x16x4xbf16>, vector<1x16x4xbf16> -> vector<18x16x4xbf16>
    %6 = vector.extract_strided_slice %5 {offsets = [0, 1, 0], sizes = [18, 1, 4], strides = [1, 1, 1]} : vector<18x16x4xbf16> to vector<18x1x4xbf16>
    %7 = vector.extract_strided_slice %5 {offsets = [0, 14, 0], sizes = [18, 1, 4], strides = [1, 1, 1]} : vector<18x16x4xbf16> to vector<18x1x4xbf16>
    %8 = tpu.concatenate %6, %5, %7 in 1 : vector<18x1x4xbf16>, vector<18x16x4xbf16>, vector<18x1x4xbf16> -> vector<18x18x4xbf16>
    %9 = vector.extract_strided_slice %8 {offsets = [0, 0, 0], sizes = [16, 16, 4], strides = [1, 1, 1]} : vector<18x18x4xbf16> to vector<16x16x4xbf16>
    %10 = vector.shape_cast %9 : vector<16x16x4xbf16> to vector<256x4xbf16>
    %c0_3 = arith.constant 0 : index
    %c0_4 = arith.constant 0 : index
    %11 = vector.load %arg2[%c0_3, %c0_4] : memref<36x4xbf16, #tpu.memory_space<vmem>>, vector<4x4xbf16>
    %cst = arith.constant dense<0.000000e+00> : vector<256x4xf32>
    %12 = tpu.matmul %10, %11, %cst {dimension_numbers = #tpu.dot_dimension_numbers<[1], [0], [0], [1], [0, 0, 1, 1], [], []>} : vector<256x4xbf16>, vector<4x4xbf16>, vector<256x4xf32> -> vector<256x4xf32>
    %c0_5 = arith.constant 0 : index
    %c0_6 = arith.constant 0 : index
    %13 = vector.load %arg5[%c0_5, %c0_6] : memref<256x4xf32, #tpu.memory_space<vmem>>, vector<256x4xf32>
    tpu.vector_store %arg5[%c0_5, %c0_6], %12 {strides = array<i32>} : memref<256x4xf32, #tpu.memory_space<vmem>>, vector<256x4xf32>,
    %14 = vector.extract_strided_slice %8 {offsets = [0, 1, 0], sizes = [16, 16, 4], strides = [1, 1, 1]} : vector<18x18x4xbf16> to vector<16x16x4xbf16>
    %15 = vector.shape_cast %14 : vector<16x16x4xbf16> to vector<256x4xbf16>
    %c4 = arith.constant 4 : index
    %c0_7 = arith.constant 0 : index
    %16 = vector.load %arg2[%c4, %c0_7] : memref<36x4xbf16, #tpu.memory_space<vmem>>, vector<4x4xbf16>
    %cst_8 = arith.constant dense<0.000000e+00> : vector<256x4xf32>
    %17 = tpu.matmul %15, %16, %cst_8 {dimension_numbers = #tpu.dot_dimension_numbers<[1], [0], [0], [1], [0, 0, 1, 1], [], []>} : vector<256x4xbf16>, vector<4x4xbf16>, vector<256x4xf32> -> vector<256x4xf32>
    %c0_9 = arith.constant 0 : index
    %c0_10 = arith.constant 0 : index
    %18 = vector.load %arg5[%c0_9, %c0_10] : memref<256x4xf32, #tpu.memory_space<vmem>>, vector<256x4xf32>
    %19 = arith.addf %18, %17 : vector<256x4xf32>
    %c0_11 = arith.constant 0 : index
    %c0_12 = arith.constant 0 : index
    %20 = vector.load %arg5[%c0_11, %c0_12] : memref<256x4xf32, #tpu.memory_space<vmem>>, vector<256x4xf32>
    tpu.vector_store %arg5[%c0_11, %c0_12], %19 {strides = array<i32>} : memref<256x4xf32, #tpu.memory_space<vmem>>, vector<256x4xf32>,
    %21 = vector.extract_strided_slice %8 {offsets = [0, 2, 0], sizes = [16, 16, 4], strides = [1, 1, 1]} : vector<18x18x4xbf16> to vector<16x16x4xbf16>
    %22 = vector.shape_cast %21 : vector<16x16x4xbf16> to vector<256x4xbf16>
    %c8 = arith.constant 8 : index
    %c0_13 = arith.constant 0 : index
    %23 = vector.load %arg2[%c8, %c0_13] : memref<36x4xbf16, #tpu.memory_space<vmem>>, vector<4x4xbf16>
    %cst_14 = arith.constant dense<0.000000e+00> : vector<256x4xf32>
    %24 = tpu.matmul %22, %23, %cst_14 {dimension_numbers = #tpu.dot_dimension_numbers<[1], [0], [0], [1], [0, 0, 1, 1], [], []>} : vector<256x4xbf16>, vector<4x4xbf16>, vector<256x4xf32> -> vector<256x4xf32>
    %c0_15 = arith.constant 0 : index
    %c0_16 = arith.constant 0 : index
    %25 = vector.load %arg5[%c0_15, %c0_16] : memref<256x4xf32, #tpu.memory_space<vmem>>, vector<256x4xf32>
    %26 = arith.addf %25, %24 : vector<256x4xf32>
    %c0_17 = arith.constant 0 : index
    %c0_18 = arith.constant 0 : index
    %27 = vector.load %arg5[%c0_17, %c0_18] : memref<256x4xf32, #tpu.memory_space<vmem>>, vector<256x4xf32>
    tpu.vector_store %arg5[%c0_17, %c0_18], %26 {strides = array<i32>} : memref<256x4xf32, #tpu.memory_space<vmem>>, vector<256x4xf32>,
    %28 = vector.extract_strided_slice %8 {offsets = [1, 0, 0], sizes = [16, 16, 4], strides = [1, 1, 1]} : vector<18x18x4xbf16> to vector<16x16x4xbf16>
    %29 = vector.shape_cast %28 : vector<16x16x4xbf16> to vector<256x4xbf16>
    %c12 = arith.constant 12 : index
    %c0_19 = arith.constant 0 : index
    %30 = vector.load %arg2[%c12, %c0_19] : memref<36x4xbf16, #tpu.memory_space<vmem>>, vector<4x4xbf16>
    %cst_20 = arith.constant dense<0.000000e+00> : vector<256x4xf32>
    %31 = tpu.matmul %29, %30, %cst_20 {dimension_numbers = #tpu.dot_dimension_numbers<[1], [0], [0], [1], [0, 0, 1, 1], [], []>} : vector<256x4xbf16>, vector<4x4xbf16>, vector<256x4xf32> -> vector<256x4xf32>
    %c0_21 = arith.constant 0 : index
    %c0_22 = arith.constant 0 : index
    %32 = vector.load %arg5[%c0_21, %c0_22] : memref<256x4xf32, #tpu.memory_space<vmem>>, vector<256x4xf32>
    %33 = arith.addf %32, %31 : vector<256x4xf32>
    %c0_23 = arith.constant 0 : index
    %c0_24 = arith.constant 0 : index
    %34 = vector.load %arg5[%c0_23, %c0_24] : memref<256x4xf32, #tpu.memory_space<vmem>>, vector<256x4xf32>
    tpu.vector_store %arg5[%c0_23, %c0_24], %33 {strides = array<i32>} : memref<256x4xf32, #tpu.memory_space<vmem>>, vector<256x4xf32>,
    %35 = vector.extract_strided_slice %8 {offsets = [1, 1, 0], sizes = [16, 16, 4], strides = [1, 1, 1]} : vector<18x18x4xbf16> to vector<16x16x4xbf16>
    %36 = vector.shape_cast %35 : vector<16x16x4xbf16> to vector<256x4xbf16>
    %c16 = arith.constant 16 : index
    %c0_25 = arith.constant 0 : index
    %37 = vector.load %arg2[%c16, %c0_25] : memref<36x4xbf16, #tpu.memory_space<vmem>>, vector<4x4xbf16>
    %cst_26 = arith.constant dense<0.000000e+00> : vector<256x4xf32>
    %38 = tpu.matmul %36, %37, %cst_26 {dimension_numbers = #tpu.dot_dimension_numbers<[1], [0], [0], [1], [0, 0, 1, 1], [], []>} : vector<256x4xbf16>, vector<4x4xbf16>, vector<256x4xf32> -> vector<256x4xf32>
    %c0_27 = arith.constant 0 : index
    %c0_28 = arith.constant 0 : index
    %39 = vector.load %arg5[%c0_27, %c0_28] : memref<256x4xf32, #tpu.memory_space<vmem>>, vector<256x4xf32>
    %40 = arith.addf %39, %38 : vector<256x4xf32>
    %c0_29 = arith.constant 0 : index
    %c0_30 = arith.constant 0 : index
    %41 = vector.load %arg5[%c0_29, %c0_30] : memref<256x4xf32, #tpu.memory_space<vmem>>, vector<256x4xf32>
    tpu.vector_store %arg5[%c0_29, %c0_30], %40 {strides = array<i32>} : memref<256x4xf32, #tpu.memory_space<vmem>>, vector<256x4xf32>,
    %42 = vector.extract_strided_slice %8 {offsets = [1, 2, 0], sizes = [16, 16, 4], strides = [1, 1, 1]} : vector<18x18x4xbf16> to vector<16x16x4xbf16>
    %43 = vector.shape_cast %42 : vector<16x16x4xbf16> to vector<256x4xbf16>
    %c20 = arith.constant 20 : index
    %c0_31 = arith.constant 0 : index
    %44 = vector.load %arg2[%c20, %c0_31] : memref<36x4xbf16, #tpu.memory_space<vmem>>, vector<4x4xbf16>
    %cst_32 = arith.constant dense<0.000000e+00> : vector<256x4xf32>
    %45 = tpu.matmul %43, %44, %cst_32 {dimension_numbers = #tpu.dot_dimension_numbers<[1], [0], [0], [1], [0, 0, 1, 1], [], []>} : vector<256x4xbf16>, vector<4x4xbf16>, vector<256x4xf32> -> vector<256x4xf32>
    %c0_33 = arith.constant 0 : index
    %c0_34 = arith.constant 0 : index
    %46 = vector.load %arg5[%c0_33, %c0_34] : memref<256x4xf32, #tpu.memory_space<vmem>>, vector<256x4xf32>
    %47 = arith.addf %46, %45 : vector<256x4xf32>
    %c0_35 = arith.constant 0 : index
    %c0_36 = arith.constant 0 : index
    %48 = vector.load %arg5[%c0_35, %c0_36] : memref<256x4xf32, #tpu.memory_space<vmem>>, vector<256x4xf32>
    tpu.vector_store %arg5[%c0_35, %c0_36], %47 {strides = array<i32>} : memref<256x4xf32, #tpu.memory_space<vmem>>, vector<256x4xf32>,
    %49 = vector.extract_strided_slice %8 {offsets = [2, 0, 0], sizes = [16, 16, 4], strides = [1, 1, 1]} : vector<18x18x4xbf16> to vector<16x16x4xbf16>
    %50 = vector.shape_cast %49 : vector<16x16x4xbf16> to vector<256x4xbf16>
    %c24 = arith.constant 24 : index
    %c0_37 = arith.constant 0 : index
    %51 = vector.load %arg2[%c24, %c0_37] : memref<36x4xbf16, #tpu.memory_space<vmem>>, vector<4x4xbf16>
    %cst_38 = arith.constant dense<0.000000e+00> : vector<256x4xf32>
    %52 = tpu.matmul %50, %51, %cst_38 {dimension_numbers = #tpu.dot_dimension_numbers<[1], [0], [0], [1], [0, 0, 1, 1], [], []>} : vector<256x4xbf16>, vector<4x4xbf16>, vector<256x4xf32> -> vector<256x4xf32>
    %c0_39 = arith.constant 0 : index
    %c0_40 = arith.constant 0 : index
    %53 = vector.load %arg5[%c0_39, %c0_40] : memref<256x4xf32, #tpu.memory_space<vmem>>, vector<256x4xf32>
    %54 = arith.addf %53, %52 : vector<256x4xf32>
    %c0_41 = arith.constant 0 : index
    %c0_42 = arith.constant 0 : index
    %55 = vector.load %arg5[%c0_41, %c0_42] : memref<256x4xf32, #tpu.memory_space<vmem>>, vector<256x4xf32>
    tpu.vector_store %arg5[%c0_41, %c0_42], %54 {strides = array<i32>} : memref<256x4xf32, #tpu.memory_space<vmem>>, vector<256x4xf32>,
    %56 = vector.extract_strided_slice %8 {offsets = [2, 1, 0], sizes = [16, 16, 4], strides = [1, 1, 1]} : vector<18x18x4xbf16> to vector<16x16x4xbf16>
    %57 = vector.shape_cast %56 : vector<16x16x4xbf16> to vector<256x4xbf16>
    %c28 = arith.constant 28 : index
    %c0_43 = arith.constant 0 : index
    %58 = vector.load %arg2[%c28, %c0_43] : memref<36x4xbf16, #tpu.memory_space<vmem>>, vector<4x4xbf16>
    %cst_44 = arith.constant dense<0.000000e+00> : vector<256x4xf32>
    %59 = tpu.matmul %57, %58, %cst_44 {dimension_numbers = #tpu.dot_dimension_numbers<[1], [0], [0], [1], [0, 0, 1, 1], [], []>} : vector<256x4xbf16>, vector<4x4xbf16>, vector<256x4xf32> -> vector<256x4xf32>
    %c0_45 = arith.constant 0 : index
    %c0_46 = arith.constant 0 : index
    %60 = vector.load %arg5[%c0_45, %c0_46] : memref<256x4xf32, #tpu.memory_space<vmem>>, vector<256x4xf32>
    %61 = arith.addf %60, %59 : vector<256x4xf32>
    %c0_47 = arith.constant 0 : index
    %c0_48 = arith.constant 0 : index
    %62 = vector.load %arg5[%c0_47, %c0_48] : memref<256x4xf32, #tpu.memory_space<vmem>>, vector<256x4xf32>
    tpu.vector_store %arg5[%c0_47, %c0_48], %61 {strides = array<i32>} : memref<256x4xf32, #tpu.memory_space<vmem>>, vector<256x4xf32>,
    %63 = vector.extract_strided_slice %8 {offsets = [2, 2, 0], sizes = [16, 16, 4], strides = [1, 1, 1]} : vector<18x18x4xbf16> to vector<16x16x4xbf16>
    %64 = vector.shape_cast %63 : vector<16x16x4xbf16> to vector<256x4xbf16>
    %c32 = arith.constant 32 : index
    %c0_49 = arith.constant 0 : index
    %65 = vector.load %arg2[%c32, %c0_49] : memref<36x4xbf16, #tpu.memory_space<vmem>>, vector<4x4xbf16>
    %cst_50 = arith.constant dense<0.000000e+00> : vector<256x4xf32>
    %66 = tpu.matmul %64, %65, %cst_50 {dimension_numbers = #tpu.dot_dimension_numbers<[1], [0], [0], [1], [0, 0, 1, 1], [], []>} : vector<256x4xbf16>, vector<4x4xbf16>, vector<256x4xf32> -> vector<256x4xf32>
    %c0_51 = arith.constant 0 : index
    %c0_52 = arith.constant 0 : index
    %67 = vector.load %arg5[%c0_51, %c0_52] : memref<256x4xf32, #tpu.memory_space<vmem>>, vector<256x4xf32>
    %68 = arith.addf %67, %66 : vector<256x4xf32>
    %c0_53 = arith.constant 0 : index
    %c0_54 = arith.constant 0 : index
    %69 = vector.load %arg5[%c0_53, %c0_54] : memref<256x4xf32, #tpu.memory_space<vmem>>, vector<256x4xf32>
    tpu.vector_store %arg5[%c0_53, %c0_54], %68 {strides = array<i32>} : memref<256x4xf32, #tpu.memory_space<vmem>>, vector<256x4xf32>,
    %c0_55 = arith.constant 0 : index
    %c0_56 = arith.constant 0 : index
    %70 = vector.load %arg5[%c0_55, %c0_56] : memref<256x4xf32, #tpu.memory_space<vmem>>, vector<1x4xf32>
    %cst_57 = arith.constant 0.000000e+00 : f32
    %71 = vector.broadcast %cst_57 : f32 to vector<1x4xf32>
    %c0_58 = arith.constant 0 : index
    %c0_59 = arith.constant 0 : index
    %72 = vector.load %arg5[%c0_58, %c0_59] : memref<256x4xf32, #tpu.memory_space<vmem>>, vector<256x4xf32>
    %73 = vector.broadcast %70 : vector<1x4xf32> to vector<256x4xf32>
    %74 = arith.subf %72, %73 : vector<256x4xf32>
    %cst_60 = arith.constant dense<0.000000e+00> : vector<4xf32>
    %75 = vector.multi_reduction <add>, %74, %cst_60 [0] : vector<256x4xf32> to vector<4xf32>
    %76 = vector.shape_cast %75 : vector<4xf32> to vector<1x4xf32>
    %77 = arith.addf %71, %76 : vector<1x4xf32>
    %78 = arith.mulf %74, %74 : vector<256x4xf32>
    %cst_61 = arith.constant dense<0.000000e+00> : vector<4xf32>
    %79 = vector.multi_reduction <add>, %78, %cst_61 [0] : vector<256x4xf32> to vector<4xf32>
    %80 = vector.shape_cast %79 : vector<4xf32> to vector<1x4xf32>
    %81 = arith.addf %71, %80 : vector<1x4xf32>
    %cst_62 = arith.constant 3.906250e-03 : f32
    %82 = vector.broadcast %cst_62 : f32 to vector<1x4xf32>
    %83 = arith.mulf %77, %82 : vector<1x4xf32>
    %cst_63 = arith.constant 3.906250e-03 : f32
    %84 = vector.broadcast %cst_63 : f32 to vector<1x4xf32>
    %85 = arith.mulf %81, %84 : vector<1x4xf32>
    %86 = arith.mulf %83, %83 : vector<1x4xf32>
    %87 = arith.subf %85, %86 : vector<1x4xf32>
    %cst_64 = arith.constant 0.000000e+00 : f32
    %88 = vector.broadcast %cst_64 : f32 to vector<1x4xf32>
    %89 = arith.maximumf %87, %88 : vector<1x4xf32>
    %90 = arith.addf %70, %83 : vector<1x4xf32>
    %cst_65 = arith.constant 9.99999974E-6 : f32
    %91 = vector.broadcast %cst_65 : f32 to vector<1x4xf32>
    %92 = arith.addf %89, %91 : vector<1x4xf32>
    %93 = math.rsqrt %92 : vector<1x4xf32>
    %c0_66 = arith.constant 0 : index
    %c0_67 = arith.constant 0 : index
    %94 = vector.load %arg5[%c0_66, %c0_67] : memref<256x4xf32, #tpu.memory_space<vmem>>, vector<256x4xf32>
    %95 = vector.broadcast %90 : vector<1x4xf32> to vector<256x4xf32>
    %96 = arith.subf %94, %95 : vector<256x4xf32>
    %97 = vector.broadcast %93 : vector<1x4xf32> to vector<256x4xf32>
    %98 = arith.mulf %96, %97 : vector<256x4xf32>
    %cst_68 = arith.constant 0.000000e+00 : f32
    %99 = vector.broadcast %cst_68 : f32 to vector<256x4xf32>
    %100 = arith.maximumf %98, %99 : vector<256x4xf32>
    %101 = arith.truncf %100 : vector<256x4xf32> to vector<256x4xbf16>
    %102 = vector.shape_cast %101 : vector<256x4xbf16> to vector<16x16x4xbf16>
    %103 = vector.extract_strided_slice %102 {offsets = [1, 0, 0], sizes = [1, 16, 4], strides = [1, 1, 1]} : vector<16x16x4xbf16> to vector<1x16x4xbf16>
    %104 = vector.extract_strided_slice %102 {offsets = [14, 0, 0], sizes = [1, 16, 4], strides = [1, 1, 1]} : vector<16x16x4xbf16> to vector<1x16x4xbf16>
    %105 = tpu.concatenate %103, %102, %104 in 0 : vector<1x16x4xbf16>, vector<16x16x4xbf16>, vector<1x16x4xbf16> -> vector<18x16x4xbf16>
    %106 = vector.extract_strided_slice %105 {offsets = [0, 1, 0], sizes = [18, 1, 4], strides = [1, 1, 1]} : vector<18x16x4xbf16> to vector<18x1x4xbf16>
    %107 = vector.extract_strided_slice %105 {offsets = [0, 14, 0], sizes = [18, 1, 4], strides = [1, 1, 1]} : vector<18x16x4xbf16> to vector<18x1x4xbf16>
    %108 = tpu.concatenate %106, %105, %107 in 1 : vector<18x1x4xbf16>, vector<18x16x4xbf16>, vector<18x1x4xbf16> -> vector<18x18x4xbf16>
    %109 = vector.extract_strided_slice %108 {offsets = [0, 0, 0], sizes = [16, 16, 4], strides = [1, 1, 1]} : vector<18x18x4xbf16> to vector<16x16x4xbf16>
    %110 = vector.shape_cast %109 : vector<16x16x4xbf16> to vector<256x4xbf16>
    %c0_69 = arith.constant 0 : index
    %c0_70 = arith.constant 0 : index
    %111 = vector.load %arg3[%c0_69, %c0_70] : memref<36x4xbf16, #tpu.memory_space<vmem>>, vector<4x4xbf16>
    %cst_71 = arith.constant dense<0.000000e+00> : vector<256x4xf32>
    %112 = tpu.matmul %110, %111, %cst_71 {dimension_numbers = #tpu.dot_dimension_numbers<[1], [0], [0], [1], [0, 0, 1, 1], [], []>} : vector<256x4xbf16>, vector<4x4xbf16>, vector<256x4xf32> -> vector<256x4xf32>
    %c0_72 = arith.constant 0 : index
    %c0_73 = arith.constant 0 : index
    %113 = vector.load %arg5[%c0_72, %c0_73] : memref<256x4xf32, #tpu.memory_space<vmem>>, vector<256x4xf32>
    tpu.vector_store %arg5[%c0_72, %c0_73], %112 {strides = array<i32>} : memref<256x4xf32, #tpu.memory_space<vmem>>, vector<256x4xf32>,
    %114 = vector.extract_strided_slice %108 {offsets = [0, 1, 0], sizes = [16, 16, 4], strides = [1, 1, 1]} : vector<18x18x4xbf16> to vector<16x16x4xbf16>
    %115 = vector.shape_cast %114 : vector<16x16x4xbf16> to vector<256x4xbf16>
    %c4_74 = arith.constant 4 : index
    %c0_75 = arith.constant 0 : index
    %116 = vector.load %arg3[%c4_74, %c0_75] : memref<36x4xbf16, #tpu.memory_space<vmem>>, vector<4x4xbf16>
    %cst_76 = arith.constant dense<0.000000e+00> : vector<256x4xf32>
    %117 = tpu.matmul %115, %116, %cst_76 {dimension_numbers = #tpu.dot_dimension_numbers<[1], [0], [0], [1], [0, 0, 1, 1], [], []>} : vector<256x4xbf16>, vector<4x4xbf16>, vector<256x4xf32> -> vector<256x4xf32>
    %c0_77 = arith.constant 0 : index
    %c0_78 = arith.constant 0 : index
    %118 = vector.load %arg5[%c0_77, %c0_78] : memref<256x4xf32, #tpu.memory_space<vmem>>, vector<256x4xf32>
    %119 = arith.addf %118, %117 : vector<256x4xf32>
    %c0_79 = arith.constant 0 : index
    %c0_80 = arith.constant 0 : index
    %120 = vector.load %arg5[%c0_79, %c0_80] : memref<256x4xf32, #tpu.memory_space<vmem>>, vector<256x4xf32>
    tpu.vector_store %arg5[%c0_79, %c0_80], %119 {strides = array<i32>} : memref<256x4xf32, #tpu.memory_space<vmem>>, vector<256x4xf32>,
    %121 = vector.extract_strided_slice %108 {offsets = [0, 2, 0], sizes = [16, 16, 4], strides = [1, 1, 1]} : vector<18x18x4xbf16> to vector<16x16x4xbf16>
    %122 = vector.shape_cast %121 : vector<16x16x4xbf16> to vector<256x4xbf16>
    %c8_81 = arith.constant 8 : index
    %c0_82 = arith.constant 0 : index
    %123 = vector.load %arg3[%c8_81, %c0_82] : memref<36x4xbf16, #tpu.memory_space<vmem>>, vector<4x4xbf16>
    %cst_83 = arith.constant dense<0.000000e+00> : vector<256x4xf32>
    %124 = tpu.matmul %122, %123, %cst_83 {dimension_numbers = #tpu.dot_dimension_numbers<[1], [0], [0], [1], [0, 0, 1, 1], [], []>} : vector<256x4xbf16>, vector<4x4xbf16>, vector<256x4xf32> -> vector<256x4xf32>
    %c0_84 = arith.constant 0 : index
    %c0_85 = arith.constant 0 : index
    %125 = vector.load %arg5[%c0_84, %c0_85] : memref<256x4xf32, #tpu.memory_space<vmem>>, vector<256x4xf32>
    %126 = arith.addf %125, %124 : vector<256x4xf32>
    %c0_86 = arith.constant 0 : index
    %c0_87 = arith.constant 0 : index
    %127 = vector.load %arg5[%c0_86, %c0_87] : memref<256x4xf32, #tpu.memory_space<vmem>>, vector<256x4xf32>
    tpu.vector_store %arg5[%c0_86, %c0_87], %126 {strides = array<i32>} : memref<256x4xf32, #tpu.memory_space<vmem>>, vector<256x4xf32>,
    %128 = vector.extract_strided_slice %108 {offsets = [1, 0, 0], sizes = [16, 16, 4], strides = [1, 1, 1]} : vector<18x18x4xbf16> to vector<16x16x4xbf16>
    %129 = vector.shape_cast %128 : vector<16x16x4xbf16> to vector<256x4xbf16>
    %c12_88 = arith.constant 12 : index
    %c0_89 = arith.constant 0 : index
    %130 = vector.load %arg3[%c12_88, %c0_89] : memref<36x4xbf16, #tpu.memory_space<vmem>>, vector<4x4xbf16>
    %cst_90 = arith.constant dense<0.000000e+00> : vector<256x4xf32>
    %131 = tpu.matmul %129, %130, %cst_90 {dimension_numbers = #tpu.dot_dimension_numbers<[1], [0], [0], [1], [0, 0, 1, 1], [], []>} : vector<256x4xbf16>, vector<4x4xbf16>, vector<256x4xf32> -> vector<256x4xf32>
    %c0_91 = arith.constant 0 : index
    %c0_92 = arith.constant 0 : index
    %132 = vector.load %arg5[%c0_91, %c0_92] : memref<256x4xf32, #tpu.memory_space<vmem>>, vector<256x4xf32>
    %133 = arith.addf %132, %131 : vector<256x4xf32>
    %c0_93 = arith.constant 0 : index
    %c0_94 = arith.constant 0 : index
    %134 = vector.load %arg5[%c0_93, %c0_94] : memref<256x4xf32, #tpu.memory_space<vmem>>, vector<256x4xf32>
    tpu.vector_store %arg5[%c0_93, %c0_94], %133 {strides = array<i32>} : memref<256x4xf32, #tpu.memory_space<vmem>>, vector<256x4xf32>,
    %135 = vector.extract_strided_slice %108 {offsets = [1, 1, 0], sizes = [16, 16, 4], strides = [1, 1, 1]} : vector<18x18x4xbf16> to vector<16x16x4xbf16>
    %136 = vector.shape_cast %135 : vector<16x16x4xbf16> to vector<256x4xbf16>
    %c16_95 = arith.constant 16 : index
    %c0_96 = arith.constant 0 : index
    %137 = vector.load %arg3[%c16_95, %c0_96] : memref<36x4xbf16, #tpu.memory_space<vmem>>, vector<4x4xbf16>
    %cst_97 = arith.constant dense<0.000000e+00> : vector<256x4xf32>
    %138 = tpu.matmul %136, %137, %cst_97 {dimension_numbers = #tpu.dot_dimension_numbers<[1], [0], [0], [1], [0, 0, 1, 1], [], []>} : vector<256x4xbf16>, vector<4x4xbf16>, vector<256x4xf32> -> vector<256x4xf32>
    %c0_98 = arith.constant 0 : index
    %c0_99 = arith.constant 0 : index
    %139 = vector.load %arg5[%c0_98, %c0_99] : memref<256x4xf32, #tpu.memory_space<vmem>>, vector<256x4xf32>
    %140 = arith.addf %139, %138 : vector<256x4xf32>
    %c0_100 = arith.constant 0 : index
    %c0_101 = arith.constant 0 : index
    %141 = vector.load %arg5[%c0_100, %c0_101] : memref<256x4xf32, #tpu.memory_space<vmem>>, vector<256x4xf32>
    tpu.vector_store %arg5[%c0_100, %c0_101], %140 {strides = array<i32>} : memref<256x4xf32, #tpu.memory_space<vmem>>, vector<256x4xf32>,
    %142 = vector.extract_strided_slice %108 {offsets = [1, 2, 0], sizes = [16, 16, 4], strides = [1, 1, 1]} : vector<18x18x4xbf16> to vector<16x16x4xbf16>
    %143 = vector.shape_cast %142 : vector<16x16x4xbf16> to vector<256x4xbf16>
    %c20_102 = arith.constant 20 : index
    %c0_103 = arith.constant 0 : index
    %144 = vector.load %arg3[%c20_102, %c0_103] : memref<36x4xbf16, #tpu.memory_space<vmem>>, vector<4x4xbf16>
    %cst_104 = arith.constant dense<0.000000e+00> : vector<256x4xf32>
    %145 = tpu.matmul %143, %144, %cst_104 {dimension_numbers = #tpu.dot_dimension_numbers<[1], [0], [0], [1], [0, 0, 1, 1], [], []>} : vector<256x4xbf16>, vector<4x4xbf16>, vector<256x4xf32> -> vector<256x4xf32>
    %c0_105 = arith.constant 0 : index
    %c0_106 = arith.constant 0 : index
    %146 = vector.load %arg5[%c0_105, %c0_106] : memref<256x4xf32, #tpu.memory_space<vmem>>, vector<256x4xf32>
    %147 = arith.addf %146, %145 : vector<256x4xf32>
    %c0_107 = arith.constant 0 : index
    %c0_108 = arith.constant 0 : index
    %148 = vector.load %arg5[%c0_107, %c0_108] : memref<256x4xf32, #tpu.memory_space<vmem>>, vector<256x4xf32>
    tpu.vector_store %arg5[%c0_107, %c0_108], %147 {strides = array<i32>} : memref<256x4xf32, #tpu.memory_space<vmem>>, vector<256x4xf32>,
    %149 = vector.extract_strided_slice %108 {offsets = [2, 0, 0], sizes = [16, 16, 4], strides = [1, 1, 1]} : vector<18x18x4xbf16> to vector<16x16x4xbf16>
    %150 = vector.shape_cast %149 : vector<16x16x4xbf16> to vector<256x4xbf16>
    %c24_109 = arith.constant 24 : index
    %c0_110 = arith.constant 0 : index
    %151 = vector.load %arg3[%c24_109, %c0_110] : memref<36x4xbf16, #tpu.memory_space<vmem>>, vector<4x4xbf16>
    %cst_111 = arith.constant dense<0.000000e+00> : vector<256x4xf32>
    %152 = tpu.matmul %150, %151, %cst_111 {dimension_numbers = #tpu.dot_dimension_numbers<[1], [0], [0], [1], [0, 0, 1, 1], [], []>} : vector<256x4xbf16>, vector<4x4xbf16>, vector<256x4xf32> -> vector<256x4xf32>
    %c0_112 = arith.constant 0 : index
    %c0_113 = arith.constant 0 : index
    %153 = vector.load %arg5[%c0_112, %c0_113] : memref<256x4xf32, #tpu.memory_space<vmem>>, vector<256x4xf32>
    %154 = arith.addf %153, %152 : vector<256x4xf32>
    %c0_114 = arith.constant 0 : index
    %c0_115 = arith.constant 0 : index
    %155 = vector.load %arg5[%c0_114, %c0_115] : memref<256x4xf32, #tpu.memory_space<vmem>>, vector<256x4xf32>
    tpu.vector_store %arg5[%c0_114, %c0_115], %154 {strides = array<i32>} : memref<256x4xf32, #tpu.memory_space<vmem>>, vector<256x4xf32>,
    %156 = vector.extract_strided_slice %108 {offsets = [2, 1, 0], sizes = [16, 16, 4], strides = [1, 1, 1]} : vector<18x18x4xbf16> to vector<16x16x4xbf16>
    %157 = vector.shape_cast %156 : vector<16x16x4xbf16> to vector<256x4xbf16>
    %c28_116 = arith.constant 28 : index
    %c0_117 = arith.constant 0 : index
    %158 = vector.load %arg3[%c28_116, %c0_117] : memref<36x4xbf16, #tpu.memory_space<vmem>>, vector<4x4xbf16>
    %cst_118 = arith.constant dense<0.000000e+00> : vector<256x4xf32>
    %159 = tpu.matmul %157, %158, %cst_118 {dimension_numbers = #tpu.dot_dimension_numbers<[1], [0], [0], [1], [0, 0, 1, 1], [], []>} : vector<256x4xbf16>, vector<4x4xbf16>, vector<256x4xf32> -> vector<256x4xf32>
    %c0_119 = arith.constant 0 : index
    %c0_120 = arith.constant 0 : index
    %160 = vector.load %arg5[%c0_119, %c0_120] : memref<256x4xf32, #tpu.memory_space<vmem>>, vector<256x4xf32>
    %161 = arith.addf %160, %159 : vector<256x4xf32>
    %c0_121 = arith.constant 0 : index
    %c0_122 = arith.constant 0 : index
    %162 = vector.load %arg5[%c0_121, %c0_122] : memref<256x4xf32, #tpu.memory_space<vmem>>, vector<256x4xf32>
    tpu.vector_store %arg5[%c0_121, %c0_122], %161 {strides = array<i32>} : memref<256x4xf32, #tpu.memory_space<vmem>>, vector<256x4xf32>,
    %163 = vector.extract_strided_slice %108 {offsets = [2, 2, 0], sizes = [16, 16, 4], strides = [1, 1, 1]} : vector<18x18x4xbf16> to vector<16x16x4xbf16>
    %164 = vector.shape_cast %163 : vector<16x16x4xbf16> to vector<256x4xbf16>
    %c32_123 = arith.constant 32 : index
    %c0_124 = arith.constant 0 : index
    %165 = vector.load %arg3[%c32_123, %c0_124] : memref<36x4xbf16, #tpu.memory_space<vmem>>, vector<4x4xbf16>
    %cst_125 = arith.constant dense<0.000000e+00> : vector<256x4xf32>
    %166 = tpu.matmul %164, %165, %cst_125 {dimension_numbers = #tpu.dot_dimension_numbers<[1], [0], [0], [1], [0, 0, 1, 1], [], []>} : vector<256x4xbf16>, vector<4x4xbf16>, vector<256x4xf32> -> vector<256x4xf32>
    %c0_126 = arith.constant 0 : index
    %c0_127 = arith.constant 0 : index
    %167 = vector.load %arg5[%c0_126, %c0_127] : memref<256x4xf32, #tpu.memory_space<vmem>>, vector<256x4xf32>
    %168 = arith.addf %167, %166 : vector<256x4xf32>
    %c0_128 = arith.constant 0 : index
    %c0_129 = arith.constant 0 : index
    %169 = vector.load %arg5[%c0_128, %c0_129] : memref<256x4xf32, #tpu.memory_space<vmem>>, vector<256x4xf32>
    tpu.vector_store %arg5[%c0_128, %c0_129], %168 {strides = array<i32>} : memref<256x4xf32, #tpu.memory_space<vmem>>, vector<256x4xf32>,
    %c0_130 = arith.constant 0 : index
    %c0_131 = arith.constant 0 : index
    %170 = vector.load %arg5[%c0_130, %c0_131] : memref<256x4xf32, #tpu.memory_space<vmem>>, vector<1x4xf32>
    %cst_132 = arith.constant 0.000000e+00 : f32
    %171 = vector.broadcast %cst_132 : f32 to vector<1x4xf32>
    %c0_133 = arith.constant 0 : index
    %c0_134 = arith.constant 0 : index
    %172 = vector.load %arg5[%c0_133, %c0_134] : memref<256x4xf32, #tpu.memory_space<vmem>>, vector<256x4xf32>
    %173 = vector.broadcast %170 : vector<1x4xf32> to vector<256x4xf32>
    %174 = arith.subf %172, %173 : vector<256x4xf32>
    %cst_135 = arith.constant dense<0.000000e+00> : vector<4xf32>
    %175 = vector.multi_reduction <add>, %174, %cst_135 [0] : vector<256x4xf32> to vector<4xf32>
    %176 = vector.shape_cast %175 : vector<4xf32> to vector<1x4xf32>
    %177 = arith.addf %171, %176 : vector<1x4xf32>
    %178 = arith.mulf %174, %174 : vector<256x4xf32>
    %cst_136 = arith.constant dense<0.000000e+00> : vector<4xf32>
    %179 = vector.multi_reduction <add>, %178, %cst_136 [0] : vector<256x4xf32> to vector<4xf32>
    %180 = vector.shape_cast %179 : vector<4xf32> to vector<1x4xf32>
    %181 = arith.addf %171, %180 : vector<1x4xf32>
    %cst_137 = arith.constant 3.906250e-03 : f32
    %182 = vector.broadcast %cst_137 : f32 to vector<1x4xf32>
    %183 = arith.mulf %177, %182 : vector<1x4xf32>
    %cst_138 = arith.constant 3.906250e-03 : f32
    %184 = vector.broadcast %cst_138 : f32 to vector<1x4xf32>
    %185 = arith.mulf %181, %184 : vector<1x4xf32>
    %186 = arith.mulf %183, %183 : vector<1x4xf32>
    %187 = arith.subf %185, %186 : vector<1x4xf32>
    %cst_139 = arith.constant 0.000000e+00 : f32
    %188 = vector.broadcast %cst_139 : f32 to vector<1x4xf32>
    %189 = arith.maximumf %187, %188 : vector<1x4xf32>
    %190 = arith.addf %170, %183 : vector<1x4xf32>
    %cst_140 = arith.constant 9.99999974E-6 : f32
    %191 = vector.broadcast %cst_140 : f32 to vector<1x4xf32>
    %192 = arith.addf %189, %191 : vector<1x4xf32>
    %193 = math.rsqrt %192 : vector<1x4xf32>
    %c0_141 = arith.constant 0 : index
    %c0_142 = arith.constant 0 : index
    %194 = vector.load %arg5[%c0_141, %c0_142] : memref<256x4xf32, #tpu.memory_space<vmem>>, vector<256x4xf32>
    %195 = vector.broadcast %190 : vector<1x4xf32> to vector<256x4xf32>
    %196 = arith.subf %194, %195 : vector<256x4xf32>
    %197 = vector.broadcast %193 : vector<1x4xf32> to vector<256x4xf32>
    %198 = arith.mulf %196, %197 : vector<256x4xf32>
    %c0_143 = arith.constant 0 : index
    %c0_144 = arith.constant 0 : index
    %c0_145 = arith.constant 0 : index
    %c0_146 = arith.constant 0 : index
    %199 = vector.load %arg1[%c0_143, %c0_144, %c0_145, %c0_146] : memref<1x16x16x4xf32, #tpu.memory_space<vmem>>, vector<1x16x16x4xf32>
    %200 = vector.shape_cast %199 : vector<1x16x16x4xf32> to vector<16x16x4xf32>
    %201 = vector.shape_cast %200 : vector<16x16x4xf32> to vector<256x4xf32>
    %202 = arith.addf %198, %201 : vector<256x4xf32>
    %203 = vector.shape_cast %202 : vector<256x4xf32> to vector<1x16x16x4xf32>
    %c0_147 = arith.constant 0 : index
    %c0_148 = arith.constant 0 : index
    %c0_149 = arith.constant 0 : index
    %c0_150 = arith.constant 0 : index
    %204 = vector.load %arg4[%c0_147, %c0_148, %c0_149, %c0_150] : memref<1x16x16x4xf32, #tpu.memory_space<vmem>>, vector<1x16x16x4xf32>
    tpu.vector_store %arg4[%c0_147, %c0_148, %c0_149, %c0_150], %203 {strides = array<i32>} : memref<1x16x16x4xf32, #tpu.memory_space<vmem>>, vector<1x16x16x4xf32>,
    return
  }
  func.func @transform_0(%arg0: i32) -> (i32, i32, i32, i32) {
    %c0_i32 = arith.constant 0 : i32
    %c0_i32_0 = arith.constant 0 : i32
    %c0_i32_1 = arith.constant 0 : i32
    %c0_i32_2 = arith.constant 0 : i32
    return %arg0, %c0_i32, %c0_i32_0, %c0_i32_1 : i32, i32, i32, i32
  }
  func.func @transform_1(%arg0: i32) -> (i32, i32) {
    %c0_i32 = arith.constant 0 : i32
    %c0_i32_0 = arith.constant 0 : i32
    %c0_i32_1 = arith.constant 0 : i32
    return %c0_i32, %c0_i32_0 : i32, i32
  }
  func.func @transform_2(%arg0: i32) -> (i32, i32) {
    %c0_i32 = arith.constant 0 : i32
    %c0_i32_0 = arith.constant 0 : i32
    %c0_i32_1 = arith.constant 0 : i32
    return %c0_i32, %c0_i32_0 : i32, i32
  }
  func.func @transform_3(%arg0: i32) -> (i32, i32, i32, i32) {
    %c0_i32 = arith.constant 0 : i32
    %c0_i32_0 = arith.constant 0 : i32
    %c0_i32_1 = arith.constant 0 : i32
    %c0_i32_2 = arith.constant 0 : i32
    return %arg0, %c0_i32, %c0_i32_0, %c0_i32_1 : i32, i32, i32, i32
  }
}

</mosaic_0001>

<bundles_post_ra>
// kernel: resnet_block_forward.1
= control target key start
LH: loop header
LB: loop body
LE: loop exit
PB: predicated region body
PF: predicated region fallthrough
CT: control target
= control target key end

     0   :  { %s8203_s12 = smov 0   ;;  %s10936_s0 = inlined_call_operand.vmem [shape: f32[2,16,16,4], index: 0, kind: input, shape index: {}]   ;;  %s10937_s1 = inlined_call_operand.vmem [shape: bf16[36,4], index: 1, kind: input, shape index: {}]   ;;  %s10938_s2 = inlined_call_operand.vmem [shape: bf16[36,4], index: 2, kind: input, shape index: {}]   ;;  %s10939_s3 = inlined_call_operand.vmem [shape: f32[2,16,16,4], index: 3, kind: output, shape index: {}]  }
   0x1 LB: > { %s6910_s13 = sadd.s32 4294967295, %s8181_s12   ;;  %p6914_p0 = scmp.ge.s32.totalorder %s8181_s12, 1  ;;  %s8181_s12 = sphi %s8203_s12, %s13_s12  }
   0x2   : > { %p137_p1 = scmp.lt.s32.totalorder %s8181_s12, 3 }
   0x4   : > { %p138_p2 = pnand %p6914_p0, %p137_p1 }
   0x6   : > { %141 = sbr.rel (%p138_p2) target bundleno = 1207 (0x4b7), region = 32 }
   0xb   : > { %v447_v0 = vld [vmem:[%s10937_s1] sm:$0x3]  ;;  %vm494_vm0 = vcmask 1041408   ;;  %p161_p3 = scmp.lt.s32.totalorder %s6910_s13, 1  ;;  %v1243_v2 = vld [vmem:[%s10937_s1 + $0x4] sm:$0x3] }
   0xc   : > { %8137 = vmatprep.subr.msk.bf16.mxu0 %vm494_vm0, %v447_v0  ;;  %v496_v1 = vsel %vm494_vm0, %v447_v0, 0  ;;  %v8163_v3 = vld [vmem:[%s10937_s1] ss:$0 sps:$4 sm:$0xcc]   ;;  %vm412_vm1 = vcmask 1040384   ;;  %vm448_vm3 = vcmask 31744  }
   0xd   : > { %7526 = vmatpush3.bf16.msra.mxu0 %v496_v1  ;;  %s10961_s13 = smov (!%p161_p3, %s6910_s13), 1  ;;  %v8164_v4 = vld [vmem:[%s10937_s1 + $0x4] ss:$0 sps:$4 sm:$0xcc]   ;;  %v861_v5 = vrot.slane %v8163_v3, 2  ;;  %v1290_v21 = vsel %vm494_vm0, %v1243_v2, 0 }
   0xe   : > { %8139 = vmatprep.subr.msk.bf16.mxu0 %vm494_vm0, %v1243_v2  ;;  %s7217_s20 = sshll.u32 %s10961_s13, 8  ;;  %v1553_v9 = vrot.slane %v8164_v4, 2  ;;  %vm413_vm2 = vsmask.f32 256  ;;  %vm691_vm5 = vsmask.f32 7424 }
   0xf   : > { %s8234_s25 = scalar_lea.vmem %s10936_s0, %s7217_s20  ;;  %8138 = vmatprep.subr.msk.bf16.mxu1 %vm494_vm0, %v861_v5  ;;  %v908_v12 = vsel %vm494_vm0, %v861_v5, 0  ;;  %vm8252_vm4 = vmand %vm412_vm1, %vm413_vm2  ;;  %v8282_v53 = vld [vmem:[%s10937_s1 + $0x8] sm:$0x3]  ;;  %vm1197_vm6 = vcmask 1046528   ;;  %s10821_s6 = scalar_lea.vmem %s10939_s3, %s7217_s20 }
  0x10   : > { %v174_v6 = vld [vmem:[%s8234_s25 + $0x10] sm:$0xff]  ;;  %v175_v7 = vld [vmem:[%s8234_s25 + $0x18] sm:$0xff]  ;;  %v172_v8 = vld [vmem:[%s8234_s25] sm:$0xff]  ;;  %7560 = vmatpush3.bf16.msra.mxu1 %v908_v12  ;;  %v1558_v52 = vsel %vm494_vm0, %v1553_v9, 0 }
  0x11   : > { %v205_v10 = vpack.c.bf16 %v175_v7, %v174_v6  ;;  %v173_v11 = vld [vmem:[%s8234_s25 + $0x8] sm:$0xff]  ;;  %v176_v13 = vld [vmem:[%s8234_s25 + $0x20] sm:$0xff]  ;;  %v178_v17 = vld [vmem:[%s8234_s25 + $0x30] sm:$0xff]  ;;  %8140 = vmatprep.subr.msk.bf16.mxu1 %vm494_vm0, %v1553_v9 }
  0x12   : > { %v177_v14 = vld [vmem:[%s8234_s25 + $0x28] sm:$0xff]  ;;  %v204_v15 = vpack.c.bf16 %v173_v11, %v172_v8  ;;  %v179_v18 = vld [vmem:[%s8234_s25 + $0x38] sm:$0xff]  ;;  %v180_v27 = vld [vmem:[%s8234_s25 + $0x40] sm:$0xff] }
  0x13   : > { %v206_v16 = vpack.c.bf16 %v177_v14, %v176_v13  ;;  %v221_v19 = vshrl.u32 %v205_v10, 16  ;;  %v285_v20 = vshll.u32 %v205_v10, 16  ;;  %v207_v22 = vpack.c.bf16 %v179_v18, %v178_v17  ;;  %v181_v28 = vld [vmem:[%s8234_s25 + $0x48] sm:$0xff]  ;;  %v182_v62 = vld [vmem:[%s8234_s25 + $0x50] sm:$0xff]  ;;  %v183_v63 = vld [vmem:[%s8234_s25 + $0x58] sm:$0xff] }
  0x14   : > { %v224_v23 = vshrl.u32 %v204_v15, 16  ;;  %v289_v24 = vshll.u32 %v204_v15, 16  ;;  %v208_v40 = vpack.c.bf16 %v181_v28, %v180_v27  ;;  %v209_v9 = vpack.c.bf16 %v183_v63, %v182_v62  ;;  %v185_v17 = vld [vmem:[%s8234_s25 + $0x68] sm:$0xff] }
  0x15   : > { %v227_v25 = vshrl.u32 %v206_v16, 16  ;;  %v293_v26 = vshll.u32 %v206_v16, 16  ;;  %v284_v29 = vrot.slane %v221_v19, 7  ;;  %v380_v30 = vrot.slane %v285_v20, 7  ;;  %v184_v16 = vld [vmem:[%s8234_s25 + $0x60] sm:$0xff] }
  0x16   : > { %v230_v31 = vshrl.u32 %v207_v22, 16  ;;  %v297_v32 = vshll.u32 %v207_v22, 16  ;;  %v288_v34 = vrot.slane %v224_v23, 7  ;;  %v381_v36 = vrot.slane %v289_v24, 7 }
  0x17   : > { %v292_v35 = vrot.slane %v227_v25, 7  ;;  %v287_v37 = vor.u32 %v285_v20, %v284_v29  ;;  %v8258_v38 = vsel %vm8252_vm4, %v284_v29, %v380_v30  ;;  %v382_v48 = vrot.slane %v293_v26, 7  ;;  %v186_v30 = vld [vmem:[%s8234_s25 + $0x70] sm:$0xff] }
  0x18   : > { %v296_v39 = vrot.slane %v230_v31, 7  ;;  %v291_v41 = vor.u32 %v289_v24, %v288_v34  ;;  %v699_v42 = vshll.u32 %v8258_v38, 16  ;;  %v8263_v44 = vsel %vm8252_vm4, %v288_v34, %v381_v36 }
  0x19   : > { %v295_v43 = vor.u32 %v293_v26, %v292_v35  ;;  %v8267_v45 = vsel %vm8252_vm4, %v221_v19, %v287_v37  ;;  %v710_v46 = vshll.u32 %v8263_v44, 16  ;;  %v233_v61 = vshrl.u32 %v208_v40, 16  ;;  %v188_v37 = vld [vmem:[%s8234_s25 + $0x80] sm:$0xff] }
  0x1a   : > { %v299_v47 = vor.u32 %v297_v32, %v296_v39  ;;  %7527 = vmatprep.mubr.msk.bf16.mxu0 %vm448_vm3, %v8267_v45  ;;  %v8274_v49 = vsel %vm8252_vm4, %v224_v23, %v291_v41  ;;  %v692_v50 = vshrl.u32 %v8267_v45, 16  ;;  %v694_v51 = vshll.u32 %v8267_v45, 16 }
  0x1b   : > { %7528 = vmatmul.mubr.msk.bf16.vlgmr.msra.gmra.mxu0 %vm448_vm3, %v8274_v49  ;;  %v701_v54 = vrot.slane %v699_v42, 1  ;;  %v8288_v55 = vsel %vm8252_vm4, %v227_v25, %v295_v43  ;;  %v703_v56 = vshrl.u32 %v8274_v49, 16  ;;  %v705_v57 = vshll.u32 %v8274_v49, 16 }
  0x1c   : > { %7594 = vmatpush3.bf16.msra.mxu0 %v1290_v21  ;;  %7531 = vmatprep.mubr.msk.bf16.mxu0 %vm448_vm3, %v8267_v45  ;;  %v696_v58 = vrot.slane %v694_v51, 1  ;;  %v712_v59 = vrot.slane %v710_v46, 1  ;;  %v8296_v60 = vsel %vm8252_vm4, %v230_v31, %v299_v47  ;;  %v301_v1 = vshll.u32 %v208_v40, 16  ;;  %v187_v31 = vld [vmem:[%s8234_s25 + $0x78] sm:$0xff] }
  0x1d   : > { %v707_v0 = vrot.slane %v705_v57, 1  ;;  %v8302_v2 = vsel %vm8252_vm4, %v292_v35, %v382_v48  ;;  %v714_v3 = vshrl.u32 %v8288_v55, 16  ;;  %8141 = vmatprep.subr.msk.bf16.mxu0 %vm494_vm0, %v8282_v53  ;;  %v300_v5 = vrot.slane %v233_v61, 7 }
  0x1e   : > { %v697_v4 = vor.u32 %v696_v58, %v692_v50  ;;  %v716_v6 = vshll.u32 %v8288_v55, 16  ;;  %v721_v7 = vshll.u32 %v8302_v2, 16  ;;  %v383_v10 = vrot.slane %v297_v32, 7 }
  0x1f   : > { %v708_v8 = vor.u32 %v707_v0, %v703_v56  ;;  %v725_v11 = vshrl.u32 %v8296_v60, 16  ;;  %v303_v13 = vor.u32 %v301_v1, %v300_v5  ;;  %v236_v19 = vshrl.u32 %v209_v9, 16 }
  0x20   : > { %v8311_v12 = vsel %vm691_vm5, %v697_v4, %v701_v54  ;;  %v718_v14 = vrot.slane %v716_v6, 1  ;;  %v723_v15 = vrot.slane %v721_v7, 1  ;;  %v305_v20 = vshll.u32 %v209_v9, 16  ;;  %v190_v7 = vld [vmem:[%s8234_s25 + $0x90] sm:$0xff] }
  0x21   : > { %7561 = vmatprep.mubr.msk.bf16.mxu1 %vm448_vm3, %v8311_v12  ;;  %v8318_v18 = vsel %vm691_vm5, %v708_v8, %v712_v59  ;;  %v8322_v21 = vsel %vm8252_vm4, %v296_v39, %v383_v10  ;;  %v8328_v22 = vsel %vm8252_vm4, %v233_v61, %v303_v13  ;;  %v727_v24 = vshll.u32 %v8296_v60, 16  ;;  %v189_v39 = vld [vmem:[%s8234_s25 + $0x88] sm:$0xff]  ;;  %v191_v8 = vld [vmem:[%s8234_s25 + $0x98] sm:$0xff] }
  0x22   : > { %7562 = vmatmul.mubr.msk.bf16.vlgmr.msra.gmra.mxu1 %vm448_vm3, %v8318_v18  ;;  %v719_v23 = vor.u32 %v718_v14, %v714_v3  ;;  %v732_v25 = vshll.u32 %v8322_v21, 16  ;;  %v304_v26 = vrot.slane %v236_v19, 7  ;;  %v210_v27 = vpack.c.bf16 %v185_v17, %v184_v16 }
  0x23   : > { %7532 = vmatmul.mubr.msk.bf16.gmra.mxu0 %vm448_vm3, %v8288_v55  ;;  %7565 = vmatprep.mubr.msk.bf16.mxu1 %vm448_vm3, %v8311_v12  ;;  %v384_v28 = vrot.slane %v301_v1, 7  ;;  %v736_v29 = vshrl.u32 %v8328_v22, 16  ;;  %v729_v34 = vrot.slane %v727_v24, 1  ;;  %v738_v36 = vshll.u32 %v8328_v22, 16 }
  0x24   : > { %7535 = vmatprep.mubr.msk.bf16.mxu0 %vm448_vm3, %v8296_v60  ;;  %v8342_v32 = vsel %vm691_vm5, %v719_v23, %v723_v15  ;;  %v734_v35 = vrot.slane %v732_v25, 1  ;;  %7628 = vmatpush3.bf16.msra.mxu1 %v1558_v52  ;;  %v307_v40 = vor.u32 %v305_v20, %v304_v26  ;;  %v239_v41 = vshrl.u32 %v210_v27, 16 }
  0x25   : > { %v309_v42 = vshll.u32 %v210_v27, 16  ;;  %v8349_v43 = vsel %vm8252_vm4, %v300_v5, %v384_v28  ;;  %v730_v46 = vor.u32 %v729_v34, %v725_v11  ;;  %v740_v47 = vrot.slane %v738_v36, 1  ;;  %v193_v36 = vld [vmem:[%s8234_s25 + $0xa8] sm:$0xff] }
  0x26   : > { %v743_v48 = vshll.u32 %v8349_v43, 16  ;;  %v211_v50 = vpack.c.bf16 %v187_v31, %v186_v30  ;;  %v8354_v51 = vsel %vm8252_vm4, %v236_v19, %v307_v40  ;;  %v308_v54 = vrot.slane %v239_v41, 7 }
  0x27   : > { %v385_v56 = vrot.slane %v305_v20, 7  ;;  %v212_v52 = vpack.c.bf16 %v189_v39, %v188_v37  ;;  %v8357_v57 = vsel %vm691_vm5, %v730_v46, %v734_v35  ;;  %v741_v58 = vor.u32 %v740_v47, %v736_v29  ;;  %v192_v35 = vld [vmem:[%s8234_s25 + $0xa0] sm:$0xff] }
  0x28   : > { %v745_v59 = vrot.slane %v743_v48, 1  ;;  %v242_v61 = vshrl.u32 %v211_v50, 16  ;;  %v311_v62 = vor.u32 %v309_v42, %v308_v54  ;;  %v313_v63 = vshll.u32 %v211_v50, 16 }
  0x29   : > { %v8361_v0 = vsel %vm8252_vm4, %v304_v26, %v385_v56  ;;  %v747_v1 = vshrl.u32 %v8354_v51, 16  ;;  %v749_v5 = vshll.u32 %v8354_v51, 16  ;;  %v245_v10 = vshrl.u32 %v212_v52, 16 }
  0x2a   : > { %7566 = vmatmul.mubr.msk.bf16.gmra.mxu1 %vm448_vm3, %v8342_v32  ;;  %v8367_v3 = vsel %vm691_vm5, %v741_v58, %v745_v59  ;;  %v312_v4 = vrot.slane %v242_v61, 7  ;;  %v754_v6 = vshll.u32 %v8361_v0, 16  ;;  %v8379_v9 = vsel %vm8252_vm4, %v239_v41, %v311_v62 }
  0x2b   : > { %7536 = vmatmul.mubr.msk.bf16.gmra.mxu0 %vm448_vm3, %v8328_v22  ;;  %7569 = vmatprep.mubr.msk.bf16.mxu1 %vm448_vm3, %v8357_v57  ;;  %v317_v11 = vshll.u32 %v212_v52, 16  ;;  %v386_v13 = vrot.slane %v309_v42, 7  ;;  %v751_v15 = vrot.slane %v749_v5, 1  ;;  %v758_v17 = vshrl.u32 %v8379_v9, 16 }
  0x2c   : > { %7539 = vmatprep.mubr.msk.bf16.mxu0 %vm448_vm3, %v8354_v51  ;;  %v315_v14 = vor.u32 %v313_v63, %v312_v4  ;;  %v756_v16 = vrot.slane %v754_v6, 1  ;;  %v316_v19 = vrot.slane %v245_v10, 7  ;;  %v760_v23 = vshll.u32 %v8379_v9, 16 }
  0x2d   : > { %v8386_v20 = vsel %vm8252_vm4, %v308_v54, %v386_v13  ;;  %v213_v24 = vpack.c.bf16 %v191_v8, %v190_v7  ;;  %v752_v26 = vor.u32 %v751_v15, %v747_v1  ;;  %v387_v28 = vrot.slane %v313_v63, 7  ;;  %v194_v63 = vld [vmem:[%s8234_s25 + $0xb0] sm:$0xff]  ;;  %v195_v1 = vld [vmem:[%s8234_s25 + $0xb8] sm:$0xff] }
  0x2e   : > { %v8391_v25 = vsel %vm8252_vm4, %v242_v61, %v315_v14  ;;  %v765_v27 = vshll.u32 %v8386_v20, 16  ;;  %v319_v29 = vor.u32 %v317_v11, %v316_v19  ;;  %v762_v30 = vrot.slane %v760_v23, 1  ;;  %v196_v23 = vld [vmem:[%s8234_s25 + $0xc0] sm:$0xff] }
  0x2f   : > { %v248_v31 = vshrl.u32 %v213_v24, 16  ;;  %v321_v34 = vshll.u32 %v213_v24, 16  ;;  %v8397_v37 = vsel %vm691_vm5, %v752_v26, %v756_v16  ;;  %v8401_v40 = vsel %vm8252_vm4, %v312_v4, %v387_v28  ;;  %v197_v24 = vld [vmem:[%s8234_s25 + $0xc8] sm:$0xff] }
  0x30   : > { %v767_v39 = vrot.slane %v765_v27, 1  ;;  %v769_v41 = vshrl.u32 %v8391_v25, 16  ;;  %v8406_v42 = vsel %vm8252_vm4, %v245_v10, %v319_v29  ;;  %v763_v46 = vor.u32 %v762_v30, %v758_v17  ;;  %v198_v29 = vld [vmem:[%s8234_s25 + $0xd0] sm:$0xff]  ;;  %v199_v30 = vld [vmem:[%s8234_s25 + $0xd8] sm:$0xff] }
  0x31   : > { %v320_v47 = vrot.slane %v248_v31, 7  ;;  %v771_v48 = vshll.u32 %v8391_v25, 16  ;;  %v776_v50 = vshll.u32 %v8401_v40, 16  ;;  %v214_v54 = vpack.c.bf16 %v193_v36, %v192_v35 }
  0x32   : > { %7570 = vmatmul.mubr.msk.bf16.gmra.mxu1 %vm448_vm3, %v8367_v3  ;;  %v388_v56 = vrot.slane %v317_v11, 7  ;;  %v780_v52 = vshrl.u32 %v8406_v42, 16  ;;  %v8418_v58 = vsel %vm691_vm5, %v763_v46, %v767_v39  ;;  %v782_v62 = vshll.u32 %v8406_v42, 16 }
  0x33   : > { %7540 = vmatmul.mubr.msk.bf16.gmra.mxu0 %vm448_vm3, %v8379_v9  ;;  %7573 = vmatprep.mubr.msk.bf16.mxu1 %vm448_vm3, %v8397_v37  ;;  %v323_v59 = vor.u32 %v321_v34, %v320_v47  ;;  %v773_v61 = vrot.slane %v771_v48, 1  ;;  %v778_v4 = vrot.slane %v776_v50, 1  ;;  %v251_v5 = vshrl.u32 %v214_v54, 16 }
  0x34   : > { %7543 = vmatprep.mubr.msk.bf16.mxu0 %vm448_vm3, %v8391_v25  ;;  %v325_v6 = vshll.u32 %v214_v54, 16  ;;  %v8427_v7 = vsel %vm8252_vm4, %v316_v19, %v388_v56  ;;  %v784_v11 = vrot.slane %v782_v62, 1  ;;  %v215_v15 = vpack.c.bf16 %v195_v1, %v194_v63 }
  0x35   : > { %v8431_v8 = vsel %vm8252_vm4, %v248_v31, %v323_v59  ;;  %v774_v10 = vor.u32 %v773_v61, %v769_v41  ;;  %v787_v13 = vshll.u32 %v8427_v7, 16  ;;  %v324_v14 = vrot.slane %v251_v5, 7 }
  0x36   : > { %v389_v16 = vrot.slane %v321_v34, 7  ;;  %v791_v17 = vshrl.u32 %v8431_v8, 16  ;;  %v785_v19 = vor.u32 %v784_v11, %v780_v52  ;;  %v793_v28 = vshll.u32 %v8431_v8, 16 }
  0x37   : > { %v8438_v26 = vsel %vm691_vm5, %v774_v10, %v778_v4  ;;  %v789_v27 = vrot.slane %v787_v13, 1  ;;  %v327_v31 = vor.u32 %v325_v6, %v324_v14  ;;  %v254_v35 = vshrl.u32 %v215_v15, 16  ;;  %v200_v13 = vld [vmem:[%s8234_s25 + $0xe0] sm:$0xff] }
  0x38   : > { %v329_v36 = vshll.u32 %v215_v15, 16  ;;  %v8445_v39 = vsel %vm8252_vm4, %v320_v47, %v389_v16  ;;  %v795_v34 = vrot.slane %v793_v28, 1  ;;  %v216_v46 = vpack.c.bf16 %v197_v24, %v196_v23  ;;  %v201_v15 = vld [vmem:[%s8234_s25 + $0xe8] sm:$0xff] }
  0x39   : > { %v798_v41 = vshll.u32 %v8445_v39, 16  ;;  %v8452_v48 = vsel %vm8252_vm4, %v251_v5, %v327_v31  ;;  %v328_v50 = vrot.slane %v254_v35, 7  ;;  %v390_v54 = vrot.slane %v325_v6, 7 }
  0x3a   : > { %7574 = vmatmul.mubr.msk.bf16.gmra.mxu1 %vm448_vm3, %v8418_v58  ;;  %v217_v56 = vpack.c.bf16 %v199_v30, %v198_v29  ;;  %v796_v47 = vor.u32 %v795_v34, %v791_v17  ;;  %v257_v59 = vshrl.u32 %v216_v46, 16  ;;  %v333_v61 = vshll.u32 %v216_v46, 16 }
  0x3b   : > { %7544 = vmatmul.mubr.msk.bf16.gmra.mxu0 %vm448_vm3, %v8406_v42  ;;  %7577 = vmatprep.mubr.msk.bf16.mxu1 %vm448_vm3, %v8438_v26  ;;  %v800_v52 = vrot.slane %v798_v41, 1  ;;  %v8461_v62 = vsel %vm691_vm5, %v785_v19, %v789_v27  ;;  %v331_v63 = vor.u32 %v329_v36, %v328_v50  ;;  %v8465_v1 = vsel %vm8252_vm4, %v324_v14, %v390_v54 }
  0x3c   : > { %7547 = vmatprep.mubr.msk.bf16.mxu0 %vm448_vm3, %v8431_v8  ;;  %v804_v4 = vshll.u32 %v8452_v48, 16  ;;  %v332_v5 = vrot.slane %v257_v59, 7  ;;  %v802_v6 = vshrl.u32 %v8452_v48, 16  ;;  %v809_v10 = vshll.u32 %v8465_v1, 16 }
  0x3d   : > { %v260_v11 = vshrl.u32 %v217_v56, 16  ;;  %v8474_v16 = vsel %vm8252_vm4, %v254_v35, %v331_v63  ;;  %v337_v23 = vshll.u32 %v217_v56, 16  ;;  %v391_v24 = vrot.slane %v329_v36, 7 }
  0x3e   : > { %v806_v17 = vrot.slane %v804_v4, 1  ;;  %v8477_v14 = vsel %vm691_vm5, %v796_v47, %v800_v52  ;;  %v335_v19 = vor.u32 %v333_v61, %v332_v5  ;;  %v811_v27 = vrot.slane %v809_v10, 1 }
  0x3f   : > { %v336_v28 = vrot.slane %v260_v11, 7  ;;  %v8481_v29 = vsel %vm8252_vm4, %v328_v50, %v391_v24  ;;  %v813_v30 = vshrl.u32 %v8474_v16, 16  ;;  %v815_v31 = vshll.u32 %v8474_v16, 16 }
  0x40   : > { %v218_v34 = vpack.c.bf16 %v201_v15, %v200_v13  ;;  %v8487_v35 = vsel %vm8252_vm4, %v257_v59, %v335_v19  ;;  %v820_v41 = vshll.u32 %v8481_v29, 16  ;;  %v392_v46 = vrot.slane %v333_v61, 7 }
  0x41   : > { %v339_v36 = vor.u32 %v337_v23, %v336_v28  ;;  %v807_v54 = vor.u32 %v806_v17, %v802_v6  ;;  %v817_v56 = vrot.slane %v815_v31, 1  ;;  %v826_v6 = vshll.u32 %v8487_v35, 16 }
  0x42   : > { %7578 = vmatmul.mubr.msk.bf16.gmra.mxu1 %vm448_vm3, %v8461_v62  ;;  %v263_v50 = vshrl.u32 %v218_v34, 16  ;;  %v341_v47 = vshll.u32 %v218_v34, 16  ;;  %v822_v59 = vrot.slane %v820_v41, 1  ;;  %v8502_v61 = vsel %vm8252_vm4, %v332_v5, %v392_v46 }
  0x43   : > { %7548 = vmatmul.mubr.msk.bf16.gmra.mxu0 %vm448_vm3, %v8452_v48  ;;  %7581 = vmatprep.mubr.msk.bf16.mxu1 %vm448_vm3, %v8477_v14  ;;  %v8498_v52 = vsel %vm8252_vm4, %v260_v11, %v339_v36  ;;  %v818_v63 = vor.u32 %v817_v56, %v813_v30  ;;  %v393_v10 = vrot.slane %v337_v23, 7  ;;  %v8509_v15 = vsel %vm691_vm5, %v807_v54, %v811_v27 }
  0x44   : > { %7551 = vmatprep.mubr.msk.bf16.mxu0 %vm448_vm3, %v8474_v16  ;;  %v340_v4 = vrot.slane %v263_v50, 7  ;;  %v837_v13 = vshll.u32 %v8498_v52, 16  ;;  %v824_v17 = vshrl.u32 %v8487_v35, 16  ;;  %v831_v24 = vshll.u32 %v8502_v61, 16 }
  0x45   : > { %v8514_v5 = vsel %vm691_vm5, %v818_v63, %v822_v59  ;;  %v828_v19 = vrot.slane %v826_v6, 1  ;;  %v8518_v30 = vsel %vm8252_vm4, %v336_v28, %v393_v10  ;;  %v835_v23 = vshrl.u32 %v8498_v52, 16 }
  0x46   : > { %v343_v11 = vor.u32 %v341_v47, %v340_v4  ;;  %v839_v27 = vrot.slane %v837_v13, 1  ;;  %v842_v34 = vshll.u32 %v8518_v30, 16  ;;  %v394_v36 = vrot.slane %v341_v47, 7 }
  0x47   : > { %v829_v28 = vor.u32 %v828_v19, %v824_v17  ;;  %v833_v41 = vrot.slane %v831_v24, 1  ;;  %v1198_v47 = vrot.slane %v8267_v45, 1  ;;  %v1199_v59 = vrot.slane %v8258_v38, 1 }
  0x48   : > { %v8523_v31 = vsel %vm8252_vm4, %v263_v50, %v343_v11  ;;  %v840_v54 = vor.u32 %v839_v27, %v835_v23  ;;  %v844_v56 = vrot.slane %v842_v34, 1  ;;  %v8537_v50 = vsel %vm8252_vm4, %v340_v4, %v394_v36  ;;  %v8165_v11 = vld [vmem:[%s10937_s1 + $0x8] ss:$0 sps:$4 sm:$0xcc]  }
  0x49   : > { %v848_v46 = vshll.u32 %v8523_v31, 16  ;;  %v8542_v63 = vsel %vm691_vm5, %v829_v28, %v833_v41  ;;  %v846_v6 = vshrl.u32 %v8523_v31, 16  ;;  %v853_v13 = vshll.u32 %v8537_v50, 16 }
  0x4a   : > { %7582 = vmatmul.mubr.msk.bf16.gmra.mxu1 %vm448_vm3, %v8509_v15  ;;  %v8550_v4 = vsel %vm691_vm5, %v840_v54, %v844_v56  ;;  %v8553_v17 = vsel %vm1197_vm6, %v1198_v47, %v1199_v59  ;;  %v2101_v19 = vrot.slane %v8165_v11, 2  ;;  %v1201_v23 = vrot.slane %v8274_v49, 1  ;;  %v8596_v56 = vld [vmem:[%s10937_s1 + $0xc] ss:$0 sps:$4 sm:$0xcc]  }
  0x4b   : > { %7552 = vmatmul.mubr.msk.bf16.gmra.mxu0 %vm448_vm3, %v8487_v35  ;;  %7585 = vmatprep.mubr.msk.bf16.mxu1 %vm448_vm3, %v8514_v5  ;;  %v850_v10 = vrot.slane %v848_v46, 1  ;;  %v855_v24 = vrot.slane %v853_v13, 1  ;;  %v1202_v27 = vrot.slane %v8263_v44, 1  ;;  %v1833_v28 = vsel %vm494_vm0, %v8282_v53, 0  ;;  %v8579_v44 = vld [vmem:[%s10937_s1 + $0xc] sm:$0x3] }
  0x4c   : > { %7555 = vmatprep.mubr.msk.bf16.mxu0 %vm448_vm3, %v8498_v52  ;;  %8142 = vmatprep.subr.msk.bf16.mxu1 %vm494_vm0, %v2101_v19  ;;  %v1204_v53 = vrot.slane %v8288_v55, 1  ;;  %v1205_v41 = vrot.slane %v8302_v2, 1  ;;  %v1207_v46 = vrot.slane %v8296_v60, 1  ;;  %v1208_v54 = vrot.slane %v8322_v21, 1 }
  0x4d   : > { %v851_v38 = vor.u32 %v850_v10, %v846_v6  ;;  %v8570_v36 = vsel %vm1197_vm6, %v1201_v23, %v1202_v27  ;;  %v2106_v2 = vsel %vm494_vm0, %v2101_v19, 0  ;;  %v2630_v59 = vrot.slane %v8596_v56, 2 }
  0x4e   : > { %v8602_v47 = vsel %vm1197_vm6, %v1207_v46, %v1208_v54  ;;  %v1210_v21 = vrot.slane %v8328_v22, 1  ;;  %v1211_v6 = vrot.slane %v8349_v43, 1  ;;  %v1213_v10 = vrot.slane %v8354_v51, 1 }
  0x4f   : > { %v8567_v34 = vsel %vm691_vm5, %v851_v38, %v855_v24  ;;  %v1214_v13 = vrot.slane %v8361_v0, 1  ;;  %v1216_v43 = vrot.slane %v8379_v9, 1  ;;  %v1217_v0 = vrot.slane %v8386_v20, 1 }
  0x50   : > { %v8622_v11 = vsel %vm1197_vm6, %v1210_v21, %v1211_v6  ;;  %v1219_v24 = vrot.slane %v8391_v25, 1  ;;  %v1220_v19 = vrot.slane %v8401_v40, 1  ;;  %v1222_v20 = vrot.slane %v8406_v42, 1 }
  0x51   : > { %v8625_v38 = vsel %vm1197_vm6, %v1213_v10, %v1214_v13  ;;  %v8640_v23 = vsel %vm1197_vm6, %v1216_v43, %v1217_v0  ;;  %v1223_v40 = vrot.slane %v8427_v7, 1  ;;  %v1228_v7 = vrot.slane %v8452_v48, 1  ;;  %v202_v10 = vld [vmem:[%s8234_s25 + $0xf0] sm:$0xff]  ;;  %v203_v13 = vld [vmem:[%s8234_s25 + $0xf8] sm:$0xff] }
  0x52   : > { %7586 = vmatmul.mubr.msk.bf16.gmra.mxu1 %vm448_vm3, %v8542_v63  ;;  %v8643_v27 = vsel %vm1197_vm6, %v1219_v24, %v1220_v19  ;;  %v1231_v54 = vrot.slane %v8474_v16, 1  ;;  %v1237_v43 = vrot.slane %v8498_v52, 1  ;;  %v1238_v0 = vrot.slane %v8518_v30, 1 }
  0x53   : > { %7556 = vmatmul.mubr.msk.bf16.gmra.mxu0 %vm448_vm3, %v8523_v31  ;;  %7589 = vmatprep.mubr.msk.bf16.mxu1 %vm448_vm3, %v8550_v4  ;;  %v219_v24 = vpack.c.bf16 %v203_v13, %v202_v10  ;;  %v1240_v30 = vrot.slane %v8523_v31, 1 }
  0x54   : > { %7595 = vmatprep.mubr.msk.bf16.mxu0 %vm448_vm3, %v8553_v17 }
  0x5a   : > { %7590 = vmatmul.mubr.msk.bf16.gmra.mxu1 %vm448_vm3, %v8567_v34 }
  0x5b   : > { %7596 = vmatmul.mubr.msk.bf16.vlgmr.msra.gmra.mxu0 %vm448_vm3, %v8570_v36  ;;  %7629 = vmatprep.mubr.msk.bf16.mxu1 %vm448_vm3, %v8274_v49  ;;  %v8599_v49 = vsel %vm1197_vm6, %v1204_v53, %v1205_v41  ;;  %v1226_v53 = vrot.slane %v8445_v39, 1  ;;  %v8658_v41 = vsel %vm1197_vm6, %v1222_v20, %v1223_v40  ;;  %v1229_v39 = vrot.slane %v8465_v1, 1 }
  0x5c   : > { %7662 = vmatpush3.bf16.msra.mxu0 %v1833_v28  ;;  %7599 = vmatprep.mubr.msk.bf16.mxu0 %vm448_vm3, %v8553_v17  ;;  %v1225_v28 = vrot.slane %v8431_v8, 1  ;;  %v1234_v1 = vrot.slane %v8487_v35, 1  ;;  %v8699_v20 = vsel %vm1197_vm6, %v1237_v43, %v1238_v0  ;;  %v1241_v40 = vrot.slane %v8537_v50, 1 }
  0x5d   : > { %8143 = vmatprep.subr.msk.bf16.mxu0 %vm494_vm0, %v8579_v44  ;;  %v8676_v21 = vsel %vm1197_vm6, %v1228_v7, %v1229_v39 }
  0x5e   : > { %v8661_v46 = vsel %vm1197_vm6, %v1225_v28, %v1226_v53  ;;  %v345_v53 = vshll.u32 %v219_v24, 16  ;;  %v8712_v7 = vsel %vm1197_vm6, %v1240_v30, %v1241_v40 }
  0x62   : > { %7630 = vmatmul.mubr.msk.bf16.vlgmr.msra.gmra.mxu1 %vm448_vm3, %v8267_v45 }
  0x63   : > { %7600 = vmatmul.mubr.msk.bf16.gmra.mxu0 %vm448_vm3, %v8599_v49  ;;  %7633 = vmatprep.mubr.msk.bf16.mxu1 %vm448_vm3, %v8288_v55 }
  0x64   : > { %7603 = vmatprep.mubr.msk.bf16.mxu0 %vm448_vm3, %v8602_v47  ;;  %7696 = vmatpush3.bf16.msra.mxu1 %v2106_v2  ;;  %v1232_v2 = vrot.slane %v8481_v29, 1  ;;  %v1235_v29 = vrot.slane %v8502_v61, 1  ;;  %v266_v61 = vshrl.u32 %v219_v24, 16 }
  0x65   : > { %8144 = vmatprep.subr.msk.bf16.mxu1 %vm494_vm0, %v2630_v59 }
  0x66   : > { %v8679_v6 = vsel %vm1197_vm6, %v1231_v54, %v1232_v2  ;;  %v8696_v19 = vsel %vm1197_vm6, %v1234_v1, %v1235_v29  ;;  %v344_v28 = vrot.slane %v266_v61, 7  ;;  %v2367_v54 = vsel %vm494_vm0, %v8579_v44, 0  ;;  %v2891_v2 = vld [vmem:[%s10937_s1 + $0x10] sm:$0x3] }
  0x67   : > { %v2893_v30 = vsel %vm494_vm0, %v2891_v2, 0 }
  0x68   : > { %v347_v39 = vor.u32 %v345_v53, %v344_v28 }
  0x6a   : > { %7634 = vmatmul.mubr.msk.bf16.gmra.mxu1 %vm448_vm3, %v8296_v60  ;;  %v8724_v50 = vsel %vm8252_vm4, %v266_v61, %v347_v39 }
  0x6b   : > { %7604 = vmatmul.mubr.msk.bf16.gmra.mxu0 %vm448_vm3, %v8622_v11  ;;  %7637 = vmatprep.mubr.msk.bf16.mxu1 %vm448_vm3, %v8328_v22  ;;  %v1819_v44 = vshll.u32 %v8724_v50, 16  ;;  %v2094_v0 = vrot.slane %v8724_v50, 1 }
  0x6c   : > { %7607 = vmatprep.mubr.msk.bf16.mxu0 %vm448_vm3, %v8625_v38 }
  0x6d   : > { %v1821_v1 = vrot.slane %v1819_v44, 1 }
  0x72   : > { %7638 = vmatmul.mubr.msk.bf16.gmra.mxu1 %vm448_vm3, %v8354_v51 }
  0x73   : > { %7608 = vmatmul.mubr.msk.bf16.gmra.mxu0 %vm448_vm3, %v8640_v23  ;;  %7641 = vmatprep.mubr.msk.bf16.mxu1 %vm448_vm3, %v8379_v9 }
  0x74   : > { %7611 = vmatprep.mubr.msk.bf16.mxu0 %vm448_vm3, %v8643_v27 }
  0x7a   : > { %7642 = vmatmul.mubr.msk.bf16.gmra.mxu1 %vm448_vm3, %v8391_v25 }
  0x7b   : > { %7612 = vmatmul.mubr.msk.bf16.gmra.mxu0 %vm448_vm3, %v8658_v41  ;;  %7645 = vmatprep.mubr.msk.bf16.mxu1 %vm448_vm3, %v8406_v42 }
  0x7c   : > { %7615 = vmatprep.mubr.msk.bf16.mxu0 %vm448_vm3, %v8661_v46 }
  0x82   : > { %7646 = vmatmul.mubr.msk.bf16.gmra.mxu1 %vm448_vm3, %v8431_v8 }
  0x83   : > { %7616 = vmatmul.mubr.msk.bf16.gmra.mxu0 %vm448_vm3, %v8676_v21  ;;  %7649 = vmatprep.mubr.msk.bf16.mxu1 %vm448_vm3, %v8452_v48 }
  0x84   : > { %7619 = vmatprep.mubr.msk.bf16.mxu0 %vm448_vm3, %v8679_v6 }
  0x8a   : > { %7650 = vmatmul.mubr.msk.bf16.gmra.mxu1 %vm448_vm3, %v8474_v16 }
  0x8b   : > { %7620 = vmatmul.mubr.msk.bf16.gmra.mxu0 %vm448_vm3, %v8696_v19  ;;  %7653 = vmatprep.mubr.msk.bf16.mxu1 %vm448_vm3, %v8487_v35 }
  0x8c   : > { %7623 = vmatprep.mubr.msk.bf16.mxu0 %vm448_vm3, %v8699_v20 }
  0x92   : > { %7654 = vmatmul.mubr.msk.bf16.gmra.mxu1 %vm448_vm3, %v8498_v52 }
  0x93   : > { %7624 = vmatmul.mubr.msk.bf16.gmra.mxu0 %vm448_vm3, %v8712_v7  ;;  %7657 = vmatprep.mubr.msk.bf16.mxu1 %vm448_vm3, %v8523_v31 }
  0x94   : > { %7663 = vmatprep.mubr.msk.bf16.mxu0 %vm448_vm3, %v8318_v18  ;;  %v2632_v18 = vsel %vm494_vm0, %v2630_v59, 0  ;;  %v1817_v59 = vshrl.u32 %v8724_v50, 16 }
  0x96   : > { %v1822_v10 = vor.u32 %v1821_v1, %v1817_v59 }
  0x9a   : > { %7658 = vmatmul.mubr.msk.bf16.gmra.mxu1 %vm448_vm3, %v8724_v50 }
  0x9b   : > { %7664 = vmatmul.mubr.msk.bf16.vlgmr.msra.gmra.mxu0 %vm448_vm3, %v8311_v12  ;;  %7697 = vmatprep.mubr.msk.bf16.mxu1 %vm448_vm3, %v8570_v36  ;;  %v395_v36 = vrot.slane %v345_v53, 7 }
  0x9c   : > { %7730 = vmatpush3.bf16.msra.mxu0 %v2367_v54  ;;  %7667 = vmatprep.mubr.msk.bf16.mxu0 %vm448_vm3, %v8342_v32 }
  0x9d   : > { %8145 = vmatprep.subr.msk.bf16.mxu0 %vm494_vm0, %v2891_v2  ;;  %v446_v56 = vsel %vm8252_vm4, %v344_v28, %v395_v36 }
  0x9e   : > { %v1824_v29 = vshll.u32 %v446_v56, 16  ;;  %v2095_v24 = vrot.slane %v446_v56, 1 }
  0xa0   : > { %v1826_v13 = vrot.slane %v1824_v29, 1  ;;  %v8808_v61 = vsel %vm1197_vm6, %v2094_v0, %v2095_v24 }
  0xa2   : > { %7698 = vmatmul.mubr.msk.bf16.vlgmr.msra.gmra.mxu1 %vm448_vm3, %v8553_v17  ;;  %v8796_v43 = vsel %vm691_vm5, %v1822_v10, %v1826_v13 }
  0xa3   : > { %7668 = vmatmul.mubr.msk.bf16.gmra.mxu0 %vm448_vm3, %v8357_v57  ;;  %7701 = vmatprep.mubr.msk.bf16.mxu1 %vm448_vm3, %v8599_v49 }
  0xa4   : > { %7671 = vmatprep.mubr.msk.bf16.mxu0 %vm448_vm3, %v8367_v3  ;;  %7764 = vmatpush3.bf16.msra.mxu1 %v2632_v18 }
  0xaa   : > { %7702 = vmatmul.mubr.msk.bf16.gmra.mxu1 %vm448_vm3, %v8602_v47 }
  0xab   : > { %7672 = vmatmul.mubr.msk.bf16.gmra.mxu0 %vm448_vm3, %v8397_v37  ;;  %7705 = vmatprep.mubr.msk.bf16.mxu1 %vm448_vm3, %v8622_v11 }
  0xac   : > { %7675 = vmatprep.mubr.msk.bf16.mxu0 %vm448_vm3, %v8418_v58 }
  0xb2   : > { %7706 = vmatmul.mubr.msk.bf16.gmra.mxu1 %vm448_vm3, %v8625_v38 }
  0xb3   : > { %7676 = vmatmul.mubr.msk.bf16.gmra.mxu0 %vm448_vm3, %v8438_v26  ;;  %7709 = vmatprep.mubr.msk.bf16.mxu1 %vm448_vm3, %v8640_v23 }
  0xb4   : > { %7679 = vmatprep.mubr.msk.bf16.mxu0 %vm448_vm3, %v8461_v62 }
  0xba   : > { %7710 = vmatmul.mubr.msk.bf16.gmra.mxu1 %vm448_vm3, %v8643_v27 }
  0xbb   : > { %7680 = vmatmul.mubr.msk.bf16.gmra.mxu0 %vm448_vm3, %v8477_v14  ;;  %7713 = vmatprep.mubr.msk.bf16.mxu1 %vm448_vm3, %v8658_v41 }
  0xbc   : > { %7683 = vmatprep.mubr.msk.bf16.mxu0 %vm448_vm3, %v8509_v15 }
  0xc2   : > { %7714 = vmatmul.mubr.msk.bf16.gmra.mxu1 %vm448_vm3, %v8661_v46 }
  0xc3   : > { %7684 = vmatmul.mubr.msk.bf16.gmra.mxu0 %vm448_vm3, %v8514_v5  ;;  %7717 = vmatprep.mubr.msk.bf16.mxu1 %vm448_vm3, %v8676_v21 }
  0xc4   : > { %7687 = vmatprep.mubr.msk.bf16.mxu0 %vm448_vm3, %v8542_v63 }
  0xca   : > { %7718 = vmatmul.mubr.msk.bf16.gmra.mxu1 %vm448_vm3, %v8679_v6 }
  0xcb   : > { %7688 = vmatmul.mubr.msk.bf16.gmra.mxu0 %vm448_vm3, %v8550_v4  ;;  %7721 = vmatprep.mubr.msk.bf16.mxu1 %vm448_vm3, %v8696_v19 }
  0xcc   : > { %7691 = vmatprep.mubr.msk.bf16.mxu0 %vm448_vm3, %v8567_v34 }
  0xd2   : > { %7722 = vmatmul.mubr.msk.bf16.gmra.mxu1 %vm448_vm3, %v8699_v20 }
  0xd3   : > { %7692 = vmatmul.mubr.msk.bf16.gmra.mxu0 %vm448_vm3, %v8796_v43  ;;  %7725 = vmatprep.mubr.msk.bf16.mxu1 %vm448_vm3, %v8712_v7 }
  0xd4   : > { %7731 = vmatprep.mubr.msk.bf16.mxu0 %vm448_vm3, %v8267_v45 }
  0xda   : > { %7726 = vmatmul.mubr.msk.bf16.gmra.mxu1 %vm448_vm3, %v8808_v61 }
  0xdb   : > { %v7529_v40 = vpop.f32.mrf.mxu0  ;;  %7732 = vmatmul.mubr.msk.bf16.vlgmr.msra.gmra.mxu0 %vm448_vm3, %v8288_v55  ;;  %7765 = vmatprep.mubr.msk.bf16.mxu1 %vm448_vm3, %v8311_v12 }
  0xdc   : > { %661 = vst.msk [vmem:[#allocation2 + $0x10] sm:$0xff] %vm448_vm3, %v7529_v40  ;;  %7798 = vmatpush3.bf16.msra.mxu0 %v2893_v30  ;;  %7735 = vmatprep.mubr.msk.bf16.mxu0 %vm448_vm3, %v8296_v60 }
  0xdd   : > { %v532_v45 = vpop.f32.mrf.mxu0 }
  0xde   : > { %659 = vst.msk [vmem:[#allocation2] sm:$0xff] %vm448_vm3, %v532_v45 }
  0xdf   : > { %v7530_v28 = vpop.f32.mrf.mxu0 }
  0xe0   : > { %662 = vst.msk [vmem:[#allocation2 + $0x18] sm:$0xff] %vm448_vm3, %v7530_v28 }
  0xe1   : > { %v535_v53 = vpop.f32.mrf.mxu0 }
  0xe2   : > { %660 = vst.msk [vmem:[#allocation2 + $0x8] sm:$0xff] %vm448_vm3, %v535_v53  ;;  %v7563_v39 = vpop.f32.mrf.mxu1  ;;  %7766 = vmatmul.mubr.msk.bf16.vlgmr.msra.gmra.mxu1 %vm448_vm3, %v8342_v32 }
  0xe3   : > { %v7533_v55 = vpop.f32.mrf.mxu0  ;;  %v1073_v12 = vld [vmem:[#allocation2 + $0x10] sm:$0xff]  ;;  %7736 = vmatmul.mubr.msk.bf16.gmra.mxu0 %vm448_vm3, %v8328_v22  ;;  %7769 = vmatprep.mubr.msk.bf16.mxu1 %vm448_vm3, %v8357_v57 }
  0xe4   : > { %665 = vst.msk [vmem:[#allocation2 + $0x30] sm:$0xff] %vm448_vm3, %v7533_v55  ;;  %v1105_v60 = vadd.f32 %v7563_v39, %v1073_v12  ;;  %v944_v54 = vpop.f32.mrf.mxu1  ;;  %7739 = vmatprep.mubr.msk.bf16.mxu0 %vm448_vm3, %v8354_v51 }
  0xe5   : > { %v548_v2 = vpop.f32.mrf.mxu0  ;;  %v1071_v18 = vld [vmem:[#allocation2] sm:$0xff] }
  0xe6   : > { %1137 = vst.msk [vmem:[#allocation2 + $0x10] sm:$0xff] %vm448_vm3, %v1105_v60  ;;  %663 = vst.msk [vmem:[#allocation2 + $0x20] sm:$0xff] %vm448_vm3, %v548_v2  ;;  %v1103_v32 = vadd.f32 %v1071_v18, %v944_v54  ;;  %v7564_v36 = vpop.f32.mrf.mxu1 }
  0xe7   : > { %v7534_v44 = vpop.f32.mrf.mxu0  ;;  %v1074_v22 = vld [vmem:[#allocation2 + $0x18] sm:$0xff] }
  0xe8   : > { %1135 = vst.msk [vmem:[#allocation2] sm:$0xff] %vm448_vm3, %v1103_v32  ;;  %666 = vst.msk [vmem:[#allocation2 + $0x38] sm:$0xff] %vm448_vm3, %v7534_v44  ;;  %v1106_v57 = vadd.f32 %v7564_v36, %v1074_v22  ;;  %v947_v56 = vpop.f32.mrf.mxu1 }
  0xe9   : > { %v551_v59 = vpop.f32.mrf.mxu0  ;;  %v1072_v1 = vld [vmem:[#allocation2 + $0x8] sm:$0xff] }
  0xea   : > { %1138 = vst.msk [vmem:[#allocation2 + $0x18] sm:$0xff] %vm448_vm3, %v1106_v57  ;;  %664 = vst.msk [vmem:[#allocation2 + $0x28] sm:$0xff] %vm448_vm3, %v551_v59  ;;  %v1104_v51 = vadd.f32 %v1072_v1, %v947_v56  ;;  %v7567_v29 = vpop.f32.mrf.mxu1  ;;  %7770 = vmatmul.mubr.msk.bf16.gmra.mxu1 %vm448_vm3, %v8367_v3 }
  0xeb   : > { %v7537_v10 = vpop.f32.mrf.mxu0  ;;  %v1077_v13 = vld [vmem:[#allocation2 + $0x30] sm:$0xff]  ;;  %7740 = vmatmul.mubr.msk.bf16.gmra.mxu0 %vm448_vm3, %v8379_v9  ;;  %7773 = vmatprep.mubr.msk.bf16.mxu1 %vm448_vm3, %v8397_v37 }
  0xec   : > { %1136 = vst.msk [vmem:[#allocation2 + $0x8] sm:$0xff] %vm448_vm3, %v1104_v51  ;;  %669 = vst.msk [vmem:[#allocation2 + $0x50] sm:$0xff] %vm448_vm3, %v7537_v10  ;;  %v1109_v0 = vadd.f32 %v7567_v29, %v1077_v13  ;;  %v960_v24 = vpop.f32.mrf.mxu1  ;;  %7743 = vmatprep.mubr.msk.bf16.mxu0 %vm448_vm3, %v8391_v25 }
  0xed   : > { %v564_v30 = vpop.f32.mrf.mxu0  ;;  %v1075_v40 = vld [vmem:[#allocation2 + $0x20] sm:$0xff] }
  0xee   : > { %1141 = vst.msk [vmem:[#allocation2 + $0x30] sm:$0xff] %vm448_vm3, %v1109_v0  ;;  %667 = vst.msk [vmem:[#allocation2 + $0x40] sm:$0xff] %vm448_vm3, %v564_v30  ;;  %v1107_v3 = vadd.f32 %v1075_v40, %v960_v24  ;;  %v7568_v9 = vpop.f32.mrf.mxu1 }
  0xef   : > { %v7538_v45 = vpop.f32.mrf.mxu0  ;;  %v1078_v28 = vld [vmem:[#allocation2 + $0x38] sm:$0xff] }
  0xf0   : > { %1139 = vst.msk [vmem:[#allocation2 + $0x20] sm:$0xff] %vm448_vm3, %v1107_v3  ;;  %670 = vst.msk [vmem:[#allocation2 + $0x58] sm:$0xff] %vm448_vm3, %v7538_v45  ;;  %v1110_v37 = vadd.f32 %v7568_v9, %v1078_v28  ;;  %v963_v53 = vpop.f32.mrf.mxu1 }
  0xf1   : > { %v567_v39 = vpop.f32.mrf.mxu0  ;;  %v1076_v55 = vld [vmem:[#allocation2 + $0x28] sm:$0xff] }
  0xf2   : > { %1142 = vst.msk [vmem:[#allocation2 + $0x38] sm:$0xff] %vm448_vm3, %v1110_v37  ;;  %668 = vst.msk [vmem:[#allocation2 + $0x48] sm:$0xff] %vm448_vm3, %v567_v39  ;;  %v1108_v25 = vadd.f32 %v1076_v55, %v963_v53  ;;  %v7571_v12 = vpop.f32.mrf.mxu1  ;;  %7774 = vmatmul.mubr.msk.bf16.gmra.mxu1 %vm448_vm3, %v8418_v58 }
  0xf3   : > { %v7541_v60 = vpop.f32.mrf.mxu0  ;;  %v1081_v54 = vld [vmem:[#allocation2 + $0x50] sm:$0xff]  ;;  %7744 = vmatmul.mubr.msk.bf16.gmra.mxu0 %vm448_vm3, %v8406_v42  ;;  %7777 = vmatprep.mubr.msk.bf16.mxu1 %vm448_vm3, %v8438_v26 }
  0xf4   : > { %1140 = vst.msk [vmem:[#allocation2 + $0x28] sm:$0xff] %vm448_vm3, %v1108_v25  ;;  %673 = vst.msk [vmem:[#allocation2 + $0x70] sm:$0xff] %vm448_vm3, %v7541_v60  ;;  %v1113_v2 = vadd.f32 %v7571_v12, %v1081_v54  ;;  %v976_v18 = vpop.f32.mrf.mxu1  ;;  %7747 = vmatprep.mubr.msk.bf16.mxu0 %vm448_vm3, %v8431_v8 }
  0xf5   : > { %v580_v32 = vpop.f32.mrf.mxu0  ;;  %v1079_v36 = vld [vmem:[#allocation2 + $0x40] sm:$0xff] }
  0xf6   : > { %1145 = vst.msk [vmem:[#allocation2 + $0x50] sm:$0xff] %vm448_vm3, %v1113_v2  ;;  %671 = vst.msk [vmem:[#allocation2 + $0x60] sm:$0xff] %vm448_vm3, %v580_v32  ;;  %v1111_v58 = vadd.f32 %v1079_v36, %v976_v18  ;;  %v7572_v42 = vpop.f32.mrf.mxu1 }
  0xf7   : > { %v7542_v44 = vpop.f32.mrf.mxu0  ;;  %v1082_v22 = vld [vmem:[#allocation2 + $0x58] sm:$0xff] }
  0xf8   : > { %1143 = vst.msk [vmem:[#allocation2 + $0x40] sm:$0xff] %vm448_vm3, %v1111_v58  ;;  %674 = vst.msk [vmem:[#allocation2 + $0x78] sm:$0xff] %vm448_vm3, %v7542_v44  ;;  %v1114_v26 = vadd.f32 %v7572_v42, %v1082_v22  ;;  %v979_v57 = vpop.f32.mrf.mxu1 }
  0xf9   : > { %v583_v56 = vpop.f32.mrf.mxu0  ;;  %v1080_v59 = vld [vmem:[#allocation2 + $0x48] sm:$0xff] }
  0xfa   : > { %1146 = vst.msk [vmem:[#allocation2 + $0x58] sm:$0xff] %vm448_vm3, %v1114_v26  ;;  %672 = vst.msk [vmem:[#allocation2 + $0x68] sm:$0xff] %vm448_vm3, %v583_v56  ;;  %v1112_v8 = vadd.f32 %v1080_v59, %v979_v57  ;;  %v7575_v1 = vpop.f32.mrf.mxu1  ;;  %7778 = vmatmul.mubr.msk.bf16.gmra.mxu1 %vm448_vm3, %v8461_v62 }
  0xfb   : > { %v7545_v51 = vpop.f32.mrf.mxu0  ;;  %v1085_v29 = vld [vmem:[#allocation2 + $0x70] sm:$0xff]  ;;  %7748 = vmatmul.mubr.msk.bf16.gmra.mxu0 %vm448_vm3, %v8452_v48  ;;  %7781 = vmatprep.mubr.msk.bf16.mxu1 %vm448_vm3, %v8477_v14 }
  0xfc   : > { %1144 = vst.msk [vmem:[#allocation2 + $0x48] sm:$0xff] %vm448_vm3, %v1112_v8  ;;  %677 = vst.msk [vmem:[#allocation2 + $0x90] sm:$0xff] %vm448_vm3, %v7545_v51  ;;  %v1117_v10 = vadd.f32 %v7575_v1, %v1085_v29  ;;  %v992_v13 = vpop.f32.mrf.mxu1  ;;  %7751 = vmatprep.mubr.msk.bf16.mxu0 %vm448_vm3, %v8474_v16 }
  0xfd   : > { %v596_v0 = vpop.f32.mrf.mxu0  ;;  %v1083_v24 = vld [vmem:[#allocation2 + $0x60] sm:$0xff] }
  0xfe   : > { %1149 = vst.msk [vmem:[#allocation2 + $0x70] sm:$0xff] %vm448_vm3, %v1117_v10  ;;  %675 = vst.msk [vmem:[#allocation2 + $0x80] sm:$0xff] %vm448_vm3, %v596_v0  ;;  %v1115_v62 = vadd.f32 %v1083_v24, %v992_v13  ;;  %v7576_v48 = vpop.f32.mrf.mxu1 }
  0xff   : > { %v7546_v30 = vpop.f32.mrf.mxu0  ;;  %v1086_v40 = vld [vmem:[#allocation2 + $0x78] sm:$0xff] }
 0x100   : > { %1147 = vst.msk [vmem:[#allocation2 + $0x60] sm:$0xff] %vm448_vm3, %v1115_v62  ;;  %678 = vst.msk [vmem:[#allocation2 + $0x98] sm:$0xff] %vm448_vm3, %v7546_v30  ;;  %v1118_v14 = vadd.f32 %v7576_v48, %v1086_v40  ;;  %v995_v3 = vpop.f32.mrf.mxu1 }
 0x101   : > { %v599_v9 = vpop.f32.mrf.mxu0  ;;  %v1084_v45 = vld [vmem:[#allocation2 + $0x68] sm:$0xff] }
 0x102   : > { %1150 = vst.msk [vmem:[#allocation2 + $0x78] sm:$0xff] %vm448_vm3, %v1118_v14  ;;  %676 = vst.msk [vmem:[#allocation2 + $0x88] sm:$0xff] %vm448_vm3, %v599_v9  ;;  %v1116_v16 = vadd.f32 %v1084_v45, %v995_v3  ;;  %v7579_v28 = vpop.f32.mrf.mxu1  ;;  %7782 = vmatmul.mubr.msk.bf16.gmra.mxu1 %vm448_vm3, %v8509_v15 }
 0x103   : > { %v7549_v37 = vpop.f32.mrf.mxu0  ;;  %v1089_v53 = vld [vmem:[#allocation2 + $0x90] sm:$0xff]  ;;  %7752 = vmatmul.mubr.msk.bf16.gmra.mxu0 %vm448_vm3, %v8487_v35  ;;  %7785 = vmatprep.mubr.msk.bf16.mxu1 %vm448_vm3, %v8514_v5 }
 0x104   : > { %1148 = vst.msk [vmem:[#allocation2 + $0x68] sm:$0xff] %vm448_vm3, %v1116_v16  ;;  %681 = vst.msk [vmem:[#allocation2 + $0xb0] sm:$0xff] %vm448_vm3, %v7549_v37  ;;  %v1121_v39 = vadd.f32 %v7579_v28, %v1089_v53  ;;  %v1008_v55 = vpop.f32.mrf.mxu1  ;;  %7755 = vmatprep.mubr.msk.bf16.mxu0 %vm448_vm3, %v8498_v52 }
 0x105   : > { %v612_v25 = vpop.f32.mrf.mxu0  ;;  %v1087_v12 = vld [vmem:[#allocation2 + $0x80] sm:$0xff] }
 0x106   : > { %1153 = vst.msk [vmem:[#allocation2 + $0x90] sm:$0xff] %vm448_vm3, %v1121_v39  ;;  %679 = vst.msk [vmem:[#allocation2 + $0xa0] sm:$0xff] %vm448_vm3, %v612_v25  ;;  %v1119_v15 = vadd.f32 %v1087_v12, %v1008_v55  ;;  %v7580_v35 = vpop.f32.mrf.mxu1  ;;  %v1455_v39 = vld [vmem:[#allocation2 + $0x10] sm:$0xff] }
 0x107   : > { %v7550_v60 = vpop.f32.mrf.mxu0  ;;  %v1090_v54 = vld [vmem:[#allocation2 + $0x98] sm:$0xff] }
 0x108   : > { %1151 = vst.msk [vmem:[#allocation2 + $0x80] sm:$0xff] %vm448_vm3, %v1119_v15  ;;  %682 = vst.msk [vmem:[#allocation2 + $0xb8] sm:$0xff] %vm448_vm3, %v7550_v60  ;;  %v1122_v5 = vadd.f32 %v7580_v35, %v1090_v54  ;;  %v1011_v2 = vpop.f32.mrf.mxu1  ;;  %v1453_v60 = vld [vmem:[#allocation2] sm:$0xff] }
 0x109   : > { %v615_v18 = vpop.f32.mrf.mxu0  ;;  %v1088_v32 = vld [vmem:[#allocation2 + $0x88] sm:$0xff] }
 0x10a   : > { %1154 = vst.msk [vmem:[#allocation2 + $0x98] sm:$0xff] %vm448_vm3, %v1122_v5  ;;  %680 = vst.msk [vmem:[#allocation2 + $0xa8] sm:$0xff] %vm448_vm3, %v615_v18  ;;  %v1120_v52 = vadd.f32 %v1088_v32, %v1011_v2  ;;  %v7583_v36 = vpop.f32.mrf.mxu1  ;;  %7786 = vmatmul.mubr.msk.bf16.gmra.mxu1 %vm448_vm3, %v8542_v63  ;;  %v1456_v18 = vld [vmem:[#allocation2 + $0x18] sm:$0xff] }
 0x10b   : > { %v7553_v58 = vpop.f32.mrf.mxu0  ;;  %v1093_v42 = vld [vmem:[#allocation2 + $0xb0] sm:$0xff]  ;;  %7756 = vmatmul.mubr.msk.bf16.gmra.mxu0 %vm448_vm3, %v8523_v31  ;;  %7789 = vmatprep.mubr.msk.bf16.mxu1 %vm448_vm3, %v8550_v4 }
 0x10c   : > { %1152 = vst.msk [vmem:[#allocation2 + $0x88] sm:$0xff] %vm448_vm3, %v1120_v52  ;;  %685 = vst.msk [vmem:[#allocation2 + $0xd0] sm:$0xff] %vm448_vm3, %v7553_v58  ;;  %v1125_v44 = vadd.f32 %v7583_v36, %v1093_v42  ;;  %v1024_v22 = vpop.f32.mrf.mxu1  ;;  %7759 = vmatprep.mubr.msk.bf16.mxu0 %vm448_vm3, %v8724_v50  ;;  %v1454_v42 = vld [vmem:[#allocation2 + $0x8] sm:$0xff] }
 0x10d   : > { %v628_v26 = vpop.f32.mrf.mxu0  ;;  %v1091_v57 = vld [vmem:[#allocation2 + $0xa0] sm:$0xff] }
 0x10e   : > { %1157 = vst.msk [vmem:[#allocation2 + $0xb0] sm:$0xff] %vm448_vm3, %v1125_v44  ;;  %683 = vst.msk [vmem:[#allocation2 + $0xc0] sm:$0xff] %vm448_vm3, %v628_v26  ;;  %v1123_v63 = vadd.f32 %v1091_v57, %v1024_v22  ;;  %v7584_v56 = vpop.f32.mrf.mxu1 }
 0x10f   : > { %v7554_v59 = vpop.f32.mrf.mxu0  ;;  %v1094_v8 = vld [vmem:[#allocation2 + $0xb8] sm:$0xff] }
 0x110   : > { %1155 = vst.msk [vmem:[#allocation2 + $0xa0] sm:$0xff] %vm448_vm3, %v1123_v63  ;;  %686 = vst.msk [vmem:[#allocation2 + $0xd8] sm:$0xff] %vm448_vm3, %v7554_v59  ;;  %v1126_v4 = vadd.f32 %v7584_v56, %v1094_v8  ;;  %v1027_v1 = vpop.f32.mrf.mxu1  ;;  %v1459_v63 = vld [vmem:[#allocation2 + $0x30] sm:$0xff] }
 0x111   : > { %v631_v51 = vpop.f32.mrf.mxu0  ;;  %v1092_v29 = vld [vmem:[#allocation2 + $0xa8] sm:$0xff] }
 0x112   : > { %1158 = vst.msk [vmem:[#allocation2 + $0xb8] sm:$0xff] %vm448_vm3, %v1126_v4  ;;  %684 = vst.msk [vmem:[#allocation2 + $0xc8] sm:$0xff] %vm448_vm3, %v631_v51  ;;  %v1124_v50 = vadd.f32 %v1092_v29, %v1027_v1  ;;  %v7587_v10 = vpop.f32.mrf.mxu1  ;;  %7790 = vmatmul.mubr.msk.bf16.gmra.mxu1 %vm448_vm3, %v8567_v34  ;;  %v1457_v4 = vld [vmem:[#allocation2 + $0x20] sm:$0xff] }
 0x113   : > { %v7557_v13 = vpop.f32.mrf.mxu0  ;;  %v1097_v0 = vld [vmem:[#allocation2 + $0xd0] sm:$0xff]  ;;  %7760 = vmatmul.mubr.msk.bf16.gmra.mxu0 %vm448_vm3, %v8523_v31  ;;  %7793 = vmatprep.mubr.msk.bf16.mxu1 %vm448_vm3, %v8796_v43 }
 0x114   : > { %1156 = vst.msk [vmem:[#allocation2 + $0xa8] sm:$0xff] %vm448_vm3, %v1124_v50  ;;  %689 = vst.msk [vmem:[#allocation2 + $0xf0] sm:$0xff] %vm448_vm3, %v7557_v13  ;;  %v1129_v24 = vadd.f32 %v7587_v10, %v1097_v0  ;;  %v1040_v62 = vpop.f32.mrf.mxu1  ;;  %7799 = vmatprep.mubr.msk.bf16.mxu0 %vm448_vm3, %v8553_v17  ;;  %v1460_v13 = vld [vmem:[#allocation2 + $0x38] sm:$0xff] }
 0x115   : > { %v644_v48 = vpop.f32.mrf.mxu0  ;;  %v1095_v30 = vld [vmem:[#allocation2 + $0xc0] sm:$0xff] }
 0x116   : > { %1161 = vst.msk [vmem:[#allocation2 + $0xd0] sm:$0xff] %vm448_vm3, %v1129_v24  ;;  %687 = vst.msk [vmem:[#allocation2 + $0xe0] sm:$0xff] %vm448_vm3, %v644_v48  ;;  %v1127_v40 = vadd.f32 %v1095_v30, %v1040_v62  ;;  %v7588_v31 = vpop.f32.mrf.mxu1 }
 0x117   : > { %v7558_v14 = vpop.f32.mrf.mxu0  ;;  %v1098_v3 = vld [vmem:[#allocation2 + $0xd8] sm:$0xff] }
 0x118   : > { %1159 = vst.msk [vmem:[#allocation2 + $0xc0] sm:$0xff] %vm448_vm3, %v1127_v40  ;;  %690 = vst.msk [vmem:[#allocation2 + $0xf8] sm:$0xff] %vm448_vm3, %v7558_v14  ;;  %v1130_v43 = vadd.f32 %v7588_v31, %v1098_v3  ;;  %v1043_v9 = vpop.f32.mrf.mxu1 }
 0x119   : > { %v647_v45 = vpop.f32.mrf.mxu0  ;;  %v1096_v16 = vld [vmem:[#allocation2 + $0xc8] sm:$0xff] }
 0x11a   : > { %1162 = vst.msk [vmem:[#allocation2 + $0xd8] sm:$0xff] %vm448_vm3, %v1130_v43  ;;  %688 = vst.msk [vmem:[#allocation2 + $0xe8] sm:$0xff] %vm448_vm3, %v647_v45  ;;  %v1128_v17 = vadd.f32 %v1096_v16, %v1043_v9  ;;  %v7591_v28 = vpop.f32.mrf.mxu1  ;;  %7794 = vmatmul.mubr.msk.bf16.gmra.mxu1 %vm448_vm3, %v8567_v34  ;;  %v1463_v43 = vld [vmem:[#allocation2 + $0x50] sm:$0xff] }
 0x11b   : > { %v1101_v37 = vld [vmem:[#allocation2 + $0xf0] sm:$0xff]  ;;  %v7597_v53 = vpop.f32.mrf.mxu0  ;;  %7800 = vmatmul.mubr.msk.bf16.vlgmr.msra.gmra.mxu0 %vm448_vm3, %v8599_v49 }
 0x11c   : > { %1160 = vst.msk [vmem:[#allocation2 + $0xc8] sm:$0xff] %vm448_vm3, %v1128_v17  ;;  %v1133_v55 = vadd.f32 %v7591_v28, %v1101_v37  ;;  %v1487_v25 = vadd.f32 %v7597_v53, %v1455_v39  ;;  %v1056_v12 = vpop.f32.mrf.mxu1  ;;  %7803 = vmatprep.mubr.msk.bf16.mxu0 %vm448_vm3, %v8602_v47  ;;  %v1461_v37 = vld [vmem:[#allocation2 + $0x40] sm:$0xff] }
 0x11d   : > { %v1099_v15 = vld [vmem:[#allocation2 + $0xe0] sm:$0xff]  ;;  %v1326_v35 = vpop.f32.mrf.mxu0 }
 0x11e   : > { %1165 = vst.msk [vmem:[#allocation2 + $0xf0] sm:$0xff] %vm448_vm3, %v1133_v55  ;;  %1519 = vst.msk [vmem:[#allocation2 + $0x10] sm:$0xff] %vm448_vm3, %v1487_v25  ;;  %v1131_v34 = vadd.f32 %v1099_v15, %v1056_v12  ;;  %v1485_v54 = vadd.f32 %v1453_v60, %v1326_v35  ;;  %v7592_v5 = vpop.f32.mrf.mxu1  ;;  %v1464_v12 = vld [vmem:[#allocation2 + $0x58] sm:$0xff] }
 0x11f   : > { %v1102_v2 = vld [vmem:[#allocation2 + $0xf8] sm:$0xff]  ;;  %v7598_v49 = vpop.f32.mrf.mxu0 }
 0x120   : > { %1163 = vst.msk [vmem:[#allocation2 + $0xe0] sm:$0xff] %vm448_vm3, %v1131_v34  ;;  %1517 = vst.msk [vmem:[#allocation2] sm:$0xff] %vm448_vm3, %v1485_v54  ;;  %v1134_v32 = vadd.f32 %v7592_v5, %v1102_v2  ;;  %v1488_v52 = vadd.f32 %v7598_v49, %v1456_v18  ;;  %v1059_v47 = vpop.f32.mrf.mxu1  ;;  %v1462_v54 = vld [vmem:[#allocation2 + $0x48] sm:$0xff] }
 0x121   : > { %v1100_v36 = vld [vmem:[#allocation2 + $0xe8] sm:$0xff]  ;;  %v1329_v58 = vpop.f32.mrf.mxu0 }
 0x122   : > { %1166 = vst.msk [vmem:[#allocation2 + $0xf8] sm:$0xff] %vm448_vm3, %v1134_v32  ;;  %1520 = vst.msk [vmem:[#allocation2 + $0x18] sm:$0xff] %vm448_vm3, %v1488_v52  ;;  %v1132_v44 = vadd.f32 %v1100_v36, %v1059_v47  ;;  %v1486_v22 = vadd.f32 %v1454_v42, %v1329_v58  ;;  %v7631_v26 = vpop.f32.mrf.mxu1  ;;  %v1467_v52 = vld [vmem:[#allocation2 + $0x70] sm:$0xff] }
 0x123   : > { %v7601_v57 = vpop.f32.mrf.mxu0  ;;  %7804 = vmatmul.mubr.msk.bf16.gmra.mxu0 %vm448_vm3, %v8622_v11 }
 0x124   : > { %1164 = vst.msk [vmem:[#allocation2 + $0xe8] sm:$0xff] %vm448_vm3, %v1132_v44  ;;  %1518 = vst.msk [vmem:[#allocation2 + $0x8] sm:$0xff] %vm448_vm3, %v1486_v22  ;;  %v1491_v56 = vadd.f32 %v7601_v57, %v1459_v63  ;;  %v1594_v59 = vpop.f32.mrf.mxu1  ;;  %7807 = vmatprep.mubr.msk.bf16.mxu0 %vm448_vm3, %v8625_v38  ;;  %v1458_v38 = vld [vmem:[#allocation2 + $0x28] sm:$0xff]  ;;  %v1465_v22 = vld [vmem:[#allocation2 + $0x60] sm:$0xff] }
 0x125   : > { %v1342_v8 = vpop.f32.mrf.mxu0  ;;  %v1723_v1 = vld [vmem:[#allocation2 + $0x10] sm:$0xff] }
 0x126   : > { %1523 = vst.msk [vmem:[#allocation2 + $0x30] sm:$0xff] %vm448_vm3, %v1491_v56  ;;  %v1489_v51 = vadd.f32 %v1457_v4, %v1342_v8  ;;  %v1755_v29 = vadd.f32 %v7631_v26, %v1723_v1  ;;  %v7632_v50 = vpop.f32.mrf.mxu1 }
 0x127   : > { %v7602_v10 = vpop.f32.mrf.mxu0  ;;  %v1721_v11 = vld [vmem:[#allocation2] sm:$0xff] }
 0x128   : > { %1521 = vst.msk [vmem:[#allocation2 + $0x20] sm:$0xff] %vm448_vm3, %v1489_v51  ;;  %1787 = vst.msk [vmem:[#allocation2 + $0x10] sm:$0xff] %vm448_vm3, %v1755_v29  ;;  %v1492_v0 = vadd.f32 %v7602_v10, %v1460_v13  ;;  %v1753_v24 = vadd.f32 %v1721_v11, %v1594_v59  ;;  %v1597_v62 = vpop.f32.mrf.mxu1  ;;  %v1468_v59 = vld [vmem:[#allocation2 + $0x78] sm:$0xff]  ;;  %v1466_v29 = vld [vmem:[#allocation2 + $0x68] sm:$0xff] }
 0x129   : > { %v1345_v48 = vpop.f32.mrf.mxu0  ;;  %v1724_v30 = vld [vmem:[#allocation2 + $0x18] sm:$0xff] }
 0x12a   : > { %1524 = vst.msk [vmem:[#allocation2 + $0x38] sm:$0xff] %vm448_vm3, %v1492_v0  ;;  %1785 = vst.msk [vmem:[#allocation2] sm:$0xff] %vm448_vm3, %v1753_v24  ;;  %v1490_v40 = vadd.f32 %v1458_v38, %v1345_v48  ;;  %v1756_v31 = vadd.f32 %v7632_v50, %v1724_v30  ;;  %v7635_v14 = vpop.f32.mrf.mxu1  ;;  %v1471_v24 = vld [vmem:[#allocation2 + $0x90] sm:$0xff] }
 0x12b   : > { %v7605_v3 = vpop.f32.mrf.mxu0  ;;  %v1722_v9 = vld [vmem:[#allocation2 + $0x8] sm:$0xff]  ;;  %7808 = vmatmul.mubr.msk.bf16.gmra.mxu0 %vm448_vm3, %v8640_v23 }
 0x12c   : > { %1522 = vst.msk [vmem:[#allocation2 + $0x28] sm:$0xff] %vm448_vm3, %v1490_v40  ;;  %1788 = vst.msk [vmem:[#allocation2 + $0x18] sm:$0xff] %vm448_vm3, %v1756_v31  ;;  %v1495_v45 = vadd.f32 %v7605_v3, %v1463_v43  ;;  %v1754_v16 = vadd.f32 %v1722_v9, %v1597_v62  ;;  %v1610_v17 = vpop.f32.mrf.mxu1  ;;  %7811 = vmatprep.mubr.msk.bf16.mxu0 %vm448_vm3, %v8643_v27  ;;  %v1469_v31 = vld [vmem:[#allocation2 + $0x80] sm:$0xff] }
 0x12d   : > { %v1358_v28 = vpop.f32.mrf.mxu0  ;;  %v1727_v53 = vld [vmem:[#allocation2 + $0x30] sm:$0xff] }
 0x12e   : > { %1527 = vst.msk [vmem:[#allocation2 + $0x50] sm:$0xff] %vm448_vm3, %v1495_v45  ;;  %1786 = vst.msk [vmem:[#allocation2 + $0x8] sm:$0xff] %vm448_vm3, %v1754_v16  ;;  %v1493_v39 = vadd.f32 %v1461_v37, %v1358_v28  ;;  %v1759_v55 = vadd.f32 %v7635_v14, %v1727_v53  ;;  %v7636_v23 = vpop.f32.mrf.mxu1  ;;  %v1472_v45 = vld [vmem:[#allocation2 + $0x98] sm:$0xff]  ;;  %v1470_v53 = vld [vmem:[#allocation2 + $0x88] sm:$0xff] }
 0x12f   : > { %v7606_v25 = vpop.f32.mrf.mxu0  ;;  %v1725_v15 = vld [vmem:[#allocation2 + $0x20] sm:$0xff] }
 0x130   : > { %1525 = vst.msk [vmem:[#allocation2 + $0x40] sm:$0xff] %vm448_vm3, %v1493_v39  ;;  %1791 = vst.msk [vmem:[#allocation2 + $0x30] sm:$0xff] %vm448_vm3, %v1759_v55  ;;  %v1496_v35 = vadd.f32 %v7606_v25, %v1464_v12  ;;  %v1757_v60 = vadd.f32 %v1725_v15, %v1610_v17  ;;  %v1613_v27 = vpop.f32.mrf.mxu1  ;;  %v1475_v15 = vld [vmem:[#allocation2 + $0xb0] sm:$0xff] }
 0x131   : > { %v1361_v34 = vpop.f32.mrf.mxu0  ;;  %v1728_v5 = vld [vmem:[#allocation2 + $0x38] sm:$0xff] }
 0x132   : > { %1528 = vst.msk [vmem:[#allocation2 + $0x58] sm:$0xff] %vm448_vm3, %v1496_v35  ;;  %1789 = vst.msk [vmem:[#allocation2 + $0x20] sm:$0xff] %vm448_vm3, %v1757_v60  ;;  %v1494_v2 = vadd.f32 %v1462_v54, %v1361_v34  ;;  %v1760_v49 = vadd.f32 %v7636_v23, %v1728_v5  ;;  %v7639_v18 = vpop.f32.mrf.mxu1  ;;  %v1473_v5 = vld [vmem:[#allocation2 + $0xa0] sm:$0xff] }
 0x133   : > { %v7609_v32 = vpop.f32.mrf.mxu0  ;;  %v1726_v47 = vld [vmem:[#allocation2 + $0x28] sm:$0xff]  ;;  %7812 = vmatmul.mubr.msk.bf16.gmra.mxu0 %vm448_vm3, %v8658_v41 }
 0x134   : > { %1526 = vst.msk [vmem:[#allocation2 + $0x48] sm:$0xff] %vm448_vm3, %v1494_v2  ;;  %1792 = vst.msk [vmem:[#allocation2 + $0x38] sm:$0xff] %vm448_vm3, %v1760_v49  ;;  %v1499_v36 = vadd.f32 %v7609_v32, %v1467_v52  ;;  %v1758_v58 = vadd.f32 %v1726_v47, %v1613_v27  ;;  %v1626_v42 = vpop.f32.mrf.mxu1  ;;  %7815 = vmatprep.mubr.msk.bf16.mxu0 %vm448_vm3, %v8661_v46  ;;  %v1476_v52 = vld [vmem:[#allocation2 + $0xb8] sm:$0xff] }
 0x135   : > { %v1374_v44 = vpop.f32.mrf.mxu0  ;;  %v1731_v26 = vld [vmem:[#allocation2 + $0x50] sm:$0xff] }
 0x136   : > { %1531 = vst.msk [vmem:[#allocation2 + $0x70] sm:$0xff] %vm448_vm3, %v1499_v36  ;;  %1790 = vst.msk [vmem:[#allocation2 + $0x28] sm:$0xff] %vm448_vm3, %v1758_v58  ;;  %v1497_v57 = vadd.f32 %v1465_v22, %v1374_v44  ;;  %v1763_v63 = vadd.f32 %v7639_v18, %v1731_v26  ;;  %v7640_v41 = vpop.f32.mrf.mxu1  ;;  %v1474_v44 = vld [vmem:[#allocation2 + $0xa8] sm:$0xff] }
 0x137   : > { %v7610_v56 = vpop.f32.mrf.mxu0  ;;  %v1729_v8 = vld [vmem:[#allocation2 + $0x40] sm:$0xff] }
 0x138   : > { %1529 = vst.msk [vmem:[#allocation2 + $0x60] sm:$0xff] %vm448_vm3, %v1497_v57  ;;  %1795 = vst.msk [vmem:[#allocation2 + $0x50] sm:$0xff] %vm448_vm3, %v1763_v63  ;;  %v1500_v4 = vadd.f32 %v7610_v56, %v1468_v59  ;;  %v1761_v1 = vadd.f32 %v1729_v8, %v1626_v42  ;;  %v1629_v46 = vpop.f32.mrf.mxu1  ;;  %v1479_v56 = vld [vmem:[#allocation2 + $0xd0] sm:$0xff] }
 0x139   : > { %v1377_v51 = vpop.f32.mrf.mxu0  ;;  %v1732_v50 = vld [vmem:[#allocation2 + $0x58] sm:$0xff] }
 0x13a   : > { %1532 = vst.msk [vmem:[#allocation2 + $0x78] sm:$0xff] %vm448_vm3, %v1500_v4  ;;  %1793 = vst.msk [vmem:[#allocation2 + $0x40] sm:$0xff] %vm448_vm3, %v1761_v1  ;;  %v1498_v10 = vadd.f32 %v1466_v29, %v1377_v51  ;;  %v1764_v13 = vadd.f32 %v7640_v41, %v1732_v50  ;;  %v7643_v11 = vpop.f32.mrf.mxu1  ;;  %v1477_v51 = vld [vmem:[#allocation2 + $0xc0] sm:$0xff] }
 0x13b   : > { %v7613_v0 = vpop.f32.mrf.mxu0  ;;  %v1730_v62 = vld [vmem:[#allocation2 + $0x48] sm:$0xff]  ;;  %7816 = vmatmul.mubr.msk.bf16.gmra.mxu0 %vm448_vm3, %v8676_v21 }
 0x13c   : > { %1530 = vst.msk [vmem:[#allocation2 + $0x68] sm:$0xff] %vm448_vm3, %v1498_v10  ;;  %1796 = vst.msk [vmem:[#allocation2 + $0x58] sm:$0xff] %vm448_vm3, %v1764_v13  ;;  %v1503_v48 = vadd.f32 %v7613_v0, %v1471_v24  ;;  %v1762_v38 = vadd.f32 %v1730_v62, %v1629_v46  ;;  %v1642_v30 = vpop.f32.mrf.mxu1  ;;  %7819 = vmatprep.mubr.msk.bf16.mxu0 %vm448_vm3, %v8679_v6  ;;  %v1480_v0 = vld [vmem:[#allocation2 + $0xd8] sm:$0xff] }
 0x13d   : > { %v1390_v40 = vpop.f32.mrf.mxu0  ;;  %v1735_v14 = vld [vmem:[#allocation2 + $0x70] sm:$0xff] }
 0x13e   : > { %1535 = vst.msk [vmem:[#allocation2 + $0x90] sm:$0xff] %vm448_vm3, %v1503_v48  ;;  %1794 = vst.msk [vmem:[#allocation2 + $0x48] sm:$0xff] %vm448_vm3, %v1762_v38  ;;  %v1501_v3 = vadd.f32 %v1469_v31, %v1390_v40  ;;  %v1767_v43 = vadd.f32 %v7643_v11, %v1735_v14  ;;  %v7644_v21 = vpop.f32.mrf.mxu1 }
 0x13f   : > { %v7614_v9 = vpop.f32.mrf.mxu0  ;;  %v1733_v16 = vld [vmem:[#allocation2 + $0x60] sm:$0xff] }
 0x140   : > { %1533 = vst.msk [vmem:[#allocation2 + $0x80] sm:$0xff] %vm448_vm3, %v1501_v3  ;;  %1799 = vst.msk [vmem:[#allocation2 + $0x70] sm:$0xff] %vm448_vm3, %v1767_v43  ;;  %v1504_v17 = vadd.f32 %v7614_v9, %v1472_v45  ;;  %v1765_v28 = vadd.f32 %v1733_v16, %v1642_v30  ;;  %v1645_v6 = vpop.f32.mrf.mxu1  ;;  %v1478_v30 = vld [vmem:[#allocation2 + $0xc8] sm:$0xff] }
 0x141   : > { %v1393_v37 = vpop.f32.mrf.mxu0  ;;  %v1736_v39 = vld [vmem:[#allocation2 + $0x78] sm:$0xff] }
 0x142   : > { %1536 = vst.msk [vmem:[#allocation2 + $0x98] sm:$0xff] %vm448_vm3, %v1504_v17  ;;  %1797 = vst.msk [vmem:[#allocation2 + $0x60] sm:$0xff] %vm448_vm3, %v1765_v28  ;;  %v1502_v55 = vadd.f32 %v1470_v53, %v1393_v37  ;;  %v1768_v23 = vadd.f32 %v7644_v21, %v1736_v39  ;;  %v7647_v25 = vpop.f32.mrf.mxu1  ;;  %v1483_v21 = vld [vmem:[#allocation2 + $0xf0] sm:$0xff] }
 0x143   : > { %v7617_v12 = vpop.f32.mrf.mxu0  ;;  %v1734_v35 = vld [vmem:[#allocation2 + $0x68] sm:$0xff]  ;;  %7820 = vmatmul.mubr.msk.bf16.gmra.mxu0 %vm448_vm3, %v8696_v19 }
 0x144   : > { %1534 = vst.msk [vmem:[#allocation2 + $0x88] sm:$0xff] %vm448_vm3, %v1502_v55  ;;  %1800 = vst.msk [vmem:[#allocation2 + $0x78] sm:$0xff] %vm448_vm3, %v1768_v23  ;;  %v1507_v60 = vadd.f32 %v7617_v12, %v1475_v15  ;;  %v1766_v27 = vadd.f32 %v1734_v35, %v1645_v6  ;;  %v1658_v34 = vpop.f32.mrf.mxu1  ;;  %7823 = vmatprep.mubr.msk.bf16.mxu0 %vm448_vm3, %v8699_v20  ;;  %v1481_v6 = vld [vmem:[#allocation2 + $0xe0] sm:$0xff] }
 0x145   : > { %v1406_v54 = vpop.f32.mrf.mxu0  ;;  %v1739_v2 = vld [vmem:[#allocation2 + $0x90] sm:$0xff] }
 0x146   : > { %1539 = vst.msk [vmem:[#allocation2 + $0xb0] sm:$0xff] %vm448_vm3, %v1507_v60  ;;  %1798 = vst.msk [vmem:[#allocation2 + $0x68] sm:$0xff] %vm448_vm3, %v1766_v27  ;;  %v1505_v49 = vadd.f32 %v1473_v5, %v1406_v54  ;;  %v1771_v18 = vadd.f32 %v7647_v25, %v1739_v2  ;;  %v7648_v19 = vpop.f32.mrf.mxu1  ;;  %v1484_v25 = vld [vmem:[#allocation2 + $0xf8] sm:$0xff]  ;;  %v1482_v27 = vld [vmem:[#allocation2 + $0xe8] sm:$0xff] }
 0x147   : > { %v7618_v32 = vpop.f32.mrf.mxu0  ;;  %v1737_v47 = vld [vmem:[#allocation2 + $0x80] sm:$0xff] }
 0x148   : > { %1537 = vst.msk [vmem:[#allocation2 + $0xa0] sm:$0xff] %vm448_vm3, %v1505_v49  ;;  %1803 = vst.msk [vmem:[#allocation2 + $0x90] sm:$0xff] %vm448_vm3, %v1771_v18  ;;  %v1508_v36 = vadd.f32 %v7618_v32, %v1476_v52  ;;  %v1769_v58 = vadd.f32 %v1737_v47, %v1658_v34  ;;  %v1661_v20 = vpop.f32.mrf.mxu1 }
 0x149   : > { %v1409_v42 = vpop.f32.mrf.mxu0  ;;  %v1740_v22 = vld [vmem:[#allocation2 + $0x98] sm:$0xff] }
 0x14a   : > { %1540 = vst.msk [vmem:[#allocation2 + $0xb8] sm:$0xff] %vm448_vm3, %v1508_v36  ;;  %1801 = vst.msk [vmem:[#allocation2 + $0x80] sm:$0xff] %vm448_vm3, %v1769_v58  ;;  %v1506_v26 = vadd.f32 %v1474_v44, %v1409_v42  ;;  %v1772_v57 = vadd.f32 %v7648_v19, %v1740_v22  ;;  %v7651_v63 = vpop.f32.mrf.mxu1  ;;  %v1998_v19 = vld [vmem:[#allocation2 + $0x10] sm:$0xff] }
 0x14b   : > { %v7621_v41 = vpop.f32.mrf.mxu0  ;;  %v1738_v59 = vld [vmem:[#allocation2 + $0x88] sm:$0xff]  ;;  %7824 = vmatmul.mubr.msk.bf16.gmra.mxu0 %vm448_vm3, %v8712_v7 }
 0x14c   : > { %1538 = vst.msk [vmem:[#allocation2 + $0xa8] sm:$0xff] %vm448_vm3, %v1506_v26  ;;  %1804 = vst.msk [vmem:[#allocation2 + $0x98] sm:$0xff] %vm448_vm3, %v1772_v57  ;;  %v1511_v8 = vadd.f32 %v7621_v41, %v1479_v56  ;;  %v1770_v4 = vadd.f32 %v1738_v59, %v1661_v20  ;;  %v1674_v1 = vpop.f32.mrf.mxu1  ;;  %7827 = vmatprep.mubr.msk.bf16.mxu0 %vm448_vm3, %v8808_v61  ;;  %v1996_v20 = vld [vmem:[#allocation2] sm:$0xff] }
 0x14d   : > { %v1422_v46 = vpop.f32.mrf.mxu0  ;;  %v1743_v29 = vld [vmem:[#allocation2 + $0xb0] sm:$0xff] }
 0x14e   : > { %1543 = vst.msk [vmem:[#allocation2 + $0xd0] sm:$0xff] %vm448_vm3, %v1511_v8  ;;  %1802 = vst.msk [vmem:[#allocation2 + $0x88] sm:$0xff] %vm448_vm3, %v1770_v4  ;;  %v1509_v50 = vadd.f32 %v1477_v51, %v1422_v46  ;;  %v1775_v10 = vadd.f32 %v7651_v63, %v1743_v29  ;;  %v7652_v13 = vpop.f32.mrf.mxu1  ;;  %v1999_v63 = vld [vmem:[#allocation2 + $0x18] sm:$0xff] }
 0x14f   : > { %v7622_v11 = vpop.f32.mrf.mxu0  ;;  %v1741_v24 = vld [vmem:[#allocation2 + $0xa0] sm:$0xff] }
 0x150   : > { %1541 = vst.msk [vmem:[#allocation2 + $0xc0] sm:$0xff] %vm448_vm3, %v1509_v50  ;;  %1807 = vst.msk [vmem:[#allocation2 + $0xb0] sm:$0xff] %vm448_vm3, %v1775_v10  ;;  %v1512_v62 = vadd.f32 %v7622_v11, %v1480_v0  ;;  %v1773_v48 = vadd.f32 %v1741_v24, %v1674_v1  ;;  %v1677_v61 = vpop.f32.mrf.mxu1  ;;  %v1997_v1 = vld [vmem:[#allocation2 + $0x8] sm:$0xff] }
 0x151   : > { %v1425_v38 = vpop.f32.mrf.mxu0  ;;  %v1744_v40 = vld [vmem:[#allocation2 + $0xb8] sm:$0xff] }
 0x152   : > { %1544 = vst.msk [vmem:[#allocation2 + $0xd8] sm:$0xff] %vm448_vm3, %v1512_v62  ;;  %1805 = vst.msk [vmem:[#allocation2 + $0xa0] sm:$0xff] %vm448_vm3, %v1773_v48  ;;  %v1510_v31 = vadd.f32 %v1478_v30, %v1425_v38  ;;  %v1776_v14 = vadd.f32 %v7652_v13, %v1744_v40  ;;  %v7655_v3 = vpop.f32.mrf.mxu1  ;;  %v2002_v13 = vld [vmem:[#allocation2 + $0x30] sm:$0xff]  ;;  %v2000_v48 = vld [vmem:[#allocation2 + $0x20] sm:$0xff] }
 0x153   : > { %v7625_v43 = vpop.f32.mrf.mxu0  ;;  %v1742_v9 = vld [vmem:[#allocation2 + $0xa8] sm:$0xff]  ;;  %7828 = vmatmul.mubr.msk.bf16.gmra.mxu0 %vm448_vm3, %v8712_v7 }
 0x154   : > { %1542 = vst.msk [vmem:[#allocation2 + $0xc8] sm:$0xff] %vm448_vm3, %v1510_v31  ;;  %1808 = vst.msk [vmem:[#allocation2 + $0xb8] sm:$0xff] %vm448_vm3, %v1776_v14  ;;  %v1515_v45 = vadd.f32 %v7625_v43, %v1483_v21  ;;  %v1774_v16 = vadd.f32 %v1742_v9, %v1677_v61  ;;  %v1690_v17 = vpop.f32.mrf.mxu1  ;;  %v2003_v14 = vld [vmem:[#allocation2 + $0x38] sm:$0xff] }
 0x155   : > { %v1438_v28 = vpop.f32.mrf.mxu0  ;;  %v1747_v37 = vld [vmem:[#allocation2 + $0xd0] sm:$0xff] }
 0x156   : > { %1547 = vst.msk [vmem:[#allocation2 + $0xf0] sm:$0xff] %vm448_vm3, %v1515_v45  ;;  %1806 = vst.msk [vmem:[#allocation2 + $0xa8] sm:$0xff] %vm448_vm3, %v1774_v16  ;;  %v1513_v53 = vadd.f32 %v1481_v6, %v1438_v28  ;;  %v1779_v39 = vadd.f32 %v7655_v3, %v1747_v37  ;;  %v7656_v55 = vpop.f32.mrf.mxu1  ;;  %v2001_v16 = vld [vmem:[#allocation2 + $0x28] sm:$0xff] }
 0x157   : > { %v7626_v23 = vpop.f32.mrf.mxu0  ;;  %v1745_v7 = vld [vmem:[#allocation2 + $0xc0] sm:$0xff] }
 0x158   : > { %1545 = vst.msk [vmem:[#allocation2 + $0xe0] sm:$0xff] %vm448_vm3, %v1513_v53  ;;  %1811 = vst.msk [vmem:[#allocation2 + $0xd0] sm:$0xff] %vm448_vm3, %v1779_v39  ;;  %v1516_v12 = vadd.f32 %v7626_v23, %v1484_v25  ;;  %v1777_v15 = vadd.f32 %v1745_v7, %v1690_v17  ;;  %v1693_v35 = vpop.f32.mrf.mxu1  ;;  %v2006_v39 = vld [vmem:[#allocation2 + $0x50] sm:$0xff] }
 0x159   : > { %v1441_v60 = vpop.f32.mrf.mxu0  ;;  %v1748_v34 = vld [vmem:[#allocation2 + $0xd8] sm:$0xff] }
 0x15a   : > { %1548 = vst.msk [vmem:[#allocation2 + $0xf8] sm:$0xff] %vm448_vm3, %v1516_v12  ;;  %1809 = vst.msk [vmem:[#allocation2 + $0xc0] sm:$0xff] %vm448_vm3, %v1777_v15  ;;  %v1514_v54 = vadd.f32 %v1482_v27, %v1441_v60  ;;  %v1780_v5 = vadd.f32 %v7656_v55, %v1748_v34  ;;  %v7659_v2 = vpop.f32.mrf.mxu1  ;;  %v2004_v15 = vld [vmem:[#allocation2 + $0x40] sm:$0xff] }
 0x15b   : > { %v1746_v49 = vld [vmem:[#allocation2 + $0xc8] sm:$0xff]  ;;  %v7665_v18 = vpop.f32.mrf.mxu0 }
 0x15c   : > { %1546 = vst.msk [vmem:[#allocation2 + $0xe8] sm:$0xff] %vm448_vm3, %v1514_v54  ;;  %1812 = vst.msk [vmem:[#allocation2 + $0xd8] sm:$0xff] %vm448_vm3, %v1780_v5  ;;  %v1778_v32 = vadd.f32 %v1746_v49, %v1693_v35  ;;  %v2030_v52 = vadd.f32 %v7665_v18, %v1998_v19  ;;  %v1706_v47 = vpop.f32.mrf.mxu1  ;;  %v2007_v5 = vld [vmem:[#allocation2 + $0x58] sm:$0xff] }
 0x15d   : > { %v1751_v36 = vld [vmem:[#allocation2 + $0xf0] sm:$0xff]  ;;  %v1869_v58 = vpop.f32.mrf.mxu0 }
 0x15e   : > { %1810 = vst.msk [vmem:[#allocation2 + $0xc8] sm:$0xff] %vm448_vm3, %v1778_v32  ;;  %2062 = vst.msk [vmem:[#allocation2 + $0x10] sm:$0xff] %vm448_vm3, %v2030_v52  ;;  %v1783_v42 = vadd.f32 %v7659_v2, %v1751_v36  ;;  %v2028_v44 = vadd.f32 %v1996_v20, %v1869_v58  ;;  %v7660_v22 = vpop.f32.mrf.mxu1  ;;  %v2005_v52 = vld [vmem:[#allocation2 + $0x48] sm:$0xff] }
 0x15f   : > { %v1749_v26 = vld [vmem:[#allocation2 + $0xe0] sm:$0xff]  ;;  %v7666_v57 = vpop.f32.mrf.mxu0 }
 0x160   : > { %1815 = vst.msk [vmem:[#allocation2 + $0xf0] sm:$0xff] %vm448_vm3, %v1783_v42  ;;  %2060 = vst.msk [vmem:[#allocation2] sm:$0xff] %vm448_vm3, %v2028_v44  ;;  %v1781_v41 = vadd.f32 %v1749_v26, %v1706_v47  ;;  %v2031_v56 = vadd.f32 %v7666_v57, %v1999_v63  ;;  %v1709_v59 = vpop.f32.mrf.mxu1  ;;  %v2010_v44 = vld [vmem:[#allocation2 + $0x70] sm:$0xff] }
 0x161   : > { %v1752_v8 = vld [vmem:[#allocation2 + $0xf8] sm:$0xff]  ;;  %v1872_v4 = vpop.f32.mrf.mxu0 }
 0x162   : > { %1813 = vst.msk [vmem:[#allocation2 + $0xe0] sm:$0xff] %vm448_vm3, %v1781_v41  ;;  %2063 = vst.msk [vmem:[#allocation2 + $0x18] sm:$0xff] %vm448_vm3, %v2031_v56  ;;  %v1784_v46 = vadd.f32 %v7660_v22, %v1752_v8  ;;  %v2029_v51 = vadd.f32 %v1997_v1, %v1872_v4  ;;  %v7699_v29 = vpop.f32.mrf.mxu1  ;;  %v2008_v56 = vld [vmem:[#allocation2 + $0x60] sm:$0xff] }
 0x163   : > { %v1750_v50 = vld [vmem:[#allocation2 + $0xe8] sm:$0xff]  ;;  %v7669_v10 = vpop.f32.mrf.mxu0 }
 0x164   : > { %1816 = vst.msk [vmem:[#allocation2 + $0xf8] sm:$0xff] %vm448_vm3, %v1784_v46  ;;  %2061 = vst.msk [vmem:[#allocation2 + $0x8] sm:$0xff] %vm448_vm3, %v2029_v51  ;;  %v1782_v11 = vadd.f32 %v1750_v50, %v1709_v59  ;;  %v2034_v0 = vadd.f32 %v7669_v10, %v2002_v13  ;;  %v2142_v24 = vpop.f32.mrf.mxu1  ;;  %v2011_v51 = vld [vmem:[#allocation2 + $0x78] sm:$0xff] }
 0x165   : > { %v1885_v62 = vpop.f32.mrf.mxu0  ;;  %v2271_v61 = vld [vmem:[#allocation2 + $0x10] sm:$0xff] }
 0x166   : > { %1814 = vst.msk [vmem:[#allocation2 + $0xe8] sm:$0xff] %vm448_vm3, %v1782_v11  ;;  %2066 = vst.msk [vmem:[#allocation2 + $0x30] sm:$0xff] %vm448_vm3, %v2034_v0  ;;  %v2032_v38 = vadd.f32 %v2000_v48, %v1885_v62  ;;  %v2303_v30 = vadd.f32 %v7699_v29, %v2271_v61  ;;  %v7700_v40 = vpop.f32.mrf.mxu1  ;;  %v2009_v0 = vld [vmem:[#allocation2 + $0x68] sm:$0xff] }
 0x167   : > { %v7670_v31 = vpop.f32.mrf.mxu0  ;;  %v2269_v3 = vld [vmem:[#allocation2] sm:$0xff] }
 0x168   : > { %2064 = vst.msk [vmem:[#allocation2 + $0x20] sm:$0xff] %vm448_vm3, %v2032_v38  ;;  %2335 = vst.msk [vmem:[#allocation2 + $0x10] sm:$0xff] %vm448_vm3, %v2303_v30  ;;  %v2035_v43 = vadd.f32 %v7670_v31, %v2003_v14  ;;  %v2301_v21 = vadd.f32 %v2269_v3, %v2142_v24  ;;  %v2145_v9 = vpop.f32.mrf.mxu1  ;;  %v2014_v30 = vld [vmem:[#allocation2 + $0x90] sm:$0xff] }
 0x169   : > { %v1888_v45 = vpop.f32.mrf.mxu0  ;;  %v2272_v17 = vld [vmem:[#allocation2 + $0x18] sm:$0xff] }
 0x16a   : > { %2067 = vst.msk [vmem:[#allocation2 + $0x38] sm:$0xff] %vm448_vm3, %v2035_v43  ;;  %2333 = vst.msk [vmem:[#allocation2] sm:$0xff] %vm448_vm3, %v2301_v21  ;;  %v2033_v28 = vadd.f32 %v2001_v16, %v1888_v45  ;;  %v2304_v6 = vadd.f32 %v7700_v40, %v2272_v17  ;;  %v7703_v37 = vpop.f32.mrf.mxu1  ;;  %v2012_v21 = vld [vmem:[#allocation2 + $0x80] sm:$0xff] }
 0x16b   : > { %v7673_v53 = vpop.f32.mrf.mxu0  ;;  %v2270_v55 = vld [vmem:[#allocation2 + $0x8] sm:$0xff] }
 0x16c   : > { %2065 = vst.msk [vmem:[#allocation2 + $0x28] sm:$0xff] %vm448_vm3, %v2033_v28  ;;  %2336 = vst.msk [vmem:[#allocation2 + $0x18] sm:$0xff] %vm448_vm3, %v2304_v6  ;;  %v2038_v23 = vadd.f32 %v7673_v53, %v2006_v39  ;;  %v2302_v25 = vadd.f32 %v2270_v55, %v2145_v9  ;;  %v2158_v7 = vpop.f32.mrf.mxu1  ;;  %v2015_v6 = vld [vmem:[#allocation2 + $0x98] sm:$0xff] }
 0x16d   : > { %v1901_v12 = vpop.f32.mrf.mxu0  ;;  %v2275_v35 = vld [vmem:[#allocation2 + $0x30] sm:$0xff] }
 0x16e   : > { %2070 = vst.msk [vmem:[#allocation2 + $0x50] sm:$0xff] %vm448_vm3, %v2038_v23  ;;  %2334 = vst.msk [vmem:[#allocation2 + $0x8] sm:$0xff] %vm448_vm3, %v2302_v25  ;;  %v2036_v60 = vadd.f32 %v2004_v15, %v1901_v12  ;;  %v2307_v27 = vadd.f32 %v7703_v37, %v2275_v35  ;;  %v7704_v34 = vpop.f32.mrf.mxu1  ;;  %v2013_v25 = vld [vmem:[#allocation2 + $0x88] sm:$0xff] }
 0x16f   : > { %v7674_v54 = vpop.f32.mrf.mxu0  ;;  %v2273_v2 = vld [vmem:[#allocation2 + $0x20] sm:$0xff] }
 0x170   : > { %2068 = vst.msk [vmem:[#allocation2 + $0x40] sm:$0xff] %vm448_vm3, %v2036_v60  ;;  %2339 = vst.msk [vmem:[#allocation2 + $0x30] sm:$0xff] %vm448_vm3, %v2307_v27  ;;  %v2039_v49 = vadd.f32 %v7674_v54, %v2007_v5  ;;  %v2305_v18 = vadd.f32 %v2273_v2, %v2158_v7  ;;  %v2161_v19 = vpop.f32.mrf.mxu1  ;;  %v2018_v27 = vld [vmem:[#allocation2 + $0xb0] sm:$0xff] }
 0x171   : > { %v1904_v32 = vpop.f32.mrf.mxu0  ;;  %v2276_v47 = vld [vmem:[#allocation2 + $0x38] sm:$0xff] }
 0x172   : > { %2071 = vst.msk [vmem:[#allocation2 + $0x58] sm:$0xff] %vm448_vm3, %v2039_v49  ;;  %2337 = vst.msk [vmem:[#allocation2 + $0x20] sm:$0xff] %vm448_vm3, %v2305_v18  ;;  %v2037_v36 = vadd.f32 %v2005_v52, %v1904_v32  ;;  %v2308_v58 = vadd.f32 %v7704_v34, %v2276_v47  ;;  %v7707_v20 = vpop.f32.mrf.mxu1  ;;  %v2016_v18 = vld [vmem:[#allocation2 + $0xa0] sm:$0xff] }
 0x173   : > { %v7677_v42 = vpop.f32.mrf.mxu0  ;;  %v2274_v22 = vld [vmem:[#allocation2 + $0x28] sm:$0xff] }
 0x174   : > { %2069 = vst.msk [vmem:[#allocation2 + $0x48] sm:$0xff] %vm448_vm3, %v2037_v36  ;;  %2340 = vst.msk [vmem:[#allocation2 + $0x38] sm:$0xff] %vm448_vm3, %v2308_v58  ;;  %v2042_v26 = vadd.f32 %v7677_v42, %v2010_v44  ;;  %v2306_v57 = vadd.f32 %v2274_v22, %v2161_v19  ;;  %v2174_v63 = vpop.f32.mrf.mxu1  ;;  %v2019_v58 = vld [vmem:[#allocation2 + $0xb8] sm:$0xff] }
 0x175   : > { %v1917_v41 = vpop.f32.mrf.mxu0  ;;  %v2279_v59 = vld [vmem:[#allocation2 + $0x50] sm:$0xff] }
 0x176   : > { %2074 = vst.msk [vmem:[#allocation2 + $0x70] sm:$0xff] %vm448_vm3, %v2042_v26  ;;  %2338 = vst.msk [vmem:[#allocation2 + $0x28] sm:$0xff] %vm448_vm3, %v2306_v57  ;;  %v2040_v8 = vadd.f32 %v2008_v56, %v1917_v41  ;;  %v2311_v4 = vadd.f32 %v7707_v20, %v2279_v59  ;;  %v7708_v1 = vpop.f32.mrf.mxu1  ;;  %v2017_v57 = vld [vmem:[#allocation2 + $0xa8] sm:$0xff] }
 0x177   : > { %v7678_v46 = vpop.f32.mrf.mxu0  ;;  %v2277_v29 = vld [vmem:[#allocation2 + $0x40] sm:$0xff] }
 0x178   : > { %2072 = vst.msk [vmem:[#allocation2 + $0x60] sm:$0xff] %vm448_vm3, %v2040_v8  ;;  %2343 = vst.msk [vmem:[#allocation2 + $0x50] sm:$0xff] %vm448_vm3, %v2311_v4  ;;  %v2043_v50 = vadd.f32 %v7678_v46, %v2011_v51  ;;  %v2309_v10 = vadd.f32 %v2277_v29, %v2174_v63  ;;  %v2177_v13 = vpop.f32.mrf.mxu1  ;;  %v2022_v4 = vld [vmem:[#allocation2 + $0xd0] sm:$0xff] }
 0x179   : > { %v1920_v11 = vpop.f32.mrf.mxu0  ;;  %v2280_v24 = vld [vmem:[#allocation2 + $0x58] sm:$0xff] }
 0x17a   : > { %2075 = vst.msk [vmem:[#allocation2 + $0x78] sm:$0xff] %vm448_vm3, %v2043_v50  ;;  %2341 = vst.msk [vmem:[#allocation2 + $0x40] sm:$0xff] %vm448_vm3, %v2309_v10  ;;  %v2041_v62 = vadd.f32 %v2009_v0, %v1920_v11  ;;  %v2312_v48 = vadd.f32 %v7708_v1, %v2280_v24  ;;  %v7711_v61 = vpop.f32.mrf.mxu1  ;;  %v2020_v10 = vld [vmem:[#allocation2 + $0xc0] sm:$0xff] }
 0x17b   : > { %v7681_v38 = vpop.f32.mrf.mxu0  ;;  %v2278_v40 = vld [vmem:[#allocation2 + $0x48] sm:$0xff] }
 0x17c   : > { %2073 = vst.msk [vmem:[#allocation2 + $0x68] sm:$0xff] %vm448_vm3, %v2041_v62  ;;  %2344 = vst.msk [vmem:[#allocation2 + $0x58] sm:$0xff] %vm448_vm3, %v2312_v48  ;;  %v2046_v31 = vadd.f32 %v7681_v38, %v2014_v30  ;;  %v2310_v14 = vadd.f32 %v2278_v40, %v2177_v13  ;;  %v2190_v3 = vpop.f32.mrf.mxu1  ;;  %v2023_v48 = vld [vmem:[#allocation2 + $0xd8] sm:$0xff] }
 0x17d   : > { %v1933_v43 = vpop.f32.mrf.mxu0  ;;  %v2283_v9 = vld [vmem:[#allocation2 + $0x70] sm:$0xff] }
 0x17e   : > { %2078 = vst.msk [vmem:[#allocation2 + $0x90] sm:$0xff] %vm448_vm3, %v2046_v31  ;;  %2342 = vst.msk [vmem:[#allocation2 + $0x48] sm:$0xff] %vm448_vm3, %v2310_v14  ;;  %v2044_v45 = vadd.f32 %v2012_v21, %v1933_v43  ;;  %v2315_v16 = vadd.f32 %v7711_v61, %v2283_v9  ;;  %v7712_v17 = vpop.f32.mrf.mxu1  ;;  %v2021_v14 = vld [vmem:[#allocation2 + $0xc8] sm:$0xff] }
 0x17f   : > { %v7682_v28 = vpop.f32.mrf.mxu0  ;;  %v2281_v37 = vld [vmem:[#allocation2 + $0x60] sm:$0xff] }
 0x180   : > { %2076 = vst.msk [vmem:[#allocation2 + $0x80] sm:$0xff] %vm448_vm3, %v2044_v45  ;;  %2347 = vst.msk [vmem:[#allocation2 + $0x70] sm:$0xff] %vm448_vm3, %v2315_v16  ;;  %v2047_v53 = vadd.f32 %v7682_v28, %v2015_v6  ;;  %v2313_v39 = vadd.f32 %v2281_v37, %v2190_v3  ;;  %v2193_v55 = vpop.f32.mrf.mxu1  ;;  %v2026_v16 = vld [vmem:[#allocation2 + $0xf0] sm:$0xff] }
 0x181   : > { %v1936_v23 = vpop.f32.mrf.mxu0  ;;  %v2284_v7 = vld [vmem:[#allocation2 + $0x78] sm:$0xff] }
 0x182   : > { %2079 = vst.msk [vmem:[#allocation2 + $0x98] sm:$0xff] %vm448_vm3, %v2047_v53  ;;  %2345 = vst.msk [vmem:[#allocation2 + $0x60] sm:$0xff] %vm448_vm3, %v2313_v39  ;;  %v2045_v12 = vadd.f32 %v2013_v25, %v1936_v23  ;;  %v2316_v15 = vadd.f32 %v7712_v17, %v2284_v7  ;;  %v7715_v35 = vpop.f32.mrf.mxu1  ;;  %v2024_v39 = vld [vmem:[#allocation2 + $0xe0] sm:$0xff] }
 0x183   : > { %v7685_v60 = vpop.f32.mrf.mxu0  ;;  %v2282_v34 = vld [vmem:[#allocation2 + $0x68] sm:$0xff] }
 0x184   : > { %2077 = vst.msk [vmem:[#allocation2 + $0x88] sm:$0xff] %vm448_vm3, %v2045_v12  ;;  %2348 = vst.msk [vmem:[#allocation2 + $0x78] sm:$0xff] %vm448_vm3, %v2316_v15  ;;  %v2050_v54 = vadd.f32 %v7685_v60, %v2018_v27  ;;  %v2314_v5 = vadd.f32 %v2282_v34, %v2193_v55  ;;  %v2206_v2 = vpop.f32.mrf.mxu1  ;;  %v2027_v15 = vld [vmem:[#allocation2 + $0xf8] sm:$0xff] }
 0x185   : > { %v1949_v49 = vpop.f32.mrf.mxu0  ;;  %v2287_v19 = vld [vmem:[#allocation2 + $0x90] sm:$0xff] }
 0x186   : > { %2082 = vst.msk [vmem:[#allocation2 + $0xb0] sm:$0xff] %vm448_vm3, %v2050_v54  ;;  %2346 = vst.msk [vmem:[#allocation2 + $0x68] sm:$0xff] %vm448_vm3, %v2314_v5  ;;  %v2048_v32 = vadd.f32 %v2016_v18, %v1949_v49  ;;  %v2319_v52 = vadd.f32 %v7715_v35, %v2287_v19  ;;  %v7716_v47 = vpop.f32.mrf.mxu1  ;;  %v2025_v5 = vld [vmem:[#allocation2 + $0xe8] sm:$0xff] }
 0x187   : > { %v7686_v36 = vpop.f32.mrf.mxu0  ;;  %v2285_v20 = vld [vmem:[#allocation2 + $0x80] sm:$0xff] }
 0x188   : > { %2080 = vst.msk [vmem:[#allocation2 + $0xa0] sm:$0xff] %vm448_vm3, %v2048_v32  ;;  %2351 = vst.msk [vmem:[#allocation2 + $0x90] sm:$0xff] %vm448_vm3, %v2319_v52  ;;  %v2051_v42 = vadd.f32 %v7686_v36, %v2019_v58  ;;  %v2317_v44 = vadd.f32 %v2285_v20, %v2206_v2  ;;  %v2209_v22 = vpop.f32.mrf.mxu1 }
 0x189   : > { %v1952_v26 = vpop.f32.mrf.mxu0  ;;  %v2288_v63 = vld [vmem:[#allocation2 + $0x98] sm:$0xff] }
 0x18a   : > { %2083 = vst.msk [vmem:[#allocation2 + $0xb8] sm:$0xff] %vm448_vm3, %v2051_v42  ;;  %2349 = vst.msk [vmem:[#allocation2 + $0x80] sm:$0xff] %vm448_vm3, %v2317_v44  ;;  %v2049_v41 = vadd.f32 %v2017_v57, %v1952_v26  ;;  %v2320_v56 = vadd.f32 %v7716_v47, %v2288_v63  ;;  %v7719_v59 = vpop.f32.mrf.mxu1  ;;  %v2532_v47 = vld [vmem:[#allocation2 + $0x10] sm:$0xff] }
 0x18b   : > { %v7689_v8 = vpop.f32.mrf.mxu0  ;;  %v2286_v1 = vld [vmem:[#allocation2 + $0x88] sm:$0xff] }
 0x18c   : > { %2081 = vst.msk [vmem:[#allocation2 + $0xa8] sm:$0xff] %vm448_vm3, %v2049_v41  ;;  %2352 = vst.msk [vmem:[#allocation2 + $0x98] sm:$0xff] %vm448_vm3, %v2320_v56  ;;  %v2054_v46 = vadd.f32 %v7689_v8, %v2022_v4  ;;  %v2318_v51 = vadd.f32 %v2286_v1, %v2209_v22  ;;  %v2222_v29 = vpop.f32.mrf.mxu1  ;;  %v2530_v22 = vld [vmem:[#allocation2] sm:$0xff] }
 0x18d   : > { %v1965_v50 = vpop.f32.mrf.mxu0  ;;  %v2291_v13 = vld [vmem:[#allocation2 + $0xb0] sm:$0xff] }
 0x18e   : > { %2086 = vst.msk [vmem:[#allocation2 + $0xd0] sm:$0xff] %vm448_vm3, %v2054_v46  ;;  %2350 = vst.msk [vmem:[#allocation2 + $0x88] sm:$0xff] %vm448_vm3, %v2318_v51  ;;  %v2052_v11 = vadd.f32 %v2020_v10, %v1965_v50  ;;  %v2323_v0 = vadd.f32 %v7719_v59, %v2291_v13  ;;  %v7720_v24 = vpop.f32.mrf.mxu1  ;;  %v2533_v59 = vld [vmem:[#allocation2 + $0x18] sm:$0xff] }
 0x18f   : > { %v7690_v62 = vpop.f32.mrf.mxu0  ;;  %v2289_v61 = vld [vmem:[#allocation2 + $0xa0] sm:$0xff] }
 0x190   : > { %2084 = vst.msk [vmem:[#allocation2 + $0xc0] sm:$0xff] %vm448_vm3, %v2052_v11  ;;  %2355 = vst.msk [vmem:[#allocation2 + $0xb0] sm:$0xff] %vm448_vm3, %v2323_v0  ;;  %v2055_v38 = vadd.f32 %v7690_v62, %v2023_v48  ;;  %v2321_v30 = vadd.f32 %v2289_v61, %v2222_v29  ;;  %v2225_v40 = vpop.f32.mrf.mxu1  ;;  %v2531_v29 = vld [vmem:[#allocation2 + $0x8] sm:$0xff] }
 0x191   : > { %v1968_v31 = vpop.f32.mrf.mxu0  ;;  %v2292_v3 = vld [vmem:[#allocation2 + $0xb8] sm:$0xff] }
 0x192   : > { %2087 = vst.msk [vmem:[#allocation2 + $0xd8] sm:$0xff] %vm448_vm3, %v2055_v38  ;;  %2353 = vst.msk [vmem:[#allocation2 + $0xa0] sm:$0xff] %vm448_vm3, %v2321_v30  ;;  %v2053_v43 = vadd.f32 %v2021_v14, %v1968_v31  ;;  %v2324_v21 = vadd.f32 %v7720_v24, %v2292_v3  ;;  %v7723_v9 = vpop.f32.mrf.mxu1  ;;  %v2536_v24 = vld [vmem:[#allocation2 + $0x30] sm:$0xff]  ;;  %v2534_v30 = vld [vmem:[#allocation2 + $0x20] sm:$0xff] }
 0x193   : > { %v7693_v45 = vpop.f32.mrf.mxu0  ;;  %v2290_v17 = vld [vmem:[#allocation2 + $0xa8] sm:$0xff] }
 0x194   : > { %2085 = vst.msk [vmem:[#allocation2 + $0xc8] sm:$0xff] %vm448_vm3, %v2053_v43  ;;  %2356 = vst.msk [vmem:[#allocation2 + $0xb8] sm:$0xff] %vm448_vm3, %v2324_v21  ;;  %v2058_v28 = vadd.f32 %v7693_v45, %v2026_v16  ;;  %v2322_v6 = vadd.f32 %v2290_v17, %v2225_v40  ;;  %v2238_v37 = vpop.f32.mrf.mxu1  ;;  %v2537_v21 = vld [vmem:[#allocation2 + $0x38] sm:$0xff] }
 0x195   : > { %v1981_v53 = vpop.f32.mrf.mxu0  ;;  %v2295_v55 = vld [vmem:[#allocation2 + $0xd0] sm:$0xff] }
 0x196   : > { %2090 = vst.msk [vmem:[#allocation2 + $0xf0] sm:$0xff] %vm448_vm3, %v2058_v28  ;;  %2354 = vst.msk [vmem:[#allocation2 + $0xa8] sm:$0xff] %vm448_vm3, %v2322_v6  ;;  %v2056_v23 = vadd.f32 %v2024_v39, %v1981_v53  ;;  %v2327_v25 = vadd.f32 %v7723_v9, %v2295_v55  ;;  %v7724_v7 = vpop.f32.mrf.mxu1  ;;  %v2535_v6 = vld [vmem:[#allocation2 + $0x28] sm:$0xff]  ;;  %v3741_v53 = vld [vmem:[%s10938_s2] sm:$0x3] }
 0x197   : > { %v7694_v12 = vpop.f32.mrf.mxu0  ;;  %v2293_v35 = vld [vmem:[#allocation2 + $0xc0] sm:$0xff]  ;;  %8146 = vmatprep.subr.msk.bf16.mxu1 %vm494_vm0, %v3741_v53 }
 0x198   : > { %2088 = vst.msk [vmem:[#allocation2 + $0xe0] sm:$0xff] %vm448_vm3, %v2056_v23  ;;  %2359 = vst.msk [vmem:[#allocation2 + $0xd0] sm:$0xff] %vm448_vm3, %v2327_v25  ;;  %v2059_v60 = vadd.f32 %v7694_v12, %v2027_v15  ;;  %v2325_v27 = vadd.f32 %v2293_v35, %v2238_v37  ;;  %v2241_v34 = vpop.f32.mrf.mxu1  ;;  %v3788_v25 = vsel %vm494_vm0, %v3741_v53, 0  ;;  %v2540_v15 = vld [vmem:[#allocation2 + $0x50] sm:$0xff]  ;;  %v2546_v53 = vld [vmem:[#allocation2 + $0x80] sm:$0xff] }
 0x199   : > { %v1984_v54 = vpop.f32.mrf.mxu0  ;;  %v2296_v2 = vld [vmem:[#allocation2 + $0xd8] sm:$0xff]  ;;  %7832 = vmatpush3.bf16.msra.mxu1 %v3788_v25 }
 0x19a   : > { %2091 = vst.msk [vmem:[#allocation2 + $0xf8] sm:$0xff] %vm448_vm3, %v2059_v60  ;;  %2357 = vst.msk [vmem:[#allocation2 + $0xc0] sm:$0xff] %vm448_vm3, %v2325_v27  ;;  %v2057_v49 = vadd.f32 %v2025_v5, %v1984_v54  ;;  %v2328_v18 = vadd.f32 %v7724_v7, %v2296_v2  ;;  %v7727_v19 = vpop.f32.mrf.mxu1  ;;  %v8167_v7 = vld [vmem:[%s10938_s2] ss:$0 sps:$4 sm:$0xcc]  }
 0x19b   : > { %v2294_v32 = vld [vmem:[#allocation2 + $0xc8] sm:$0xff]  ;;  %v7733_v52 = vpop.f32.mrf.mxu0  ;;  %v4152_v54 = vrot.slane %v8167_v7, 2  ;;  %v2538_v2 = vld [vmem:[#allocation2 + $0x40] sm:$0xff] }
 0x19c   : > { %2089 = vst.msk [vmem:[#allocation2 + $0xe8] sm:$0xff] %vm448_vm3, %v2057_v49  ;;  %2360 = vst.msk [vmem:[#allocation2 + $0xd8] sm:$0xff] %vm448_vm3, %v2328_v18  ;;  %v2326_v36 = vadd.f32 %v2294_v32, %v2241_v34  ;;  %v2564_v58 = vadd.f32 %v7733_v52, %v2532_v47  ;;  %v2254_v20 = vpop.f32.mrf.mxu1 }
 0x19d   : > { %v2299_v42 = vld [vmem:[#allocation2 + $0xf0] sm:$0xff]  ;;  %v2403_v44 = vpop.f32.mrf.mxu0  ;;  %8147 = vmatprep.subr.msk.bf16.mxu0 %vm494_vm0, %v4152_v54  ;;  %v4199_v52 = vsel %vm494_vm0, %v4152_v54, 0  ;;  %v2547_v54 = vld [vmem:[#allocation2 + $0x88] sm:$0xff] }
 0x19e   : > { %2358 = vst.msk [vmem:[#allocation2 + $0xc8] sm:$0xff] %vm448_vm3, %v2326_v36  ;;  %2596 = vst.msk [vmem:[#allocation2 + $0x10] sm:$0xff] %vm448_vm3, %v2564_v58  ;;  %v2331_v26 = vadd.f32 %v7727_v19, %v2299_v42  ;;  %v2562_v57 = vadd.f32 %v2530_v22, %v2403_v44  ;;  %v7728_v63 = vpop.f32.mrf.mxu1  ;;  %v2541_v36 = vld [vmem:[#allocation2 + $0x58] sm:$0xff]  ;;  %7866 = vmatpush3.bf16.msra.mxu0 %v4199_v52 }
 0x19f   : > { %v2297_v41 = vld [vmem:[#allocation2 + $0xe0] sm:$0xff]  ;;  %v7734_v56 = vpop.f32.mrf.mxu0 }
 0x1a0   : > { %2363 = vst.msk [vmem:[#allocation2 + $0xf0] sm:$0xff] %vm448_vm3, %v2331_v26  ;;  %2594 = vst.msk [vmem:[#allocation2] sm:$0xff] %vm448_vm3, %v2562_v57  ;;  %v2329_v8 = vadd.f32 %v2297_v41, %v2254_v20  ;;  %v2565_v4 = vadd.f32 %v7734_v56, %v2533_v59  ;;  %v2257_v1 = vpop.f32.mrf.mxu1  ;;  %v2539_v26 = vld [vmem:[#allocation2 + $0x48] sm:$0xff] }
 0x1a1   : > { %v2300_v46 = vld [vmem:[#allocation2 + $0xf8] sm:$0xff]  ;;  %v2406_v51 = vpop.f32.mrf.mxu0 }
 0x1a2   : > { %2361 = vst.msk [vmem:[#allocation2 + $0xe0] sm:$0xff] %vm448_vm3, %v2329_v8  ;;  %2597 = vst.msk [vmem:[#allocation2 + $0x18] sm:$0xff] %vm448_vm3, %v2565_v4  ;;  %v2332_v50 = vadd.f32 %v7728_v63, %v2300_v46  ;;  %v2563_v10 = vadd.f32 %v2531_v29, %v2406_v51  ;;  %v7767_v13 = vpop.f32.mrf.mxu1  ;;  %v2544_v8 = vld [vmem:[#allocation2 + $0x70] sm:$0xff] }
 0x1a3   : > { %v2298_v11 = vld [vmem:[#allocation2 + $0xe8] sm:$0xff]  ;;  %v7737_v0 = vpop.f32.mrf.mxu0 }
 0x1a4   : > { %2364 = vst.msk [vmem:[#allocation2 + $0xf8] sm:$0xff] %vm448_vm3, %v2332_v50  ;;  %2595 = vst.msk [vmem:[#allocation2 + $0x8] sm:$0xff] %vm448_vm3, %v2563_v10  ;;  %v2330_v62 = vadd.f32 %v2298_v11, %v2257_v1  ;;  %v2568_v48 = vadd.f32 %v7737_v0, %v2536_v24  ;;  %v2668_v61 = vpop.f32.mrf.mxu1  ;;  %v2542_v50 = vld [vmem:[#allocation2 + $0x60] sm:$0xff] }
 0x1a5   : > { %v2419_v38 = vpop.f32.mrf.mxu0  ;;  %v2797_v40 = vld [vmem:[#allocation2 + $0x10] sm:$0xff] }
 0x1a6   : > { %2362 = vst.msk [vmem:[#allocation2 + $0xe8] sm:$0xff] %vm448_vm3, %v2330_v62  ;;  %2600 = vst.msk [vmem:[#allocation2 + $0x30] sm:$0xff] %vm448_vm3, %v2568_v48  ;;  %v2566_v31 = vadd.f32 %v2534_v30, %v2419_v38  ;;  %v2829_v14 = vadd.f32 %v7767_v13, %v2797_v40  ;;  %v7768_v3 = vpop.f32.mrf.mxu1  ;;  %v2545_v62 = vld [vmem:[#allocation2 + $0x78] sm:$0xff] }
 0x1a7   : > { %v7738_v43 = vpop.f32.mrf.mxu0  ;;  %v2795_v9 = vld [vmem:[#allocation2] sm:$0xff] }
 0x1a8   : > { %2598 = vst.msk [vmem:[#allocation2 + $0x20] sm:$0xff] %vm448_vm3, %v2566_v31  ;;  %2861 = vst.msk [vmem:[#allocation2 + $0x10] sm:$0xff] %vm448_vm3, %v2829_v14  ;;  %v2569_v45 = vadd.f32 %v7738_v43, %v2537_v21  ;;  %v2827_v16 = vadd.f32 %v2795_v9, %v2668_v61  ;;  %v2671_v17 = vpop.f32.mrf.mxu1  ;;  %v2543_v31 = vld [vmem:[#allocation2 + $0x68] sm:$0xff] }
 0x1a9   : > { %v2422_v28 = vpop.f32.mrf.mxu0  ;;  %v2798_v37 = vld [vmem:[#allocation2 + $0x18] sm:$0xff] }
 0x1aa   : > { %2601 = vst.msk [vmem:[#allocation2 + $0x38] sm:$0xff] %vm448_vm3, %v2569_v45  ;;  %2859 = vst.msk [vmem:[#allocation2] sm:$0xff] %vm448_vm3, %v2827_v16  ;;  %v2567_v39 = vadd.f32 %v2535_v6, %v2422_v28  ;;  %v2830_v55 = vadd.f32 %v7768_v3, %v2798_v37  ;;  %v7771_v23 = vpop.f32.mrf.mxu1  ;;  %v2548_v45 = vld [vmem:[#allocation2 + $0x90] sm:$0xff] }
 0x1ab   : > { %v7741_v12 = vpop.f32.mrf.mxu0  ;;  %v2796_v35 = vld [vmem:[#allocation2 + $0x8] sm:$0xff] }
 0x1ac   : > { %2599 = vst.msk [vmem:[#allocation2 + $0x28] sm:$0xff] %vm448_vm3, %v2567_v39  ;;  %2862 = vst.msk [vmem:[#allocation2 + $0x18] sm:$0xff] %vm448_vm3, %v2830_v55  ;;  %v2572_v60 = vadd.f32 %v7741_v12, %v2540_v15  ;;  %v2828_v27 = vadd.f32 %v2796_v35, %v2671_v17  ;;  %v2684_v34 = vpop.f32.mrf.mxu1  ;;  %v2549_v12 = vld [vmem:[#allocation2 + $0x98] sm:$0xff] }
 0x1ad   : > { %v2435_v5 = vpop.f32.mrf.mxu0  ;;  %v2801_v49 = vld [vmem:[#allocation2 + $0x30] sm:$0xff] }
 0x1ae   : > { %2604 = vst.msk [vmem:[#allocation2 + $0x50] sm:$0xff] %vm448_vm3, %v2572_v60  ;;  %2860 = vst.msk [vmem:[#allocation2 + $0x8] sm:$0xff] %vm448_vm3, %v2828_v27  ;;  %v2570_v18 = vadd.f32 %v2538_v2, %v2435_v5  ;;  %v2833_v19 = vadd.f32 %v7771_v23, %v2801_v49  ;;  %v7772_v32 = vpop.f32.mrf.mxu1 }
 0x1af   : > { %v7742_v47 = vpop.f32.mrf.mxu0  ;;  %v2799_v58 = vld [vmem:[#allocation2 + $0x20] sm:$0xff] }
 0x1b0   : > { %2602 = vst.msk [vmem:[#allocation2 + $0x40] sm:$0xff] %vm448_vm3, %v2570_v18  ;;  %2865 = vst.msk [vmem:[#allocation2 + $0x30] sm:$0xff] %vm448_vm3, %v2833_v19  ;;  %v2573_v20 = vadd.f32 %v7742_v47, %v2541_v36  ;;  %v2831_v42 = vadd.f32 %v2799_v58, %v2684_v34  ;;  %v2687_v44 = vpop.f32.mrf.mxu1 }
 0x1b1   : > { %v2438_v22 = vpop.f32.mrf.mxu0  ;;  %v2802_v57 = vld [vmem:[#allocation2 + $0x38] sm:$0xff] }
 0x1b2   : > { %2605 = vst.msk [vmem:[#allocation2 + $0x58] sm:$0xff] %vm448_vm3, %v2573_v20  ;;  %2863 = vst.msk [vmem:[#allocation2 + $0x20] sm:$0xff] %vm448_vm3, %v2831_v42  ;;  %v2571_v63 = vadd.f32 %v2539_v26, %v2438_v22  ;;  %v2834_v41 = vadd.f32 %v7772_v32, %v2802_v57  ;;  %v7775_v56 = vpop.f32.mrf.mxu1  ;;  %v2552_v32 = vld [vmem:[#allocation2 + $0xb0] sm:$0xff]  ;;  %v2550_v42 = vld [vmem:[#allocation2 + $0xa0] sm:$0xff] }
 0x1b3   : > { %v7745_v59 = vpop.f32.mrf.mxu0  ;;  %v2800_v4 = vld [vmem:[#allocation2 + $0x28] sm:$0xff] }
 0x1b4   : > { %2603 = vst.msk [vmem:[#allocation2 + $0x48] sm:$0xff] %vm448_vm3, %v2571_v63  ;;  %2866 = vst.msk [vmem:[#allocation2 + $0x38] sm:$0xff] %vm448_vm3, %v2834_v41  ;;  %v2576_v1 = vadd.f32 %v7745_v59, %v2544_v8  ;;  %v2832_v46 = vadd.f32 %v2800_v4, %v2687_v44  ;;  %v2700_v51 = vpop.f32.mrf.mxu1  ;;  %v2553_v41 = vld [vmem:[#allocation2 + $0xb8] sm:$0xff] }
 0x1b5   : > { %v2451_v29 = vpop.f32.mrf.mxu0  ;;  %v2805_v10 = vld [vmem:[#allocation2 + $0x50] sm:$0xff] }
 0x1b6   : > { %2608 = vst.msk [vmem:[#allocation2 + $0x70] sm:$0xff] %vm448_vm3, %v2576_v1  ;;  %2864 = vst.msk [vmem:[#allocation2 + $0x28] sm:$0xff] %vm448_vm3, %v2832_v46  ;;  %v2574_v13 = vadd.f32 %v2542_v50, %v2451_v29  ;;  %v2837_v11 = vadd.f32 %v7775_v56, %v2805_v10  ;;  %v7776_v0 = vpop.f32.mrf.mxu1  ;;  %v2551_v46 = vld [vmem:[#allocation2 + $0xa8] sm:$0xff] }
 0x1b7   : > { %v7746_v24 = vpop.f32.mrf.mxu0  ;;  %v2803_v48 = vld [vmem:[#allocation2 + $0x40] sm:$0xff] }
 0x1b8   : > { %2606 = vst.msk [vmem:[#allocation2 + $0x60] sm:$0xff] %vm448_vm3, %v2574_v13  ;;  %2869 = vst.msk [vmem:[#allocation2 + $0x50] sm:$0xff] %vm448_vm3, %v2837_v11  ;;  %v2577_v61 = vadd.f32 %v7746_v24, %v2545_v62  ;;  %v2835_v38 = vadd.f32 %v2803_v48, %v2700_v51  ;;  %v2703_v30 = vpop.f32.mrf.mxu1  ;;  %v2556_v11 = vld [vmem:[#allocation2 + $0xd0] sm:$0xff] }
 0x1b9   : > { %v2454_v40 = vpop.f32.mrf.mxu0  ;;  %v2806_v14 = vld [vmem:[#allocation2 + $0x58] sm:$0xff] }
 0x1ba   : > { %2609 = vst.msk [vmem:[#allocation2 + $0x78] sm:$0xff] %vm448_vm3, %v2577_v61  ;;  %2867 = vst.msk [vmem:[#allocation2 + $0x40] sm:$0xff] %vm448_vm3, %v2835_v38  ;;  %v2575_v3 = vadd.f32 %v2543_v31, %v2454_v40  ;;  %v2838_v43 = vadd.f32 %v7776_v0, %v2806_v14  ;;  %v7779_v21 = vpop.f32.mrf.mxu1  ;;  %v2554_v38 = vld [vmem:[#allocation2 + $0xc0] sm:$0xff] }
 0x1bb   : > { %v7749_v9 = vpop.f32.mrf.mxu0  ;;  %v2804_v16 = vld [vmem:[#allocation2 + $0x48] sm:$0xff] }
 0x1bc   : > { %2607 = vst.msk [vmem:[#allocation2 + $0x68] sm:$0xff] %vm448_vm3, %v2575_v3  ;;  %2870 = vst.msk [vmem:[#allocation2 + $0x58] sm:$0xff] %vm448_vm3, %v2838_v43  ;;  %v2580_v17 = vadd.f32 %v7749_v9, %v2548_v45  ;;  %v2836_v28 = vadd.f32 %v2804_v16, %v2703_v30  ;;  %v2716_v6 = vpop.f32.mrf.mxu1  ;;  %v2557_v43 = vld [vmem:[#allocation2 + $0xd8] sm:$0xff] }
 0x1bd   : > { %v2467_v37 = vpop.f32.mrf.mxu0  ;;  %v2809_v39 = vld [vmem:[#allocation2 + $0x70] sm:$0xff] }
 0x1be   : > { %2612 = vst.msk [vmem:[#allocation2 + $0x90] sm:$0xff] %vm448_vm3, %v2580_v17  ;;  %2868 = vst.msk [vmem:[#allocation2 + $0x48] sm:$0xff] %vm448_vm3, %v2836_v28  ;;  %v2578_v55 = vadd.f32 %v2546_v53, %v2467_v37  ;;  %v2841_v23 = vadd.f32 %v7779_v21, %v2809_v39  ;;  %v7780_v25 = vpop.f32.mrf.mxu1  ;;  %v2555_v28 = vld [vmem:[#allocation2 + $0xc8] sm:$0xff] }
 0x1bf   : > { %v7750_v7 = vpop.f32.mrf.mxu0  ;;  %v2807_v15 = vld [vmem:[#allocation2 + $0x60] sm:$0xff] }
 0x1c0   : > { %2610 = vst.msk [vmem:[#allocation2 + $0x80] sm:$0xff] %vm448_vm3, %v2578_v55  ;;  %2873 = vst.msk [vmem:[#allocation2 + $0x70] sm:$0xff] %vm448_vm3, %v2841_v23  ;;  %v2581_v35 = vadd.f32 %v7750_v7, %v2549_v12  ;;  %v2839_v60 = vadd.f32 %v2807_v15, %v2716_v6  ;;  %v2719_v27 = vpop.f32.mrf.mxu1  ;;  %v2560_v23 = vld [vmem:[#allocation2 + $0xf0] sm:$0xff] }
 0x1c1   : > { %v2470_v34 = vpop.f32.mrf.mxu0  ;;  %v2810_v5 = vld [vmem:[#allocation2 + $0x78] sm:$0xff] }
 0x1c2   : > { %2613 = vst.msk [vmem:[#allocation2 + $0x98] sm:$0xff] %vm448_vm3, %v2581_v35  ;;  %2871 = vst.msk [vmem:[#allocation2 + $0x60] sm:$0xff] %vm448_vm3, %v2839_v60  ;;  %v2579_v2 = vadd.f32 %v2547_v54, %v2470_v34  ;;  %v2842_v49 = vadd.f32 %v7780_v25, %v2810_v5  ;;  %v7783_v18 = vpop.f32.mrf.mxu1  ;;  %v2558_v60 = vld [vmem:[#allocation2 + $0xe0] sm:$0xff] }
 0x1c3   : > { %v7753_v19 = vpop.f32.mrf.mxu0  ;;  %v2808_v52 = vld [vmem:[#allocation2 + $0x68] sm:$0xff] }
 0x1c4   : > { %2611 = vst.msk [vmem:[#allocation2 + $0x88] sm:$0xff] %vm448_vm3, %v2579_v2  ;;  %2874 = vst.msk [vmem:[#allocation2 + $0x78] sm:$0xff] %vm448_vm3, %v2842_v49  ;;  %v2584_v47 = vadd.f32 %v7753_v19, %v2552_v32  ;;  %v2840_v36 = vadd.f32 %v2808_v52, %v2719_v27  ;;  %v2732_v58 = vpop.f32.mrf.mxu1  ;;  %v2561_v49 = vld [vmem:[#allocation2 + $0xf8] sm:$0xff] }
 0x1c5   : > { %v2483_v20 = vpop.f32.mrf.mxu0  ;;  %v2813_v44 = vld [vmem:[#allocation2 + $0x90] sm:$0xff] }
 0x1c6   : > { %2616 = vst.msk [vmem:[#allocation2 + $0xb0] sm:$0xff] %vm448_vm3, %v2584_v47  ;;  %2872 = vst.msk [vmem:[#allocation2 + $0x68] sm:$0xff] %vm448_vm3, %v2840_v36  ;;  %v2582_v22 = vadd.f32 %v2550_v42, %v2483_v20  ;;  %v2845_v26 = vadd.f32 %v7783_v18, %v2813_v44  ;;  %v7784_v57 = vpop.f32.mrf.mxu1  ;;  %v2559_v36 = vld [vmem:[#allocation2 + $0xe8] sm:$0xff] }
 0x1c7   : > { %v7754_v63 = vpop.f32.mrf.mxu0  ;;  %v2811_v56 = vld [vmem:[#allocation2 + $0x80] sm:$0xff] }
 0x1c8   : > { %2614 = vst.msk [vmem:[#allocation2 + $0xa0] sm:$0xff] %vm448_vm3, %v2582_v22  ;;  %2877 = vst.msk [vmem:[#allocation2 + $0x90] sm:$0xff] %vm448_vm3, %v2845_v26  ;;  %v2585_v59 = vadd.f32 %v7754_v63, %v2553_v41  ;;  %v2843_v8 = vadd.f32 %v2811_v56, %v2732_v58  ;;  %v2735_v4 = vpop.f32.mrf.mxu1  ;;  %v3185_v56 = vlaneseq }
 0x1c9   : > { %v2486_v1 = vpop.f32.mrf.mxu0  ;;  %v2814_v51 = vld [vmem:[#allocation2 + $0x98] sm:$0xff] }
 0x1ca   : > { %2617 = vst.msk [vmem:[#allocation2 + $0xb8] sm:$0xff] %vm448_vm3, %v2585_v59  ;;  %2875 = vst.msk [vmem:[#allocation2 + $0x80] sm:$0xff] %vm448_vm3, %v2843_v8  ;;  %v2583_v29 = vadd.f32 %v2551_v46, %v2486_v1  ;;  %v2846_v50 = vadd.f32 %v7784_v57, %v2814_v51  ;;  %v7787_v10 = vpop.f32.mrf.mxu1  ;;  %v3058_v57 = vld [vmem:[#allocation2 + $0x10] sm:$0xff]  ;;  %v3056_v1 = vld [vmem:[#allocation2] sm:$0xff] }
 0x1cb   : > { %v7757_v13 = vpop.f32.mrf.mxu0  ;;  %v2812_v0 = vld [vmem:[#allocation2 + $0x88] sm:$0xff] }
 0x1cc   : > { %2615 = vst.msk [vmem:[#allocation2 + $0xa8] sm:$0xff] %vm448_vm3, %v2583_v29  ;;  %2878 = vst.msk [vmem:[#allocation2 + $0x98] sm:$0xff] %vm448_vm3, %v2846_v50  ;;  %v2588_v24 = vadd.f32 %v7757_v13, %v2556_v11  ;;  %v2844_v62 = vadd.f32 %v2812_v0, %v2735_v4  ;;  %v2748_v48 = vpop.f32.mrf.mxu1  ;;  %v3059_v13 = vld [vmem:[#allocation2 + $0x18] sm:$0xff]  ;;  %v3186_v11 = vshrl.u32 %v3185_v56, 7 }
 0x1cd   : > { %v2499_v61 = vpop.f32.mrf.mxu0  ;;  %v2817_v30 = vld [vmem:[#allocation2 + $0xb0] sm:$0xff] }
 0x1ce   : > { %2620 = vst.msk [vmem:[#allocation2 + $0xd0] sm:$0xff] %vm448_vm3, %v2588_v24  ;;  %2876 = vst.msk [vmem:[#allocation2 + $0x88] sm:$0xff] %vm448_vm3, %v2844_v62  ;;  %v2586_v40 = vadd.f32 %v2554_v38, %v2499_v61  ;;  %v2849_v31 = vadd.f32 %v7787_v10, %v2817_v30  ;;  %v7788_v14 = vpop.f32.mrf.mxu1  ;;  %v3057_v61 = vld [vmem:[#allocation2 + $0x8] sm:$0xff] }
 0x1cf   : > { %v7758_v3 = vpop.f32.mrf.mxu0  ;;  %v2815_v21 = vld [vmem:[#allocation2 + $0xa0] sm:$0xff] }
 0x1d0   : > { %2618 = vst.msk [vmem:[#allocation2 + $0xc0] sm:$0xff] %vm448_vm3, %v2586_v40  ;;  %2881 = vst.msk [vmem:[#allocation2 + $0xb0] sm:$0xff] %vm448_vm3, %v2849_v31  ;;  %v2589_v9 = vadd.f32 %v7758_v3, %v2557_v43  ;;  %v2847_v45 = vadd.f32 %v2815_v21, %v2748_v48  ;;  %v2751_v16 = vpop.f32.mrf.mxu1  ;;  %v3062_v3 = vld [vmem:[#allocation2 + $0x30] sm:$0xff]  ;;  %v9177_v43 = vld [vmem:[%s10938_s2 + $0x4] sm:$0x3]  ;;  %v9179_v21 = vsub.s32 0, %v3186_v11 }
 0x1d1   : > { %v2502_v17 = vpop.f32.mrf.mxu0  ;;  %v2818_v6 = vld [vmem:[#allocation2 + $0xb8] sm:$0xff]  ;;  %8148 = vmatprep.subr.msk.bf16.mxu1 %vm494_vm0, %v9177_v43 }
 0x1d2   : > { %2621 = vst.msk [vmem:[#allocation2 + $0xd8] sm:$0xff] %vm448_vm3, %v2589_v9  ;;  %2879 = vst.msk [vmem:[#allocation2 + $0xa0] sm:$0xff] %vm448_vm3, %v2847_v45  ;;  %v2587_v37 = vadd.f32 %v2555_v28, %v2502_v17  ;;  %v2850_v53 = vadd.f32 %v7788_v14, %v2818_v6  ;;  %v7791_v39 = vpop.f32.mrf.mxu1  ;;  %v3060_v17 = vld [vmem:[#allocation2 + $0x20] sm:$0xff] }
 0x1d3   : > { %v7761_v55 = vpop.f32.mrf.mxu0  ;;  %v2816_v25 = vld [vmem:[#allocation2 + $0xa8] sm:$0xff]  ;;  %10944 = vst [vmem:[#allocation3_spill] sm:$0xff] %v9179_v21 }
 0x1d4   : > { %2619 = vst.msk [vmem:[#allocation2 + $0xc8] sm:$0xff] %vm448_vm3, %v2587_v37  ;;  %2882 = vst.msk [vmem:[#allocation2 + $0xb8] sm:$0xff] %vm448_vm3, %v2850_v53  ;;  %v2592_v7 = vadd.f32 %v7761_v55, %v2560_v23  ;;  %v2848_v12 = vadd.f32 %v2816_v25, %v2751_v16  ;;  %v2764_v15 = vpop.f32.mrf.mxu1  ;;  %v3063_v53 = vld [vmem:[#allocation2 + $0x38] sm:$0xff]  ;;  %v3061_v25 = vld [vmem:[#allocation2 + $0x28] sm:$0xff] }
 0x1d5   : > { %v2515_v35 = vpop.f32.mrf.mxu0  ;;  %v2821_v27 = vld [vmem:[#allocation2 + $0xd0] sm:$0xff] }
 0x1d6   : > { %2624 = vst.msk [vmem:[#allocation2 + $0xf0] sm:$0xff] %vm448_vm3, %v2592_v7  ;;  %2880 = vst.msk [vmem:[#allocation2 + $0xa8] sm:$0xff] %vm448_vm3, %v2848_v12  ;;  %v2590_v34 = vadd.f32 %v2558_v60, %v2515_v35  ;;  %v2853_v54 = vadd.f32 %v7791_v39, %v2821_v27  ;;  %v7792_v5 = vpop.f32.mrf.mxu1 }
 0x1d7   : > { %v7762_v2 = vpop.f32.mrf.mxu0  ;;  %v2819_v18 = vld [vmem:[#allocation2 + $0xc0] sm:$0xff] }
 0x1d8   : > { %2622 = vst.msk [vmem:[#allocation2 + $0xe0] sm:$0xff] %vm448_vm3, %v2590_v34  ;;  %2885 = vst.msk [vmem:[#allocation2 + $0xd0] sm:$0xff] %vm448_vm3, %v2853_v54  ;;  %v2593_v19 = vadd.f32 %v7762_v2, %v2561_v49  ;;  %v2851_v32 = vadd.f32 %v2819_v18, %v2764_v15  ;;  %v2767_v52 = vpop.f32.mrf.mxu1  ;;  %v3066_v34 = vld [vmem:[#allocation2 + $0x50] sm:$0xff] }
 0x1d9   : > { %v2518_v47 = vpop.f32.mrf.mxu0  ;;  %v2822_v58 = vld [vmem:[#allocation2 + $0xd8] sm:$0xff] }
 0x1da   : > { %2625 = vst.msk [vmem:[#allocation2 + $0xf8] sm:$0xff] %vm448_vm3, %v2593_v19  ;;  %2883 = vst.msk [vmem:[#allocation2 + $0xc0] sm:$0xff] %vm448_vm3, %v2851_v32  ;;  %v2591_v20 = vadd.f32 %v2559_v36, %v2518_v47  ;;  %v2854_v42 = vadd.f32 %v7792_v5, %v2822_v58  ;;  %v7795_v44 = vpop.f32.mrf.mxu1  ;;  %v3064_v19 = vld [vmem:[#allocation2 + $0x40] sm:$0xff] }
 0x1db   : > { %v2820_v22 = vld [vmem:[#allocation2 + $0xc8] sm:$0xff]  ;;  %v7801_v26 = vpop.f32.mrf.mxu0 }
 0x1dc   : > { %2623 = vst.msk [vmem:[#allocation2 + $0xe8] sm:$0xff] %vm448_vm3, %v2591_v20  ;;  %2886 = vst.msk [vmem:[#allocation2 + $0xd8] sm:$0xff] %vm448_vm3, %v2854_v42  ;;  %v2852_v63 = vadd.f32 %v2820_v22, %v2767_v52  ;;  %v3090_v41 = vadd.f32 %v7801_v26, %v3058_v57  ;;  %v2780_v59 = vpop.f32.mrf.mxu1 }
 0x1dd   : > { %v2825_v8 = vld [vmem:[#allocation2 + $0xf0] sm:$0xff]  ;;  %v2929_v4 = vpop.f32.mrf.mxu0 }
 0x1de   : > { %2884 = vst.msk [vmem:[#allocation2 + $0xc8] sm:$0xff] %vm448_vm3, %v2852_v63  ;;  %3122 = vst.msk [vmem:[#allocation2 + $0x10] sm:$0xff] %vm448_vm3, %v3090_v41  ;;  %v2857_v46 = vadd.f32 %v7795_v44, %v2825_v8  ;;  %v3088_v51 = vadd.f32 %v3056_v1, %v2929_v4  ;;  %v7796_v29 = vpop.f32.mrf.mxu1  ;;  %v3067_v44 = vld [vmem:[#allocation2 + $0x58] sm:$0xff]  ;;  %v3065_v4 = vld [vmem:[#allocation2 + $0x48] sm:$0xff] }
 0x1df   : > { %v2823_v50 = vld [vmem:[#allocation2 + $0xe0] sm:$0xff]  ;;  %v7802_v10 = vpop.f32.mrf.mxu0 }
 0x1e0   : > { %2889 = vst.msk [vmem:[#allocation2 + $0xf0] sm:$0xff] %vm448_vm3, %v2857_v46  ;;  %3120 = vst.msk [vmem:[#allocation2] sm:$0xff] %vm448_vm3, %v3088_v51  ;;  %v2855_v0 = vadd.f32 %v2823_v50, %v2780_v59  ;;  %v3091_v24 = vadd.f32 %v7802_v10, %v3059_v13  ;;  %v2783_v38 = vpop.f32.mrf.mxu1 }
 0x1e1   : > { %v2826_v62 = vld [vmem:[#allocation2 + $0xf8] sm:$0xff]  ;;  %v2932_v48 = vpop.f32.mrf.mxu0 }
 0x1e2   : > { %2887 = vst.msk [vmem:[#allocation2 + $0xe0] sm:$0xff] %vm448_vm3, %v2855_v0  ;;  %3123 = vst.msk [vmem:[#allocation2 + $0x18] sm:$0xff] %vm448_vm3, %v3091_v24  ;;  %v2858_v30 = vadd.f32 %v7796_v29, %v2826_v62  ;;  %v3089_v40 = vadd.f32 %v3057_v61, %v2932_v48  ;;  %v3070_v24 = vld [vmem:[#allocation2 + $0x70] sm:$0xff] }
 0x1e3   : > { %v2824_v31 = vld [vmem:[#allocation2 + $0xe8] sm:$0xff]  ;;  %v7805_v14 = vpop.f32.mrf.mxu0 }
 0x1e4   : > { %2890 = vst.msk [vmem:[#allocation2 + $0xf8] sm:$0xff] %vm448_vm3, %v2858_v30  ;;  %3121 = vst.msk [vmem:[#allocation2 + $0x8] sm:$0xff] %vm448_vm3, %v3089_v40  ;;  %v2856_v9 = vadd.f32 %v2824_v31, %v2783_v38  ;;  %v3094_v45 = vadd.f32 %v7805_v14, %v3062_v3 }
 0x1e5   : > { %v2945_v16 = vpop.f32.mrf.mxu0  ;;  %v9197_v15 = vld [vmem:[#allocation2 + $0x10] sm:$0xff] }
 0x1e6   : > { %2888 = vst.msk [vmem:[#allocation2 + $0xe8] sm:$0xff] %vm448_vm3, %v2856_v9  ;;  %3126 = vst.msk [vmem:[#allocation2 + $0x30] sm:$0xff] %vm448_vm3, %v3094_v45  ;;  %v3092_v28 = vadd.f32 %v3060_v17, %v2945_v16  ;;  %v3068_v9 = vld [vmem:[#allocation2 + $0x60] sm:$0xff] }
 0x1e7   : > { %v9187_v6 = vld [vmem:[#allocation2] sm:$0x1]  ;;  %v7806_v37 = vpop.f32.mrf.mxu0 }
 0x1e8   : > { %v9191_v39 = vrot.slane %v9187_v6, %v9179_v21  ;;  %3124 = vst.msk [vmem:[#allocation2 + $0x20] sm:$0xff] %vm448_vm3, %v3092_v28  ;;  %v3095_v55 = vadd.f32 %v7806_v37, %v3063_v53  ;;  %v9194_v7 = vld [vmem:[#allocation2] sm:$0xff] }
 0x1e9   : > { %v2948_v23 = vpop.f32.mrf.mxu0  ;;  %v9199_v35 = vld [vmem:[#allocation2 + $0x18] sm:$0xff] }
 0x1ea   : > { %3127 = vst.msk [vmem:[#allocation2 + $0x38] sm:$0xff] %vm448_vm3, %v3095_v55  ;;  %v3093_v12 = vadd.f32 %v3061_v25, %v2948_v23  ;;  %v3189_v60 = vsub.f32 %v9194_v7, %v9191_v39  ;;  %v3191_v5 = vsub.f32 %v9197_v15, %v9191_v39  ;;  %v3192_v32 = vsub.f32 %v9199_v35, %v9191_v39 }
 0x1eb   : > { %v7809_v27 = vpop.f32.mrf.mxu0  ;;  %v9203_v54 = vld [vmem:[#allocation2 + $0x8] sm:$0xff] }
 0x1ec   : > { %3125 = vst.msk [vmem:[#allocation2 + $0x28] sm:$0xff] %vm448_vm3, %v3093_v12  ;;  %v3098_v2 = vadd.f32 %v7809_v27, %v3066_v34  ;;  %v3190_v49 = vsub.f32 %v9203_v54, %v9191_v39  ;;  %v3221_v52 = vsel %vm448_vm3, %v3189_v60, 0.0  ;;  %v3291_v58 = vmul.f32 %v3189_v60, %v3189_v60  ;;  %v3071_v12 = vld [vmem:[#allocation2 + $0x78] sm:$0xff] }
 0x1ed   : > { %v2961_v18 = vpop.f32.mrf.mxu0  ;;  %v3293_v57 = vmul.f32 %v3191_v5, %v3191_v5  ;;  %v9217_v63 = vld [vmem:[#allocation2 + $0x30] sm:$0xff]  ;;  %v3224_v59 = vsel %vm448_vm3, %v3191_v5, 0.0  ;;  %v3294_v46 = vmul.f32 %v3192_v32, %v3192_v32  ;;  %v3226_v50 = vsel %vm448_vm3, %v3192_v32, 0.0 }
 0x1ee   : > { %3130 = vst.msk [vmem:[#allocation2 + $0x50] sm:$0xff] %vm448_vm3, %v3098_v2  ;;  %v3096_v47 = vadd.f32 %v3064_v19, %v2961_v18  ;;  %v3222_v36 = vsel %vm448_vm3, %v3190_v49, 0.0  ;;  %v3292_v20 = vmul.f32 %v3190_v49, %v3190_v49  ;;  %v3323_v10 = vsel %vm448_vm3, %v3291_v58, 0.0 }
 0x1ef   : > { %v7810_v42 = vpop.f32.mrf.mxu0  ;;  %v9215_v22 = vld [vmem:[#allocation2 + $0x20] sm:$0xff]  ;;  %v3223_v26 = vadd.f32 %v3222_v36, %v3221_v52  ;;  %v3195_v62 = vsub.f32 %v9217_v63, %v9191_v39  ;;  %v3326_v38 = vsel %vm448_vm3, %v3293_v57, 0.0  ;;  %v3328_v17 = vsel %vm448_vm3, %v3294_v46, 0.0  ;;  %v3069_v52 = vld [vmem:[#allocation2 + $0x68] sm:$0xff] }
 0x1f0   : > { %3128 = vst.msk [vmem:[#allocation2 + $0x40] sm:$0xff] %vm448_vm3, %v3096_v47  ;;  %v3099_v41 = vadd.f32 %v7810_v42, %v3067_v44  ;;  %v3193_v56 = vsub.f32 %v9215_v22, %v9191_v39  ;;  %v3324_v51 = vsel %vm448_vm3, %v3292_v20, 0.0 }
 0x1f1   : > { %v2964_v8 = vpop.f32.mrf.mxu0  ;;  %v3225_v1 = vadd.f32 %v3224_v59, %v3223_v26  ;;  %v9227_v13 = vld [vmem:[#allocation2 + $0x38] sm:$0xff]  ;;  %v3325_v61 = vadd.f32 %v3324_v51, %v3323_v10  ;;  %v3297_v27 = vmul.f32 %v3195_v62, %v3195_v62  ;;  %v3232_v18 = vsel %vm448_vm3, %v3195_v62, 0.0  ;;  %v3074_v59 = vld [vmem:[#allocation2 + $0x90] sm:$0xff] }
 0x1f2   : > { %3131 = vst.msk [vmem:[#allocation2 + $0x58] sm:$0xff] %vm448_vm3, %v3099_v41  ;;  %v3097_v29 = vadd.f32 %v3065_v4, %v2964_v8  ;;  %v3228_v31 = vsel %vm448_vm3, %v3193_v56, 0.0  ;;  %v3295_v14 = vmul.f32 %v3193_v56, %v3193_v56  ;;  %v3196_v28 = vsub.f32 %v9227_v13, %v9191_v39 }
 0x1f3   : > { %v9229_v11 = vld [vmem:[#allocation2 + $0x28] sm:$0xff]  ;;  %v7813_v0 = vpop.f32.mrf.mxu0  ;;  %v3227_v48 = vadd.f32 %v3226_v50, %v3225_v1  ;;  %v3327_v16 = vadd.f32 %v3326_v38, %v3325_v61  ;;  %v3334_v1 = vsel %vm448_vm3, %v3297_v27, 0.0  ;;  %v3072_v38 = vld [vmem:[#allocation2 + $0x80] sm:$0xff] }
 0x1f4   : > { %3129 = vst.msk [vmem:[#allocation2 + $0x48] sm:$0xff] %vm448_vm3, %v3097_v29  ;;  %v3102_v30 = vadd.f32 %v7813_v0, %v3070_v24  ;;  %v3194_v40 = vsub.f32 %v9229_v11, %v9191_v39  ;;  %v3330_v19 = vsel %vm448_vm3, %v3295_v14, 0.0  ;;  %v3298_v20 = vmul.f32 %v3196_v28, %v3196_v28 }
 0x1f5   : > { %v2977_v3 = vpop.f32.mrf.mxu0  ;;  %v3229_v45 = vadd.f32 %v3228_v31, %v3227_v48  ;;  %v3329_v34 = vadd.f32 %v3328_v17, %v3327_v16  ;;  %v9245_v5 = vld [vmem:[#allocation2 + $0x50] sm:$0xff]  ;;  %v3234_v44 = vsel %vm448_vm3, %v3196_v28, 0.0 }
 0x1f6   : > { %3134 = vst.msk [vmem:[#allocation2 + $0x70] sm:$0xff] %vm448_vm3, %v3102_v30  ;;  %v3100_v37 = vadd.f32 %v3068_v9, %v2977_v3  ;;  %v3230_v53 = vsel %vm448_vm3, %v3194_v40, 0.0  ;;  %v3296_v55 = vmul.f32 %v3194_v40, %v3194_v40  ;;  %v3199_v26 = vsub.f32 %v9245_v5, %v9191_v39 }
 0x1f7   : > { %v9243_v23 = vld [vmem:[#allocation2 + $0x40] sm:$0xff]  ;;  %v7814_v25 = vpop.f32.mrf.mxu0  ;;  %v3231_v60 = vadd.f32 %v3230_v53, %v3229_v45  ;;  %v3331_v36 = vadd.f32 %v3330_v19, %v3329_v34  ;;  %v3336_v30 = vsel %vm448_vm3, %v3298_v20, 0.0 }
 0x1f8   : > { %v3197_v2 = vsub.f32 %v9243_v23, %v9191_v39  ;;  %3132 = vst.msk [vmem:[#allocation2 + $0x60] sm:$0xff] %vm448_vm3, %v3100_v37  ;;  %v3103_v49 = vadd.f32 %v7814_v25, %v3071_v12  ;;  %v3332_v58 = vsel %vm448_vm3, %v3296_v55, 0.0  ;;  %v3301_v40 = vmul.f32 %v3199_v26, %v3199_v26  ;;  %v3075_v37 = vld [vmem:[#allocation2 + $0x98] sm:$0xff] }
 0x1f9   : > { %v2980_v32 = vpop.f32.mrf.mxu0  ;;  %v3233_v47 = vadd.f32 %v3232_v18, %v3231_v60  ;;  %v9257_v57 = vld [vmem:[#allocation2 + $0x58] sm:$0xff]  ;;  %v3333_v4 = vadd.f32 %v3332_v58, %v3331_v36  ;;  %v3240_v16 = vsel %vm448_vm3, %v3199_v26, 0.0 }
 0x1fa   : > { %3135 = vst.msk [vmem:[#allocation2 + $0x78] sm:$0xff] %vm448_vm3, %v3103_v49  ;;  %v3101_v42 = vadd.f32 %v3069_v52, %v2980_v32  ;;  %v3299_v46 = vmul.f32 %v3197_v2, %v3197_v2  ;;  %v3236_v50 = vsel %vm448_vm3, %v3197_v2, 0.0  ;;  %v3200_v62 = vsub.f32 %v9257_v57, %v9191_v39  ;;  %v3073_v49 = vld [vmem:[#allocation2 + $0x88] sm:$0xff] }
 0x1fb   : > { %v9259_v41 = vld [vmem:[#allocation2 + $0x48] sm:$0xff]  ;;  %v7817_v56 = vpop.f32.mrf.mxu0  ;;  %v3235_v8 = vadd.f32 %v3234_v44, %v3233_v47  ;;  %v3335_v24 = vadd.f32 %v3334_v1, %v3333_v4  ;;  %v3342_v18 = vsel %vm448_vm3, %v3301_v40, 0.0 }
 0x1fc   : > { %v3198_v51 = vsub.f32 %v9259_v41, %v9191_v39  ;;  %3133 = vst.msk [vmem:[#allocation2 + $0x68] sm:$0xff] %vm448_vm3, %v3101_v42  ;;  %v3106_v29 = vadd.f32 %v7817_v56, %v3074_v59  ;;  %v3338_v53 = vsel %vm448_vm3, %v3299_v46, 0.0  ;;  %v3242_v34 = vsel %vm448_vm3, %v3200_v62, 0.0  ;;  %v3078_v56 = vld [vmem:[#allocation2 + $0xb0] sm:$0xff] }
 0x1fd   : > { %v2993_v10 = vpop.f32.mrf.mxu0  ;;  %v3237_v0 = vadd.f32 %v3236_v50, %v3235_v8  ;;  %v3337_v45 = vadd.f32 %v3336_v30, %v3335_v24  ;;  %v9278_v55 = vld [vmem:[#allocation2 + $0x70] sm:$0xff]  ;;  %v3302_v2 = vmul.f32 %v3200_v62, %v3200_v62  ;;  %v3079_v62 = vld [vmem:[#allocation2 + $0xb8] sm:$0xff] }
 0x1fe   : > { %v3238_v48 = vsel %vm448_vm3, %v3198_v51, 0.0  ;;  %v3300_v61 = vmul.f32 %v3198_v51, %v3198_v51  ;;  %3138 = vst.msk [vmem:[#allocation2 + $0x90] sm:$0xff] %vm448_vm3, %v3106_v29  ;;  %v3104_v14 = vadd.f32 %v3072_v38, %v2993_v10  ;;  %v3203_v20 = vsub.f32 %v9278_v55, %v9191_v39  ;;  %v3076_v10 = vld [vmem:[#allocation2 + $0xa0] sm:$0xff] }
 0x1ff   : > { %v9271_v31 = vld [vmem:[#allocation2 + $0x60] sm:$0xff]  ;;  %v7818_v3 = vpop.f32.mrf.mxu0  ;;  %v3239_v9 = vadd.f32 %v3238_v48, %v3237_v0  ;;  %v3339_v27 = vadd.f32 %v3338_v53, %v3337_v45  ;;  %v3344_v46 = vsel %vm448_vm3, %v3302_v2, 0.0 }
 0x200   : > { %v3340_v17 = vsel %vm448_vm3, %v3300_v61, 0.0  ;;  %v3201_v28 = vsub.f32 %v9271_v31, %v9191_v39  ;;  %3136 = vst.msk [vmem:[#allocation2 + $0x80] sm:$0xff] %vm448_vm3, %v3104_v14  ;;  %v3107_v25 = vadd.f32 %v7818_v3, %v3075_v37  ;;  %v3248_v38 = vsel %vm448_vm3, %v3203_v20, 0.0 }
 0x201   : > { %v2996_v12 = vpop.f32.mrf.mxu0  ;;  %v3241_v60 = vadd.f32 %v3240_v16, %v3239_v9  ;;  %v9283_v19 = vld [vmem:[#allocation2 + $0x78] sm:$0xff]  ;;  %v3341_v58 = vadd.f32 %v3340_v17, %v3339_v27  ;;  %v3305_v30 = vmul.f32 %v3203_v20, %v3203_v20  ;;  %v3077_v17 = vld [vmem:[#allocation2 + $0xa8] sm:$0xff] }
 0x202   : > { %3139 = vst.msk [vmem:[#allocation2 + $0x98] sm:$0xff] %vm448_vm3, %v3107_v25  ;;  %v3105_v52 = vadd.f32 %v3073_v49, %v2996_v12  ;;  %v3244_v42 = vsel %vm448_vm3, %v3201_v28, 0.0  ;;  %v3303_v44 = vmul.f32 %v3201_v28, %v3201_v28  ;;  %v3204_v51 = vsub.f32 %v9283_v19, %v9191_v39 }
 0x203   : > { %v9285_v32 = vld [vmem:[#allocation2 + $0x68] sm:$0xff]  ;;  %v7821_v47 = vpop.f32.mrf.mxu0  ;;  %v3243_v36 = vadd.f32 %v3242_v34, %v3241_v60  ;;  %v3343_v1 = vadd.f32 %v3342_v18, %v3341_v58  ;;  %v3082_v34 = vld [vmem:[#allocation2 + $0xd0] sm:$0xff]  ;;  %v3350_v49 = vsel %vm448_vm3, %v3305_v30, 0.0 }
 0x204   : > { %v3202_v26 = vsub.f32 %v9285_v32, %v9191_v39  ;;  %3137 = vst.msk [vmem:[#allocation2 + $0x88] sm:$0xff] %vm448_vm3, %v3105_v52  ;;  %v3110_v59 = vadd.f32 %v7821_v47, %v3078_v56  ;;  %v3346_v40 = vsel %vm448_vm3, %v3303_v44, 0.0  ;;  %v3250_v53 = vsel %vm448_vm3, %v3204_v51, 0.0  ;;  %v3080_v56 = vld [vmem:[#allocation2 + $0xc0] sm:$0xff] }
 0x205   : > { %v3009_v8 = vpop.f32.mrf.mxu0  ;;  %v3245_v4 = vadd.f32 %v3244_v42, %v3243_v36  ;;  %v3345_v61 = vadd.f32 %v3344_v46, %v3343_v1  ;;  %v9308_v25 = vld [vmem:[#allocation2 + $0x90] sm:$0xff]  ;;  %v3306_v60 = vmul.f32 %v3204_v51, %v3204_v51 }
 0x206   : > { %v3246_v29 = vsel %vm448_vm3, %v3202_v26, 0.0  ;;  %v3304_v50 = vmul.f32 %v3202_v26, %v3202_v26  ;;  %3142 = vst.msk [vmem:[#allocation2 + $0xb0] sm:$0xff] %vm448_vm3, %v3110_v59  ;;  %v3108_v0 = vadd.f32 %v3076_v10, %v3009_v8  ;;  %v3207_v36 = vsub.f32 %v9308_v25, %v9191_v39 }
 0x207   : > { %v7822_v24 = vpop.f32.mrf.mxu0  ;;  %v3247_v48 = vadd.f32 %v3246_v29, %v3245_v4  ;;  %v9301_v14 = vld [vmem:[#allocation2 + $0x80] sm:$0xff]  ;;  %v3347_v37 = vadd.f32 %v3346_v40, %v3345_v61  ;;  %v3352_v1 = vsel %vm448_vm3, %v3306_v60, 0.0  ;;  %v3086_v60 = vld [vmem:[#allocation2 + $0xf0] sm:$0xff] }
 0x208   : > { %v3111_v3 = vadd.f32 %v7822_v24, %v3079_v62  ;;  %v3348_v9 = vsel %vm448_vm3, %v3304_v50, 0.0  ;;  %v3205_v45 = vsub.f32 %v9301_v14, %v9191_v39  ;;  %3140 = vst.msk [vmem:[#allocation2 + $0xa0] sm:$0xff] %vm448_vm3, %v3108_v0  ;;  %v3083_v50 = vld [vmem:[#allocation2 + $0xd8] sm:$0xff]  ;;  %v3256_v61 = vsel %vm448_vm3, %v3207_v36, 0.0 }
 0x209   : > { %v3012_v16 = vpop.f32.mrf.mxu0  ;;  %v3249_v28 = vadd.f32 %v3248_v38, %v3247_v48  ;;  %v3349_v47 = vadd.f32 %v3348_v9, %v3347_v37  ;;  %v9318_v42 = vld [vmem:[#allocation2 + $0x98] sm:$0xff]  ;;  %v3309_v38 = vmul.f32 %v3207_v36, %v3207_v36  ;;  %v3081_v9 = vld [vmem:[#allocation2 + $0xc8] sm:$0xff] }
 0x20a   : > { %3143 = vst.msk [vmem:[#allocation2 + $0xb8] sm:$0xff] %vm448_vm3, %v3111_v3  ;;  %v3109_v12 = vadd.f32 %v3077_v17, %v3012_v16  ;;  %v3252_v58 = vsel %vm448_vm3, %v3205_v45, 0.0  ;;  %v3307_v20 = vmul.f32 %v3205_v45, %v3205_v45  ;;  %v3208_v10 = vsub.f32 %v9318_v42, %v9191_v39 }
 0x20b   : > { %v7825_v27 = vpop.f32.mrf.mxu0  ;;  %v3251_v2 = vadd.f32 %v3250_v53, %v3249_v28  ;;  %v9312_v18 = vld [vmem:[#allocation2 + $0x88] sm:$0xff]  ;;  %v3351_v4 = vadd.f32 %v3350_v49, %v3349_v47 }
 0x20c   : > { %3141 = vst.msk [vmem:[#allocation2 + $0xa8] sm:$0xff] %vm448_vm3, %v3109_v12  ;;  %v3114_v52 = vadd.f32 %v7825_v27, %v3082_v34  ;;  %v3206_v44 = vsub.f32 %v9312_v18, %v9191_v39  ;;  %v3354_v30 = vsel %vm448_vm3, %v3307_v20, 0.0  ;;  %v3258_v27 = vsel %vm448_vm3, %v3208_v10, 0.0 }
 0x20d   : > { %v3025_v26 = vpop.f32.mrf.mxu0  ;;  %v3253_v8 = vadd.f32 %v3252_v58, %v3251_v2  ;;  %v3353_v48 = vadd.f32 %v3352_v1, %v3351_v4  ;;  %v9333_v45 = vld [vmem:[#allocation2 + $0xb0] sm:$0xff]  ;;  %v3310_v34 = vmul.f32 %v3208_v10, %v3208_v10  ;;  %v3084_v4 = vld [vmem:[#allocation2 + $0xe0] sm:$0xff] }
 0x20e   : > { %3146 = vst.msk [vmem:[#allocation2 + $0xd0] sm:$0xff] %vm448_vm3, %v3114_v52  ;;  %v3112_v59 = vadd.f32 %v3080_v56, %v3025_v26  ;;  %v3254_v46 = vsel %vm448_vm3, %v3206_v44, 0.0  ;;  %v3308_v51 = vmul.f32 %v3206_v44, %v3206_v44  ;;  %v3358_v52 = vsel %vm448_vm3, %v3309_v38, 0.0 }
 0x20f   : > { %v7826_v29 = vpop.f32.mrf.mxu0  ;;  %v9327_v0 = vld [vmem:[#allocation2 + $0xa0] sm:$0xff]  ;;  %v3255_v62 = vadd.f32 %v3254_v46, %v3253_v8  ;;  %v3355_v37 = vadd.f32 %v3354_v30, %v3353_v48  ;;  %v3211_v47 = vsub.f32 %v9333_v45, %v9191_v39  ;;  %v3360_v10 = vsel %vm448_vm3, %v3310_v34, 0.0 }
 0x210   : > { %3144 = vst.msk [vmem:[#allocation2 + $0xc0] sm:$0xff] %vm448_vm3, %v3112_v59  ;;  %v3115_v24 = vadd.f32 %v7826_v29, %v3083_v50  ;;  %v3356_v40 = vsel %vm448_vm3, %v3308_v51, 0.0  ;;  %v3209_v16 = vsub.f32 %v9327_v0, %v9191_v39 }
 0x211   : > { %v3028_v3 = vpop.f32.mrf.mxu0  ;;  %v3257_v28 = vadd.f32 %v3256_v61, %v3255_v62  ;;  %v9347_v36 = vld [vmem:[#allocation2 + $0xb8] sm:$0xff]  ;;  %v3357_v44 = vadd.f32 %v3356_v40, %v3355_v37  ;;  %v3264_v48 = vsel %vm448_vm3, %v3211_v47, 0.0 }
 0x212   : > { %3147 = vst.msk [vmem:[#allocation2 + $0xd8] sm:$0xff] %vm448_vm3, %v3115_v24  ;;  %v3113_v17 = vadd.f32 %v3081_v9, %v3028_v3  ;;  %v3260_v26 = vsel %vm448_vm3, %v3209_v16, 0.0  ;;  %v3311_v56 = vmul.f32 %v3209_v16, %v3209_v16  ;;  %v3212_v24 = vsub.f32 %v9347_v36, %v9191_v39  ;;  %v3087_v62 = vld [vmem:[#allocation2 + $0xf8] sm:$0xff] }
 0x213   : > { %v9338_v53 = vld [vmem:[#allocation2 + $0xa8] sm:$0xff]  ;;  %v7829_v12 = vpop.f32.mrf.mxu0  ;;  %v3259_v20 = vadd.f32 %v3258_v27, %v3257_v28  ;;  %v3359_v50 = vadd.f32 %v3358_v52, %v3357_v44  ;;  %v3313_v3 = vmul.f32 %v3211_v47, %v3211_v47 }
 0x214   : > { %v3210_v2 = vsub.f32 %v9338_v53, %v9191_v39  ;;  %3145 = vst.msk [vmem:[#allocation2 + $0xc8] sm:$0xff] %vm448_vm3, %v3113_v17  ;;  %v3118_v49 = vadd.f32 %v7829_v12, %v3086_v60  ;;  %v3362_v9 = vsel %vm448_vm3, %v3311_v56, 0.0  ;;  %v3085_v28 = vld [vmem:[#allocation2 + $0xe8] sm:$0xff]  ;;  %v3314_v52 = vmul.f32 %v3212_v24, %v3212_v24 }
 0x215   : > { %v3041_v58 = vpop.f32.mrf.mxu0  ;;  %v3261_v29 = vadd.f32 %v3260_v26, %v3259_v20  ;;  %v3361_v40 = vadd.f32 %v3360_v10, %v3359_v50  ;;  %v9363_v37 = vld [vmem:[#allocation2 + $0xd0] sm:$0xff]  ;;  %v3366_v26 = vsel %vm448_vm3, %v3313_v3, 0.0 }
 0x216   : > { %v3262_v59 = vsel %vm448_vm3, %v3210_v2, 0.0  ;;  %v3312_v8 = vmul.f32 %v3210_v2, %v3210_v2  ;;  %3150 = vst.msk [vmem:[#allocation2 + $0xf0] sm:$0xff] %vm448_vm3, %v3118_v49  ;;  %v3116_v46 = vadd.f32 %v3084_v4, %v3041_v58  ;;  %v9371_v2 = vld [vmem:[%s10938_s2 + $0x4] ss:$0 sps:$4 sm:$0xcc]   ;;  %v3266_v49 = vsel %vm448_vm3, %v3212_v24, 0.0 }
 0x217   : > { %v9352_v1 = vld [vmem:[#allocation2 + $0xc0] sm:$0xff]  ;;  %v7830_v51 = vpop.f32.mrf.mxu0  ;;  %v3263_v30 = vadd.f32 %v3262_v59, %v3261_v29  ;;  %v3363_v34 = vadd.f32 %v3362_v9, %v3361_v40  ;;  %v4843_v44 = vrot.slane %v9371_v2, 2  ;;  %v3215_v56 = vsub.f32 %v9363_v37, %v9191_v39 }
 0x218   : > { %3148 = vst.msk [vmem:[#allocation2 + $0xe0] sm:$0xff] %vm448_vm3, %v3116_v46  ;;  %v3119_v61 = vadd.f32 %v7830_v51, %v3087_v62  ;;  %v3364_v16 = vsel %vm448_vm3, %v3312_v8, 0.0  ;;  %v3213_v17 = vsub.f32 %v9352_v1, %v9191_v39  ;;  %v3368_v10 = vsel %vm448_vm3, %v3314_v52, 0.0 }
 0x219   : > { %v3044_v38 = vpop.f32.mrf.mxu0  ;;  %v3265_v27 = vadd.f32 %v3264_v48, %v3263_v30  ;;  %v3365_v20 = vadd.f32 %v3364_v16, %v3363_v34  ;;  %v9382_v8 = vld [vmem:[#allocation2 + $0xd8] sm:$0xff]  ;;  %8149 = vmatprep.subr.msk.bf16.mxu0 %vm494_vm0, %v4843_v44  ;;  %v3317_v30 = vmul.f32 %v3215_v56, %v3215_v56 }
 0x21a   : > { %3151 = vst.msk [vmem:[#allocation2 + $0xf8] sm:$0xff] %vm448_vm3, %v3119_v61  ;;  %v3117_v60 = vadd.f32 %v3085_v28, %v3044_v38  ;;  %v3268_v59 = vsel %vm448_vm3, %v3213_v17, 0.0  ;;  %v3315_v46 = vmul.f32 %v3213_v17, %v3213_v17  ;;  %v3216_v62 = vsub.f32 %v9382_v8, %v9191_v39 }
 0x21b   : > { %v9365_v12 = vld [vmem:[#allocation2 + $0xc8] sm:$0xff]  ;;  %v3267_v58 = vadd.f32 %v3266_v49, %v3265_v27  ;;  %v3367_v50 = vadd.f32 %v3366_v26, %v3365_v20  ;;  %v3272_v38 = vsel %vm448_vm3, %v3215_v56, 0.0  ;;  %v3374_v52 = vsel %vm448_vm3, %v3317_v30, 0.0 }
 0x21c   : > { %v3214_v47 = vsub.f32 %v9365_v12, %v9191_v39  ;;  %3149 = vst.msk [vmem:[#allocation2 + $0xe8] sm:$0xff] %vm448_vm3, %v3117_v60  ;;  %v3370_v40 = vsel %vm448_vm3, %v3315_v46, 0.0  ;;  %v3274_v27 = vsel %vm448_vm3, %v3216_v62, 0.0  ;;  %v3318_v34 = vmul.f32 %v3216_v62, %v3216_v62 }
 0x21d   : > { %v3269_v29 = vadd.f32 %v3268_v59, %v3267_v58  ;;  %v3369_v61 = vadd.f32 %v3368_v10, %v3367_v50  ;;  %v9396_v9 = vld [vmem:[#allocation2 + $0xf0] sm:$0xff] }
 0x21e   : > { %v3270_v4 = vsel %vm448_vm3, %v3214_v47, 0.0  ;;  %v3316_v51 = vmul.f32 %v3214_v47, %v3214_v47  ;;  %v3219_v47 = vsub.f32 %v9396_v9, %v9191_v39  ;;  %v3376_v50 = vsel %vm448_vm3, %v3318_v34, 0.0 }
 0x21f   : > { %v9389_v24 = vld [vmem:[#allocation2 + $0xe0] sm:$0xff]  ;;  %v3271_v48 = vadd.f32 %v3270_v4, %v3269_v29  ;;  %v3371_v60 = vadd.f32 %v3370_v40, %v3369_v61 }
 0x220   : > { %v3372_v3 = vsel %vm448_vm3, %v3316_v51, 0.0  ;;  %v3217_v16 = vsub.f32 %v9389_v24, %v9191_v39  ;;  %v3280_v61 = vsel %vm448_vm3, %v3219_v47, 0.0 }
 0x221   : > { %v3273_v17 = vadd.f32 %v3272_v38, %v3271_v48  ;;  %v9408_v58 = vld [vmem:[#allocation2 + $0xf8] sm:$0xff]  ;;  %v3373_v26 = vadd.f32 %v3372_v3, %v3371_v60  ;;  %v3321_v38 = vmul.f32 %v3219_v47, %v3219_v47 }
 0x222   : > { %v3276_v56 = vsel %vm448_vm3, %v3217_v16, 0.0  ;;  %v3319_v59 = vmul.f32 %v3217_v16, %v3217_v16  ;;  %v3220_v10 = vsub.f32 %v9408_v58, %v9191_v39 }
 0x223   : > { %v9400_v28 = vld [vmem:[#allocation2 + $0xe8] sm:$0xff]  ;;  %v3275_v20 = vadd.f32 %v3274_v27, %v3273_v17  ;;  %v3375_v29 = vadd.f32 %v3374_v52, %v3373_v26  ;;  %v3382_v34 = vsel %vm448_vm3, %v3321_v38, 0.0 }
 0x224   : > { %v3218_v49 = vsub.f32 %v9400_v28, %v9191_v39  ;;  %v3378_v30 = vsel %vm448_vm3, %v3319_v59, 0.0  ;;  %v3282_v17 = vsel %vm448_vm3, %v3220_v10, 0.0  ;;  %v3322_v60 = vmul.f32 %v3220_v10, %v3220_v10 }
 0x225   : > { %v3277_v51 = vadd.f32 %v3276_v56, %v3275_v20  ;;  %v3377_v48 = vadd.f32 %v3376_v50, %v3375_v29 }
 0x226   : > { %v3278_v4 = vsel %vm448_vm3, %v3218_v49, 0.0  ;;  %v3320_v46 = vmul.f32 %v3218_v49, %v3218_v49  ;;  %v3384_v20 = vsel %vm448_vm3, %v3322_v60, 0.0 }
 0x227   : > { %v3279_v62 = vadd.f32 %v3278_v4, %v3277_v51  ;;  %v3379_v16 = vadd.f32 %v3378_v30, %v3377_v48 }
 0x228   : > { %v3380_v40 = vsel %vm448_vm3, %v3320_v46, 0.0 }
 0x229   : > { %v3281_v3 = vadd.f32 %v3280_v61, %v3279_v62  ;;  %v3381_v49 = vadd.f32 %v3380_v40, %v3379_v16 }
 0x22b   : > { %v3283_v27 = vadd.f32 %v3282_v17, %v3281_v3  ;;  %v3383_v39 = vadd.f32 %v3382_v34, %v3381_v49  ;;  %v9432_v49 = vsel %vm494_vm0, %v4843_v44, 0 }
 0x22d   : > { %v3284_v52 = vrot.slane %v3283_v27, 4  ;;  %v3385_v56 = vadd.f32 %v3384_v20, %v3383_v39 }
 0x22f   : > { %v3285_v26 = vadd.f32 %v3284_v52, %v3283_v27  ;;  %v3386_v4 = vrot.slane %v3385_v56, 4  ;;  %v9427_v27 = vsel %vm494_vm0, %v9177_v43, 0 }
 0x231   : > { %v3286_v47 = vrot.slane %v3285_v26, 2  ;;  %v3387_v51 = vadd.f32 %v3386_v4, %v3385_v56 }
 0x233   : > { %v3287_v59 = vadd.f32 %v3286_v47, %v3285_v26  ;;  %v3388_v29 = vrot.slane %v3387_v51, 2 }
 0x235   : > { %v3288_v46 = vrot.slane %v3287_v59, 1  ;;  %v3389_v62 = vadd.f32 %v3388_v29, %v3387_v51 }
 0x237   : > { %v3289_v50 = vadd.f32 %v3288_v46, %v3287_v59  ;;  %v3390_v48 = vrot.slane %v3389_v62, 1 }
 0x239   : > { %v3393_v10 = vmul.f32 0.00390625, %v3289_v50  ;;  %v3391_v61 = vadd.f32 %v3390_v48, %v3389_v62 }
 0x23b   : > { %v3395_v30 = vmul.f32 %v3393_v10, %v3393_v10  ;;  %v3394_v40 = vmul.f32 0.00390625, %v3391_v61  ;;  %v3398_v17 = vadd.f32 %v3393_v10, %v9187_v6 }
 0x23d   : > { %v3396_v38 = vsub.f32 %v3394_v40, %v3395_v30  ;;  %v9423_v60 = vrot.slane %v3398_v17, %v9179_v21 }
 0x23f   : > { %v3397_v3 = vmax.f32 %v3396_v38, 0.0  ;;  %v3407_v34 = vsub.f32 %v9197_v15, %v9423_v60  ;;  %v3408_v52 = vsub.f32 %v9199_v35, %v9423_v60  ;;  %v3405_v6 = vsub.f32 %v9194_v7, %v9423_v60 }
 0x240   : > { %v3406_v39 = vsub.f32 %v9203_v54, %v9423_v60  ;;  %v3409_v43 = vsub.f32 %v9215_v22, %v9423_v60  ;;  %v3410_v2 = vsub.f32 %v9229_v11, %v9423_v60  ;;  %v3411_v44 = vsub.f32 %v9217_v63, %v9423_v60 }
 0x241   : > { %v3399_v16 = vadd.f32 1e-05, %v3397_v3  ;;  %v3412_v15 = vsub.f32 %v9227_v13, %v9423_v60  ;;  %v3413_v35 = vsub.f32 %v9243_v23, %v9423_v60  ;;  %v3414_v7 = vsub.f32 %v9259_v41, %v9423_v60 }
 0x242   : > { %v3415_v54 = vsub.f32 %v9245_v5, %v9423_v60  ;;  %v3416_v22 = vsub.f32 %v9257_v57, %v9423_v60  ;;  %v3417_v11 = vsub.f32 %v9271_v31, %v9423_v60  ;;  %v3418_v63 = vsub.f32 %v9285_v32, %v9423_v60 }
 0x243   : > { %8171 = vrsqrt.f32 %v3399_v16  ;;  %v3419_v13 = vsub.f32 %v9278_v55, %v9423_v60  ;;  %v3420_v23 = vsub.f32 %v9283_v19, %v9423_v60 }
 0x250   : > { %v9482_v59 = vpop.eup %8171 }
 0x251   : > { %v3439_v62 = vmul.f32 %v9482_v59, %v3407_v34  ;;  %v3440_v48 = vmul.f32 %v9482_v59, %v3408_v52  ;;  %v3437_v10 = vmul.f32 %v9482_v59, %v3405_v6  ;;  %v3438_v61 = vmul.f32 %v9482_v59, %v3406_v39 }
 0x252   : > { %v3441_v30 = vmul.f32 %v9482_v59, %v3409_v43  ;;  %v3442_v40 = vmul.f32 %v9482_v59, %v3410_v2  ;;  %v3443_v38 = vmul.f32 %v9482_v59, %v3411_v44  ;;  %v3444_v3 = vmul.f32 %v9482_v59, %v3412_v15 }
 0x253   : > { %v3471_v16 = vmax.f32 %v3439_v62, 0.0  ;;  %v3472_v17 = vmax.f32 %v3440_v48, 0.0  ;;  %v3469_v29 = vmax.f32 %v3437_v10, 0.0  ;;  %v3470_v50 = vmax.f32 %v3438_v61, 0.0 }
 0x254   : > { %v3473_v46 = vmax.f32 %v3441_v30, 0.0  ;;  %v3474_v34 = vmax.f32 %v3442_v40, 0.0  ;;  %v3475_v51 = vmax.f32 %v3443_v38, 0.0  ;;  %v3476_v52 = vmax.f32 %v3444_v3, 0.0 }
 0x255   : > { %v3502_v4 = vpack.c.bf16 %v3472_v17, %v3471_v16  ;;  %v3501_v6 = vpack.c.bf16 %v3470_v50, %v3469_v29  ;;  %v3445_v39 = vmul.f32 %v9482_v59, %v3413_v35  ;;  %v3446_v43 = vmul.f32 %v9482_v59, %v3414_v7 }
 0x256   : > { %v3503_v47 = vpack.c.bf16 %v3474_v34, %v3473_v46  ;;  %v3504_v2 = vpack.c.bf16 %v3476_v52, %v3475_v51  ;;  %v9503_v44 = vmul.f32 %v9482_v59, %v3415_v54  ;;  %v9506_v15 = vmul.f32 %v9482_v59, %v3416_v22 }
 0x257   : > { %v3518_v62 = vshrl.u32 %v3502_v4, 16  ;;  %v3582_v48 = vshll.u32 %v3502_v4, 16  ;;  %v3521_v10 = vshrl.u32 %v3501_v6, 16  ;;  %v3586_v61 = vshll.u32 %v3501_v6, 16 }
 0x258   : > { %v3524_v30 = vshrl.u32 %v3503_v47, 16  ;;  %v3590_v40 = vshll.u32 %v3503_v47, 16  ;;  %v3527_v38 = vshrl.u32 %v3504_v2, 16  ;;  %v3594_v29 = vshll.u32 %v3504_v2, 16 }
 0x259   : > { %v3581_v50 = vrot.slane %v3518_v62, 7  ;;  %v3585_v35 = vrot.slane %v3521_v10, 7  ;;  %v3678_v3 = vrot.slane %v3586_v61, 7  ;;  %v3677_v7 = vrot.slane %v3582_v48, 7 }
 0x25a   : > { %v3589_v46 = vrot.slane %v3524_v30, 7  ;;  %v3593_v51 = vrot.slane %v3527_v38, 7  ;;  %v3679_v16 = vrot.slane %v3590_v40, 7  ;;  %v3477_v54 = vmax.f32 %v3445_v39, 0.0 }
 0x25b   : > { %v3584_v17 = vor.u32 %v3582_v48, %v3581_v50  ;;  %v3588_v34 = vor.u32 %v3586_v61, %v3585_v35  ;;  %v9510_v22 = vsel %vm8252_vm4, %v3581_v50, %v3677_v7  ;;  %v9514_v4 = vsel %vm8252_vm4, %v3585_v35, %v3678_v3 }
 0x25c   : > { %v3990_v47 = vshll.u32 %v9510_v22, 16  ;;  %v4001_v52 = vshll.u32 %v9514_v4, 16  ;;  %v3592_v6 = vor.u32 %v3590_v40, %v3589_v46  ;;  %v3596_v2 = vor.u32 %v3594_v29, %v3593_v51 }
 0x25d   : > { %v9520_v56 = vsel %vm8252_vm4, %v3518_v62, %v3584_v17  ;;  %v9524_v39 = vsel %vm8252_vm4, %v3521_v10, %v3588_v34  ;;  %v9528_v48 = vsel %vm8252_vm4, %v3589_v46, %v3679_v16  ;;  %v3478_v61 = vmax.f32 %v3446_v43, 0.0  ;;  %v9539_v10 = vld [vmem:[%s10938_s2 + $0x8] sm:$0x3] }
 0x25e   : > { %7833 = vmatprep.mubr.msk.bf16.mxu1 %vm448_vm3, %v9520_v56  ;;  %v3994_v50 = vshrl.u32 %v9524_v39, 16  ;;  %v3996_v40 = vshll.u32 %v9524_v39, 16  ;;  %v3983_v35 = vshrl.u32 %v9520_v56, 16  ;;  %v3985_v62 = vshll.u32 %v9520_v56, 16 }
 0x25f   : > { %7834 = vmatmul.mubr.msk.bf16.vlgmr.msra.gmra.mxu1 %vm448_vm3, %v9524_v39  ;;  %v3992_v43 = vrot.slane %v3990_v47, 1  ;;  %v4003_v3 = vrot.slane %v4001_v52, 1  ;;  %v9545_v7 = vsel %vm8252_vm4, %v3524_v30, %v3592_v6  ;;  %v9549_v46 = vsel %vm8252_vm4, %v3527_v38, %v3596_v2 }
 0x260   : > { %7900 = vmatpush3.bf16.msra.mxu1 %v9427_v27  ;;  %7837 = vmatprep.mubr.msk.bf16.mxu1 %vm448_vm3, %v9520_v56  ;;  %v3987_v16 = vrot.slane %v3985_v62, 1  ;;  %v3998_v17 = vrot.slane %v3996_v40, 1  ;;  %v4005_v34 = vshrl.u32 %v9545_v7, 16  ;;  %v4007_v47 = vshll.u32 %v9545_v7, 16 }
 0x261   : > { %v4012_v52 = vshll.u32 %v9528_v48, 16  ;;  %v3505_v26 = vpack.c.bf16 %v3478_v61, %v3477_v54  ;;  %v3680_v30 = vrot.slane %v3594_v29, 7  ;;  %v4016_v6 = vshrl.u32 %v9549_v46, 16  ;;  %8150 = vmatprep.subr.msk.bf16.mxu1 %vm494_vm0, %v9539_v10 }
 0x262   : > { %v3988_v38 = vor.u32 %v3987_v16, %v3983_v35  ;;  %v3999_v27 = vor.u32 %v3998_v17, %v3994_v50  ;;  %v4009_v2 = vrot.slane %v4007_v47, 1  ;;  %v4018_v20 = vshll.u32 %v9549_v46, 16 }
 0x263   : > { %v4014_v62 = vrot.slane %v4012_v52, 1  ;;  %v3530_v40 = vshrl.u32 %v3505_v26, 16  ;;  %v3598_v57 = vshll.u32 %v3505_v26, 16  ;;  %v9563_v5 = vsel %vm8252_vm4, %v3593_v51, %v3680_v30 }
 0x264   : > { %v9566_v54 = vsel %vm691_vm5, %v3988_v38, %v3992_v43  ;;  %v9569_v29 = vsel %vm691_vm5, %v3999_v27, %v4003_v3  ;;  %v4010_v61 = vor.u32 %v4009_v2, %v4005_v34  ;;  %v4020_v41 = vrot.slane %v4018_v20, 1 }
 0x265   : > { %7867 = vmatprep.mubr.msk.bf16.mxu0 %vm448_vm3, %v9566_v54  ;;  %v3597_v50 = vrot.slane %v3530_v40, 7  ;;  %v4023_v35 = vshll.u32 %v9563_v5, 16  ;;  %v3479_v26 = vmax.f32 %v9503_v44, 0.0  ;;  %v3480_v16 = vmax.f32 %v9506_v15, 0.0 }
 0x266   : > { %7868 = vmatmul.mubr.msk.bf16.vlgmr.msra.gmra.mxu0 %vm448_vm3, %v9569_v29  ;;  %v9579_v51 = vsel %vm691_vm5, %v4010_v61, %v4014_v62  ;;  %v4021_v43 = vor.u32 %v4020_v41, %v4016_v6  ;;  %v3681_v3 = vrot.slane %v3598_v57, 7  ;;  %v3449_v20 = vmul.f32 %v9482_v59, %v3417_v11 }
 0x267   : > { %7838 = vmatmul.mubr.msk.bf16.gmra.mxu1 %vm448_vm3, %v9545_v7  ;;  %7871 = vmatprep.mubr.msk.bf16.mxu0 %vm448_vm3, %v9566_v54  ;;  %v3600_v44 = vor.u32 %v3598_v57, %v3597_v50  ;;  %v4025_v15 = vrot.slane %v4023_v35, 1  ;;  %v3506_v17 = vpack.c.bf16 %v3480_v16, %v3479_v26  ;;  %v3450_v41 = vmul.f32 %v9482_v59, %v3418_v63 }
 0x268   : > { %7841 = vmatprep.mubr.msk.bf16.mxu1 %vm448_vm3, %v9549_v46  ;;  %v9597_v31 = vsel %vm8252_vm4, %v3597_v50, %v3681_v3  ;;  %v3481_v11 = vmax.f32 %v3449_v20, 0.0  ;;  %v3451_v57 = vmul.f32 %v9482_v59, %v3419_v13  ;;  %v3452_v32 = vmul.f32 %v9482_v59, %v3420_v23  ;;  %7934 = vmatpush3.bf16.msra.mxu0 %v9432_v49 }
 0x269   : > { %v9610_v63 = vsel %vm8252_vm4, %v3530_v40, %v3600_v44  ;;  %v9613_v34 = vsel %vm691_vm5, %v4021_v43, %v4025_v15  ;;  %v3533_v47 = vshrl.u32 %v3506_v17, 16  ;;  %v3602_v52 = vshll.u32 %v3506_v17, 16 }
 0x26a   : > { %v4027_v55 = vshrl.u32 %v9610_v63, 16  ;;  %v4029_v13 = vshll.u32 %v9610_v63, 16  ;;  %v4034_v30 = vshll.u32 %v9597_v31, 16  ;;  %v3482_v19 = vmax.f32 %v3450_v41, 0.0 }
 0x26b   : > { %v3601_v6 = vrot.slane %v3533_v47, 7  ;;  %v3682_v23 = vrot.slane %v3602_v52, 7  ;;  %v3483_v38 = vmax.f32 %v3451_v57, 0.0  ;;  %v3484_v49 = vmax.f32 %v3452_v32, 0.0 }
 0x26c   : > { %v4031_v27 = vrot.slane %v4029_v13, 1  ;;  %v4036_v2 = vrot.slane %v4034_v30, 1  ;;  %v3507_v62 = vpack.c.bf16 %v3482_v19, %v3481_v11  ;;  %v10945_v40 = vsub.f32 %v9301_v14, %v9423_v60 }
 0x26d   : > { %v3604_v50 = vor.u32 %v3602_v52, %v3601_v6  ;;  %v9624_v35 = vsel %vm8252_vm4, %v3601_v6, %v3682_v23  ;;  %v3508_v26 = vpack.c.bf16 %v3484_v49, %v3483_v38  ;;  %v10946_v16 = vsub.f32 %v9312_v18, %v9423_v60 }
 0x26e   : > { %v3453_v61 = vmul.f32 %v9482_v59, %v10945_v40  ;;  %7872 = vmatmul.mubr.msk.bf16.gmra.mxu0 %vm448_vm3, %v9579_v51  ;;  %v4032_v3 = vor.u32 %v4031_v27, %v4027_v55  ;;  %v3536_v20 = vshrl.u32 %v3507_v62, 16  ;;  %v3606_v44 = vshll.u32 %v3507_v62, 16 }
 0x26f   : > { %v3454_v43 = vmul.f32 %v9482_v59, %v10946_v16  ;;  %v4045_v14 = vshll.u32 %v9624_v35, 16  ;;  %7842 = vmatmul.mubr.msk.bf16.gmra.mxu1 %vm448_vm3, %v9610_v63  ;;  %7875 = vmatprep.mubr.msk.bf16.mxu0 %vm448_vm3, %v9613_v34  ;;  %v9639_v15 = vsel %vm8252_vm4, %v3533_v47, %v3604_v50  ;;  %v3539_v18 = vshrl.u32 %v3508_v26, 16 }
 0x270   : > { %v3610_v17 = vshll.u32 %v3508_v26, 16  ;;  %v3485_v41 = vmax.f32 %v3453_v61, 0.0  ;;  %7845 = vmatprep.mubr.msk.bf16.mxu1 %vm448_vm3, %v9639_v15  ;;  %v9644_v11 = vsel %vm691_vm5, %v4032_v3, %v4036_v2  ;;  %v3605_v57 = vrot.slane %v3536_v20, 7 }
 0x271   : > { %v4038_v32 = vshrl.u32 %v9639_v15, 16  ;;  %v4040_v52 = vshll.u32 %v9639_v15, 16  ;;  %v4047_v55 = vrot.slane %v4045_v14, 1  ;;  %v3609_v13 = vrot.slane %v3539_v18, 7 }
 0x272   : > { %v3683_v30 = vrot.slane %v3606_v44, 7  ;;  %v3486_v19 = vmax.f32 %v3454_v43, 0.0  ;;  %v3608_v47 = vor.u32 %v3606_v44, %v3605_v57  ;;  %v3684_v23 = vrot.slane %v3610_v17, 7 }
 0x273   : > { %v4042_v6 = vrot.slane %v4040_v52, 1  ;;  %v10947_v38 = vsub.f32 %v9308_v25, %v9423_v60  ;;  %v3612_v27 = vor.u32 %v3610_v17, %v3609_v13  ;;  %v10948_v40 = vsub.f32 %v9318_v42, %v9423_v60 }
 0x274   : > { %v9654_v2 = vsel %vm8252_vm4, %v3605_v57, %v3683_v30  ;;  %v3509_v62 = vpack.c.bf16 %v3486_v19, %v3485_v41  ;;  %v9662_v50 = vsel %vm8252_vm4, %v3536_v20, %v3608_v47  ;;  %v9667_v16 = vsel %vm8252_vm4, %v3609_v13, %v3684_v23 }
 0x275   : > { %v3455_v49 = vmul.f32 %v9482_v59, %v10947_v38  ;;  %v3456_v61 = vmul.f32 %v9482_v59, %v10948_v40  ;;  %v4043_v26 = vor.u32 %v4042_v6, %v4038_v32  ;;  %v4056_v25 = vshll.u32 %v9654_v2, 16 }
 0x276   : > { %v9671_v43 = vsel %vm8252_vm4, %v3539_v18, %v3612_v27  ;;  %v4049_v3 = vshrl.u32 %v9662_v50, 16  ;;  %v4051_v42 = vshll.u32 %v9662_v50, 16  ;;  %v3542_v44 = vshrl.u32 %v3509_v62, 16  ;;  %7876 = vmatmul.mubr.msk.bf16.gmra.mxu0 %vm448_vm3, %v9644_v11 }
 0x277   : > { %v9678_v20 = vsel %vm691_vm5, %v4043_v26, %v4047_v55  ;;  %v4058_v14 = vrot.slane %v4056_v25, 1  ;;  %v3614_v17 = vshll.u32 %v3509_v62, 16  ;;  %v4060_v41 = vshrl.u32 %v9671_v43, 16  ;;  %7846 = vmatmul.mubr.msk.bf16.gmra.mxu1 %vm448_vm3, %v9662_v50 }
 0x278   : > { %7879 = vmatprep.mubr.msk.bf16.mxu0 %vm448_vm3, %v9678_v20  ;;  %v4053_v18 = vrot.slane %v4051_v42, 1  ;;  %v3613_v57 = vrot.slane %v3542_v44, 7  ;;  %v4062_v32 = vshll.u32 %v9671_v43, 16  ;;  %v4067_v52 = vshll.u32 %v9667_v16, 16  ;;  %7849 = vmatprep.mubr.msk.bf16.mxu1 %vm448_vm3, %v9671_v43 }
 0x279   : > { %v3487_v55 = vmax.f32 %v3455_v49, 0.0  ;;  %v3488_v13 = vmax.f32 %v3456_v61, 0.0  ;;  %v3685_v30 = vrot.slane %v3614_v17, 7  ;;  %v10949_v19 = vsub.f32 %v9327_v0, %v9423_v60 }
 0x27a   : > { %v4054_v6 = vor.u32 %v4053_v18, %v4049_v3  ;;  %v3616_v23 = vor.u32 %v3614_v17, %v3613_v57  ;;  %v4064_v38 = vrot.slane %v4062_v32, 1  ;;  %v4069_v27 = vrot.slane %v4067_v52, 1 }
 0x27b   : > { %v3457_v47 = vmul.f32 %v9482_v59, %v10949_v19  ;;  %v3510_v62 = vpack.c.bf16 %v3488_v13, %v3487_v55  ;;  %v9695_v40 = vsel %vm8252_vm4, %v3613_v57, %v3685_v30  ;;  %v10950_v26 = vsub.f32 %v9338_v53, %v9423_v60 }
 0x27c   : > { %v9702_v25 = vsel %vm691_vm5, %v4054_v6, %v4058_v14  ;;  %v9706_v0 = vsel %vm8252_vm4, %v3542_v44, %v3616_v23  ;;  %v4065_v3 = vor.u32 %v4064_v38, %v4060_v41  ;;  %v4078_v42 = vshll.u32 %v9695_v40, 16 }
 0x27d   : > { %v3458_v49 = vmul.f32 %v9482_v59, %v10950_v26  ;;  %v3489_v61 = vmax.f32 %v3457_v47, 0.0  ;;  %v3545_v17 = vshrl.u32 %v3510_v62, 16  ;;  %v3618_v18 = vshll.u32 %v3510_v62, 16 }
 0x27e   : > { %v4071_v57 = vshrl.u32 %v9706_v0, 16  ;;  %v4073_v32 = vshll.u32 %v9706_v0, 16  ;;  %v9712_v53 = vsel %vm691_vm5, %v4065_v3, %v4069_v27  ;;  %v4080_v52 = vrot.slane %v4078_v42, 1  ;;  %7880 = vmatmul.mubr.msk.bf16.gmra.mxu0 %vm448_vm3, %v9702_v25 }
 0x27f   : > { %v3490_v55 = vmax.f32 %v3458_v49, 0.0  ;;  %v10951_v14 = vsub.f32 %v9333_v45, %v9423_v60  ;;  %v3617_v41 = vrot.slane %v3545_v17, 7  ;;  %v3686_v30 = vrot.slane %v3618_v18, 7  ;;  %7850 = vmatmul.mubr.msk.bf16.gmra.mxu1 %vm448_vm3, %v9706_v0  ;;  %7883 = vmatprep.mubr.msk.bf16.mxu0 %vm448_vm3, %v9712_v53 }
 0x280   : > { %v4075_v13 = vrot.slane %v4073_v32, 1  ;;  %v10952_v19 = vsub.f32 %v9347_v36, %v9423_v60  ;;  %v10953_v23 = vsub.f32 %v9352_v1, %v9423_v60  ;;  %v10954_v27 = vsub.f32 %v9365_v12, %v9423_v60 }
 0x281   : > { %v3459_v44 = vmul.f32 %v9482_v59, %v10951_v14  ;;  %v3511_v45 = vpack.c.bf16 %v3490_v55, %v3489_v61  ;;  %v3620_v62 = vor.u32 %v3618_v18, %v3617_v41  ;;  %v9738_v49 = vsel %vm8252_vm4, %v3617_v41, %v3686_v30 }
 0x282   : > { %v3460_v47 = vmul.f32 %v9482_v59, %v10952_v19  ;;  %v3461_v38 = vmul.f32 %v9482_v59, %v10953_v23  ;;  %v3462_v36 = vmul.f32 %v9482_v59, %v10954_v27  ;;  %v4076_v26 = vor.u32 %v4075_v13, %v4071_v57 }
 0x283   : > { %v3491_v6 = vmax.f32 %v3459_v44, 0.0  ;;  %v3548_v42 = vshrl.u32 %v3511_v45, 16  ;;  %v3622_v61 = vshll.u32 %v3511_v45, 16  ;;  %v4089_v32 = vshll.u32 %v9738_v49, 16 }
 0x284   : > { %v3492_v3 = vmax.f32 %v3460_v47, 0.0  ;;  %v3493_v55 = vmax.f32 %v3461_v38, 0.0  ;;  %v9743_v1 = vsel %vm8252_vm4, %v3545_v17, %v3620_v62  ;;  %v3494_v12 = vmax.f32 %v3462_v36, 0.0 }
 0x285   : > { %v3433_v18 = vsub.f32 %v9389_v24, %v9423_v60  ;;  %7853 = vmatprep.mubr.msk.bf16.mxu1 %vm448_vm3, %v9743_v1  ;;  %v9750_v57 = vsel %vm691_vm5, %v4076_v26, %v4080_v52  ;;  %v3621_v44 = vrot.slane %v3548_v42, 7  ;;  %v4082_v41 = vshrl.u32 %v9743_v1, 16 }
 0x286   : > { %v3512_v14 = vpack.c.bf16 %v3492_v3, %v3491_v6  ;;  %v4084_v13 = vshll.u32 %v9743_v1, 16  ;;  %v3687_v17 = vrot.slane %v3622_v61, 7  ;;  %v3513_v47 = vpack.c.bf16 %v3494_v12, %v3493_v55  ;;  %7884 = vmatmul.mubr.msk.bf16.gmra.mxu0 %vm448_vm3, %v9750_v57 }
 0x287   : > { %v3624_v45 = vor.u32 %v3622_v61, %v3621_v44  ;;  %v4091_v23 = vrot.slane %v4089_v32, 1  ;;  %v10955_v24 = vsub.f32 %v9363_v37, %v9423_v60  ;;  %v10956_v62 = vsub.f32 %v9382_v8, %v9423_v60 }
 0x288   : > { %v3551_v30 = vshrl.u32 %v3512_v14, 16  ;;  %v3626_v19 = vshll.u32 %v3512_v14, 16  ;;  %v4086_v6 = vrot.slane %v4084_v13, 1  ;;  %v9762_v27 = vsel %vm8252_vm4, %v3621_v44, %v3687_v17 }
 0x289   : > { %v3463_v38 = vmul.f32 %v9482_v59, %v10955_v24  ;;  %v3554_v36 = vshrl.u32 %v3513_v47, 16  ;;  %v3464_v26 = vmul.f32 %v9482_v59, %v10956_v62  ;;  %v9770_v3 = vsel %vm8252_vm4, %v3548_v42, %v3624_v45 }
 0x28a   : > { %v3625_v52 = vrot.slane %v3551_v30, 7  ;;  %v4087_v37 = vor.u32 %v4086_v6, %v4082_v41  ;;  %v3630_v61 = vshll.u32 %v3513_v47, 16  ;;  %v3688_v32 = vrot.slane %v3626_v19, 7  ;;  %7854 = vmatmul.mubr.msk.bf16.gmra.mxu1 %vm448_vm3, %v9770_v3 }
 0x28b   : > { %v4095_v14 = vshll.u32 %v9770_v3, 16  ;;  %v4100_v12 = vshll.u32 %v9762_v27, 16  ;;  %v3629_v44 = vrot.slane %v3554_v36, 7  ;;  %v4093_v13 = vshrl.u32 %v9770_v3, 16 }
 0x28c   : > { %v3628_v55 = vor.u32 %v3626_v19, %v3625_v52  ;;  %v9777_v8 = vsel %vm691_vm5, %v4087_v37, %v4091_v23  ;;  %v9782_v42 = vsel %vm8252_vm4, %v3625_v52, %v3688_v32  ;;  %v3495_v41 = vmax.f32 %v3463_v38, 0.0 }
 0x28d   : > { %7887 = vmatprep.mubr.msk.bf16.mxu0 %vm448_vm3, %v9777_v8  ;;  %v4097_v17 = vrot.slane %v4095_v14, 1  ;;  %v3632_v47 = vor.u32 %v3630_v61, %v3629_v44  ;;  %v4111_v45 = vshll.u32 %v9782_v42, 16  ;;  %v3496_v23 = vmax.f32 %v3464_v26, 0.0 }
 0x28e   : > { %v9788_v19 = vsel %vm8252_vm4, %v3551_v30, %v3628_v55  ;;  %v3689_v24 = vrot.slane %v3630_v61, 7  ;;  %v3434_v38 = vsub.f32 %v9400_v28, %v9423_v60  ;;  %v4102_v62 = vrot.slane %v4100_v12, 1 }
 0x28f   : > { %7857 = vmatprep.mubr.msk.bf16.mxu1 %vm448_vm3, %v9788_v19  ;;  %v4106_v6 = vshll.u32 %v9788_v19, 16  ;;  %v4098_v52 = vor.u32 %v4097_v17, %v4093_v13  ;;  %v9798_v30 = vsel %vm8252_vm4, %v3554_v36, %v3632_v47  ;;  %v3465_v37 = vmul.f32 %v9482_v59, %v3433_v18 }
 0x290   : > { %v4104_v32 = vshrl.u32 %v9788_v19, 16  ;;  %v3514_v14 = vpack.c.bf16 %v3496_v23, %v3495_v41  ;;  %v9804_v21 = vsel %vm8252_vm4, %v3629_v44, %v3689_v24  ;;  %v4113_v28 = vrot.slane %v4111_v45, 1 }
 0x291   : > { %v4108_v55 = vrot.slane %v4106_v6, 1  ;;  %v9807_v26 = vsel %vm691_vm5, %v4098_v52, %v4102_v62  ;;  %v4117_v61 = vshll.u32 %v9798_v30, 16  ;;  %v3466_v12 = vmul.f32 %v9482_v59, %v3434_v38 }
 0x292   : > { %7888 = vmatmul.mubr.msk.bf16.gmra.mxu0 %vm448_vm3, %v9807_v26  ;;  %v3557_v36 = vshrl.u32 %v3514_v14, 16  ;;  %v3634_v13 = vshll.u32 %v3514_v14, 16  ;;  %v3497_v17 = vmax.f32 %v3465_v37, 0.0  ;;  %7858 = vmatmul.mubr.msk.bf16.gmra.mxu1 %vm448_vm3, %v9798_v30  ;;  %v4115_v44 = vshrl.u32 %v9798_v30, 16 }
 0x293   : > { %v4109_v18 = vor.u32 %v4108_v55, %v4104_v32  ;;  %v4119_v41 = vrot.slane %v4117_v61, 1  ;;  %v4122_v47 = vshll.u32 %v9804_v21, 16  ;;  %v3498_v45 = vmax.f32 %v3466_v12, 0.0 }
 0x294   : > { %v3633_v23 = vrot.slane %v3557_v36, 7  ;;  %v3690_v24 = vrot.slane %v3634_v13, 7 }
 0x295   : > { %v9818_v6 = vsel %vm691_vm5, %v4109_v18, %v4113_v28  ;;  %v4120_v38 = vor.u32 %v4119_v41, %v4115_v44  ;;  %v3515_v52 = vpack.c.bf16 %v3498_v45, %v3497_v17  ;;  %v4124_v32 = vrot.slane %v4122_v47, 1 }
 0x296   : > { %7891 = vmatprep.mubr.msk.bf16.mxu0 %vm448_vm3, %v9818_v6  ;;  %v3636_v62 = vor.u32 %v3634_v13, %v3633_v23  ;;  %v9824_v37 = vsel %vm8252_vm4, %v3633_v23, %v3690_v24  ;;  %v4488_v17 = vrot.slane %v9520_v56, 1  ;;  %v4489_v45 = vrot.slane %v9510_v22, 1 }
 0x297   : > { %v3560_v55 = vshrl.u32 %v3515_v52, 16  ;;  %v3638_v14 = vshll.u32 %v3515_v52, 16  ;;  %v9833_v28 = vsel %vm691_vm5, %v4120_v38, %v4124_v32  ;;  %v4133_v13 = vshll.u32 %v9824_v37, 16 }
 0x298   : > { %v9828_v61 = vsel %vm8252_vm4, %v3557_v36, %v3636_v62  ;;  %v9853_v62 = vsel %vm1197_vm6, %v4488_v17, %v4489_v45 }
 0x299   : > { %7861 = vmatprep.mubr.msk.bf16.mxu1 %vm448_vm3, %v9828_v61  ;;  %v3637_v12 = vrot.slane %v3560_v55, 7  ;;  %v4128_v18 = vshll.u32 %v9828_v61, 16  ;;  %v3691_v44 = vrot.slane %v3638_v14, 7  ;;  %v4126_v36 = vshrl.u32 %v9828_v61, 16 }
 0x29a   : > { %7892 = vmatmul.mubr.msk.bf16.gmra.mxu0 %vm448_vm3, %v9833_v28  ;;  %v4135_v52 = vrot.slane %v4133_v13, 1  ;;  %v8169_v13 = vld [vmem:[%s10938_s2 + $0x8] ss:$0 sps:$4 sm:$0xcc]  }
 0x29b   : > { %v3640_v41 = vor.u32 %v3638_v14, %v3637_v12  ;;  %v4130_v47 = vrot.slane %v4128_v18, 1  ;;  %v9844_v23 = vsel %vm8252_vm4, %v3637_v12, %v3691_v44  ;;  %v4491_v18 = vrot.slane %v9524_v39, 1 }
 0x29c   : > { %v4144_v22 = vshll.u32 %v9844_v23, 16 }
 0x29d   : > { %v9848_v24 = vsel %vm8252_vm4, %v3560_v55, %v3640_v41  ;;  %v4131_v38 = vor.u32 %v4130_v47, %v4126_v36  ;;  %v4492_v41 = vrot.slane %v9514_v4, 1  ;;  %v5123_v47 = vsel %vm494_vm0, %v9539_v10, 0  ;;  %v9897_v4 = vld [vmem:[%s10938_s2 + $0xc] ss:$0 sps:$4 sm:$0xcc]  }
 0x29e   : > { %7862 = vmatmul.mubr.msk.bf16.gmra.mxu1 %vm448_vm3, %v9848_v24  ;;  %v4139_v32 = vshll.u32 %v9848_v24, 16  ;;  %v4137_v55 = vshrl.u32 %v9848_v24, 16  ;;  %v4146_v44 = vrot.slane %v4144_v22, 1  ;;  %v4494_v10 = vrot.slane %v9545_v7, 1 }
 0x29f   : > { %v9858_v14 = vsel %vm691_vm5, %v4131_v38, %v4135_v52  ;;  %7901 = vmatprep.mubr.msk.bf16.mxu1 %vm448_vm3, %v9853_v62  ;;  %v9878_v45 = vsel %vm1197_vm6, %v4491_v18, %v4492_v41  ;;  %v5391_v38 = vrot.slane %v8169_v13, 2  ;;  %v9883_v52 = vld [vmem:[%s10938_s2 + $0xc] sm:$0x3]  ;;  %v4498_v22 = vrot.slane %v9563_v5, 1 }
 0x2a0   : > { %7895 = vmatprep.mubr.msk.bf16.mxu0 %vm448_vm3, %v9858_v14  ;;  %v4141_v12 = vrot.slane %v4139_v32, 1  ;;  %v4497_v32 = vrot.slane %v9549_v46, 1  ;;  %v4500_v5 = vrot.slane %v9610_v63, 1  ;;  %v4503_v13 = vrot.slane %v9639_v15, 1 }
 0x2a1   : > { %8151 = vmatprep.subr.msk.bf16.mxu0 %vm494_vm0, %v5391_v38 }
 0x2a2   : > { %v4142_v17 = vor.u32 %v4141_v12, %v4137_v55  ;;  %v5396_v55 = vsel %vm494_vm0, %v5391_v38, 0  ;;  %v5920_v12 = vrot.slane %v9897_v4, 2  ;;  %v4507_v38 = vrot.slane %v9654_v2, 1 }
 0x2a3   : > { %v4512_v2 = vrot.slane %v9706_v0, 1 }
 0x2a4   : > { %v9871_v36 = vsel %vm691_vm5, %v4142_v17, %v4146_v44  ;;  %v4501_v17 = vrot.slane %v9597_v31, 1  ;;  %v4504_v44 = vrot.slane %v9624_v35, 1  ;;  %v4506_v31 = vrot.slane %v9662_v50, 1 }
 0x2a5   : > { %7896 = vmatmul.mubr.msk.bf16.gmra.mxu0 %vm448_vm3, %v9871_v36  ;;  %v4509_v35 = vrot.slane %v9671_v43, 1 }
 0x2a6   : > { %7902 = vmatmul.mubr.msk.bf16.vlgmr.msra.gmra.mxu1 %vm448_vm3, %v9878_v45  ;;  %7935 = vmatprep.mubr.msk.bf16.mxu0 %vm448_vm3, %v9524_v39  ;;  %v4495_v39 = vrot.slane %v9528_v48, 1  ;;  %v9915_v48 = vsel %vm1197_vm6, %v4497_v32, %v4498_v22  ;;  %v9929_v41 = vsel %vm1197_vm6, %v4500_v5, %v4501_v17  ;;  %v9947_v32 = vsel %vm1197_vm6, %v4506_v31, %v4507_v38 }
 0x2a7   : > { %7968 = vmatpush3.bf16.msra.mxu1 %v5123_v47  ;;  %7905 = vmatprep.mubr.msk.bf16.mxu1 %vm448_vm3, %v9853_v62  ;;  %v9936_v47 = vsel %vm1197_vm6, %v4503_v13, %v4504_v44  ;;  %v4513_v22 = vrot.slane %v9695_v40, 1  ;;  %v4518_v40 = vrot.slane %v9770_v3, 1  ;;  %v3435_v17 = vsub.f32 %v9396_v9, %v9423_v60 }
 0x2a8   : > { %8152 = vmatprep.subr.msk.bf16.mxu1 %vm494_vm0, %v9883_v52  ;;  %v9908_v18 = vsel %vm1197_vm6, %v4494_v10, %v4495_v39  ;;  %v4510_v10 = vrot.slane %v9667_v16, 1  ;;  %v4515_v16 = vrot.slane %v9743_v1, 1  ;;  %v3436_v44 = vsub.f32 %v9408_v58, %v9423_v60 }
 0x2a9   : > { %v9965_v5 = vsel %vm1197_vm6, %v4512_v2, %v4513_v22  ;;  %v4519_v31 = vrot.slane %v9762_v27, 1  ;;  %v3467_v38 = vmul.f32 %v9482_v59, %v3435_v17  ;;  %v4527_v27 = vrot.slane %v9828_v61, 1 }
 0x2aa   : > { %v9954_v39 = vsel %vm1197_vm6, %v4509_v35, %v4510_v10  ;;  %v4522_v35 = vrot.slane %v9782_v42, 1  ;;  %v3468_v10 = vmul.f32 %v9482_v59, %v3436_v44  ;;  %v4524_v59 = vrot.slane %v9798_v30, 1 }
 0x2ab   : > { %v9989_v2 = vsel %vm1197_vm6, %v4518_v40, %v4519_v31  ;;  %v3499_v58 = vmax.f32 %v3467_v38, 0.0  ;;  %v4525_v42 = vrot.slane %v9804_v21, 1  ;;  %v5657_v38 = vsel %vm494_vm0, %v9883_v52, 0 }
 0x2ac   : > { %v3500_v60 = vmax.f32 %v3468_v10, 0.0  ;;  %v6181_v10 = vld [vmem:[%s10938_s2 + $0x10] sm:$0x3] }
 0x2ad   : > { %7936 = vmatmul.mubr.msk.bf16.vlgmr.msra.gmra.mxu0 %vm448_vm3, %v9520_v56 }
 0x2ae   : > { %7906 = vmatmul.mubr.msk.bf16.gmra.mxu1 %vm448_vm3, %v9908_v18  ;;  %7939 = vmatprep.mubr.msk.bf16.mxu0 %vm448_vm3, %v9545_v7  ;;  %v3516_v22 = vpack.c.bf16 %v3500_v60, %v3499_v58 }
 0x2af   : > { %7909 = vmatprep.mubr.msk.bf16.mxu1 %vm448_vm3, %v9915_v48  ;;  %8002 = vmatpush3.bf16.msra.mxu0 %v5396_v55  ;;  %v4516_v55 = vrot.slane %v9738_v49, 1  ;;  %v4521_v49 = vrot.slane %v9788_v19, 1 }
 0x2b0   : > { %8153 = vmatprep.subr.msk.bf16.mxu0 %vm494_vm0, %v5920_v12  ;;  %v3563_v21 = vshrl.u32 %v3516_v22, 16  ;;  %v3642_v31 = vshll.u32 %v3516_v22, 16 }
 0x2b1   : > { %v9972_v13 = vsel %vm1197_vm6, %v4515_v16, %v4516_v55  ;;  %v9996_v9 = vsel %vm1197_vm6, %v4521_v49, %v4522_v35  ;;  %v4528_v16 = vrot.slane %v9824_v37, 1  ;;  %v10007_v55 = vsel %vm1197_vm6, %v4524_v59, %v4525_v42 }
 0x2b2   : > { %v4530_v37 = vrot.slane %v9848_v24, 1  ;;  %v4531_v49 = vrot.slane %v9844_v23, 1  ;;  %v3641_v17 = vrot.slane %v3563_v21, 7 }
 0x2b3   : > { %v10014_v40 = vsel %vm1197_vm6, %v4527_v27, %v4528_v16 }
 0x2b4   : > { %v10023_v44 = vsel %vm1197_vm6, %v4530_v37, %v4531_v49  ;;  %v3644_v35 = vor.u32 %v3642_v31, %v3641_v17  ;;  %v6183_v37 = vsel %vm494_vm0, %v6181_v10, 0 }
 0x2b5   : > { %7940 = vmatmul.mubr.msk.bf16.gmra.mxu0 %vm448_vm3, %v9549_v46 }
 0x2b6   : > { %7910 = vmatmul.mubr.msk.bf16.gmra.mxu1 %vm448_vm3, %v9929_v41  ;;  %7943 = vmatprep.mubr.msk.bf16.mxu0 %vm448_vm3, %v9610_v63  ;;  %v10033_v23 = vsel %vm8252_vm4, %v3563_v21, %v3644_v35 }
 0x2b7   : > { %7913 = vmatprep.mubr.msk.bf16.mxu1 %vm448_vm3, %v9936_v47  ;;  %v5109_v52 = vshll.u32 %v10033_v23, 16  ;;  %v5107_v58 = vshrl.u32 %v10033_v23, 16  ;;  %v5384_v42 = vrot.slane %v10033_v23, 1 }
 0x2bd   : > { %7944 = vmatmul.mubr.msk.bf16.gmra.mxu0 %vm448_vm3, %v9639_v15 }
 0x2be   : > { %7914 = vmatmul.mubr.msk.bf16.gmra.mxu1 %vm448_vm3, %v9947_v32  ;;  %7947 = vmatprep.mubr.msk.bf16.mxu0 %vm448_vm3, %v9662_v50 }
 0x2bf   : > { %7917 = vmatprep.mubr.msk.bf16.mxu1 %vm448_vm3, %v9954_v39 }
 0x2c5   : > { %7948 = vmatmul.mubr.msk.bf16.gmra.mxu0 %vm448_vm3, %v9671_v43 }
 0x2c6   : > { %7918 = vmatmul.mubr.msk.bf16.gmra.mxu1 %vm448_vm3, %v9965_v5  ;;  %7951 = vmatprep.mubr.msk.bf16.mxu0 %vm448_vm3, %v9706_v0 }
 0x2c7   : > { %7921 = vmatprep.mubr.msk.bf16.mxu1 %vm448_vm3, %v9972_v13 }
 0x2cd   : > { %7952 = vmatmul.mubr.msk.bf16.gmra.mxu0 %vm448_vm3, %v9743_v1 }
 0x2ce   : > { %7922 = vmatmul.mubr.msk.bf16.gmra.mxu1 %vm448_vm3, %v9989_v2  ;;  %7955 = vmatprep.mubr.msk.bf16.mxu0 %vm448_vm3, %v9770_v3 }
 0x2cf   : > { %7925 = vmatprep.mubr.msk.bf16.mxu1 %vm448_vm3, %v9996_v9 }
 0x2d5   : > { %7956 = vmatmul.mubr.msk.bf16.gmra.mxu0 %vm448_vm3, %v9788_v19 }
 0x2d6   : > { %7926 = vmatmul.mubr.msk.bf16.gmra.mxu1 %vm448_vm3, %v10007_v55  ;;  %7959 = vmatprep.mubr.msk.bf16.mxu0 %vm448_vm3, %v9798_v30 }
 0x2d7   : > { %7929 = vmatprep.mubr.msk.bf16.mxu1 %vm448_vm3, %v10014_v40 }
 0x2dd   : > { %7960 = vmatmul.mubr.msk.bf16.gmra.mxu0 %vm448_vm3, %v9828_v61 }
 0x2de   : > { %7930 = vmatmul.mubr.msk.bf16.gmra.mxu1 %vm448_vm3, %v10023_v44  ;;  %7963 = vmatprep.mubr.msk.bf16.mxu0 %vm448_vm3, %v9848_v24 }
 0x2df   : > { %7969 = vmatprep.mubr.msk.bf16.mxu1 %vm448_vm3, %v9569_v29  ;;  %v5922_v29 = vsel %vm494_vm0, %v5920_v12, 0  ;;  %v5111_v12 = vrot.slane %v5109_v52, 1 }
 0x2e1   : > { %v5112_v59 = vor.u32 %v5111_v12, %v5107_v58 }
 0x2e5   : > { %7964 = vmatmul.mubr.msk.bf16.gmra.mxu0 %vm448_vm3, %v10033_v23 }
 0x2e6   : > { %7970 = vmatmul.mubr.msk.bf16.vlgmr.msra.gmra.mxu1 %vm448_vm3, %v9566_v54  ;;  %8003 = vmatprep.mubr.msk.bf16.mxu0 %vm448_vm3, %v9878_v45  ;;  %v3692_v45 = vrot.slane %v3642_v31, 7 }
 0x2e7   : > { %8036 = vmatpush3.bf16.msra.mxu1 %v5657_v38  ;;  %7973 = vmatprep.mubr.msk.bf16.mxu1 %vm448_vm3, %v9579_v51 }
 0x2e8   : > { %8154 = vmatprep.subr.msk.bf16.mxu1 %vm494_vm0, %v6181_v10  ;;  %v3740_v4 = vsel %vm8252_vm4, %v3641_v17, %v3692_v45 }
 0x2e9   : > { %v5114_v60 = vshll.u32 %v3740_v4, 16  ;;  %v5385_v16 = vrot.slane %v3740_v4, 1 }
 0x2eb   : > { %v5116_v27 = vrot.slane %v5114_v60, 1  ;;  %v10118_v21 = vsel %vm1197_vm6, %v5384_v42, %v5385_v16 }
 0x2ed   : > { %8004 = vmatmul.mubr.msk.bf16.vlgmr.msra.gmra.mxu0 %vm448_vm3, %v9853_v62  ;;  %v10107_v33 = vsel %vm691_vm5, %v5112_v59, %v5116_v27 }
 0x2ee   : > { %7974 = vmatmul.mubr.msk.bf16.gmra.mxu1 %vm448_vm3, %v9613_v34  ;;  %8007 = vmatprep.mubr.msk.bf16.mxu0 %vm448_vm3, %v9908_v18 }
 0x2ef   : > { %7977 = vmatprep.mubr.msk.bf16.mxu1 %vm448_vm3, %v9644_v11  ;;  %8070 = vmatpush3.bf16.msra.mxu0 %v5922_v29 }
 0x2f5   : > { %8008 = vmatmul.mubr.msk.bf16.gmra.mxu0 %vm448_vm3, %v9915_v48 }
 0x2f6   : > { %7978 = vmatmul.mubr.msk.bf16.gmra.mxu1 %vm448_vm3, %v9678_v20  ;;  %8011 = vmatprep.mubr.msk.bf16.mxu0 %vm448_vm3, %v9929_v41 }
 0x2f7   : > { %7981 = vmatprep.mubr.msk.bf16.mxu1 %vm448_vm3, %v9702_v25 }
 0x2fd   : > { %8012 = vmatmul.mubr.msk.bf16.gmra.mxu0 %vm448_vm3, %v9936_v47 }
 0x2fe   : > { %7982 = vmatmul.mubr.msk.bf16.gmra.mxu1 %vm448_vm3, %v9712_v53  ;;  %8015 = vmatprep.mubr.msk.bf16.mxu0 %vm448_vm3, %v9947_v32 }
 0x2ff   : > { %7985 = vmatprep.mubr.msk.bf16.mxu1 %vm448_vm3, %v9750_v57 }
 0x305   : > { %8016 = vmatmul.mubr.msk.bf16.gmra.mxu0 %vm448_vm3, %v9954_v39 }
 0x306   : > { %7986 = vmatmul.mubr.msk.bf16.gmra.mxu1 %vm448_vm3, %v9777_v8  ;;  %8019 = vmatprep.mubr.msk.bf16.mxu0 %vm448_vm3, %v9965_v5 }
 0x307   : > { %7989 = vmatprep.mubr.msk.bf16.mxu1 %vm448_vm3, %v9807_v26 }
 0x30d   : > { %8020 = vmatmul.mubr.msk.bf16.gmra.mxu0 %vm448_vm3, %v9972_v13 }
 0x30e   : > { %7990 = vmatmul.mubr.msk.bf16.gmra.mxu1 %vm448_vm3, %v9818_v6  ;;  %8023 = vmatprep.mubr.msk.bf16.mxu0 %vm448_vm3, %v9989_v2 }
 0x30f   : > { %7993 = vmatprep.mubr.msk.bf16.mxu1 %vm448_vm3, %v9833_v28 }
 0x315   : > { %8024 = vmatmul.mubr.msk.bf16.gmra.mxu0 %vm448_vm3, %v9996_v9 }
 0x316   : > { %7994 = vmatmul.mubr.msk.bf16.gmra.mxu1 %vm448_vm3, %v9858_v14  ;;  %8027 = vmatprep.mubr.msk.bf16.mxu0 %vm448_vm3, %v10007_v55 }
 0x317   : > { %7997 = vmatprep.mubr.msk.bf16.mxu1 %vm448_vm3, %v9871_v36 }
 0x31d   : > { %8028 = vmatmul.mubr.msk.bf16.gmra.mxu0 %vm448_vm3, %v10014_v40 }
 0x31e   : > { %7998 = vmatmul.mubr.msk.bf16.gmra.mxu1 %vm448_vm3, %v10107_v33  ;;  %8031 = vmatprep.mubr.msk.bf16.mxu0 %vm448_vm3, %v10023_v44 }
 0x31f   : > { %8037 = vmatprep.mubr.msk.bf16.mxu1 %vm448_vm3, %v9520_v56  ;;  %v7835_v22 = vpop.f32.mrf.mxu1 }
 0x320   : > { %3953 = vst.msk [vmem:[#allocation2 + $0x10] sm:$0xff] %vm448_vm3, %v7835_v22 }
 0x321   : > { %v3824_v49 = vpop.f32.mrf.mxu1 }
 0x322   : > { %3951 = vst.msk [vmem:[#allocation2] sm:$0xff] %vm448_vm3, %v3824_v49 }
 0x323   : > { %v7836_v56 = vpop.f32.mrf.mxu1 }
 0x324   : > { %3954 = vst.msk [vmem:[#allocation2 + $0x18] sm:$0xff] %vm448_vm3, %v7836_v56 }
 0x325   : > { %8032 = vmatmul.mubr.msk.bf16.gmra.mxu0 %vm448_vm3, %v10118_v21  ;;  %v3827_v17 = vpop.f32.mrf.mxu1 }
 0x326   : > { %8038 = vmatmul.mubr.msk.bf16.vlgmr.msra.gmra.mxu1 %vm448_vm3, %v9545_v7  ;;  %8071 = vmatprep.mubr.msk.bf16.mxu0 %vm448_vm3, %v9566_v54  ;;  %3952 = vst.msk [vmem:[#allocation2 + $0x8] sm:$0xff] %vm448_vm3, %v3827_v17  ;;  %v7869_v31 = vpop.f32.mrf.mxu0 }
 0x327   : > { %8104 = vmatpush3.bf16.msra.mxu1 %v6183_v37  ;;  %8041 = vmatprep.mubr.msk.bf16.mxu1 %vm448_vm3, %v9549_v46  ;;  %v4364_v35 = vld [vmem:[#allocation2 + $0x10] sm:$0xff]  ;;  %v7839_v38 = vpop.f32.mrf.mxu1 }
 0x328   : > { %v4396_v10 = vadd.f32 %v7869_v31, %v4364_v35  ;;  %3957 = vst.msk [vmem:[#allocation2 + $0x30] sm:$0xff] %vm448_vm3, %v7839_v38  ;;  %v4235_v7 = vpop.f32.mrf.mxu0 }
 0x329   : > { %v4362_v29 = vld [vmem:[#allocation2] sm:$0xff]  ;;  %v3840_v45 = vpop.f32.mrf.mxu1 }
 0x32a   : > { %4428 = vst.msk [vmem:[#allocation2 + $0x10] sm:$0xff] %vm448_vm3, %v4396_v10  ;;  %v4394_v46 = vadd.f32 %v4362_v29, %v4235_v7  ;;  %3955 = vst.msk [vmem:[#allocation2 + $0x20] sm:$0xff] %vm448_vm3, %v3840_v45  ;;  %v7870_v54 = vpop.f32.mrf.mxu0 }
 0x32b   : > { %v4365_v52 = vld [vmem:[#allocation2 + $0x18] sm:$0xff]  ;;  %v7840_v4 = vpop.f32.mrf.mxu1 }
 0x32c   : > { %4426 = vst.msk [vmem:[#allocation2] sm:$0xff] %vm448_vm3, %v4394_v46  ;;  %v4397_v12 = vadd.f32 %v7870_v54, %v4365_v52  ;;  %3958 = vst.msk [vmem:[#allocation2 + $0x38] sm:$0xff] %vm448_vm3, %v7840_v4 }
 0x32d   : > { %8072 = vmatmul.mubr.msk.bf16.vlgmr.msra.gmra.mxu0 %vm448_vm3, %v9579_v51  ;;  %v4238_v51 = vpop.f32.mrf.mxu0  ;;  %v4363_v58 = vld [vmem:[#allocation2 + $0x8] sm:$0xff]  ;;  %v3843_v60 = vpop.f32.mrf.mxu1 }
 0x32e   : > { %8042 = vmatmul.mubr.msk.bf16.gmra.mxu1 %vm448_vm3, %v9610_v63  ;;  %8075 = vmatprep.mubr.msk.bf16.mxu0 %vm448_vm3, %v9613_v34  ;;  %4429 = vst.msk [vmem:[#allocation2 + $0x18] sm:$0xff] %vm448_vm3, %v4397_v12  ;;  %v4395_v59 = vadd.f32 %v4363_v58, %v4238_v51  ;;  %3956 = vst.msk [vmem:[#allocation2 + $0x28] sm:$0xff] %vm448_vm3, %v3843_v60 }
 0x32f   : > { %8045 = vmatprep.mubr.msk.bf16.mxu1 %vm448_vm3, %v9639_v15  ;;  %v7873_v63 = vpop.f32.mrf.mxu0  ;;  %v4368_v34 = vld [vmem:[#allocation2 + $0x30] sm:$0xff]  ;;  %v7843_v27 = vpop.f32.mrf.mxu1 }
 0x330   : > { %4427 = vst.msk [vmem:[#allocation2 + $0x8] sm:$0xff] %vm448_vm3, %v4395_v59  ;;  %v4400_v42 = vadd.f32 %v7873_v63, %v4368_v34  ;;  %3961 = vst.msk [vmem:[#allocation2 + $0x50] sm:$0xff] %vm448_vm3, %v7843_v27 }
 0x331   : > { %v4251_v15 = vpop.f32.mrf.mxu0  ;;  %v4366_v16 = vld [vmem:[#allocation2 + $0x20] sm:$0xff]  ;;  %v3856_v22 = vpop.f32.mrf.mxu1 }
 0x332   : > { %4432 = vst.msk [vmem:[#allocation2 + $0x30] sm:$0xff] %vm448_vm3, %v4400_v42  ;;  %v4398_v37 = vadd.f32 %v4366_v16, %v4251_v15  ;;  %3959 = vst.msk [vmem:[#allocation2 + $0x40] sm:$0xff] %vm448_vm3, %v3856_v22 }
 0x333   : > { %v7874_v49 = vpop.f32.mrf.mxu0  ;;  %v4369_v56 = vld [vmem:[#allocation2 + $0x38] sm:$0xff]  ;;  %v7844_v17 = vpop.f32.mrf.mxu1 }
 0x334   : > { %4430 = vst.msk [vmem:[#allocation2 + $0x20] sm:$0xff] %vm448_vm3, %v4398_v37  ;;  %v4401_v31 = vadd.f32 %v7874_v49, %v4369_v56  ;;  %3962 = vst.msk [vmem:[#allocation2 + $0x58] sm:$0xff] %vm448_vm3, %v7844_v17 }
 0x335   : > { %8076 = vmatmul.mubr.msk.bf16.gmra.mxu0 %vm448_vm3, %v9644_v11  ;;  %v4254_v11 = vpop.f32.mrf.mxu0  ;;  %v4367_v35 = vld [vmem:[#allocation2 + $0x28] sm:$0xff]  ;;  %v3859_v38 = vpop.f32.mrf.mxu1 }
 0x336   : > { %8046 = vmatmul.mubr.msk.bf16.gmra.mxu1 %vm448_vm3, %v9662_v50  ;;  %8079 = vmatprep.mubr.msk.bf16.mxu0 %vm448_vm3, %v9678_v20  ;;  %4433 = vst.msk [vmem:[#allocation2 + $0x38] sm:$0xff] %vm448_vm3, %v4401_v31  ;;  %v4399_v10 = vadd.f32 %v4367_v35, %v4254_v11  ;;  %3960 = vst.msk [vmem:[#allocation2 + $0x48] sm:$0xff] %vm448_vm3, %v3859_v38 }
 0x337   : > { %8049 = vmatprep.mubr.msk.bf16.mxu1 %vm448_vm3, %v9671_v43  ;;  %v7877_v50 = vpop.f32.mrf.mxu0  ;;  %v4372_v20 = vld [vmem:[#allocation2 + $0x50] sm:$0xff]  ;;  %v7847_v7 = vpop.f32.mrf.mxu1 }
 0x338   : > { %4431 = vst.msk [vmem:[#allocation2 + $0x28] sm:$0xff] %vm448_vm3, %v4399_v10  ;;  %v4404_v29 = vadd.f32 %v7877_v50, %v4372_v20  ;;  %3965 = vst.msk [vmem:[#allocation2 + $0x70] sm:$0xff] %vm448_vm3, %v7847_v7 }
 0x339   : > { %v4267_v43 = vpop.f32.mrf.mxu0  ;;  %v4370_v45 = vld [vmem:[#allocation2 + $0x40] sm:$0xff]  ;;  %v3872_v46 = vpop.f32.mrf.mxu1 }
 0x33a   : > { %4436 = vst.msk [vmem:[#allocation2 + $0x50] sm:$0xff] %vm448_vm3, %v4404_v29  ;;  %v4402_v54 = vadd.f32 %v4370_v45, %v4267_v43  ;;  %3963 = vst.msk [vmem:[#allocation2 + $0x60] sm:$0xff] %vm448_vm3, %v3872_v46 }
 0x33b   : > { %v7878_v52 = vpop.f32.mrf.mxu0  ;;  %v4373_v4 = vld [vmem:[#allocation2 + $0x58] sm:$0xff]  ;;  %v7848_v12 = vpop.f32.mrf.mxu1 }
 0x33c   : > { %4434 = vst.msk [vmem:[#allocation2 + $0x40] sm:$0xff] %vm448_vm3, %v4402_v54  ;;  %v4405_v51 = vadd.f32 %v7878_v52, %v4373_v4  ;;  %3966 = vst.msk [vmem:[#allocation2 + $0x78] sm:$0xff] %vm448_vm3, %v7848_v12 }
 0x33d   : > { %8080 = vmatmul.mubr.msk.bf16.gmra.mxu0 %vm448_vm3, %v9702_v25  ;;  %v4270_v25 = vpop.f32.mrf.mxu0  ;;  %v4371_v58 = vld [vmem:[#allocation2 + $0x48] sm:$0xff]  ;;  %v3875_v60 = vpop.f32.mrf.mxu1 }
 0x33e   : > { %8050 = vmatmul.mubr.msk.bf16.gmra.mxu1 %vm448_vm3, %v9706_v0  ;;  %8083 = vmatprep.mubr.msk.bf16.mxu0 %vm448_vm3, %v9712_v53  ;;  %4437 = vst.msk [vmem:[#allocation2 + $0x58] sm:$0xff] %vm448_vm3, %v4405_v51  ;;  %v4403_v59 = vadd.f32 %v4371_v58, %v4270_v25  ;;  %3964 = vst.msk [vmem:[#allocation2 + $0x68] sm:$0xff] %vm448_vm3, %v3875_v60 }
 0x33f   : > { %8053 = vmatprep.mubr.msk.bf16.mxu1 %vm448_vm3, %v9743_v1  ;;  %v7881_v0 = vpop.f32.mrf.mxu0  ;;  %v4376_v53 = vld [vmem:[#allocation2 + $0x70] sm:$0xff]  ;;  %v7851_v63 = vpop.f32.mrf.mxu1 }
 0x340   : > { %4435 = vst.msk [vmem:[#allocation2 + $0x48] sm:$0xff] %vm448_vm3, %v4403_v59  ;;  %v4408_v34 = vadd.f32 %v7881_v0, %v4376_v53  ;;  %3969 = vst.msk [vmem:[#allocation2 + $0x90] sm:$0xff] %vm448_vm3, %v7851_v63 }
 0x341   : > { %v4283_v1 = vpop.f32.mrf.mxu0  ;;  %v4374_v27 = vld [vmem:[#allocation2 + $0x60] sm:$0xff]  ;;  %v3888_v42 = vpop.f32.mrf.mxu1 }
 0x342   : > { %4440 = vst.msk [vmem:[#allocation2 + $0x70] sm:$0xff] %vm448_vm3, %v4408_v34  ;;  %v4406_v15 = vadd.f32 %v4374_v27, %v4283_v1  ;;  %3967 = vst.msk [vmem:[#allocation2 + $0x80] sm:$0xff] %vm448_vm3, %v3888_v42 }
 0x343   : > { %v7882_v16 = vpop.f32.mrf.mxu0  ;;  %v4377_v22 = vld [vmem:[#allocation2 + $0x78] sm:$0xff]  ;;  %v7852_v37 = vpop.f32.mrf.mxu1 }
 0x344   : > { %4438 = vst.msk [vmem:[#allocation2 + $0x60] sm:$0xff] %vm448_vm3, %v4406_v15  ;;  %v4409_v49 = vadd.f32 %v7882_v16, %v4377_v22  ;;  %3970 = vst.msk [vmem:[#allocation2 + $0x98] sm:$0xff] %vm448_vm3, %v7852_v37 }
 0x345   : > { %8084 = vmatmul.mubr.msk.bf16.gmra.mxu0 %vm448_vm3, %v9750_v57  ;;  %v4286_v57 = vpop.f32.mrf.mxu0  ;;  %v4375_v56 = vld [vmem:[#allocation2 + $0x68] sm:$0xff]  ;;  %v3891_v17 = vpop.f32.mrf.mxu1 }
 0x346   : > { %8054 = vmatmul.mubr.msk.bf16.gmra.mxu1 %vm448_vm3, %v9770_v3  ;;  %8087 = vmatprep.mubr.msk.bf16.mxu0 %vm448_vm3, %v9777_v8  ;;  %4441 = vst.msk [vmem:[#allocation2 + $0x78] sm:$0xff] %vm448_vm3, %v4409_v49  ;;  %v4407_v31 = vadd.f32 %v4375_v56, %v4286_v57  ;;  %3968 = vst.msk [vmem:[#allocation2 + $0x88] sm:$0xff] %vm448_vm3, %v3891_v17 }
 0x347   : > { %8057 = vmatprep.mubr.msk.bf16.mxu1 %vm448_vm3, %v9788_v19  ;;  %v7885_v3 = vpop.f32.mrf.mxu0  ;;  %v4380_v8 = vld [vmem:[#allocation2 + $0x90] sm:$0xff] }
 0x348   : > { %4439 = vst.msk [vmem:[#allocation2 + $0x68] sm:$0xff] %vm448_vm3, %v4407_v31  ;;  %v4412_v11 = vadd.f32 %v7885_v3, %v4380_v8 }
 0x349   : > { %v4299_v38 = vpop.f32.mrf.mxu0  ;;  %v4378_v19 = vld [vmem:[#allocation2 + $0x80] sm:$0xff] }
 0x34a   : > { %v7855_v35 = vpop.f32.mrf.mxu1  ;;  %4444 = vst.msk [vmem:[#allocation2 + $0x90] sm:$0xff] %vm448_vm3, %v4412_v11  ;;  %v4410_v10 = vadd.f32 %v4378_v19, %v4299_v38  ;;  %v4745_v11 = vld [vmem:[#allocation2 + $0x10] sm:$0xff] }
 0x34b   : > { %3973 = vst.msk [vmem:[#allocation2 + $0xb0] sm:$0xff] %vm448_vm3, %v7855_v35  ;;  %v7886_v20 = vpop.f32.mrf.mxu0  ;;  %v4381_v7 = vld [vmem:[#allocation2 + $0x98] sm:$0xff] }
 0x34c   : > { %v3904_v50 = vpop.f32.mrf.mxu1  ;;  %4442 = vst.msk [vmem:[#allocation2 + $0x80] sm:$0xff] %vm448_vm3, %v4410_v10  ;;  %v4413_v29 = vadd.f32 %v7886_v20, %v4381_v7  ;;  %v4743_v20 = vld [vmem:[#allocation2] sm:$0xff] }
 0x34d   : > { %8088 = vmatmul.mubr.msk.bf16.gmra.mxu0 %vm448_vm3, %v9807_v26  ;;  %3971 = vst.msk [vmem:[#allocation2 + $0xa0] sm:$0xff] %vm448_vm3, %v3904_v50  ;;  %v4302_v26 = vpop.f32.mrf.mxu0  ;;  %v4379_v45 = vld [vmem:[#allocation2 + $0x88] sm:$0xff] }
 0x34e   : > { %8058 = vmatmul.mubr.msk.bf16.gmra.mxu1 %vm448_vm3, %v9798_v30  ;;  %8091 = vmatprep.mubr.msk.bf16.mxu0 %vm448_vm3, %v9818_v6  ;;  %v7856_v43 = vpop.f32.mrf.mxu1  ;;  %4445 = vst.msk [vmem:[#allocation2 + $0x98] sm:$0xff] %vm448_vm3, %v4413_v29  ;;  %v4411_v30 = vadd.f32 %v4379_v45, %v4302_v26  ;;  %v4746_v45 = vld [vmem:[#allocation2 + $0x18] sm:$0xff] }
 0x34f   : > { %8061 = vmatprep.mubr.msk.bf16.mxu1 %vm448_vm3, %v9828_v61  ;;  %3974 = vst.msk [vmem:[#allocation2 + $0xb8] sm:$0xff] %vm448_vm3, %v7856_v43 }
 0x350   : > { %v3907_v46 = vpop.f32.mrf.mxu1  ;;  %4443 = vst.msk [vmem:[#allocation2 + $0x88] sm:$0xff] %vm448_vm3, %v4411_v30 }
 0x351   : > { %3972 = vst.msk [vmem:[#allocation2 + $0xa8] sm:$0xff] %vm448_vm3, %v3907_v46 }
 0x352   : > { %v7889_v6 = vpop.f32.mrf.mxu0  ;;  %v4384_v54 = vld [vmem:[#allocation2 + $0xb0] sm:$0xff]  ;;  %v7859_v52 = vpop.f32.mrf.mxu1 }
 0x353   : > { %v4416_v4 = vadd.f32 %v7889_v6, %v4384_v54  ;;  %3977 = vst.msk [vmem:[#allocation2 + $0xd0] sm:$0xff] %vm448_vm3, %v7859_v52  ;;  %v4744_v54 = vld [vmem:[#allocation2 + $0x8] sm:$0xff] }
 0x354   : > { %v4315_v61 = vpop.f32.mrf.mxu0  ;;  %v4382_v12 = vld [vmem:[#allocation2 + $0xa0] sm:$0xff]  ;;  %v3920_v51 = vpop.f32.mrf.mxu1 }
 0x355   : > { %8092 = vmatmul.mubr.msk.bf16.gmra.mxu0 %vm448_vm3, %v9833_v28  ;;  %4448 = vst.msk [vmem:[#allocation2 + $0xb0] sm:$0xff] %vm448_vm3, %v4416_v4  ;;  %v4414_v25 = vadd.f32 %v4382_v12, %v4315_v61  ;;  %3975 = vst.msk [vmem:[#allocation2 + $0xc0] sm:$0xff] %vm448_vm3, %v3920_v51  ;;  %v4749_v51 = vld [vmem:[#allocation2 + $0x30] sm:$0xff] }
 0x356   : > { %8062 = vmatmul.mubr.msk.bf16.gmra.mxu1 %vm448_vm3, %v9848_v24  ;;  %8095 = vmatprep.mubr.msk.bf16.mxu0 %vm448_vm3, %v9858_v14  ;;  %v7890_v58 = vpop.f32.mrf.mxu0  ;;  %v4385_v60 = vld [vmem:[#allocation2 + $0xb8] sm:$0xff]  ;;  %v7860_v59 = vpop.f32.mrf.mxu1 }
 0x357   : > { %8065 = vmatprep.mubr.msk.bf16.mxu1 %vm448_vm3, %v10033_v23  ;;  %4446 = vst.msk [vmem:[#allocation2 + $0xa0] sm:$0xff] %vm448_vm3, %v4414_v25  ;;  %v4417_v28 = vadd.f32 %v7890_v58, %v4385_v60  ;;  %3978 = vst.msk [vmem:[#allocation2 + $0xd8] sm:$0xff] %vm448_vm3, %v7860_v59 }
 0x358   : > { %v4318_v0 = vpop.f32.mrf.mxu0  ;;  %v4383_v53 = vld [vmem:[#allocation2 + $0xa8] sm:$0xff]  ;;  %v3923_v63 = vpop.f32.mrf.mxu1 }
 0x359   : > { %4449 = vst.msk [vmem:[#allocation2 + $0xb8] sm:$0xff] %vm448_vm3, %v4417_v28  ;;  %v4415_v14 = vadd.f32 %v4383_v53, %v4318_v0  ;;  %3976 = vst.msk [vmem:[#allocation2 + $0xc8] sm:$0xff] %vm448_vm3, %v3923_v63  ;;  %v4747_v28 = vld [vmem:[#allocation2 + $0x20] sm:$0xff] }
 0x35a   : > { %v7893_v34 = vpop.f32.mrf.mxu0  ;;  %v4388_v1 = vld [vmem:[#allocation2 + $0xd0] sm:$0xff] }
 0x35b   : > { %4447 = vst.msk [vmem:[#allocation2 + $0xa8] sm:$0xff] %vm448_vm3, %v4415_v14  ;;  %v4420_v23 = vadd.f32 %v7893_v34, %v4388_v1 }
 0x35c   : > { %v4331_v27 = vpop.f32.mrf.mxu0  ;;  %v4386_v42 = vld [vmem:[#allocation2 + $0xc0] sm:$0xff] }
 0x35d   : > { %8096 = vmatmul.mubr.msk.bf16.gmra.mxu0 %vm448_vm3, %v9871_v36  ;;  %4452 = vst.msk [vmem:[#allocation2 + $0xd0] sm:$0xff] %vm448_vm3, %v4420_v23  ;;  %v4418_v16 = vadd.f32 %v4386_v42, %v4331_v27 }
 0x35e   : > { %v7863_v15 = vpop.f32.mrf.mxu1  ;;  %8066 = vmatmul.mubr.msk.bf16.gmra.mxu1 %vm448_vm3, %v9848_v24  ;;  %8099 = vmatprep.mubr.msk.bf16.mxu0 %vm448_vm3, %v10107_v33  ;;  %v7894_v22 = vpop.f32.mrf.mxu0  ;;  %v4389_v37 = vld [vmem:[#allocation2 + $0xd8] sm:$0xff] }
 0x35f   : > { %3981 = vst.msk [vmem:[#allocation2 + $0xf0] sm:$0xff] %vm448_vm3, %v7863_v15  ;;  %8105 = vmatprep.mubr.msk.bf16.mxu1 %vm448_vm3, %v9853_v62  ;;  %4450 = vst.msk [vmem:[#allocation2 + $0xc0] sm:$0xff] %vm448_vm3, %v4418_v16  ;;  %v4421_v57 = vadd.f32 %v7894_v22, %v4389_v37  ;;  %v4748_v15 = vld [vmem:[#allocation2 + $0x28] sm:$0xff] }
 0x360   : > { %v3936_v49 = vpop.f32.mrf.mxu1  ;;  %v4334_v56 = vpop.f32.mrf.mxu0  ;;  %v4387_v17 = vld [vmem:[#allocation2 + $0xc8] sm:$0xff] }
 0x361   : > { %3979 = vst.msk [vmem:[#allocation2 + $0xe0] sm:$0xff] %vm448_vm3, %v3936_v49  ;;  %4453 = vst.msk [vmem:[#allocation2 + $0xd8] sm:$0xff] %vm448_vm3, %v4421_v57  ;;  %v4419_v33 = vadd.f32 %v4387_v17, %v4334_v56  ;;  %v4753_v56 = vld [vmem:[#allocation2 + $0x50] sm:$0xff] }
 0x362   : > { %v7864_v24 = vpop.f32.mrf.mxu1 }
 0x363   : > { %3982 = vst.msk [vmem:[#allocation2 + $0xf8] sm:$0xff] %vm448_vm3, %v7864_v24  ;;  %4451 = vst.msk [vmem:[#allocation2 + $0xc8] sm:$0xff] %vm448_vm3, %v4419_v33 }
 0x364   : > { %v3939_v31 = vpop.f32.mrf.mxu1 }
 0x365   : > { %3980 = vst.msk [vmem:[#allocation2 + $0xe8] sm:$0xff] %vm448_vm3, %v3939_v31  ;;  %v7897_v62 = vpop.f32.mrf.mxu0  ;;  %8100 = vmatmul.mubr.msk.bf16.gmra.mxu0 %vm448_vm3, %v9871_v36 }
 0x366   : > { %v4392_v3 = vld [vmem:[#allocation2 + $0xf0] sm:$0xff]  ;;  %v7903_v8 = vpop.f32.mrf.mxu1  ;;  %8106 = vmatmul.mubr.msk.bf16.vlgmr.msra.gmra.mxu1 %vm448_vm3, %v9908_v18 }
 0x367   : > { %v4424_v35 = vadd.f32 %v7897_v62, %v4392_v3  ;;  %v4777_v38 = vadd.f32 %v7903_v8, %v4745_v11  ;;  %v4347_v19 = vpop.f32.mrf.mxu0  ;;  %8109 = vmatprep.mubr.msk.bf16.mxu1 %vm448_vm3, %v9915_v48  ;;  %v4751_v3 = vld [vmem:[#allocation2 + $0x40] sm:$0xff] }
 0x368   : > { %v4390_v10 = vld [vmem:[#allocation2 + $0xe0] sm:$0xff]  ;;  %v4616_v50 = vpop.f32.mrf.mxu1 }
 0x369   : > { %4456 = vst.msk [vmem:[#allocation2 + $0xf0] sm:$0xff] %vm448_vm3, %v4424_v35  ;;  %4809 = vst.msk [vmem:[#allocation2 + $0x10] sm:$0xff] %vm448_vm3, %v4777_v38  ;;  %v4422_v36 = vadd.f32 %v4390_v10, %v4347_v19  ;;  %v4775_v7 = vadd.f32 %v4743_v20, %v4616_v50  ;;  %v7898_v29 = vpop.f32.mrf.mxu0  ;;  %v4754_v19 = vld [vmem:[#allocation2 + $0x58] sm:$0xff] }
 0x36a   : > { %v4393_v43 = vld [vmem:[#allocation2 + $0xf8] sm:$0xff]  ;;  %v7904_v26 = vpop.f32.mrf.mxu1 }
 0x36b   : > { %4454 = vst.msk [vmem:[#allocation2 + $0xe0] sm:$0xff] %vm448_vm3, %v4422_v36  ;;  %4807 = vst.msk [vmem:[#allocation2] sm:$0xff] %vm448_vm3, %v4775_v7  ;;  %v4425_v18 = vadd.f32 %v7898_v29, %v4393_v43  ;;  %v4778_v30 = vadd.f32 %v7904_v26, %v4746_v45  ;;  %v4350_v48 = vpop.f32.mrf.mxu0  ;;  %v4752_v7 = vld [vmem:[#allocation2 + $0x48] sm:$0xff] }
 0x36c   : > { %v4391_v46 = vld [vmem:[#allocation2 + $0xe8] sm:$0xff]  ;;  %v4619_v6 = vpop.f32.mrf.mxu1 }
 0x36d   : > { %4457 = vst.msk [vmem:[#allocation2 + $0xf8] sm:$0xff] %vm448_vm3, %v4425_v18  ;;  %4810 = vst.msk [vmem:[#allocation2 + $0x18] sm:$0xff] %vm448_vm3, %v4778_v30  ;;  %v4423_v52 = vadd.f32 %v4391_v46, %v4350_v48  ;;  %v4776_v4 = vadd.f32 %v4744_v54, %v4619_v6  ;;  %v7937_v61 = vpop.f32.mrf.mxu0  ;;  %v4757_v30 = vld [vmem:[#allocation2 + $0x70] sm:$0xff] }
 0x36e   : > { %v7907_v12 = vpop.f32.mrf.mxu1  ;;  %8110 = vmatmul.mubr.msk.bf16.gmra.mxu1 %vm448_vm3, %v9929_v41  ;;  %v4750_v41 = vld [vmem:[#allocation2 + $0x38] sm:$0xff] }
 0x36f   : > { %4455 = vst.msk [vmem:[#allocation2 + $0xe8] sm:$0xff] %vm448_vm3, %v4423_v52  ;;  %4808 = vst.msk [vmem:[#allocation2 + $0x8] sm:$0xff] %vm448_vm3, %v4776_v4  ;;  %v4781_v25 = vadd.f32 %v7907_v12, %v4749_v51  ;;  %v4884_v58 = vpop.f32.mrf.mxu0  ;;  %8113 = vmatprep.mubr.msk.bf16.mxu1 %vm448_vm3, %v9936_v47  ;;  %v4755_v4 = vld [vmem:[#allocation2 + $0x60] sm:$0xff] }
 0x370   : > { %v5013_v60 = vld [vmem:[#allocation2 + $0x10] sm:$0xff]  ;;  %v4632_v59 = vpop.f32.mrf.mxu1 }
 0x371   : > { %v5045_v0 = vadd.f32 %v7937_v61, %v5013_v60  ;;  %4813 = vst.msk [vmem:[#allocation2 + $0x30] sm:$0xff] %vm448_vm3, %v4781_v25  ;;  %v4779_v53 = vadd.f32 %v4747_v28, %v4632_v59  ;;  %v7938_v63 = vpop.f32.mrf.mxu0 }
 0x372   : > { %v5011_v14 = vld [vmem:[#allocation2] sm:$0xff]  ;;  %v7908_v34 = vpop.f32.mrf.mxu1 }
 0x373   : > { %5077 = vst.msk [vmem:[#allocation2 + $0x10] sm:$0xff] %vm448_vm3, %v5045_v0  ;;  %v5043_v1 = vadd.f32 %v5011_v14, %v4884_v58  ;;  %4811 = vst.msk [vmem:[#allocation2 + $0x20] sm:$0xff] %vm448_vm3, %v4779_v53  ;;  %v4782_v23 = vadd.f32 %v7908_v34, %v4750_v41  ;;  %v4887_v27 = vpop.f32.mrf.mxu0  ;;  %v4758_v58 = vld [vmem:[#allocation2 + $0x78] sm:$0xff]  ;;  %v4756_v53 = vld [vmem:[#allocation2 + $0x68] sm:$0xff] }
 0x374   : > { %v5014_v42 = vld [vmem:[#allocation2 + $0x18] sm:$0xff]  ;;  %v4635_v47 = vpop.f32.mrf.mxu1 }
 0x375   : > { %5075 = vst.msk [vmem:[#allocation2] sm:$0xff] %vm448_vm3, %v5043_v1  ;;  %v5046_v16 = vadd.f32 %v7938_v63, %v5014_v42  ;;  %4814 = vst.msk [vmem:[#allocation2 + $0x38] sm:$0xff] %vm448_vm3, %v4782_v23  ;;  %v4780_v22 = vadd.f32 %v4748_v15, %v4635_v47  ;;  %v7941_v37 = vpop.f32.mrf.mxu0  ;;  %v4761_v23 = vld [vmem:[#allocation2 + $0x90] sm:$0xff] }
 0x376   : > { %v5012_v49 = vld [vmem:[#allocation2 + $0x8] sm:$0xff]  ;;  %v7911_v57 = vpop.f32.mrf.mxu1  ;;  %8114 = vmatmul.mubr.msk.bf16.gmra.mxu1 %vm448_vm3, %v9947_v32 }
 0x377   : > { %5078 = vst.msk [vmem:[#allocation2 + $0x18] sm:$0xff] %vm448_vm3, %v5046_v16  ;;  %v5044_v17 = vadd.f32 %v5012_v49, %v4887_v27  ;;  %4812 = vst.msk [vmem:[#allocation2 + $0x28] sm:$0xff] %vm448_vm3, %v4780_v22  ;;  %v4785_v24 = vadd.f32 %v7911_v57, %v4753_v56  ;;  %v4900_v33 = vpop.f32.mrf.mxu0  ;;  %8117 = vmatprep.mubr.msk.bf16.mxu1 %vm448_vm3, %v9954_v39  ;;  %v4759_v22 = vld [vmem:[#allocation2 + $0x80] sm:$0xff] }
 0x378   : > { %v5017_v31 = vld [vmem:[#allocation2 + $0x30] sm:$0xff]  ;;  %v4648_v62 = vpop.f32.mrf.mxu1 }
 0x379   : > { %5076 = vst.msk [vmem:[#allocation2 + $0x8] sm:$0xff] %vm448_vm3, %v5044_v17  ;;  %v5049_v8 = vadd.f32 %v7941_v37, %v5017_v31  ;;  %4817 = vst.msk [vmem:[#allocation2 + $0x50] sm:$0xff] %vm448_vm3, %v4785_v24  ;;  %v4783_v11 = vadd.f32 %v4751_v3, %v4648_v62  ;;  %v7942_v32 = vpop.f32.mrf.mxu0  ;;  %v4762_v17 = vld [vmem:[#allocation2 + $0x98] sm:$0xff]  ;;  %v4760_v3 = vld [vmem:[#allocation2 + $0x88] sm:$0xff] }
 0x37a   : > { %v5015_v35 = vld [vmem:[#allocation2 + $0x20] sm:$0xff]  ;;  %v7912_v38 = vpop.f32.mrf.mxu1 }
 0x37b   : > { %5081 = vst.msk [vmem:[#allocation2 + $0x30] sm:$0xff] %vm448_vm3, %v5049_v8  ;;  %v5047_v10 = vadd.f32 %v5015_v35, %v4900_v33  ;;  %4815 = vst.msk [vmem:[#allocation2 + $0x40] sm:$0xff] %vm448_vm3, %v4783_v11  ;;  %v4786_v50 = vadd.f32 %v7912_v38, %v4754_v19  ;;  %v4903_v39 = vpop.f32.mrf.mxu0  ;;  %v4765_v19 = vld [vmem:[#allocation2 + $0xb0] sm:$0xff] }
 0x37c   : > { %v5018_v20 = vld [vmem:[#allocation2 + $0x38] sm:$0xff]  ;;  %v4651_v36 = vpop.f32.mrf.mxu1 }
 0x37d   : > { %5079 = vst.msk [vmem:[#allocation2 + $0x20] sm:$0xff] %vm448_vm3, %v5047_v10  ;;  %v5050_v29 = vadd.f32 %v7942_v32, %v5018_v20  ;;  %4818 = vst.msk [vmem:[#allocation2 + $0x58] sm:$0xff] %vm448_vm3, %v4786_v50  ;;  %v4784_v43 = vadd.f32 %v4752_v7, %v4651_v36  ;;  %v7945_v26 = vpop.f32.mrf.mxu0  ;;  %v4763_v7 = vld [vmem:[#allocation2 + $0xa0] sm:$0xff] }
 0x37e   : > { %v5016_v45 = vld [vmem:[#allocation2 + $0x28] sm:$0xff]  ;;  %v7915_v18 = vpop.f32.mrf.mxu1  ;;  %8118 = vmatmul.mubr.msk.bf16.gmra.mxu1 %vm448_vm3, %v9965_v5 }
 0x37f   : > { %5082 = vst.msk [vmem:[#allocation2 + $0x38] sm:$0xff] %vm448_vm3, %v5050_v29  ;;  %v5048_v48 = vadd.f32 %v5016_v45, %v4903_v39  ;;  %4816 = vst.msk [vmem:[#allocation2 + $0x48] sm:$0xff] %vm448_vm3, %v4784_v43  ;;  %v4789_v46 = vadd.f32 %v7915_v18, %v4757_v30  ;;  %v4916_v6 = vpop.f32.mrf.mxu0  ;;  %8121 = vmatprep.mubr.msk.bf16.mxu1 %vm448_vm3, %v9972_v13  ;;  %v4766_v18 = vld [vmem:[#allocation2 + $0xb8] sm:$0xff] }
 0x380   : > { %v5021_v54 = vld [vmem:[#allocation2 + $0x50] sm:$0xff]  ;;  %v4664_v52 = vpop.f32.mrf.mxu1 }
 0x381   : > { %5080 = vst.msk [vmem:[#allocation2 + $0x28] sm:$0xff] %vm448_vm3, %v5048_v48  ;;  %v5053_v61 = vadd.f32 %v7945_v26, %v5021_v54  ;;  %4821 = vst.msk [vmem:[#allocation2 + $0x70] sm:$0xff] %vm448_vm3, %v4789_v46  ;;  %v4787_v12 = vadd.f32 %v4755_v4, %v4664_v52  ;;  %v7946_v5 = vpop.f32.mrf.mxu0  ;;  %v4764_v54 = vld [vmem:[#allocation2 + $0xa8] sm:$0xff] }
 0x382   : > { %v5019_v51 = vld [vmem:[#allocation2 + $0x40] sm:$0xff]  ;;  %v7916_v25 = vpop.f32.mrf.mxu1 }
 0x383   : > { %5085 = vst.msk [vmem:[#allocation2 + $0x50] sm:$0xff] %vm448_vm3, %v5053_v61  ;;  %v5051_v60 = vadd.f32 %v5019_v51, %v4916_v6  ;;  %4819 = vst.msk [vmem:[#allocation2 + $0x60] sm:$0xff] %vm448_vm3, %v4787_v12  ;;  %v4790_v59 = vadd.f32 %v7916_v25, %v4758_v58  ;;  %v4919_v13 = vpop.f32.mrf.mxu0  ;;  %v4769_v51 = vld [vmem:[#allocation2 + $0xd0] sm:$0xff] }
 0x384   : > { %v5022_v28 = vld [vmem:[#allocation2 + $0x58] sm:$0xff]  ;;  %v4667_v0 = vpop.f32.mrf.mxu1 }
 0x385   : > { %5083 = vst.msk [vmem:[#allocation2 + $0x40] sm:$0xff] %vm448_vm3, %v5051_v60  ;;  %v5054_v63 = vadd.f32 %v7946_v5, %v5022_v28  ;;  %4822 = vst.msk [vmem:[#allocation2 + $0x78] sm:$0xff] %vm448_vm3, %v4790_v59  ;;  %v4788_v14 = vadd.f32 %v4756_v53, %v4667_v0  ;;  %v7949_v34 = vpop.f32.mrf.mxu0  ;;  %v4767_v28 = vld [vmem:[#allocation2 + $0xc0] sm:$0xff] }
 0x386   : > { %v5020_v41 = vld [vmem:[#allocation2 + $0x48] sm:$0xff]  ;;  %v7919_v1 = vpop.f32.mrf.mxu1  ;;  %8122 = vmatmul.mubr.msk.bf16.gmra.mxu1 %vm448_vm3, %v9989_v2 }
 0x387   : > { %5086 = vst.msk [vmem:[#allocation2 + $0x58] sm:$0xff] %vm448_vm3, %v5054_v63  ;;  %v5052_v27 = vadd.f32 %v5020_v41, %v4919_v13  ;;  %4820 = vst.msk [vmem:[#allocation2 + $0x68] sm:$0xff] %vm448_vm3, %v4788_v14  ;;  %v4793_v42 = vadd.f32 %v7919_v1, %v4761_v23  ;;  %v4932_v47 = vpop.f32.mrf.mxu0  ;;  %8125 = vmatprep.mubr.msk.bf16.mxu1 %vm448_vm3, %v9996_v9  ;;  %v4770_v41 = vld [vmem:[#allocation2 + $0xd8] sm:$0xff] }
 0x388   : > { %v5025_v15 = vld [vmem:[#allocation2 + $0x70] sm:$0xff]  ;;  %v4680_v16 = vpop.f32.mrf.mxu1 }
 0x389   : > { %5084 = vst.msk [vmem:[#allocation2 + $0x48] sm:$0xff] %vm448_vm3, %v5052_v27  ;;  %v5057_v37 = vadd.f32 %v7949_v34, %v5025_v15  ;;  %4825 = vst.msk [vmem:[#allocation2 + $0x90] sm:$0xff] %vm448_vm3, %v4793_v42  ;;  %v4791_v49 = vadd.f32 %v4759_v22, %v4680_v16  ;;  %v7950_v2 = vpop.f32.mrf.mxu0 }
 0x38a   : > { %v5023_v57 = vld [vmem:[#allocation2 + $0x60] sm:$0xff]  ;;  %v7920_v56 = vpop.f32.mrf.mxu1 }
 0x38b   : > { %5089 = vst.msk [vmem:[#allocation2 + $0x70] sm:$0xff] %vm448_vm3, %v5057_v37  ;;  %v5055_v24 = vadd.f32 %v5023_v57, %v4932_v47  ;;  %4823 = vst.msk [vmem:[#allocation2 + $0x80] sm:$0xff] %vm448_vm3, %v4791_v49  ;;  %v4794_v33 = vadd.f32 %v7920_v56, %v4762_v17  ;;  %v4935_v9 = vpop.f32.mrf.mxu0  ;;  %v4768_v47 = vld [vmem:[#allocation2 + $0xc8] sm:$0xff] }
 0x38c   : > { %v5026_v31 = vld [vmem:[#allocation2 + $0x78] sm:$0xff]  ;;  %v4683_v62 = vpop.f32.mrf.mxu1 }
 0x38d   : > { %5087 = vst.msk [vmem:[#allocation2 + $0x60] sm:$0xff] %vm448_vm3, %v5055_v24  ;;  %v5058_v8 = vadd.f32 %v7950_v2, %v5026_v31  ;;  %4826 = vst.msk [vmem:[#allocation2 + $0x98] sm:$0xff] %vm448_vm3, %v4794_v33  ;;  %v4792_v11 = vadd.f32 %v4760_v3, %v4683_v62  ;;  %v7953_v32 = vpop.f32.mrf.mxu0  ;;  %v4773_v2 = vld [vmem:[#allocation2 + $0xf0] sm:$0xff] }
 0x38e   : > { %v5024_v35 = vld [vmem:[#allocation2 + $0x68] sm:$0xff]  ;;  %v7923_v38 = vpop.f32.mrf.mxu1  ;;  %8126 = vmatmul.mubr.msk.bf16.gmra.mxu1 %vm448_vm3, %v10007_v55 }
 0x38f   : > { %5090 = vst.msk [vmem:[#allocation2 + $0x78] sm:$0xff] %vm448_vm3, %v5058_v8  ;;  %v5056_v10 = vadd.f32 %v5024_v35, %v4935_v9  ;;  %4824 = vst.msk [vmem:[#allocation2 + $0x88] sm:$0xff] %vm448_vm3, %v4792_v11  ;;  %v4797_v50 = vadd.f32 %v7923_v38, %v4765_v19  ;;  %v4948_v39 = vpop.f32.mrf.mxu0  ;;  %8129 = vmatprep.mubr.msk.bf16.mxu1 %vm448_vm3, %v10014_v40  ;;  %v4771_v9 = vld [vmem:[#allocation2 + $0xe0] sm:$0xff] }
 0x390   : > { %v5029_v20 = vld [vmem:[#allocation2 + $0x90] sm:$0xff]  ;;  %v4696_v36 = vpop.f32.mrf.mxu1 }
 0x391   : > { %5088 = vst.msk [vmem:[#allocation2 + $0x68] sm:$0xff] %vm448_vm3, %v5056_v10  ;;  %v5061_v29 = vadd.f32 %v7953_v32, %v5029_v20  ;;  %4829 = vst.msk [vmem:[#allocation2 + $0xb0] sm:$0xff] %vm448_vm3, %v4797_v50  ;;  %v4795_v43 = vadd.f32 %v4763_v7, %v4696_v36  ;;  %v7954_v55 = vpop.f32.mrf.mxu0  ;;  %v4772_v50 = vld [vmem:[#allocation2 + $0xe8] sm:$0xff] }
 0x392   : > { %v5027_v26 = vld [vmem:[#allocation2 + $0x80] sm:$0xff]  ;;  %v7924_v45 = vpop.f32.mrf.mxu1 }
 0x393   : > { %5093 = vst.msk [vmem:[#allocation2 + $0x90] sm:$0xff] %vm448_vm3, %v5061_v29  ;;  %v5059_v30 = vadd.f32 %v5027_v26, %v4948_v39  ;;  %4827 = vst.msk [vmem:[#allocation2 + $0xa0] sm:$0xff] %vm448_vm3, %v4795_v43  ;;  %v4798_v48 = vadd.f32 %v7924_v45, %v4766_v18  ;;  %v4951_v40 = vpop.f32.mrf.mxu0  ;;  %v5288_v43 = vld [vmem:[#allocation2 + $0x10] sm:$0xff] }
 0x394   : > { %v5030_v46 = vld [vmem:[#allocation2 + $0x98] sm:$0xff]  ;;  %v4699_v6 = vpop.f32.mrf.mxu1 }
 0x395   : > { %5091 = vst.msk [vmem:[#allocation2 + $0x80] sm:$0xff] %vm448_vm3, %v5059_v30  ;;  %v5062_v52 = vadd.f32 %v7954_v55, %v5030_v46  ;;  %4830 = vst.msk [vmem:[#allocation2 + $0xb8] sm:$0xff] %vm448_vm3, %v4798_v48  ;;  %v4796_v4 = vadd.f32 %v4764_v54, %v4699_v6  ;;  %v7957_v61 = vpop.f32.mrf.mxu0  ;;  %v5286_v48 = vld [vmem:[#allocation2] sm:$0xff] }
 0x396   : > { %v5028_v12 = vld [vmem:[#allocation2 + $0x88] sm:$0xff]  ;;  %v7927_v5 = vpop.f32.mrf.mxu1  ;;  %8130 = vmatmul.mubr.msk.bf16.gmra.mxu1 %vm448_vm3, %v10023_v44 }
 0x397   : > { %5094 = vst.msk [vmem:[#allocation2 + $0x98] sm:$0xff] %vm448_vm3, %v5062_v52  ;;  %v5060_v25 = vadd.f32 %v5028_v12, %v4951_v40  ;;  %4828 = vst.msk [vmem:[#allocation2 + $0xa8] sm:$0xff] %vm448_vm3, %v4796_v4  ;;  %v4801_v58 = vadd.f32 %v7927_v5, %v4769_v51  ;;  %v4964_v60 = vpop.f32.mrf.mxu0  ;;  %8133 = vmatprep.mubr.msk.bf16.mxu1 %vm448_vm3, %v10118_v21  ;;  %v5289_v4 = vld [vmem:[#allocation2 + $0x18] sm:$0xff] }
 0x398   : > { %v5033_v59 = vld [vmem:[#allocation2 + $0xb0] sm:$0xff]  ;;  %v4712_v13 = vpop.f32.mrf.mxu1 }
 0x399   : > { %5092 = vst.msk [vmem:[#allocation2 + $0x88] sm:$0xff] %vm448_vm3, %v5060_v25  ;;  %v5065_v0 = vadd.f32 %v7957_v61, %v5033_v59  ;;  %4833 = vst.msk [vmem:[#allocation2 + $0xd0] sm:$0xff] %vm448_vm3, %v4801_v58  ;;  %v4799_v53 = vadd.f32 %v4767_v28, %v4712_v13  ;;  %v7958_v63 = vpop.f32.mrf.mxu0  ;;  %v5287_v58 = vld [vmem:[#allocation2 + $0x8] sm:$0xff] }
 0x39a   : > { %v5031_v14 = vld [vmem:[#allocation2 + $0xa0] sm:$0xff]  ;;  %v7928_v34 = vpop.f32.mrf.mxu1 }
 0x39b   : > { %5097 = vst.msk [vmem:[#allocation2 + $0xb0] sm:$0xff] %vm448_vm3, %v5065_v0  ;;  %v5063_v1 = vadd.f32 %v5031_v14, %v4964_v60  ;;  %4831 = vst.msk [vmem:[#allocation2 + $0xc0] sm:$0xff] %vm448_vm3, %v4799_v53  ;;  %v4802_v23 = vadd.f32 %v7928_v34, %v4770_v41  ;;  %v4967_v21 = vpop.f32.mrf.mxu0  ;;  %v5292_v53 = vld [vmem:[#allocation2 + $0x30] sm:$0xff] }
 0x39c   : > { %v5034_v27 = vld [vmem:[#allocation2 + $0xb8] sm:$0xff]  ;;  %v4715_v42 = vpop.f32.mrf.mxu1 }
 0x39d   : > { %5095 = vst.msk [vmem:[#allocation2 + $0xa0] sm:$0xff] %vm448_vm3, %v5063_v1  ;;  %v5066_v15 = vadd.f32 %v7958_v63, %v5034_v27  ;;  %4834 = vst.msk [vmem:[#allocation2 + $0xd8] sm:$0xff] %vm448_vm3, %v4802_v23  ;;  %v4800_v16 = vadd.f32 %v4768_v47, %v4715_v42  ;;  %v7961_v22 = vpop.f32.mrf.mxu0  ;;  %v5290_v23 = vld [vmem:[#allocation2 + $0x20] sm:$0xff] }
 0x39e   : > { %v5032_v37 = vld [vmem:[#allocation2 + $0xa8] sm:$0xff]  ;;  %v7931_v49 = vpop.f32.mrf.mxu1  ;;  %8134 = vmatmul.mubr.msk.bf16.gmra.mxu1 %vm448_vm3, %v10023_v44  ;;  %v4774_v44 = vld [vmem:[#allocation2 + $0xf8] sm:$0xff] }
 0x39f   : > { %5098 = vst.msk [vmem:[#allocation2 + $0xb8] sm:$0xff] %vm448_vm3, %v5066_v15  ;;  %v5064_v57 = vadd.f32 %v5032_v37, %v4967_v21  ;;  %4832 = vst.msk [vmem:[#allocation2 + $0xc8] sm:$0xff] %vm448_vm3, %v4800_v16  ;;  %v4805_v56 = vadd.f32 %v7931_v49, %v4773_v2  ;;  %v4980_v17 = vpop.f32.mrf.mxu0  ;;  %v5293_v16 = vld [vmem:[#allocation2 + $0x38] sm:$0xff] }
 0x3a0   : > { %v5037_v24 = vld [vmem:[#allocation2 + $0xd0] sm:$0xff]  ;;  %v4728_v33 = vpop.f32.mrf.mxu1 }
 0x3a1   : > { %5096 = vst.msk [vmem:[#allocation2 + $0xa8] sm:$0xff] %vm448_vm3, %v5064_v57  ;;  %v5069_v31 = vadd.f32 %v7961_v22, %v5037_v24  ;;  %4837 = vst.msk [vmem:[#allocation2 + $0xf0] sm:$0xff] %vm448_vm3, %v4805_v56  ;;  %v4803_v62 = vadd.f32 %v4771_v9, %v4728_v33  ;;  %v7962_v3 = vpop.f32.mrf.mxu0  ;;  %v5291_v56 = vld [vmem:[#allocation2 + $0x28] sm:$0xff] }
 0x3a2   : > { %v5035_v8 = vld [vmem:[#allocation2 + $0xc0] sm:$0xff]  ;;  %v7932_v11 = vpop.f32.mrf.mxu1 }
 0x3a3   : > { %5101 = vst.msk [vmem:[#allocation2 + $0xd0] sm:$0xff] %vm448_vm3, %v5069_v31  ;;  %v5067_v32 = vadd.f32 %v5035_v8, %v4980_v17  ;;  %4835 = vst.msk [vmem:[#allocation2 + $0xe0] sm:$0xff] %vm448_vm3, %v4803_v62  ;;  %v4806_v35 = vadd.f32 %v7932_v11, %v4774_v44  ;;  %v4983_v38 = vpop.f32.mrf.mxu0  ;;  %v5296_v62 = vld [vmem:[#allocation2 + $0x50] sm:$0xff] }
 0x3a4   : > { %v5038_v19 = vld [vmem:[#allocation2 + $0xd8] sm:$0xff]  ;;  %v4731_v10 = vpop.f32.mrf.mxu1 }
 0x3a5   : > { %5099 = vst.msk [vmem:[#allocation2 + $0xc0] sm:$0xff] %vm448_vm3, %v5067_v32  ;;  %v5070_v39 = vadd.f32 %v7962_v3, %v5038_v19  ;;  %4838 = vst.msk [vmem:[#allocation2 + $0xf8] sm:$0xff] %vm448_vm3, %v4806_v35  ;;  %v4804_v20 = vadd.f32 %v4772_v50, %v4731_v10  ;;  %v7965_v36 = vpop.f32.mrf.mxu0  ;;  %v5294_v35 = vld [vmem:[#allocation2 + $0x40] sm:$0xff] }
 0x3a6   : > { %v5036_v7 = vld [vmem:[#allocation2 + $0xc8] sm:$0xff]  ;;  %v7971_v29 = vpop.f32.mrf.mxu1 }
 0x3a7   : > { %5102 = vst.msk [vmem:[#allocation2 + $0xd8] sm:$0xff] %vm448_vm3, %v5070_v39  ;;  %v5068_v55 = vadd.f32 %v5036_v7, %v4983_v38  ;;  %4836 = vst.msk [vmem:[#allocation2 + $0xe8] sm:$0xff] %vm448_vm3, %v4804_v20  ;;  %v5320_v26 = vadd.f32 %v7971_v29, %v5288_v43  ;;  %v4996_v45 = vpop.f32.mrf.mxu0  ;;  %v5297_v20 = vld [vmem:[#allocation2 + $0x58] sm:$0xff] }
 0x3a8   : > { %v5041_v18 = vld [vmem:[#allocation2 + $0xf0] sm:$0xff]  ;;  %v5159_v30 = vpop.f32.mrf.mxu1 }
 0x3a9   : > { %5100 = vst.msk [vmem:[#allocation2 + $0xc8] sm:$0xff] %vm448_vm3, %v5068_v55  ;;  %v5073_v40 = vadd.f32 %v7965_v36, %v5041_v18  ;;  %5352 = vst.msk [vmem:[#allocation2 + $0x10] sm:$0xff] %vm448_vm3, %v5320_v26  ;;  %v5318_v46 = vadd.f32 %v5286_v48, %v5159_v30  ;;  %v7966_v6 = vpop.f32.mrf.mxu0  ;;  %v5295_v26 = vld [vmem:[#allocation2 + $0x48] sm:$0xff] }
 0x3aa   : > { %v5039_v54 = vld [vmem:[#allocation2 + $0xe0] sm:$0xff]  ;;  %v7972_v52 = vpop.f32.mrf.mxu1 }
 0x3ab   : > { %5105 = vst.msk [vmem:[#allocation2 + $0xf0] sm:$0xff] %vm448_vm3, %v5073_v40  ;;  %v5071_v61 = vadd.f32 %v5039_v54, %v4996_v45  ;;  %5350 = vst.msk [vmem:[#allocation2] sm:$0xff] %vm448_vm3, %v5318_v46  ;;  %v5321_v12 = vadd.f32 %v7972_v52, %v5289_v4  ;;  %v4999_v5 = vpop.f32.mrf.mxu0  ;;  %v5300_v46 = vld [vmem:[#allocation2 + $0x70] sm:$0xff] }
 0x3ac   : > { %v5042_v51 = vld [vmem:[#allocation2 + $0xf8] sm:$0xff]  ;;  %v5162_v25 = vpop.f32.mrf.mxu1 }
 0x3ad   : > { %5103 = vst.msk [vmem:[#allocation2 + $0xe0] sm:$0xff] %vm448_vm3, %v5071_v61  ;;  %v5074_v60 = vadd.f32 %v7966_v6, %v5042_v51  ;;  %5353 = vst.msk [vmem:[#allocation2 + $0x18] sm:$0xff] %vm448_vm3, %v5321_v12  ;;  %v5319_v59 = vadd.f32 %v5287_v58, %v5162_v25  ;;  %v8005_v13 = vpop.f32.mrf.mxu0  ;;  %v5298_v12 = vld [vmem:[#allocation2 + $0x60] sm:$0xff] }
 0x3ae   : > { %v5040_v28 = vld [vmem:[#allocation2 + $0xe8] sm:$0xff]  ;;  %v7975_v0 = vpop.f32.mrf.mxu1 }
 0x3af   : > { %5106 = vst.msk [vmem:[#allocation2 + $0xf8] sm:$0xff] %vm448_vm3, %v5074_v60  ;;  %v5072_v63 = vadd.f32 %v5040_v28, %v4999_v5  ;;  %5351 = vst.msk [vmem:[#allocation2 + $0x8] sm:$0xff] %vm448_vm3, %v5319_v59  ;;  %v5324_v14 = vadd.f32 %v7975_v0, %v5292_v53  ;;  %v5432_v34 = vpop.f32.mrf.mxu0  ;;  %v5301_v59 = vld [vmem:[#allocation2 + $0x78] sm:$0xff] }
 0x3b0   : > { %v5561_v41 = vld [vmem:[#allocation2 + $0x10] sm:$0xff]  ;;  %v5175_v1 = vpop.f32.mrf.mxu1 }
 0x3b1   : > { %5104 = vst.msk [vmem:[#allocation2 + $0xe8] sm:$0xff] %vm448_vm3, %v5072_v63  ;;  %v5593_v21 = vadd.f32 %v8005_v13, %v5561_v41  ;;  %5356 = vst.msk [vmem:[#allocation2 + $0x30] sm:$0xff] %vm448_vm3, %v5324_v14  ;;  %v5322_v27 = vadd.f32 %v5290_v23, %v5175_v1  ;;  %v8006_v42 = vpop.f32.mrf.mxu0  ;;  %v5299_v14 = vld [vmem:[#allocation2 + $0x68] sm:$0xff] }
 0x3b2   : > { %v5559_v47 = vld [vmem:[#allocation2] sm:$0xff]  ;;  %v7976_v15 = vpop.f32.mrf.mxu1 }
 0x3b3   : > { %5625 = vst.msk [vmem:[#allocation2 + $0x10] sm:$0xff] %vm448_vm3, %v5593_v21  ;;  %v5591_v22 = vadd.f32 %v5559_v47, %v5432_v34  ;;  %5354 = vst.msk [vmem:[#allocation2 + $0x20] sm:$0xff] %vm448_vm3, %v5322_v27  ;;  %v5325_v37 = vadd.f32 %v7976_v15, %v5293_v16  ;;  %v5435_v49 = vpop.f32.mrf.mxu0  ;;  %v5304_v27 = vld [vmem:[#allocation2 + $0x90] sm:$0xff] }
 0x3b4   : > { %v5562_v2 = vld [vmem:[#allocation2 + $0x18] sm:$0xff]  ;;  %v5178_v57 = vpop.f32.mrf.mxu1 }
 0x3b5   : > { %5623 = vst.msk [vmem:[#allocation2] sm:$0xff] %vm448_vm3, %v5591_v22  ;;  %v5594_v17 = vadd.f32 %v8006_v42, %v5562_v2  ;;  %5357 = vst.msk [vmem:[#allocation2 + $0x38] sm:$0xff] %vm448_vm3, %v5325_v37  ;;  %v5323_v24 = vadd.f32 %v5291_v56, %v5178_v57  ;;  %v8009_v33 = vpop.f32.mrf.mxu0  ;;  %v5302_v37 = vld [vmem:[#allocation2 + $0x80] sm:$0xff] }
 0x3b6   : > { %v5560_v9 = vld [vmem:[#allocation2 + $0x8] sm:$0xff]  ;;  %v7979_v31 = vpop.f32.mrf.mxu1 }
 0x3b7   : > { %5626 = vst.msk [vmem:[#allocation2 + $0x18] sm:$0xff] %vm448_vm3, %v5594_v17  ;;  %v5592_v3 = vadd.f32 %v5560_v9, %v5435_v49  ;;  %5355 = vst.msk [vmem:[#allocation2 + $0x28] sm:$0xff] %vm448_vm3, %v5323_v24  ;;  %v5328_v8 = vadd.f32 %v7979_v31, %v5296_v62  ;;  %v5448_v11 = vpop.f32.mrf.mxu0  ;;  %v5305_v24 = vld [vmem:[#allocation2 + $0x98] sm:$0xff] }
 0x3b8   : > { %v5565_v44 = vld [vmem:[#allocation2 + $0x30] sm:$0xff]  ;;  %v5191_v32 = vpop.f32.mrf.mxu1 }
 0x3b9   : > { %5624 = vst.msk [vmem:[#allocation2 + $0x8] sm:$0xff] %vm448_vm3, %v5592_v3  ;;  %v5597_v38 = vadd.f32 %v8009_v33, %v5565_v44  ;;  %5360 = vst.msk [vmem:[#allocation2 + $0x50] sm:$0xff] %vm448_vm3, %v5328_v8  ;;  %v5326_v19 = vadd.f32 %v5294_v35, %v5191_v32  ;;  %v8010_v10 = vpop.f32.mrf.mxu0  ;;  %v5303_v8 = vld [vmem:[#allocation2 + $0x88] sm:$0xff] }
 0x3ba   : > { %v5563_v50 = vld [vmem:[#allocation2 + $0x20] sm:$0xff]  ;;  %v7980_v39 = vpop.f32.mrf.mxu1 }
 0x3bb   : > { %5629 = vst.msk [vmem:[#allocation2 + $0x30] sm:$0xff] %vm448_vm3, %v5597_v38  ;;  %v5595_v36 = vadd.f32 %v5563_v50, %v5448_v11  ;;  %5358 = vst.msk [vmem:[#allocation2 + $0x40] sm:$0xff] %vm448_vm3, %v5326_v19  ;;  %v5329_v7 = vadd.f32 %v7980_v39, %v5297_v20  ;;  %v5451_v29 = vpop.f32.mrf.mxu0  ;;  %v5308_v19 = vld [vmem:[#allocation2 + $0xb0] sm:$0xff] }
 0x3bc   : > { %v5566_v43 = vld [vmem:[#allocation2 + $0x38] sm:$0xff]  ;;  %v5194_v55 = vpop.f32.mrf.mxu1 }
 0x3bd   : > { %5627 = vst.msk [vmem:[#allocation2 + $0x20] sm:$0xff] %vm448_vm3, %v5595_v36  ;;  %v5598_v45 = vadd.f32 %v8010_v10, %v5566_v43  ;;  %5361 = vst.msk [vmem:[#allocation2 + $0x58] sm:$0xff] %vm448_vm3, %v5329_v7  ;;  %v5327_v18 = vadd.f32 %v5295_v26, %v5194_v55  ;;  %v8013_v30 = vpop.f32.mrf.mxu0  ;;  %v5306_v7 = vld [vmem:[#allocation2 + $0xa0] sm:$0xff] }
 0x3be   : > { %v5564_v48 = vld [vmem:[#allocation2 + $0x28] sm:$0xff]  ;;  %v7983_v40 = vpop.f32.mrf.mxu1 }
 0x3bf   : > { %5630 = vst.msk [vmem:[#allocation2 + $0x38] sm:$0xff] %vm448_vm3, %v5598_v45  ;;  %v5596_v6 = vadd.f32 %v5564_v48, %v5451_v29  ;;  %5359 = vst.msk [vmem:[#allocation2 + $0x48] sm:$0xff] %vm448_vm3, %v5327_v18  ;;  %v5332_v54 = vadd.f32 %v7983_v40, %v5300_v46  ;;  %v5464_v52 = vpop.f32.mrf.mxu0  ;;  %v5309_v18 = vld [vmem:[#allocation2 + $0xb8] sm:$0xff] }
 0x3c0   : > { %v5569_v4 = vld [vmem:[#allocation2 + $0x50] sm:$0xff]  ;;  %v5207_v61 = vpop.f32.mrf.mxu1 }
 0x3c1   : > { %5628 = vst.msk [vmem:[#allocation2 + $0x28] sm:$0xff] %vm448_vm3, %v5596_v6  ;;  %v5601_v5 = vadd.f32 %v8013_v30, %v5569_v4  ;;  %5364 = vst.msk [vmem:[#allocation2 + $0x70] sm:$0xff] %vm448_vm3, %v5332_v54  ;;  %v5330_v51 = vadd.f32 %v5298_v12, %v5207_v61  ;;  %v8014_v25 = vpop.f32.mrf.mxu0  ;;  %v5307_v54 = vld [vmem:[#allocation2 + $0xa8] sm:$0xff] }
 0x3c2   : > { %v5567_v58 = vld [vmem:[#allocation2 + $0x40] sm:$0xff]  ;;  %v7984_v60 = vpop.f32.mrf.mxu1 }
 0x3c3   : > { %5633 = vst.msk [vmem:[#allocation2 + $0x50] sm:$0xff] %vm448_vm3, %v5601_v5  ;;  %v5599_v13 = vadd.f32 %v5567_v58, %v5464_v52  ;;  %5362 = vst.msk [vmem:[#allocation2 + $0x60] sm:$0xff] %vm448_vm3, %v5330_v51  ;;  %v5333_v28 = vadd.f32 %v7984_v60, %v5301_v59  ;;  %v5467_v0 = vpop.f32.mrf.mxu0  ;;  %v5312_v51 = vld [vmem:[#allocation2 + $0xd0] sm:$0xff] }
 0x3c4   : > { %v5570_v53 = vld [vmem:[#allocation2 + $0x58] sm:$0xff]  ;;  %v5210_v63 = vpop.f32.mrf.mxu1 }
 0x3c5   : > { %5631 = vst.msk [vmem:[#allocation2 + $0x40] sm:$0xff] %vm448_vm3, %v5599_v13  ;;  %v5602_v34 = vadd.f32 %v8014_v25, %v5570_v53  ;;  %5365 = vst.msk [vmem:[#allocation2 + $0x78] sm:$0xff] %vm448_vm3, %v5333_v28  ;;  %v5331_v41 = vadd.f32 %v5299_v14, %v5210_v63  ;;  %v8017_v1 = vpop.f32.mrf.mxu0  ;;  %v5310_v28 = vld [vmem:[#allocation2 + $0xc0] sm:$0xff] }
 0x3c6   : > { %v5568_v23 = vld [vmem:[#allocation2 + $0x48] sm:$0xff]  ;;  %v7987_v21 = vpop.f32.mrf.mxu1 }
 0x3c7   : > { %5634 = vst.msk [vmem:[#allocation2 + $0x58] sm:$0xff] %vm448_vm3, %v5602_v34  ;;  %v5600_v42 = vadd.f32 %v5568_v23, %v5467_v0  ;;  %5363 = vst.msk [vmem:[#allocation2 + $0x68] sm:$0xff] %vm448_vm3, %v5331_v41  ;;  %v5336_v47 = vadd.f32 %v7987_v21, %v5304_v27  ;;  %v5480_v15 = vpop.f32.mrf.mxu0  ;;  %v5313_v41 = vld [vmem:[#allocation2 + $0xd8] sm:$0xff] }
 0x3c8   : > { %v5573_v16 = vld [vmem:[#allocation2 + $0x70] sm:$0xff]  ;;  %v5223_v22 = vpop.f32.mrf.mxu1 }
 0x3c9   : > { %5632 = vst.msk [vmem:[#allocation2 + $0x48] sm:$0xff] %vm448_vm3, %v5600_v42  ;;  %v5605_v49 = vadd.f32 %v8017_v1, %v5573_v16  ;;  %5368 = vst.msk [vmem:[#allocation2 + $0x90] sm:$0xff] %vm448_vm3, %v5336_v47  ;;  %v5334_v2 = vadd.f32 %v5302_v37, %v5223_v22  ;;  %v8018_v57 = vpop.f32.mrf.mxu0  ;;  %v5311_v47 = vld [vmem:[#allocation2 + $0xc8] sm:$0xff] }
 0x3ca   : > { %v5571_v56 = vld [vmem:[#allocation2 + $0x60] sm:$0xff]  ;;  %v7988_v17 = vpop.f32.mrf.mxu1 }
 0x3cb   : > { %5637 = vst.msk [vmem:[#allocation2 + $0x70] sm:$0xff] %vm448_vm3, %v5605_v49  ;;  %v5603_v33 = vadd.f32 %v5571_v56, %v5480_v15  ;;  %5366 = vst.msk [vmem:[#allocation2 + $0x80] sm:$0xff] %vm448_vm3, %v5334_v2  ;;  %v5337_v9 = vadd.f32 %v7988_v17, %v5305_v24  ;;  %v5483_v31 = vpop.f32.mrf.mxu0  ;;  %v5316_v2 = vld [vmem:[#allocation2 + $0xf0] sm:$0xff] }
 0x3cc   : > { %v5574_v62 = vld [vmem:[#allocation2 + $0x78] sm:$0xff]  ;;  %v5226_v3 = vpop.f32.mrf.mxu1 }
 0x3cd   : > { %5635 = vst.msk [vmem:[#allocation2 + $0x60] sm:$0xff] %vm448_vm3, %v5603_v33  ;;  %v5606_v11 = vadd.f32 %v8018_v57, %v5574_v62  ;;  %5369 = vst.msk [vmem:[#allocation2 + $0x98] sm:$0xff] %vm448_vm3, %v5337_v9  ;;  %v5335_v44 = vadd.f32 %v5303_v8, %v5226_v3  ;;  %v8021_v32 = vpop.f32.mrf.mxu0  ;;  %v5314_v9 = vld [vmem:[#allocation2 + $0xe0] sm:$0xff] }
 0x3ce   : > { %v5572_v35 = vld [vmem:[#allocation2 + $0x68] sm:$0xff]  ;;  %v7991_v38 = vpop.f32.mrf.mxu1 }
 0x3cf   : > { %5638 = vst.msk [vmem:[#allocation2 + $0x78] sm:$0xff] %vm448_vm3, %v5606_v11  ;;  %v5604_v10 = vadd.f32 %v5572_v35, %v5483_v31  ;;  %5367 = vst.msk [vmem:[#allocation2 + $0x88] sm:$0xff] %vm448_vm3, %v5335_v44  ;;  %v5340_v50 = vadd.f32 %v7991_v38, %v5308_v19  ;;  %v5496_v39 = vpop.f32.mrf.mxu0  ;;  %v5317_v44 = vld [vmem:[#allocation2 + $0xf8] sm:$0xff] }
 0x3d0   : > { %v5577_v20 = vld [vmem:[#allocation2 + $0x90] sm:$0xff]  ;;  %v5239_v36 = vpop.f32.mrf.mxu1 }
 0x3d1   : > { %5636 = vst.msk [vmem:[#allocation2 + $0x68] sm:$0xff] %vm448_vm3, %v5604_v10  ;;  %v5609_v29 = vadd.f32 %v8021_v32, %v5577_v20  ;;  %5372 = vst.msk [vmem:[#allocation2 + $0xb0] sm:$0xff] %vm448_vm3, %v5340_v50  ;;  %v5338_v43 = vadd.f32 %v5306_v7, %v5239_v36  ;;  %v8022_v55 = vpop.f32.mrf.mxu0  ;;  %v5315_v50 = vld [vmem:[#allocation2 + $0xe8] sm:$0xff] }
 0x3d2   : > { %v5575_v26 = vld [vmem:[#allocation2 + $0x80] sm:$0xff]  ;;  %v7992_v45 = vpop.f32.mrf.mxu1 }
 0x3d3   : > { %5641 = vst.msk [vmem:[#allocation2 + $0x90] sm:$0xff] %vm448_vm3, %v5609_v29  ;;  %v5607_v30 = vadd.f32 %v5575_v26, %v5496_v39  ;;  %5370 = vst.msk [vmem:[#allocation2 + $0xa0] sm:$0xff] %vm448_vm3, %v5338_v43  ;;  %v5341_v48 = vadd.f32 %v7992_v45, %v5309_v18  ;;  %v5499_v40 = vpop.f32.mrf.mxu0  ;;  %v5822_v43 = vld [vmem:[#allocation2 + $0x10] sm:$0xff] }
 0x3d4   : > { %v5578_v46 = vld [vmem:[#allocation2 + $0x98] sm:$0xff]  ;;  %v5242_v6 = vpop.f32.mrf.mxu1 }
 0x3d5   : > { %5639 = vst.msk [vmem:[#allocation2 + $0x80] sm:$0xff] %vm448_vm3, %v5607_v30  ;;  %v5610_v52 = vadd.f32 %v8022_v55, %v5578_v46  ;;  %5373 = vst.msk [vmem:[#allocation2 + $0xb8] sm:$0xff] %vm448_vm3, %v5341_v48  ;;  %v5339_v4 = vadd.f32 %v5307_v54, %v5242_v6  ;;  %v8025_v61 = vpop.f32.mrf.mxu0  ;;  %v5820_v48 = vld [vmem:[#allocation2] sm:$0xff] }
 0x3d6   : > { %v5576_v12 = vld [vmem:[#allocation2 + $0x88] sm:$0xff]  ;;  %v7995_v5 = vpop.f32.mrf.mxu1 }
 0x3d7   : > { %5642 = vst.msk [vmem:[#allocation2 + $0x98] sm:$0xff] %vm448_vm3, %v5610_v52  ;;  %v5608_v25 = vadd.f32 %v5576_v12, %v5499_v40  ;;  %5371 = vst.msk [vmem:[#allocation2 + $0xa8] sm:$0xff] %vm448_vm3, %v5339_v4  ;;  %v5344_v58 = vadd.f32 %v7995_v5, %v5312_v51  ;;  %v5512_v60 = vpop.f32.mrf.mxu0  ;;  %v5823_v4 = vld [vmem:[#allocation2 + $0x18] sm:$0xff] }
 0x3d8   : > { %v5581_v59 = vld [vmem:[#allocation2 + $0xb0] sm:$0xff]  ;;  %v5255_v13 = vpop.f32.mrf.mxu1 }
 0x3d9   : > { %5640 = vst.msk [vmem:[#allocation2 + $0x88] sm:$0xff] %vm448_vm3, %v5608_v25  ;;  %v5613_v0 = vadd.f32 %v8025_v61, %v5581_v59  ;;  %5376 = vst.msk [vmem:[#allocation2 + $0xd0] sm:$0xff] %vm448_vm3, %v5344_v58  ;;  %v5342_v53 = vadd.f32 %v5310_v28, %v5255_v13  ;;  %v8026_v63 = vpop.f32.mrf.mxu0  ;;  %v5821_v58 = vld [vmem:[#allocation2 + $0x8] sm:$0xff] }
 0x3da   : > { %v5579_v14 = vld [vmem:[#allocation2 + $0xa0] sm:$0xff]  ;;  %v7996_v34 = vpop.f32.mrf.mxu1 }
 0x3db   : > { %5645 = vst.msk [vmem:[#allocation2 + $0xb0] sm:$0xff] %vm448_vm3, %v5613_v0  ;;  %v5611_v1 = vadd.f32 %v5579_v14, %v5512_v60  ;;  %5374 = vst.msk [vmem:[#allocation2 + $0xc0] sm:$0xff] %vm448_vm3, %v5342_v53  ;;  %v5345_v23 = vadd.f32 %v7996_v34, %v5313_v41  ;;  %v5515_v21 = vpop.f32.mrf.mxu0  ;;  %v5826_v53 = vld [vmem:[#allocation2 + $0x30] sm:$0xff] }
 0x3dc   : > { %v5582_v27 = vld [vmem:[#allocation2 + $0xb8] sm:$0xff]  ;;  %v5258_v42 = vpop.f32.mrf.mxu1 }
 0x3dd   : > { %5643 = vst.msk [vmem:[#allocation2 + $0xa0] sm:$0xff] %vm448_vm3, %v5611_v1  ;;  %v5614_v15 = vadd.f32 %v8026_v63, %v5582_v27  ;;  %5377 = vst.msk [vmem:[#allocation2 + $0xd8] sm:$0xff] %vm448_vm3, %v5345_v23  ;;  %v5343_v16 = vadd.f32 %v5311_v47, %v5258_v42  ;;  %v8029_v22 = vpop.f32.mrf.mxu0  ;;  %v5824_v23 = vld [vmem:[#allocation2 + $0x20] sm:$0xff] }
 0x3de   : > { %v5580_v37 = vld [vmem:[#allocation2 + $0xa8] sm:$0xff]  ;;  %v7999_v49 = vpop.f32.mrf.mxu1 }
 0x3df   : > { %5646 = vst.msk [vmem:[#allocation2 + $0xb8] sm:$0xff] %vm448_vm3, %v5614_v15  ;;  %v5612_v57 = vadd.f32 %v5580_v37, %v5515_v21  ;;  %5375 = vst.msk [vmem:[#allocation2 + $0xc8] sm:$0xff] %vm448_vm3, %v5343_v16  ;;  %v5348_v56 = vadd.f32 %v7999_v49, %v5316_v2  ;;  %v5528_v17 = vpop.f32.mrf.mxu0  ;;  %v5827_v16 = vld [vmem:[#allocation2 + $0x38] sm:$0xff] }
 0x3e0   : > { %v5585_v24 = vld [vmem:[#allocation2 + $0xd0] sm:$0xff]  ;;  %v5271_v33 = vpop.f32.mrf.mxu1 }
 0x3e1   : > { %5644 = vst.msk [vmem:[#allocation2 + $0xa8] sm:$0xff] %vm448_vm3, %v5612_v57  ;;  %v5617_v31 = vadd.f32 %v8029_v22, %v5585_v24  ;;  %5380 = vst.msk [vmem:[#allocation2 + $0xf0] sm:$0xff] %vm448_vm3, %v5348_v56  ;;  %v5346_v62 = vadd.f32 %v5314_v9, %v5271_v33  ;;  %v8030_v3 = vpop.f32.mrf.mxu0  ;;  %v5825_v56 = vld [vmem:[#allocation2 + $0x28] sm:$0xff] }
 0x3e2   : > { %v5583_v8 = vld [vmem:[#allocation2 + $0xc0] sm:$0xff]  ;;  %v8000_v11 = vpop.f32.mrf.mxu1 }
 0x3e3   : > { %5649 = vst.msk [vmem:[#allocation2 + $0xd0] sm:$0xff] %vm448_vm3, %v5617_v31  ;;  %v5615_v32 = vadd.f32 %v5583_v8, %v5528_v17  ;;  %5378 = vst.msk [vmem:[#allocation2 + $0xe0] sm:$0xff] %vm448_vm3, %v5346_v62  ;;  %v5349_v35 = vadd.f32 %v8000_v11, %v5317_v44  ;;  %v5531_v38 = vpop.f32.mrf.mxu0  ;;  %v5830_v62 = vld [vmem:[#allocation2 + $0x50] sm:$0xff] }
 0x3e4   : > { %v5586_v19 = vld [vmem:[#allocation2 + $0xd8] sm:$0xff]  ;;  %v5274_v10 = vpop.f32.mrf.mxu1 }
 0x3e5   : > { %5647 = vst.msk [vmem:[#allocation2 + $0xc0] sm:$0xff] %vm448_vm3, %v5615_v32  ;;  %v5618_v39 = vadd.f32 %v8030_v3, %v5586_v19  ;;  %5381 = vst.msk [vmem:[#allocation2 + $0xf8] sm:$0xff] %vm448_vm3, %v5349_v35  ;;  %v5347_v20 = vadd.f32 %v5315_v50, %v5274_v10  ;;  %v8033_v36 = vpop.f32.mrf.mxu0  ;;  %v5828_v35 = vld [vmem:[#allocation2 + $0x40] sm:$0xff] }
 0x3e6   : > { %v5584_v7 = vld [vmem:[#allocation2 + $0xc8] sm:$0xff]  ;;  %v8039_v29 = vpop.f32.mrf.mxu1 }
 0x3e7   : > { %5650 = vst.msk [vmem:[#allocation2 + $0xd8] sm:$0xff] %vm448_vm3, %v5618_v39  ;;  %v5616_v55 = vadd.f32 %v5584_v7, %v5531_v38  ;;  %5379 = vst.msk [vmem:[#allocation2 + $0xe8] sm:$0xff] %vm448_vm3, %v5347_v20  ;;  %v5854_v26 = vadd.f32 %v8039_v29, %v5822_v43  ;;  %v5544_v45 = vpop.f32.mrf.mxu0  ;;  %v5831_v20 = vld [vmem:[#allocation2 + $0x58] sm:$0xff] }
 0x3e8   : > { %v5589_v18 = vld [vmem:[#allocation2 + $0xf0] sm:$0xff]  ;;  %v5693_v30 = vpop.f32.mrf.mxu1 }
 0x3e9   : > { %5648 = vst.msk [vmem:[#allocation2 + $0xc8] sm:$0xff] %vm448_vm3, %v5616_v55  ;;  %v5621_v40 = vadd.f32 %v8033_v36, %v5589_v18  ;;  %5886 = vst.msk [vmem:[#allocation2 + $0x10] sm:$0xff] %vm448_vm3, %v5854_v26  ;;  %v5852_v46 = vadd.f32 %v5820_v48, %v5693_v30  ;;  %v8034_v6 = vpop.f32.mrf.mxu0  ;;  %v5829_v26 = vld [vmem:[#allocation2 + $0x48] sm:$0xff] }
 0x3ea   : > { %v5587_v54 = vld [vmem:[#allocation2 + $0xe0] sm:$0xff]  ;;  %v8040_v52 = vpop.f32.mrf.mxu1 }
 0x3eb   : > { %5653 = vst.msk [vmem:[#allocation2 + $0xf0] sm:$0xff] %vm448_vm3, %v5621_v40  ;;  %v5619_v61 = vadd.f32 %v5587_v54, %v5544_v45  ;;  %5884 = vst.msk [vmem:[#allocation2] sm:$0xff] %vm448_vm3, %v5852_v46  ;;  %v5855_v12 = vadd.f32 %v8040_v52, %v5823_v4  ;;  %v5547_v5 = vpop.f32.mrf.mxu0  ;;  %v5834_v46 = vld [vmem:[#allocation2 + $0x70] sm:$0xff] }
 0x3ec   : > { %v5590_v51 = vld [vmem:[#allocation2 + $0xf8] sm:$0xff]  ;;  %v5696_v25 = vpop.f32.mrf.mxu1 }
 0x3ed   : > { %5651 = vst.msk [vmem:[#allocation2 + $0xe0] sm:$0xff] %vm448_vm3, %v5619_v61  ;;  %v5622_v60 = vadd.f32 %v8034_v6, %v5590_v51  ;;  %5887 = vst.msk [vmem:[#allocation2 + $0x18] sm:$0xff] %vm448_vm3, %v5855_v12  ;;  %v5853_v59 = vadd.f32 %v5821_v58, %v5696_v25  ;;  %v8073_v13 = vpop.f32.mrf.mxu0  ;;  %v5832_v12 = vld [vmem:[#allocation2 + $0x60] sm:$0xff] }
 0x3ee   : > { %v5588_v28 = vld [vmem:[#allocation2 + $0xe8] sm:$0xff]  ;;  %v8043_v0 = vpop.f32.mrf.mxu1 }
 0x3ef   : > { %5654 = vst.msk [vmem:[#allocation2 + $0xf8] sm:$0xff] %vm448_vm3, %v5622_v60  ;;  %v5620_v63 = vadd.f32 %v5588_v28, %v5547_v5  ;;  %5885 = vst.msk [vmem:[#allocation2 + $0x8] sm:$0xff] %vm448_vm3, %v5853_v59  ;;  %v5858_v14 = vadd.f32 %v8043_v0, %v5826_v53  ;;  %v5958_v34 = vpop.f32.mrf.mxu0  ;;  %v5835_v59 = vld [vmem:[#allocation2 + $0x78] sm:$0xff] }
 0x3f0   : > { %v6087_v41 = vld [vmem:[#allocation2 + $0x10] sm:$0xff]  ;;  %v5709_v1 = vpop.f32.mrf.mxu1 }
 0x3f1   : > { %5652 = vst.msk [vmem:[#allocation2 + $0xe8] sm:$0xff] %vm448_vm3, %v5620_v63  ;;  %v6119_v21 = vadd.f32 %v8073_v13, %v6087_v41  ;;  %5890 = vst.msk [vmem:[#allocation2 + $0x30] sm:$0xff] %vm448_vm3, %v5858_v14  ;;  %v5856_v27 = vadd.f32 %v5824_v23, %v5709_v1  ;;  %v8074_v42 = vpop.f32.mrf.mxu0  ;;  %v5833_v14 = vld [vmem:[#allocation2 + $0x68] sm:$0xff] }
 0x3f2   : > { %v6085_v47 = vld [vmem:[#allocation2] sm:$0xff]  ;;  %v8044_v15 = vpop.f32.mrf.mxu1 }
 0x3f3   : > { %6151 = vst.msk [vmem:[#allocation2 + $0x10] sm:$0xff] %vm448_vm3, %v6119_v21  ;;  %v6117_v22 = vadd.f32 %v6085_v47, %v5958_v34  ;;  %5888 = vst.msk [vmem:[#allocation2 + $0x20] sm:$0xff] %vm448_vm3, %v5856_v27  ;;  %v5859_v37 = vadd.f32 %v8044_v15, %v5827_v16  ;;  %v5961_v49 = vpop.f32.mrf.mxu0  ;;  %v5838_v27 = vld [vmem:[#allocation2 + $0x90] sm:$0xff] }
 0x3f4   : > { %v6088_v2 = vld [vmem:[#allocation2 + $0x18] sm:$0xff]  ;;  %v5712_v57 = vpop.f32.mrf.mxu1 }
 0x3f5   : > { %6149 = vst.msk [vmem:[#allocation2] sm:$0xff] %vm448_vm3, %v6117_v22  ;;  %v6120_v17 = vadd.f32 %v8074_v42, %v6088_v2  ;;  %5891 = vst.msk [vmem:[#allocation2 + $0x38] sm:$0xff] %vm448_vm3, %v5859_v37  ;;  %v5857_v24 = vadd.f32 %v5825_v56, %v5712_v57  ;;  %v8077_v33 = vpop.f32.mrf.mxu0  ;;  %v5836_v37 = vld [vmem:[#allocation2 + $0x80] sm:$0xff] }
 0x3f6   : > { %v6086_v9 = vld [vmem:[#allocation2 + $0x8] sm:$0xff]  ;;  %v8047_v31 = vpop.f32.mrf.mxu1 }
 0x3f7   : > { %6152 = vst.msk [vmem:[#allocation2 + $0x18] sm:$0xff] %vm448_vm3, %v6120_v17  ;;  %v6118_v3 = vadd.f32 %v6086_v9, %v5961_v49  ;;  %5889 = vst.msk [vmem:[#allocation2 + $0x28] sm:$0xff] %vm448_vm3, %v5857_v24  ;;  %v5862_v8 = vadd.f32 %v8047_v31, %v5830_v62  ;;  %v5974_v11 = vpop.f32.mrf.mxu0  ;;  %v5839_v24 = vld [vmem:[#allocation2 + $0x98] sm:$0xff] }
 0x3f8   : > { %v6091_v44 = vld [vmem:[#allocation2 + $0x30] sm:$0xff]  ;;  %v5725_v32 = vpop.f32.mrf.mxu1 }
 0x3f9   : > { %6150 = vst.msk [vmem:[#allocation2 + $0x8] sm:$0xff] %vm448_vm3, %v6118_v3  ;;  %v6123_v38 = vadd.f32 %v8077_v33, %v6091_v44  ;;  %5894 = vst.msk [vmem:[#allocation2 + $0x50] sm:$0xff] %vm448_vm3, %v5862_v8  ;;  %v5860_v19 = vadd.f32 %v5828_v35, %v5725_v32  ;;  %v8078_v10 = vpop.f32.mrf.mxu0  ;;  %v5837_v8 = vld [vmem:[#allocation2 + $0x88] sm:$0xff] }
 0x3fa   : > { %v6089_v50 = vld [vmem:[#allocation2 + $0x20] sm:$0xff]  ;;  %v8048_v39 = vpop.f32.mrf.mxu1 }
 0x3fb   : > { %6155 = vst.msk [vmem:[#allocation2 + $0x30] sm:$0xff] %vm448_vm3, %v6123_v38  ;;  %v6121_v36 = vadd.f32 %v6089_v50, %v5974_v11  ;;  %5892 = vst.msk [vmem:[#allocation2 + $0x40] sm:$0xff] %vm448_vm3, %v5860_v19  ;;  %v5863_v7 = vadd.f32 %v8048_v39, %v5831_v20  ;;  %v5977_v29 = vpop.f32.mrf.mxu0  ;;  %v5842_v19 = vld [vmem:[#allocation2 + $0xb0] sm:$0xff] }
 0x3fc   : > { %v6092_v43 = vld [vmem:[#allocation2 + $0x38] sm:$0xff]  ;;  %v5728_v55 = vpop.f32.mrf.mxu1 }
 0x3fd   : > { %6153 = vst.msk [vmem:[#allocation2 + $0x20] sm:$0xff] %vm448_vm3, %v6121_v36  ;;  %v6124_v45 = vadd.f32 %v8078_v10, %v6092_v43  ;;  %5895 = vst.msk [vmem:[#allocation2 + $0x58] sm:$0xff] %vm448_vm3, %v5863_v7  ;;  %v5861_v18 = vadd.f32 %v5829_v26, %v5728_v55  ;;  %v8081_v30 = vpop.f32.mrf.mxu0  ;;  %v5840_v7 = vld [vmem:[#allocation2 + $0xa0] sm:$0xff] }
 0x3fe   : > { %v6090_v48 = vld [vmem:[#allocation2 + $0x28] sm:$0xff]  ;;  %v8051_v40 = vpop.f32.mrf.mxu1 }
 0x3ff   : > { %6156 = vst.msk [vmem:[#allocation2 + $0x38] sm:$0xff] %vm448_vm3, %v6124_v45  ;;  %v6122_v6 = vadd.f32 %v6090_v48, %v5977_v29  ;;  %5893 = vst.msk [vmem:[#allocation2 + $0x48] sm:$0xff] %vm448_vm3, %v5861_v18  ;;  %v5866_v54 = vadd.f32 %v8051_v40, %v5834_v46  ;;  %v5990_v52 = vpop.f32.mrf.mxu0  ;;  %v5843_v18 = vld [vmem:[#allocation2 + $0xb8] sm:$0xff] }
 0x400   : > { %v6095_v4 = vld [vmem:[#allocation2 + $0x50] sm:$0xff]  ;;  %v5741_v61 = vpop.f32.mrf.mxu1 }
 0x401   : > { %6154 = vst.msk [vmem:[#allocation2 + $0x28] sm:$0xff] %vm448_vm3, %v6122_v6  ;;  %v6127_v5 = vadd.f32 %v8081_v30, %v6095_v4  ;;  %5898 = vst.msk [vmem:[#allocation2 + $0x70] sm:$0xff] %vm448_vm3, %v5866_v54  ;;  %v5864_v51 = vadd.f32 %v5832_v12, %v5741_v61  ;;  %v8082_v25 = vpop.f32.mrf.mxu0  ;;  %v5841_v54 = vld [vmem:[#allocation2 + $0xa8] sm:$0xff] }
 0x402   : > { %v6093_v58 = vld [vmem:[#allocation2 + $0x40] sm:$0xff]  ;;  %v8052_v60 = vpop.f32.mrf.mxu1 }
 0x403   : > { %6159 = vst.msk [vmem:[#allocation2 + $0x50] sm:$0xff] %vm448_vm3, %v6127_v5  ;;  %v6125_v13 = vadd.f32 %v6093_v58, %v5990_v52  ;;  %5896 = vst.msk [vmem:[#allocation2 + $0x60] sm:$0xff] %vm448_vm3, %v5864_v51  ;;  %v5867_v28 = vadd.f32 %v8052_v60, %v5835_v59  ;;  %v5993_v0 = vpop.f32.mrf.mxu0  ;;  %v5846_v51 = vld [vmem:[#allocation2 + $0xd0] sm:$0xff] }
 0x404   : > { %v6096_v53 = vld [vmem:[#allocation2 + $0x58] sm:$0xff]  ;;  %v5744_v63 = vpop.f32.mrf.mxu1 }
 0x405   : > { %6157 = vst.msk [vmem:[#allocation2 + $0x40] sm:$0xff] %vm448_vm3, %v6125_v13  ;;  %v6128_v34 = vadd.f32 %v8082_v25, %v6096_v53  ;;  %5899 = vst.msk [vmem:[#allocation2 + $0x78] sm:$0xff] %vm448_vm3, %v5867_v28  ;;  %v5865_v41 = vadd.f32 %v5833_v14, %v5744_v63  ;;  %v8085_v1 = vpop.f32.mrf.mxu0  ;;  %v5844_v28 = vld [vmem:[#allocation2 + $0xc0] sm:$0xff] }
 0x406   : > { %v6094_v23 = vld [vmem:[#allocation2 + $0x48] sm:$0xff]  ;;  %v8055_v21 = vpop.f32.mrf.mxu1 }
 0x407   : > { %6160 = vst.msk [vmem:[#allocation2 + $0x58] sm:$0xff] %vm448_vm3, %v6128_v34  ;;  %v6126_v42 = vadd.f32 %v6094_v23, %v5993_v0  ;;  %5897 = vst.msk [vmem:[#allocation2 + $0x68] sm:$0xff] %vm448_vm3, %v5865_v41  ;;  %v5870_v47 = vadd.f32 %v8055_v21, %v5838_v27  ;;  %v6006_v15 = vpop.f32.mrf.mxu0  ;;  %v5847_v41 = vld [vmem:[#allocation2 + $0xd8] sm:$0xff] }
 0x408   : > { %v6099_v16 = vld [vmem:[#allocation2 + $0x70] sm:$0xff]  ;;  %v5757_v22 = vpop.f32.mrf.mxu1 }
 0x409   : > { %6158 = vst.msk [vmem:[#allocation2 + $0x48] sm:$0xff] %vm448_vm3, %v6126_v42  ;;  %v6131_v49 = vadd.f32 %v8085_v1, %v6099_v16  ;;  %5902 = vst.msk [vmem:[#allocation2 + $0x90] sm:$0xff] %vm448_vm3, %v5870_v47  ;;  %v5868_v2 = vadd.f32 %v5836_v37, %v5757_v22  ;;  %v8086_v57 = vpop.f32.mrf.mxu0  ;;  %v5845_v47 = vld [vmem:[#allocation2 + $0xc8] sm:$0xff] }
 0x40a   : > { %v6097_v56 = vld [vmem:[#allocation2 + $0x60] sm:$0xff]  ;;  %v8056_v17 = vpop.f32.mrf.mxu1 }
 0x40b   : > { %6163 = vst.msk [vmem:[#allocation2 + $0x70] sm:$0xff] %vm448_vm3, %v6131_v49  ;;  %v6129_v33 = vadd.f32 %v6097_v56, %v6006_v15  ;;  %5900 = vst.msk [vmem:[#allocation2 + $0x80] sm:$0xff] %vm448_vm3, %v5868_v2  ;;  %v5871_v9 = vadd.f32 %v8056_v17, %v5839_v24  ;;  %v6009_v31 = vpop.f32.mrf.mxu0  ;;  %v5850_v2 = vld [vmem:[#allocation2 + $0xf0] sm:$0xff] }
 0x40c   : > { %v6100_v62 = vld [vmem:[#allocation2 + $0x78] sm:$0xff]  ;;  %v5760_v3 = vpop.f32.mrf.mxu1 }
 0x40d   : > { %6161 = vst.msk [vmem:[#allocation2 + $0x60] sm:$0xff] %vm448_vm3, %v6129_v33  ;;  %v6132_v11 = vadd.f32 %v8086_v57, %v6100_v62  ;;  %5903 = vst.msk [vmem:[#allocation2 + $0x98] sm:$0xff] %vm448_vm3, %v5871_v9  ;;  %v5869_v44 = vadd.f32 %v5837_v8, %v5760_v3  ;;  %v8089_v32 = vpop.f32.mrf.mxu0  ;;  %v5848_v9 = vld [vmem:[#allocation2 + $0xe0] sm:$0xff] }
 0x40e   : > { %v6098_v35 = vld [vmem:[#allocation2 + $0x68] sm:$0xff]  ;;  %v8059_v38 = vpop.f32.mrf.mxu1 }
 0x40f   : > { %6164 = vst.msk [vmem:[#allocation2 + $0x78] sm:$0xff] %vm448_vm3, %v6132_v11  ;;  %v6130_v10 = vadd.f32 %v6098_v35, %v6009_v31  ;;  %5901 = vst.msk [vmem:[#allocation2 + $0x88] sm:$0xff] %vm448_vm3, %v5869_v44  ;;  %v5874_v50 = vadd.f32 %v8059_v38, %v5842_v19  ;;  %v6022_v39 = vpop.f32.mrf.mxu0  ;;  %v5851_v44 = vld [vmem:[#allocation2 + $0xf8] sm:$0xff] }
 0x410   : > { %v6103_v20 = vld [vmem:[#allocation2 + $0x90] sm:$0xff]  ;;  %v5773_v36 = vpop.f32.mrf.mxu1 }
 0x411   : > { %6162 = vst.msk [vmem:[#allocation2 + $0x68] sm:$0xff] %vm448_vm3, %v6130_v10  ;;  %v6135_v29 = vadd.f32 %v8089_v32, %v6103_v20  ;;  %5906 = vst.msk [vmem:[#allocation2 + $0xb0] sm:$0xff] %vm448_vm3, %v5874_v50  ;;  %v5872_v43 = vadd.f32 %v5840_v7, %v5773_v36  ;;  %v8090_v55 = vpop.f32.mrf.mxu0  ;;  %v5849_v50 = vld [vmem:[#allocation2 + $0xe8] sm:$0xff] }
 0x412   : > { %v6101_v26 = vld [vmem:[#allocation2 + $0x80] sm:$0xff]  ;;  %v8060_v45 = vpop.f32.mrf.mxu1 }
 0x413   : > { %6167 = vst.msk [vmem:[#allocation2 + $0x90] sm:$0xff] %vm448_vm3, %v6135_v29  ;;  %v6133_v30 = vadd.f32 %v6101_v26, %v6022_v39  ;;  %5904 = vst.msk [vmem:[#allocation2 + $0xa0] sm:$0xff] %vm448_vm3, %v5872_v43  ;;  %v5875_v48 = vadd.f32 %v8060_v45, %v5843_v18  ;;  %v6025_v40 = vpop.f32.mrf.mxu0  ;;  %v6348_v43 = vld [vmem:[#allocation2 + $0x10] sm:$0xff] }
 0x414   : > { %v6104_v46 = vld [vmem:[#allocation2 + $0x98] sm:$0xff]  ;;  %v5776_v6 = vpop.f32.mrf.mxu1 }
 0x415   : > { %6165 = vst.msk [vmem:[#allocation2 + $0x80] sm:$0xff] %vm448_vm3, %v6133_v30  ;;  %v6136_v52 = vadd.f32 %v8090_v55, %v6104_v46  ;;  %5907 = vst.msk [vmem:[#allocation2 + $0xb8] sm:$0xff] %vm448_vm3, %v5875_v48  ;;  %v5873_v4 = vadd.f32 %v5841_v54, %v5776_v6  ;;  %v8093_v61 = vpop.f32.mrf.mxu0  ;;  %v6346_v48 = vld [vmem:[#allocation2] sm:$0xff] }
 0x416   : > { %v6102_v12 = vld [vmem:[#allocation2 + $0x88] sm:$0xff]  ;;  %v8063_v5 = vpop.f32.mrf.mxu1 }
 0x417   : > { %6168 = vst.msk [vmem:[#allocation2 + $0x98] sm:$0xff] %vm448_vm3, %v6136_v52  ;;  %v6134_v25 = vadd.f32 %v6102_v12, %v6025_v40  ;;  %5905 = vst.msk [vmem:[#allocation2 + $0xa8] sm:$0xff] %vm448_vm3, %v5873_v4  ;;  %v5878_v58 = vadd.f32 %v8063_v5, %v5846_v51  ;;  %v6038_v60 = vpop.f32.mrf.mxu0  ;;  %v6349_v4 = vld [vmem:[#allocation2 + $0x18] sm:$0xff] }
 0x418   : > { %v6107_v59 = vld [vmem:[#allocation2 + $0xb0] sm:$0xff]  ;;  %v5789_v13 = vpop.f32.mrf.mxu1 }
 0x419   : > { %6166 = vst.msk [vmem:[#allocation2 + $0x88] sm:$0xff] %vm448_vm3, %v6134_v25  ;;  %v6139_v0 = vadd.f32 %v8093_v61, %v6107_v59  ;;  %5910 = vst.msk [vmem:[#allocation2 + $0xd0] sm:$0xff] %vm448_vm3, %v5878_v58  ;;  %v5876_v53 = vadd.f32 %v5844_v28, %v5789_v13  ;;  %v8094_v63 = vpop.f32.mrf.mxu0  ;;  %v6347_v25 = vld [vmem:[#allocation2 + $0x8] sm:$0xff] }
 0x41a   : > { %v6105_v14 = vld [vmem:[#allocation2 + $0xa0] sm:$0xff]  ;;  %v8064_v34 = vpop.f32.mrf.mxu1 }
 0x41b   : > { %6171 = vst.msk [vmem:[#allocation2 + $0xb0] sm:$0xff] %vm448_vm3, %v6139_v0  ;;  %v6137_v1 = vadd.f32 %v6105_v14, %v6038_v60  ;;  %5908 = vst.msk [vmem:[#allocation2 + $0xc0] sm:$0xff] %vm448_vm3, %v5876_v53  ;;  %v5879_v23 = vadd.f32 %v8064_v34, %v5847_v41  ;;  %v6041_v21 = vpop.f32.mrf.mxu0  ;;  %v6352_v0 = vld [vmem:[#allocation2 + $0x30] sm:$0xff]  ;;  %v6350_v34 = vld [vmem:[#allocation2 + $0x20] sm:$0xff] }
 0x41c   : > { %v6108_v27 = vld [vmem:[#allocation2 + $0xb8] sm:$0xff]  ;;  %v5792_v42 = vpop.f32.mrf.mxu1 }
 0x41d   : > { %6169 = vst.msk [vmem:[#allocation2 + $0xa0] sm:$0xff] %vm448_vm3, %v6137_v1  ;;  %v6140_v15 = vadd.f32 %v8094_v63, %v6108_v27  ;;  %5911 = vst.msk [vmem:[#allocation2 + $0xd8] sm:$0xff] %vm448_vm3, %v5879_v23  ;;  %v5877_v16 = vadd.f32 %v5845_v47, %v5792_v42  ;;  %v8097_v22 = vpop.f32.mrf.mxu0  ;;  %v10957_v27 = vld [vmem:[#allocation3_spill] sm:$0xff] }
 0x41e   : > { %v6106_v37 = vld [vmem:[#allocation2 + $0xa8] sm:$0xff]  ;;  %v8067_v49 = vpop.f32.mrf.mxu1 }
 0x41f   : > { %6172 = vst.msk [vmem:[#allocation2 + $0xb8] sm:$0xff] %vm448_vm3, %v6140_v15  ;;  %v6138_v57 = vadd.f32 %v6106_v37, %v6041_v21  ;;  %5909 = vst.msk [vmem:[#allocation2 + $0xc8] sm:$0xff] %vm448_vm3, %v5877_v16  ;;  %v5882_v56 = vadd.f32 %v8067_v49, %v5850_v2  ;;  %v6054_v17 = vpop.f32.mrf.mxu0  ;;  %v6353_v21 = vld [vmem:[#allocation2 + $0x38] sm:$0xff]  ;;  %v6351_v37 = vld [vmem:[#allocation2 + $0x28] sm:$0xff] }
 0x420   : > { %v6111_v24 = vld [vmem:[#allocation2 + $0xd0] sm:$0xff]  ;;  %v5805_v33 = vpop.f32.mrf.mxu1 }
 0x421   : > { %6170 = vst.msk [vmem:[#allocation2 + $0xa8] sm:$0xff] %vm448_vm3, %v6138_v57  ;;  %v6143_v31 = vadd.f32 %v8097_v22, %v6111_v24  ;;  %5914 = vst.msk [vmem:[#allocation2 + $0xf0] sm:$0xff] %vm448_vm3, %v5882_v56  ;;  %v5880_v62 = vadd.f32 %v5848_v9, %v5805_v33  ;;  %v8098_v3 = vpop.f32.mrf.mxu0  ;;  %v6356_v9 = vld [vmem:[#allocation2 + $0x50] sm:$0xff] }
 0x422   : > { %v6109_v8 = vld [vmem:[#allocation2 + $0xc0] sm:$0xff]  ;;  %v8068_v11 = vpop.f32.mrf.mxu1 }
 0x423   : > { %6175 = vst.msk [vmem:[#allocation2 + $0xd0] sm:$0xff] %vm448_vm3, %v6143_v31  ;;  %v6141_v32 = vadd.f32 %v6109_v8, %v6054_v17  ;;  %5912 = vst.msk [vmem:[#allocation2 + $0xe0] sm:$0xff] %vm448_vm3, %v5880_v62  ;;  %v5883_v35 = vadd.f32 %v8068_v11, %v5851_v44  ;;  %v6057_v38 = vpop.f32.mrf.mxu0  ;;  %v6354_v11 = vld [vmem:[#allocation2 + $0x40] sm:$0xff] }
 0x424   : > { %v6112_v19 = vld [vmem:[#allocation2 + $0xd8] sm:$0xff]  ;;  %v5808_v10 = vpop.f32.mrf.mxu1 }
 0x425   : > { %6173 = vst.msk [vmem:[#allocation2 + $0xc0] sm:$0xff] %vm448_vm3, %v6141_v32  ;;  %v6144_v39 = vadd.f32 %v8098_v3, %v6112_v19  ;;  %5915 = vst.msk [vmem:[#allocation2 + $0xf8] sm:$0xff] %vm448_vm3, %v5883_v35  ;;  %v5881_v20 = vadd.f32 %v5849_v50, %v5808_v10  ;;  %v8101_v36 = vpop.f32.mrf.mxu0 }
 0x426   : > { %v6110_v7 = vld [vmem:[#allocation2 + $0xc8] sm:$0xff]  ;;  %v8107_v29 = vpop.f32.mrf.mxu1 }
 0x427   : > { %6176 = vst.msk [vmem:[#allocation2 + $0xd8] sm:$0xff] %vm448_vm3, %v6144_v39  ;;  %v6142_v55 = vadd.f32 %v6110_v7, %v6057_v38  ;;  %5913 = vst.msk [vmem:[#allocation2 + $0xe8] sm:$0xff] %vm448_vm3, %v5881_v20  ;;  %v6380_v26 = vadd.f32 %v8107_v29, %v6348_v43  ;;  %v6070_v45 = vpop.f32.mrf.mxu0  ;;  %v6357_v43 = vld [vmem:[#allocation2 + $0x58] sm:$0xff] }
 0x428   : > { %v6115_v18 = vld [vmem:[#allocation2 + $0xf0] sm:$0xff]  ;;  %v6219_v30 = vpop.f32.mrf.mxu1 }
 0x429   : > { %6174 = vst.msk [vmem:[#allocation2 + $0xc8] sm:$0xff] %vm448_vm3, %v6142_v55  ;;  %v6147_v40 = vadd.f32 %v8101_v36, %v6115_v18  ;;  %6412 = vst.msk [vmem:[#allocation2 + $0x10] sm:$0xff] %vm448_vm3, %v6380_v26  ;;  %v6378_v46 = vadd.f32 %v6346_v48, %v6219_v30  ;;  %v8102_v54 = vpop.f32.mrf.mxu0 }
 0x42a   : > { %v6113_v6 = vld [vmem:[#allocation2 + $0xe0] sm:$0xff]  ;;  %v8108_v52 = vpop.f32.mrf.mxu1 }
 0x42b   : > { %6179 = vst.msk [vmem:[#allocation2 + $0xf0] sm:$0xff] %vm448_vm3, %v6147_v40  ;;  %v6145_v61 = vadd.f32 %v6113_v6, %v6070_v45  ;;  %6410 = vst.msk [vmem:[#allocation2] sm:$0xff] %vm448_vm3, %v6378_v46  ;;  %v6381_v12 = vadd.f32 %v8108_v52, %v6349_v4  ;;  %v6073_v59 = vpop.f32.mrf.mxu0  ;;  %v6355_v6 = vld [vmem:[#allocation2 + $0x48] sm:$0xff] }
 0x42c   : > { %v6116_v5 = vld [vmem:[#allocation2 + $0xf8] sm:$0xff]  ;;  %v6222_v51 = vpop.f32.mrf.mxu1 }
 0x42d   : > { %6177 = vst.msk [vmem:[#allocation2 + $0xe0] sm:$0xff] %vm448_vm3, %v6145_v61  ;;  %v6148_v58 = vadd.f32 %v8102_v54, %v6116_v5  ;;  %6413 = vst.msk [vmem:[#allocation2 + $0x18] sm:$0xff] %vm448_vm3, %v6381_v12  ;;  %v6379_v60 = vadd.f32 %v6347_v25, %v6222_v51  ;;  %v6360_v51 = vld [vmem:[#allocation2 + $0x70] sm:$0xff] }
 0x42e   : > { %v6114_v13 = vld [vmem:[#allocation2 + $0xe8] sm:$0xff]  ;;  %v8111_v28 = vpop.f32.mrf.mxu1 }
 0x42f   : > { %6180 = vst.msk [vmem:[#allocation2 + $0xf8] sm:$0xff] %vm448_vm3, %v6148_v58  ;;  %v6146_v53 = vadd.f32 %v6114_v13, %v6073_v59  ;;  %6411 = vst.msk [vmem:[#allocation2 + $0x8] sm:$0xff] %vm448_vm3, %v6379_v60  ;;  %v6384_v63 = vadd.f32 %v8111_v28, %v6352_v0 }
 0x430   : > { %v6235_v14 = vpop.f32.mrf.mxu1  ;;  %v10488_v49 = vld [vmem:[#allocation2 + $0x10] sm:$0xff] }
 0x431   : > { %6178 = vst.msk [vmem:[#allocation2 + $0xe8] sm:$0xff] %vm448_vm3, %v6146_v53  ;;  %6416 = vst.msk [vmem:[#allocation2 + $0x30] sm:$0xff] %vm448_vm3, %v6384_v63  ;;  %v6382_v41 = vadd.f32 %v6350_v34, %v6235_v14 }
 0x432   : > { %v10477_v1 = vld [vmem:[#allocation2] sm:$0x1]  ;;  %v8112_v23 = vpop.f32.mrf.mxu1 }
 0x433   : > { %v10481_v42 = vrot.slane %v10477_v1, %v10957_v27  ;;  %6414 = vst.msk [vmem:[#allocation2 + $0x20] sm:$0xff] %vm448_vm3, %v6382_v41  ;;  %v6385_v47 = vadd.f32 %v8112_v23, %v6353_v21  ;;  %v10484_v15 = vld [vmem:[#allocation2] sm:$0xff] }
 0x434   : > { %v10486_v16 = vld [vmem:[#allocation2 + $0x18] sm:$0xff]  ;;  %v6238_v22 = vpop.f32.mrf.mxu1  ;;  %v6358_v21 = vld [vmem:[#allocation2 + $0x60] sm:$0xff] }
 0x435   : > { %v6479_v2 = vsub.f32 %v10484_v15, %v10481_v42  ;;  %6417 = vst.msk [vmem:[#allocation2 + $0x38] sm:$0xff] %vm448_vm3, %v6385_v47  ;;  %v6383_v57 = vadd.f32 %v6351_v37, %v6238_v22  ;;  %v6481_v17 = vsub.f32 %v10488_v49, %v10481_v42  ;;  %v6482_v33 = vsub.f32 %v10486_v16, %v10481_v42 }
 0x436   : > { %v10493_v56 = vld [vmem:[#allocation2 + $0x8] sm:$0xff]  ;;  %v8115_v24 = vpop.f32.mrf.mxu1 }
 0x437   : > { %6415 = vst.msk [vmem:[#allocation2 + $0x28] sm:$0xff] %vm448_vm3, %v6383_v57  ;;  %v6581_v31 = vmul.f32 %v6479_v2, %v6479_v2  ;;  %v6480_v62 = vsub.f32 %v10493_v56, %v10481_v42  ;;  %v6388_v3 = vadd.f32 %v8115_v24, %v6356_v9  ;;  %v6511_v35 = vsel %vm448_vm3, %v6479_v2, 0.0 }
 0x438   : > { %v6251_v8 = vpop.f32.mrf.mxu1  ;;  %v10502_v44 = vld [vmem:[#allocation2 + $0x30] sm:$0xff]  ;;  %v6583_v10 = vmul.f32 %v6481_v17, %v6481_v17  ;;  %v6584_v20 = vmul.f32 %v6482_v33, %v6482_v33  ;;  %v6514_v7 = vsel %vm448_vm3, %v6481_v17, 0.0  ;;  %v6516_v54 = vsel %vm448_vm3, %v6482_v33, 0.0 }
 0x439   : > { %v6386_v32 = vadd.f32 %v6354_v11, %v6251_v8  ;;  %v6512_v38 = vsel %vm448_vm3, %v6480_v62, 0.0  ;;  %v6582_v19 = vmul.f32 %v6480_v62, %v6480_v62  ;;  %6420 = vst.msk [vmem:[#allocation2 + $0x50] sm:$0xff] %vm448_vm3, %v6388_v3  ;;  %v6613_v55 = vsel %vm448_vm3, %v6581_v31, 0.0  ;;  %v6361_v31 = vld [vmem:[#allocation2 + $0x78] sm:$0xff] }
 0x43a   : > { %v10506_v50 = vld [vmem:[#allocation2 + $0x20] sm:$0xff]  ;;  %v8116_v39 = vpop.f32.mrf.mxu1  ;;  %v6513_v36 = vadd.f32 %v6512_v38, %v6511_v35  ;;  %v6485_v45 = vsub.f32 %v10502_v44, %v10481_v42  ;;  %v6616_v52 = vsel %vm448_vm3, %v6583_v10, 0.0  ;;  %v6618_v13 = vsel %vm448_vm3, %v6584_v20, 0.0  ;;  %v6359_v10 = vld [vmem:[#allocation2 + $0x68] sm:$0xff] }
 0x43b   : > { %v6483_v29 = vsub.f32 %v10506_v50, %v10481_v42  ;;  %6418 = vst.msk [vmem:[#allocation2 + $0x40] sm:$0xff] %vm448_vm3, %v6386_v32  ;;  %v6614_v26 = vsel %vm448_vm3, %v6582_v19, 0.0  ;;  %v6389_v18 = vadd.f32 %v8116_v39, %v6357_v43  ;;  %v6364_v43 = vld [vmem:[#allocation2 + $0x90] sm:$0xff] }
 0x43c   : > { %v6254_v30 = vpop.f32.mrf.mxu1  ;;  %v6515_v48 = vadd.f32 %v6514_v7, %v6513_v36  ;;  %v6615_v40 = vadd.f32 %v6614_v26, %v6613_v55  ;;  %v10517_v46 = vld [vmem:[#allocation2 + $0x38] sm:$0xff]  ;;  %v6587_v28 = vmul.f32 %v6485_v45, %v6485_v45  ;;  %v6522_v62 = vsel %vm448_vm3, %v6485_v45, 0.0 }
 0x43d   : > { %v6585_v4 = vmul.f32 %v6483_v29, %v6483_v29  ;;  %6421 = vst.msk [vmem:[#allocation2 + $0x58] sm:$0xff] %vm448_vm3, %v6389_v18  ;;  %v6387_v12 = vadd.f32 %v6355_v6, %v6254_v30  ;;  %v6518_v0 = vsel %vm448_vm3, %v6483_v29, 0.0  ;;  %v6486_v53 = vsub.f32 %v10517_v46, %v10481_v42 }
 0x43e   : > { %v10521_v61 = vld [vmem:[#allocation2 + $0x28] sm:$0xff]  ;;  %v8119_v5 = vpop.f32.mrf.mxu1  ;;  %v6617_v25 = vadd.f32 %v6616_v52, %v6615_v40  ;;  %v6517_v58 = vadd.f32 %v6516_v54, %v6515_v48  ;;  %v6624_v32 = vsel %vm448_vm3, %v6587_v28, 0.0  ;;  %v6362_v52 = vld [vmem:[#allocation2 + $0x80] sm:$0xff] }
 0x43f   : > { %v6484_v60 = vsub.f32 %v10521_v61, %v10481_v42  ;;  %v6392_v59 = vadd.f32 %v8119_v5, %v6360_v51  ;;  %6419 = vst.msk [vmem:[#allocation2 + $0x48] sm:$0xff] %vm448_vm3, %v6387_v12  ;;  %v6620_v47 = vsel %vm448_vm3, %v6585_v4, 0.0  ;;  %v6588_v3 = vmul.f32 %v6486_v53, %v6486_v53 }
 0x440   : > { %v6267_v63 = vpop.f32.mrf.mxu1  ;;  %v6519_v14 = vadd.f32 %v6518_v0, %v6517_v58  ;;  %v6619_v34 = vadd.f32 %v6618_v13, %v6617_v25  ;;  %v10537_v33 = vld [vmem:[#allocation2 + $0x50] sm:$0xff]  ;;  %v6524_v39 = vsel %vm448_vm3, %v6486_v53, 0.0 }
 0x441   : > { %v6520_v41 = vsel %vm448_vm3, %v6484_v60, 0.0  ;;  %v6586_v23 = vmul.f32 %v6484_v60, %v6484_v60  ;;  %6424 = vst.msk [vmem:[#allocation2 + $0x70] sm:$0xff] %vm448_vm3, %v6392_v59  ;;  %v6390_v37 = vadd.f32 %v6358_v21, %v6267_v63  ;;  %v6489_v20 = vsub.f32 %v10537_v33, %v10481_v42 }
 0x442   : > { %v10534_v22 = vld [vmem:[#allocation2 + $0x40] sm:$0xff]  ;;  %v8120_v2 = vpop.f32.mrf.mxu1  ;;  %v6621_v57 = vadd.f32 %v6620_v47, %v6619_v34  ;;  %v6521_v17 = vadd.f32 %v6520_v41, %v6519_v14  ;;  %v6626_v30 = vsel %vm448_vm3, %v6588_v3, 0.0  ;;  %v6365_v14 = vld [vmem:[#allocation2 + $0x98] sm:$0xff] }
 0x443   : > { %v6622_v24 = vsel %vm448_vm3, %v6586_v23, 0.0  ;;  %v6487_v9 = vsub.f32 %v10534_v22, %v10481_v42  ;;  %6422 = vst.msk [vmem:[#allocation2 + $0x60] sm:$0xff] %vm448_vm3, %v6390_v37  ;;  %v6393_v8 = vadd.f32 %v8120_v2, %v6361_v31  ;;  %v6591_v51 = vmul.f32 %v6489_v20, %v6489_v20  ;;  %v6363_v37 = vld [vmem:[#allocation2 + $0x88] sm:$0xff] }
 0x444   : > { %v6270_v11 = vpop.f32.mrf.mxu1  ;;  %v6523_v35 = vadd.f32 %v6522_v62, %v6521_v17  ;;  %v6623_v38 = vadd.f32 %v6622_v24, %v6621_v57  ;;  %v10544_v19 = vld [vmem:[#allocation2 + $0x58] sm:$0xff]  ;;  %v6530_v13 = vsel %vm448_vm3, %v6489_v20, 0.0 }
 0x445   : > { %v6589_v36 = vmul.f32 %v6487_v9, %v6487_v9  ;;  %6425 = vst.msk [vmem:[#allocation2 + $0x78] sm:$0xff] %vm448_vm3, %v6393_v8  ;;  %v6391_v7 = vadd.f32 %v6359_v10, %v6270_v11  ;;  %v6526_v48 = vsel %vm448_vm3, %v6487_v9, 0.0  ;;  %v6490_v40 = vsub.f32 %v10544_v19, %v10481_v42  ;;  %v6368_v11 = vld [vmem:[#allocation2 + $0xb0] sm:$0xff] }
 0x446   : > { %v8123_v29 = vpop.f32.mrf.mxu1  ;;  %v6625_v55 = vadd.f32 %v6624_v32, %v6623_v38  ;;  %v6525_v26 = vadd.f32 %v6524_v39, %v6523_v35  ;;  %v10550_v45 = vld [vmem:[#allocation2 + $0x48] sm:$0xff]  ;;  %v6632_v9 = vsel %vm448_vm3, %v6591_v51, 0.0 }
 0x447   : > { %v6396_v18 = vadd.f32 %v8123_v29, %v6364_v43  ;;  %v6488_v6 = vsub.f32 %v10550_v45, %v10481_v42  ;;  %6423 = vst.msk [vmem:[#allocation2 + $0x68] sm:$0xff] %vm448_vm3, %v6391_v7  ;;  %v6628_v25 = vsel %vm448_vm3, %v6589_v36, 0.0  ;;  %v6592_v34 = vmul.f32 %v6490_v40, %v6490_v40  ;;  %v6366_v43 = vld [vmem:[#allocation2 + $0xa0] sm:$0xff] }
 0x448   : > { %v6283_v54 = vpop.f32.mrf.mxu1  ;;  %v6527_v4 = vadd.f32 %v6526_v48, %v6525_v26  ;;  %v6627_v12 = vadd.f32 %v6626_v30, %v6625_v55  ;;  %v10563_v53 = vld [vmem:[#allocation2 + $0x70] sm:$0xff]  ;;  %v6532_v31 = vsel %vm448_vm3, %v6490_v40, 0.0 }
 0x449   : > { %6428 = vst.msk [vmem:[#allocation2 + $0x90] sm:$0xff] %vm448_vm3, %v6396_v18  ;;  %v6394_v5 = vadd.f32 %v6362_v52, %v6283_v54  ;;  %v6528_v58 = vsel %vm448_vm3, %v6488_v6, 0.0  ;;  %v6590_v60 = vmul.f32 %v6488_v6, %v6488_v6  ;;  %v6493_v62 = vsub.f32 %v10563_v53, %v10481_v42 }
 0x44a   : > { %v8124_v59 = vpop.f32.mrf.mxu1  ;;  %v6629_v28 = vadd.f32 %v6628_v25, %v6627_v12  ;;  %v6529_v0 = vadd.f32 %v6528_v58, %v6527_v4  ;;  %v10565_v63 = vld [vmem:[#allocation2 + $0x60] sm:$0xff]  ;;  %v6634_v20 = vsel %vm448_vm3, %v6592_v34, 0.0  ;;  %v6369_v58 = vld [vmem:[#allocation2 + $0xb8] sm:$0xff] }
 0x44b   : > { %6426 = vst.msk [vmem:[#allocation2 + $0x80] sm:$0xff] %vm448_vm3, %v6394_v5  ;;  %v6630_v41 = vsel %vm448_vm3, %v6590_v60, 0.0  ;;  %v6491_v23 = vsub.f32 %v10565_v63, %v10481_v42  ;;  %v6397_v21 = vadd.f32 %v8124_v59, %v6365_v14  ;;  %v6595_v48 = vmul.f32 %v6493_v62, %v6493_v62  ;;  %v6367_v14 = vld [vmem:[#allocation2 + $0xa8] sm:$0xff] }
 0x44c   : > { %v6286_v47 = vpop.f32.mrf.mxu1  ;;  %v6531_v2 = vadd.f32 %v6530_v13, %v6529_v0  ;;  %v6631_v57 = vadd.f32 %v6630_v41, %v6629_v28  ;;  %v10571_v17 = vld [vmem:[#allocation2 + $0x78] sm:$0xff]  ;;  %v6538_v12 = vsel %vm448_vm3, %v6493_v62, 0.0 }
 0x44d   : > { %v6395_v24 = vadd.f32 %v6363_v37, %v6286_v47  ;;  %v6593_v3 = vmul.f32 %v6491_v23, %v6491_v23  ;;  %6429 = vst.msk [vmem:[#allocation2 + $0x98] sm:$0xff] %vm448_vm3, %v6397_v21  ;;  %v6494_v38 = vsub.f32 %v10571_v17, %v10481_v42  ;;  %v6534_v36 = vsel %vm448_vm3, %v6491_v23, 0.0 }
 0x44e   : > { %v8127_v8 = vpop.f32.mrf.mxu1  ;;  %v6633_v32 = vadd.f32 %v6632_v9, %v6631_v57  ;;  %v6533_v35 = vadd.f32 %v6532_v31, %v6531_v2  ;;  %v10580_v10 = vld [vmem:[#allocation2 + $0x68] sm:$0xff]  ;;  %v6640_v47 = vsel %vm448_vm3, %v6595_v48, 0.0  ;;  %v6372_v9 = vld [vmem:[#allocation2 + $0xd0] sm:$0xff] }
 0x44f   : > { %6427 = vst.msk [vmem:[#allocation2 + $0x88] sm:$0xff] %vm448_vm3, %v6395_v24  ;;  %v6400_v39 = vadd.f32 %v8127_v8, %v6368_v11  ;;  %v6492_v7 = vsub.f32 %v10580_v10, %v10481_v42  ;;  %v6636_v40 = vsel %vm448_vm3, %v6593_v3, 0.0  ;;  %v6596_v51 = vmul.f32 %v6494_v38, %v6494_v38 }
 0x450   : > { %v6299_v29 = vpop.f32.mrf.mxu1  ;;  %v6535_v55 = vadd.f32 %v6534_v36, %v6533_v35  ;;  %v6635_v26 = vadd.f32 %v6634_v20, %v6633_v32  ;;  %v10587_v18 = vld [vmem:[#allocation2 + $0x90] sm:$0xff]  ;;  %v6540_v37 = vsel %vm448_vm3, %v6494_v38, 0.0 }
 0x451   : > { %6432 = vst.msk [vmem:[#allocation2 + $0xb0] sm:$0xff] %vm448_vm3, %v6400_v39  ;;  %v6398_v30 = vadd.f32 %v6366_v43, %v6299_v29  ;;  %v6536_v6 = vsel %vm448_vm3, %v6492_v7, 0.0  ;;  %v6594_v54 = vmul.f32 %v6492_v7, %v6492_v7  ;;  %v6497_v59 = vsub.f32 %v10587_v18, %v10481_v42  ;;  %v6370_v43 = vld [vmem:[#allocation2 + $0xc0] sm:$0xff] }
 0x452   : > { %v10592_v52 = vld [vmem:[#allocation2 + $0x80] sm:$0xff]  ;;  %v8128_v4 = vpop.f32.mrf.mxu1  ;;  %v6637_v5 = vadd.f32 %v6636_v40, %v6635_v26  ;;  %v6537_v25 = vadd.f32 %v6536_v6, %v6535_v55  ;;  %v6642_v11 = vsel %vm448_vm3, %v6596_v51, 0.0 }
 0x453   : > { %6430 = vst.msk [vmem:[#allocation2 + $0xa0] sm:$0xff] %vm448_vm3, %v6398_v30  ;;  %v6638_v60 = vsel %vm448_vm3, %v6594_v54, 0.0  ;;  %v6495_v13 = vsub.f32 %v10592_v52, %v10481_v42  ;;  %v6401_v28 = vadd.f32 %v8128_v4, %v6369_v58  ;;  %v6599_v32 = vmul.f32 %v6497_v59, %v6497_v59 }
 0x454   : > { %v6302_v0 = vpop.f32.mrf.mxu1  ;;  %v6539_v34 = vadd.f32 %v6538_v12, %v6537_v25  ;;  %v6639_v41 = vadd.f32 %v6638_v60, %v6637_v5  ;;  %v10601_v23 = vld [vmem:[#allocation2 + $0x98] sm:$0xff]  ;;  %v6546_v51 = vsel %vm448_vm3, %v6497_v59, 0.0 }
 0x455   : > { %v6399_v21 = vadd.f32 %v6367_v14, %v6302_v0  ;;  %v6597_v2 = vmul.f32 %v6495_v13, %v6495_v13  ;;  %6433 = vst.msk [vmem:[#allocation2 + $0xb8] sm:$0xff] %vm448_vm3, %v6401_v28  ;;  %v6542_v35 = vsel %vm448_vm3, %v6495_v13, 0.0  ;;  %v6498_v38 = vsub.f32 %v10601_v23, %v10481_v42  ;;  %v6373_v5 = vld [vmem:[#allocation2 + $0xd8] sm:$0xff] }
 0x456   : > { %v10605_v57 = vld [vmem:[#allocation2 + $0x88] sm:$0xff]  ;;  %v8131_v24 = vpop.f32.mrf.mxu1  ;;  %v6641_v31 = vadd.f32 %v6640_v47, %v6639_v41  ;;  %v6541_v62 = vadd.f32 %v6540_v37, %v6539_v34  ;;  %v6648_v13 = vsel %vm448_vm3, %v6599_v32, 0.0 }
 0x457   : > { %v6496_v3 = vsub.f32 %v10605_v57, %v10481_v42  ;;  %6431 = vst.msk [vmem:[#allocation2 + $0xa8] sm:$0xff] %vm448_vm3, %v6399_v21  ;;  %v6404_v8 = vadd.f32 %v8131_v24, %v6372_v9  ;;  %v6644_v55 = vsel %vm448_vm3, %v6597_v2, 0.0  ;;  %v6600_v25 = vmul.f32 %v6498_v38, %v6498_v38  ;;  %v6371_v34 = vld [vmem:[#allocation2 + $0xc8] sm:$0xff] }
 0x458   : > { %v6315_v39 = vpop.f32.mrf.mxu1  ;;  %v6543_v20 = vadd.f32 %v6542_v35, %v6541_v62  ;;  %v6643_v36 = vadd.f32 %v6642_v11, %v6641_v31  ;;  %v10621_v4 = vld [vmem:[#allocation2 + $0xb0] sm:$0xff]  ;;  %v6548_v41 = vsel %vm448_vm3, %v6498_v38, 0.0 }
 0x459   : > { %v6544_v7 = vsel %vm448_vm3, %v6496_v3, 0.0  ;;  %v6598_v29 = vmul.f32 %v6496_v3, %v6496_v3  ;;  %6436 = vst.msk [vmem:[#allocation2 + $0xd0] sm:$0xff] %vm448_vm3, %v6404_v8  ;;  %v6402_v30 = vadd.f32 %v6370_v43, %v6315_v39  ;;  %v6501_v21 = vsub.f32 %v10621_v4, %v10481_v42  ;;  %v6376_v62 = vld [vmem:[#allocation2 + $0xf0] sm:$0xff] }
 0x45a   : > { %v10618_v26 = vld [vmem:[#allocation2 + $0xa0] sm:$0xff]  ;;  %v8132_v48 = vpop.f32.mrf.mxu1  ;;  %v6645_v40 = vadd.f32 %v6644_v55, %v6643_v36  ;;  %v6545_v6 = vadd.f32 %v6544_v7, %v6543_v20  ;;  %v6650_v3 = vsel %vm448_vm3, %v6600_v25, 0.0 }
 0x45b   : > { %v6646_v54 = vsel %vm448_vm3, %v6598_v29, 0.0  ;;  %v6499_v12 = vsub.f32 %v10618_v26, %v10481_v42  ;;  %6434 = vst.msk [vmem:[#allocation2 + $0xc0] sm:$0xff] %vm448_vm3, %v6402_v30  ;;  %v6405_v58 = vadd.f32 %v8132_v48, %v6373_v5  ;;  %v6374_v7 = vld [vmem:[#allocation2 + $0xe0] sm:$0xff]  ;;  %v6603_v29 = vmul.f32 %v6501_v21, %v6501_v21  ;;  %v6377_v48 = vld [vmem:[#allocation2 + $0xf8] sm:$0xff] }
 0x45c   : > { %v6318_v60 = vpop.f32.mrf.mxu1  ;;  %v6547_v28 = vadd.f32 %v6546_v51, %v6545_v6  ;;  %v6647_v0 = vadd.f32 %v6646_v54, %v6645_v40  ;;  %v10628_v14 = vld [vmem:[#allocation2 + $0xb8] sm:$0xff]  ;;  %v6554_v25 = vsel %vm448_vm3, %v6501_v21, 0.0 }
 0x45d   : > { %v6601_v47 = vmul.f32 %v6499_v12, %v6499_v12  ;;  %6437 = vst.msk [vmem:[#allocation2 + $0xd8] sm:$0xff] %vm448_vm3, %v6405_v58  ;;  %v6403_v59 = vadd.f32 %v6371_v34, %v6318_v60  ;;  %v6550_v8 = vsel %vm448_vm3, %v6499_v12, 0.0  ;;  %v6502_v11 = vsub.f32 %v10628_v14, %v10481_v42 }
 0x45e   : > { %v10633_v37 = vld [vmem:[#allocation2 + $0xa8] sm:$0xff]  ;;  %v8135_v2 = vpop.f32.mrf.mxu1  ;;  %v6649_v24 = vadd.f32 %v6648_v13, %v6647_v0  ;;  %v6549_v9 = vadd.f32 %v6548_v41, %v6547_v28 }
 0x45f   : > { %v6500_v31 = vsub.f32 %v10633_v37, %v10481_v42  ;;  %6435 = vst.msk [vmem:[#allocation2 + $0xc8] sm:$0xff] %vm448_vm3, %v6403_v59  ;;  %v6408_v32 = vadd.f32 %v8135_v2, %v6376_v62  ;;  %v6652_v43 = vsel %vm448_vm3, %v6601_v47, 0.0  ;;  %v6604_v58 = vmul.f32 %v6502_v11, %v6502_v11  ;;  %v6375_v28 = vld [vmem:[#allocation2 + $0xe8] sm:$0xff] }
 0x460   : > { %v6331_v35 = vpop.f32.mrf.mxu1  ;;  %v6551_v38 = vadd.f32 %v6550_v8, %v6549_v9  ;;  %v6651_v39 = vadd.f32 %v6650_v3, %v6649_v24  ;;  %v10647_v12 = vld [vmem:[#allocation2 + $0xd0] sm:$0xff]  ;;  %v6656_v59 = vsel %vm448_vm3, %v6603_v29, 0.0  ;;  %v6556_v2 = vsel %vm448_vm3, %v6502_v11, 0.0 }
 0x461   : > { %v6552_v20 = vsel %vm448_vm3, %v6500_v31, 0.0  ;;  %v6602_v36 = vmul.f32 %v6500_v31, %v6500_v31  ;;  %6440 = vst.msk [vmem:[#allocation2 + $0xf0] sm:$0xff] %vm448_vm3, %v6408_v32  ;;  %v6406_v55 = vadd.f32 %v6374_v7, %v6331_v35  ;;  %v6505_v21 = vsub.f32 %v10647_v12, %v10481_v42 }
 0x462   : > { %v8136_v30 = vpop.f32.mrf.mxu1  ;;  %v6653_v40 = vadd.f32 %v6652_v43, %v6651_v39  ;;  %v6553_v6 = vadd.f32 %v6552_v20, %v6551_v38  ;;  %v10649_v5 = vld [vmem:[#allocation2 + $0xc0] sm:$0xff]  ;;  %v6658_v3 = vsel %vm448_vm3, %v6604_v58, 0.0 }
 0x463   : > { %v6654_v54 = vsel %vm448_vm3, %v6602_v36, 0.0  ;;  %v6409_v51 = vadd.f32 %v8136_v30, %v6377_v48  ;;  %v6503_v60 = vsub.f32 %v10649_v5, %v10481_v42  ;;  %6438 = vst.msk [vmem:[#allocation2 + $0xe0] sm:$0xff] %vm448_vm3, %v6406_v55  ;;  %v6607_v39 = vmul.f32 %v6505_v21, %v6505_v21 }
 0x464   : > { %v6334_v13 = vpop.f32.mrf.mxu1  ;;  %v6555_v0 = vadd.f32 %v6554_v25, %v6553_v6  ;;  %v6655_v34 = vadd.f32 %v6654_v54, %v6653_v40  ;;  %v10655_v41 = vld [vmem:[#allocation2 + $0xd8] sm:$0xff]  ;;  %v6562_v48 = vsel %vm448_vm3, %v6505_v21, 0.0 }
 0x465   : > { %6441 = vst.msk [vmem:[#allocation2 + $0xf8] sm:$0xff] %vm448_vm3, %v6409_v51  ;;  %v6407_v47 = vadd.f32 %v6375_v28, %v6334_v13  ;;  %v6605_v24 = vmul.f32 %v6503_v60, %v6503_v60  ;;  %v6558_v8 = vsel %vm448_vm3, %v6503_v60, 0.0  ;;  %v6506_v32 = vsub.f32 %v10655_v41, %v10481_v42 }
 0x466   : > { %v6657_v9 = vadd.f32 %v6656_v59, %v6655_v34  ;;  %v6557_v31 = vadd.f32 %v6556_v2, %v6555_v0  ;;  %v10662_v62 = vld [vmem:[#allocation2 + $0xc8] sm:$0xff]  ;;  %v6664_v60 = vsel %vm448_vm3, %v6607_v39, 0.0 }
 0x467   : > { %6439 = vst.msk [vmem:[#allocation2 + $0xe8] sm:$0xff] %vm448_vm3, %v6407_v47  ;;  %v6504_v11 = vsub.f32 %v10662_v62, %v10481_v42  ;;  %v6660_v20 = vsel %vm448_vm3, %v6605_v24, 0.0  ;;  %v6608_v40 = vmul.f32 %v6506_v32, %v6506_v32  ;;  %v6564_v13 = vsel %vm448_vm3, %v6506_v32, 0.0 }
 0x468   : > { %v6559_v35 = vadd.f32 %v6558_v8, %v6557_v31  ;;  %v6659_v38 = vadd.f32 %v6658_v3, %v6657_v9  ;;  %v10673_v55 = vld [vmem:[#allocation2 + $0xf0] sm:$0xff] }
 0x469   : > { %v6560_v36 = vsel %vm448_vm3, %v6504_v11, 0.0  ;;  %v6606_v7 = vmul.f32 %v6504_v11, %v6504_v11  ;;  %v6509_v28 = vsub.f32 %v10673_v55, %v10481_v42  ;;  %v6666_v2 = vsel %vm448_vm3, %v6608_v40, 0.0 }
 0x46a   : > { %v6661_v29 = vadd.f32 %v6660_v20, %v6659_v38  ;;  %v6561_v43 = vadd.f32 %v6560_v36, %v6559_v35  ;;  %v10675_v30 = vld [vmem:[#allocation2 + $0xe0] sm:$0xff] }
 0x46b   : > { %v6662_v6 = vsel %vm448_vm3, %v6606_v7, 0.0  ;;  %v6507_v54 = vsub.f32 %v10675_v30, %v10481_v42  ;;  %v6611_v8 = vmul.f32 %v6509_v28, %v6509_v28  ;;  %v6570_v20 = vsel %vm448_vm3, %v6509_v28, 0.0 }
 0x46c   : > { %v6563_v51 = vadd.f32 %v6562_v48, %v6561_v43  ;;  %v6663_v25 = vadd.f32 %v6662_v6, %v6661_v29  ;;  %v10681_v58 = vld [vmem:[#allocation2 + $0xf8] sm:$0xff] }
 0x46d   : > { %v6609_v0 = vmul.f32 %v6507_v54, %v6507_v54  ;;  %v6566_v21 = vsel %vm448_vm3, %v6507_v54, 0.0  ;;  %v6510_v24 = vsub.f32 %v10681_v58, %v10481_v42  ;;  %v6672_v48 = vsel %vm448_vm3, %v6611_v8, 0.0 }
 0x46e   : > { %v10687_v34 = vld [vmem:[#allocation2 + $0xe8] sm:$0xff]  ;;  %v6665_v47 = vadd.f32 %v6664_v60, %v6663_v25  ;;  %v6565_v59 = vadd.f32 %v6564_v13, %v6563_v51 }
 0x46f   : > { %v6508_v9 = vsub.f32 %v10687_v34, %v10481_v42  ;;  %v6668_v32 = vsel %vm448_vm3, %v6609_v0, 0.0  ;;  %v6612_v36 = vmul.f32 %v6510_v24, %v6510_v24  ;;  %v6572_v42 = vsel %vm448_vm3, %v6510_v24, 0.0 }
 0x470   : > { %v6567_v31 = vadd.f32 %v6566_v21, %v6565_v59  ;;  %v6667_v3 = vadd.f32 %v6666_v2, %v6665_v47 }
 0x471   : > { %v6568_v11 = vsel %vm448_vm3, %v6508_v9, 0.0  ;;  %v6610_v35 = vmul.f32 %v6508_v9, %v6508_v9  ;;  %v6674_v54 = vsel %vm448_vm3, %v6612_v36, 0.0 }
 0x472   : > { %v6669_v38 = vadd.f32 %v6668_v32, %v6667_v3  ;;  %v6569_v39 = vadd.f32 %v6568_v11, %v6567_v31 }
 0x473   : > { %v6670_v7 = vsel %vm448_vm3, %v6610_v35, 0.0 }
 0x474   : > { %v6571_v29 = vadd.f32 %v6570_v20, %v6569_v39  ;;  %v6671_v43 = vadd.f32 %v6670_v7, %v6669_v38 }
 0x476   : > { %v6573_v40 = vadd.f32 %v6572_v42, %v6571_v29  ;;  %v6673_v6 = vadd.f32 %v6672_v48, %v6671_v43 }
 0x478   : > { %v6574_v51 = vrot.slane %v6573_v40, 4  ;;  %v6675_v25 = vadd.f32 %v6674_v54, %v6673_v6 }
 0x47a   : > { %v6575_v60 = vadd.f32 %v6574_v51, %v6573_v40  ;;  %v6676_v13 = vrot.slane %v6675_v25, 4 }
 0x47c   : > { %v6576_v0 = vrot.slane %v6575_v60, 2  ;;  %v6677_v47 = vadd.f32 %v6676_v13, %v6675_v25 }
 0x47e   : > { %v6577_v28 = vadd.f32 %v6576_v0, %v6575_v60  ;;  %v6678_v59 = vrot.slane %v6677_v47, 2 }
 0x480   : > { %v6578_v2 = vrot.slane %v6577_v28, 1  ;;  %v6679_v21 = vadd.f32 %v6678_v59, %v6677_v47  ;;  %v6760_v59 = vld [vmem:[%s8234_s25 + $0x8] sm:$0xff] }
 0x482   : > { %v6579_v9 = vadd.f32 %v6578_v2, %v6577_v28  ;;  %v6680_v31 = vrot.slane %v6679_v21, 1  ;;  %v6759_v28 = vld [vmem:[%s8234_s25] sm:$0xff]  ;;  %v6761_v2 = vld [vmem:[%s8234_s25 + $0x10] sm:$0xff] }
 0x484   : > { %v6681_v3 = vadd.f32 %v6680_v31, %v6679_v21  ;;  %v6683_v8 = vmul.f32 0.00390625, %v6579_v9  ;;  %v6762_v21 = vld [vmem:[%s8234_s25 + $0x18] sm:$0xff] }
 0x486   : > { %v6684_v32 = vmul.f32 0.00390625, %v6681_v3  ;;  %v6685_v24 = vmul.f32 %v6683_v8, %v6683_v8  ;;  %v6688_v38 = vadd.f32 %v6683_v8, %v10477_v1 }
 0x488   : > { %v6686_v11 = vsub.f32 %v6684_v32, %v6685_v24  ;;  %v10704_v20 = vrot.slane %v6688_v38, %v10957_v27  ;;  %v6763_v32 = vld [vmem:[%s8234_s25 + $0x20] sm:$0xff]  ;;  %v6764_v24 = vld [vmem:[%s8234_s25 + $0x28] sm:$0xff] }
 0x48a   : > { %v6687_v35 = vmax.f32 %v6686_v11, 0.0  ;;  %v6695_v36 = vsub.f32 %v10484_v15, %v10704_v20  ;;  %v6696_v7 = vsub.f32 %v10493_v56, %v10704_v20  ;;  %v6697_v29 = vsub.f32 %v10488_v49, %v10704_v20  ;;  %v6765_v11 = vld [vmem:[%s8234_s25 + $0x30] sm:$0xff] }
 0x48b   : > { %v6698_v43 = vsub.f32 %v10486_v16, %v10704_v20  ;;  %v6699_v1 = vsub.f32 %v10506_v50, %v10704_v20  ;;  %v6700_v48 = vsub.f32 %v10521_v61, %v10704_v20  ;;  %v6701_v27 = vsub.f32 %v10502_v44, %v10704_v20 }
 0x48c   : > { %v6689_v39 = vadd.f32 1e-05, %v6687_v35  ;;  %v6702_v15 = vsub.f32 %v10517_v46, %v10704_v20  ;;  %v6703_v56 = vsub.f32 %v10534_v22, %v10704_v20  ;;  %v6704_v49 = vsub.f32 %v10550_v45, %v10704_v20  ;;  %v6766_v35 = vld [vmem:[%s8234_s25 + $0x38] sm:$0xff] }
 0x48d   : > { %v6705_v16 = vsub.f32 %v10537_v33, %v10704_v20  ;;  %v6706_v50 = vsub.f32 %v10544_v19, %v10704_v20  ;;  %v6707_v61 = vsub.f32 %v10565_v63, %v10704_v20  ;;  %v6708_v44 = vsub.f32 %v10580_v10, %v10704_v20 }
 0x48e   : > { %8173 = vrsqrt.f32 %v6689_v39  ;;  %v6709_v46 = vsub.f32 %v10563_v53, %v10704_v20  ;;  %v6710_v22 = vsub.f32 %v10571_v17, %v10704_v20  ;;  %v6711_v45 = vsub.f32 %v10592_v52, %v10704_v20 }
 0x48f   : > { %v6712_v33 = vsub.f32 %v10605_v57, %v10704_v20  ;;  %v6713_v19 = vsub.f32 %v10587_v18, %v10704_v20  ;;  %v6714_v63 = vsub.f32 %v10601_v23, %v10704_v20  ;;  %v6715_v10 = vsub.f32 %v10618_v26, %v10704_v20 }
 0x490   : > { %v6716_v53 = vsub.f32 %v10633_v37, %v10704_v20  ;;  %v6717_v17 = vsub.f32 %v10621_v4, %v10704_v20  ;;  %v6718_v52 = vsub.f32 %v10628_v14, %v10704_v20  ;;  %v6719_v57 = vsub.f32 %v10649_v5, %v10704_v20 }
 0x491   : > { %v6720_v18 = vsub.f32 %v10662_v62, %v10704_v20  ;;  %v6721_v23 = vsub.f32 %v10647_v12, %v10704_v20  ;;  %v6722_v26 = vsub.f32 %v10655_v41, %v10704_v20  ;;  %v6723_v37 = vsub.f32 %v10675_v30, %v10704_v20 }
 0x492   : > { %v6724_v4 = vsub.f32 %v10687_v34, %v10704_v20  ;;  %v6725_v14 = vsub.f32 %v10673_v55, %v10704_v20  ;;  %v6726_v5 = vsub.f32 %v10681_v58, %v10704_v20 }
 0x49b   : > { %v8174_v42 = vpop.eup %8173 }
 0x49c   : > { %v6727_v62 = vmul.f32 %v8174_v42, %v6695_v36  ;;  %v6728_v40 = vmul.f32 %v8174_v42, %v6696_v7  ;;  %v6729_v12 = vmul.f32 %v8174_v42, %v6697_v29  ;;  %v6730_v41 = vmul.f32 %v8174_v42, %v6698_v43  ;;  %v6767_v7 = vld [vmem:[%s8234_s25 + $0x40] sm:$0xff]  ;;  %v6768_v29 = vld [vmem:[%s8234_s25 + $0x48] sm:$0xff]  ;;  %v6769_v43 = vld [vmem:[%s8234_s25 + $0x50] sm:$0xff] }
 0x49d   : > { %v6731_v6 = vmul.f32 %v8174_v42, %v6699_v1  ;;  %v6732_v54 = vmul.f32 %v8174_v42, %v6700_v48  ;;  %v6733_v30 = vmul.f32 %v8174_v42, %v6701_v27  ;;  %v6734_v51 = vmul.f32 %v8174_v42, %v6702_v15 }
 0x49e   : > { %v6735_v25 = vmul.f32 %v8174_v42, %v6703_v56  ;;  %v6736_v34 = vmul.f32 %v8174_v42, %v6704_v49  ;;  %v6737_v55 = vmul.f32 %v8174_v42, %v6705_v16  ;;  %v6738_v60 = vmul.f32 %v8174_v42, %v6706_v50  ;;  %v6770_v56 = vld [vmem:[%s8234_s25 + $0x58] sm:$0xff]  ;;  %v6771_v49 = vld [vmem:[%s8234_s25 + $0x60] sm:$0xff]  ;;  %v6772_v16 = vld [vmem:[%s8234_s25 + $0x68] sm:$0xff] }
 0x49f   : > { %v10770_v58 = vmul.f32 %v8174_v42, %v6707_v61  ;;  %v10772_v13 = vmul.f32 %v8174_v42, %v6708_v44  ;;  %v10774_v0 = vmul.f32 %v8174_v42, %v6709_v46  ;;  %v10776_v47 = vmul.f32 %v8174_v42, %v6710_v22  ;;  %v6773_v22 = vld [vmem:[%s8234_s25 + $0x70] sm:$0xff] }
 0x4a0   : > { %v10782_v9 = vmul.f32 %v8174_v42, %v6711_v45  ;;  %v10784_v31 = vmul.f32 %v8174_v42, %v6712_v33  ;;  %v10786_v3 = vmul.f32 %v8174_v42, %v6713_v19  ;;  %v10788_v8 = vmul.f32 %v8174_v42, %v6714_v63  ;;  %v6774_v45 = vld [vmem:[%s8234_s25 + $0x78] sm:$0xff]  ;;  %v6775_v33 = vld [vmem:[%s8234_s25 + $0x80] sm:$0xff]  ;;  %v6776_v19 = vld [vmem:[%s8234_s25 + $0x88] sm:$0xff] }
 0x4a1   : > { %v10794_v38 = vmul.f32 %v8174_v42, %v6715_v10  ;;  %v10796_v39 = vmul.f32 %v8174_v42, %v6716_v53  ;;  %v10798_v20 = vmul.f32 %v8174_v42, %v6717_v17  ;;  %v10800_v36 = vmul.f32 %v8174_v42, %v6718_v52  ;;  %v6777_v63 = vld [vmem:[%s8234_s25 + $0x90] sm:$0xff]  ;;  %v6778_v10 = vld [vmem:[%s8234_s25 + $0x98] sm:$0xff] }
 0x4a2   : > { %v10805_v1 = vmul.f32 %v8174_v42, %v6719_v57  ;;  %v10807_v48 = vmul.f32 %v8174_v42, %v6720_v18  ;;  %v10809_v27 = vmul.f32 %v8174_v42, %v6721_v23  ;;  %v10811_v15 = vmul.f32 %v8174_v42, %v6722_v26  ;;  %v6779_v18 = vld [vmem:[%s8234_s25 + $0xa0] sm:$0xff]  ;;  %v6780_v23 = vld [vmem:[%s8234_s25 + $0xa8] sm:$0xff]  ;;  %v6781_v26 = vld [vmem:[%s8234_s25 + $0xb0] sm:$0xff] }
 0x4a3   : > { %v10823_v50 = vmul.f32 %v8174_v42, %v6723_v37  ;;  %v10825_v61 = vmul.f32 %v8174_v42, %v6724_v4  ;;  %v10827_v44 = vmul.f32 %v8174_v42, %v6725_v14  ;;  %v10829_v46 = vmul.f32 %v8174_v42, %v6726_v5  ;;  %v6782_v5 = vld [vmem:[%s8234_s25 + $0xb8] sm:$0xff] }
 0x4a4   : > { %v6791_v53 = vadd.f32 %v6759_v28, %v6727_v62  ;;  %v6792_v17 = vadd.f32 %v6760_v59, %v6728_v40  ;;  %v6793_v52 = vadd.f32 %v6761_v2, %v6729_v12  ;;  %v6794_v57 = vadd.f32 %v6762_v21, %v6730_v41  ;;  %v6784_v62 = vld [vmem:[%s8234_s25 + $0xc8] sm:$0xff] }
 0x4a5   : > { %10958 = vst [vmem:[#allocation3_spill] sm:$0xff] %v10829_v46  ;;  %v6795_v42 = vadd.f32 %v6763_v32, %v6731_v6  ;;  %v6796_v37 = vadd.f32 %v6764_v24, %v6732_v54  ;;  %v6797_v4 = vadd.f32 %v6765_v11, %v6733_v30  ;;  %v6798_v14 = vadd.f32 %v6766_v35, %v6734_v51  ;;  %v6783_v46 = vld [vmem:[%s8234_s25 + $0xc0] sm:$0xff]  ;;  %v6785_v6 = vld [vmem:[%s8234_s25 + $0xd0] sm:$0xff]  ;;  %v6786_v54 = vld [vmem:[%s8234_s25 + $0xd8] sm:$0xff] }
 0x4a6   : > { %v6799_v40 = vadd.f32 %v6767_v7, %v6735_v25  ;;  %v6800_v12 = vadd.f32 %v6768_v29, %v6736_v34  ;;  %v6801_v41 = vadd.f32 %v6769_v43, %v6737_v55  ;;  %v6802_v28 = vadd.f32 %v6770_v56, %v6738_v60  ;;  %6823 = vst.msk [vmem:[%s10821_s6] sm:$0xff] %vm448_vm3, %v6791_v53  ;;  %v6787_v30 = vld [vmem:[%s8234_s25 + $0xe0] sm:$0xff]  ;;  %v6788_v60 = vld [vmem:[%s8234_s25 + $0xe8] sm:$0xff] }
 0x4a7   : > { %6824 = vst.msk [vmem:[%s10821_s6 + $0x8] sm:$0xff] %vm448_vm3, %v6792_v17  ;;  %6825 = vst.msk [vmem:[%s10821_s6 + $0x10] sm:$0xff] %vm448_vm3, %v6793_v52  ;;  %v6803_v51 = vadd.f32 %v6771_v49, %v10770_v58  ;;  %v6804_v25 = vadd.f32 %v6772_v16, %v10772_v13  ;;  %v6805_v34 = vadd.f32 %v6773_v22, %v10774_v0  ;;  %v6789_v58 = vld [vmem:[%s8234_s25 + $0xf0] sm:$0xff]  ;;  %v6790_v13 = vld [vmem:[%s8234_s25 + $0xf8] sm:$0xff] }
 0x4a8   : > { %6826 = vst.msk [vmem:[%s10821_s6 + $0x18] sm:$0xff] %vm448_vm3, %v6794_v57  ;;  %v6806_v55 = vadd.f32 %v6774_v45, %v10776_v47  ;;  %6827 = vst.msk [vmem:[%s10821_s6 + $0x20] sm:$0xff] %vm448_vm3, %v6795_v42  ;;  %v6807_v0 = vadd.f32 %v6775_v33, %v10782_v9  ;;  %v6808_v59 = vadd.f32 %v6776_v19, %v10784_v31 }
 0x4a9   : > { %6828 = vst.msk [vmem:[%s10821_s6 + $0x28] sm:$0xff] %vm448_vm3, %v6796_v37  ;;  %6829 = vst.msk [vmem:[%s10821_s6 + $0x30] sm:$0xff] %vm448_vm3, %v6797_v4  ;;  %v6809_v47 = vadd.f32 %v6777_v63, %v10786_v3  ;;  %v6810_v2 = vadd.f32 %v6778_v10, %v10788_v8  ;;  %v6811_v21 = vadd.f32 %v6779_v18, %v10794_v38 }
 0x4aa   : > { %6830 = vst.msk [vmem:[%s10821_s6 + $0x38] sm:$0xff] %vm448_vm3, %v6798_v14  ;;  %6831 = vst.msk [vmem:[%s10821_s6 + $0x40] sm:$0xff] %vm448_vm3, %v6799_v40  ;;  %v6812_v9 = vadd.f32 %v6780_v23, %v10796_v39  ;;  %v6813_v31 = vadd.f32 %v6781_v26, %v10798_v20  ;;  %v6814_v3 = vadd.f32 %v6782_v5, %v10800_v36 }
 0x4ab   : > { %6832 = vst.msk [vmem:[%s10821_s6 + $0x48] sm:$0xff] %vm448_vm3, %v6800_v12  ;;  %6833 = vst.msk [vmem:[%s10821_s6 + $0x50] sm:$0xff] %vm448_vm3, %v6801_v41  ;;  %v6815_v8 = vadd.f32 %v6783_v46, %v10805_v1  ;;  %v6816_v32 = vadd.f32 %v6784_v62, %v10807_v48  ;;  %v6817_v24 = vadd.f32 %v6785_v6, %v10809_v27 }
 0x4ac   : > { %6834 = vst.msk [vmem:[%s10821_s6 + $0x58] sm:$0xff] %vm448_vm3, %v6802_v28  ;;  %6835 = vst.msk [vmem:[%s10821_s6 + $0x60] sm:$0xff] %vm448_vm3, %v6803_v51  ;;  %v6818_v11 = vadd.f32 %v6786_v54, %v10811_v15  ;;  %v6819_v35 = vadd.f32 %v6787_v30, %v10823_v50  ;;  %v6820_v38 = vadd.f32 %v6788_v60, %v10825_v61  ;;  %v10959_v20 = vld [vmem:[#allocation3_spill] sm:$0xff] }
 0x4ad   : > { %6836 = vst.msk [vmem:[%s10821_s6 + $0x68] sm:$0xff] %vm448_vm3, %v6804_v25  ;;  %6837 = vst.msk [vmem:[%s10821_s6 + $0x70] sm:$0xff] %vm448_vm3, %v6805_v34  ;;  %v6821_v39 = vadd.f32 %v6789_v58, %v10827_v44  ;;  %v6822_v36 = vadd.f32 %v6790_v13, %v10959_v20 }
 0x4ae   : > { %6838 = vst.msk [vmem:[%s10821_s6 + $0x78] sm:$0xff] %vm448_vm3, %v6806_v55  ;;  %6839 = vst.msk [vmem:[%s10821_s6 + $0x80] sm:$0xff] %vm448_vm3, %v6807_v0 }
 0x4af   : > { %6840 = vst.msk [vmem:[%s10821_s6 + $0x88] sm:$0xff] %vm448_vm3, %v6808_v59  ;;  %6841 = vst.msk [vmem:[%s10821_s6 + $0x90] sm:$0xff] %vm448_vm3, %v6809_v47 }
 0x4b0   : > { %6842 = vst.msk [vmem:[%s10821_s6 + $0x98] sm:$0xff] %vm448_vm3, %v6810_v2  ;;  %6843 = vst.msk [vmem:[%s10821_s6 + $0xa0] sm:$0xff] %vm448_vm3, %v6811_v21 }
 0x4b1   : > { %6844 = vst.msk [vmem:[%s10821_s6 + $0xa8] sm:$0xff] %vm448_vm3, %v6812_v9  ;;  %6845 = vst.msk [vmem:[%s10821_s6 + $0xb0] sm:$0xff] %vm448_vm3, %v6813_v31 }
 0x4b2   : > { %6846 = vst.msk [vmem:[%s10821_s6 + $0xb8] sm:$0xff] %vm448_vm3, %v6814_v3  ;;  %6847 = vst.msk [vmem:[%s10821_s6 + $0xc0] sm:$0xff] %vm448_vm3, %v6815_v8 }
 0x4b3   : > { %6848 = vst.msk [vmem:[%s10821_s6 + $0xc8] sm:$0xff] %vm448_vm3, %v6816_v32  ;;  %6849 = vst.msk [vmem:[%s10821_s6 + $0xd0] sm:$0xff] %vm448_vm3, %v6817_v24 }
 0x4b4   : > { %6850 = vst.msk [vmem:[%s10821_s6 + $0xd8] sm:$0xff] %vm448_vm3, %v6818_v11  ;;  %6851 = vst.msk [vmem:[%s10821_s6 + $0xe0] sm:$0xff] %vm448_vm3, %v6819_v35 }
 0x4b5   : > { %6852 = vst.msk [vmem:[%s10821_s6 + $0xe8] sm:$0xff] %vm448_vm3, %v6820_v38  ;;  %6853 = vst.msk [vmem:[%s10821_s6 + $0xf0] sm:$0xff] %vm448_vm3, %v6821_v39 }
 0x4b6   : > { %6854 = vst.msk [vmem:[%s10821_s6 + $0xf8] sm:$0xff] %vm448_vm3, %v6822_v36 }
 0x4b7 PF: > { %s13_s12 = sadd.s32 1, %s8181_s12  }
 0x4b8   : > { %p10_p4 = scmp.ge.s32.totalorder %s13_s12, 4  }
 0x4ba   :  { %12 = sbr.rel (!%p10_p4) target bundleno = 1 (0x1), region = 62 }

</bundles_post_ra>
